<compile_context>
chip_gen: v5e
topology: v5e:2x2
jax: 0.10.0
libtpu: 0.0.40
codegen_flags: <defaults>
</compile_context>

<pallas_src>
import functools

import jax
import jax.numpy as jnp
from jax import lax
from jax.experimental import pallas as pl
from jax.experimental.pallas import tpu as pltpu

# ---- small synthetic CLIP-ViT config (clip-vit-base-patch32 scaled down) ----
IMG = 32            # image size
PATCH = 16          # patch size
CHANNELS = 3
HIDDEN = 32         # hidden_size
HEADS = 4           # num_attention_heads
HEAD_DIM = HIDDEN // HEADS
INTERMEDIATE = 64   # intermediate_size
LAYERS = 2          # num_hidden_layers
NUM_PATCHES = (IMG // PATCH) ** 2       # 4
SEQ = NUM_PATCHES + 1                   # 5 (cls token + patches)
SEQ_PAD = 8                             # sequence padded to a sublane multiple
CPP = CHANNELS * PATCH * PATCH          # 768 flattened patch len (lane aligned)
LN_EPS = 1e-5
NEG_INF = -1e9


def _num_tensorcores():
    """Best-effort TensorCore count (2 on v7x, 1 on v5e/v6e); defaults to 1."""
    try:
        info = pltpu.get_tpu_info()
    except Exception:
        return 1
    for attr in ('num_cores', 'num_cores_per_chip', 'cores_per_chip',
                 'tensorcores_per_chip', 'num_tensorcores', 'core_count'):
        n = getattr(info, attr, None)
        try:
            n = int(n)
        except (TypeError, ValueError):
            continue
        if n > 0:
            return n
    return 1


_NUM_CORES = max(1, min(_num_tensorcores(), 2))


# ----------------------------- fused Pallas kernel ---------------------------
def _ln(x, g, b):
    mu = jnp.mean(x, axis=-1, keepdims=True)
    var = jnp.mean(jnp.square(x - mu), axis=-1, keepdims=True)
    return (x - mu) * lax.rsqrt(var + LN_EPS) * g + b


def _split_images(a, nb):
    """(nb*SEQ_PAD, C) -> (nb, SEQ_PAD, C) via sublane-aligned stack (no reshape)."""
    return jnp.stack([a[i * SEQ_PAD:(i + 1) * SEQ_PAD, :] for i in range(nb)],
                     axis=0)


def _merge_images(a, nb):
    """(nb, SEQ_PAD, C) -> (nb*SEQ_PAD, C) via sublane-aligned concat."""
    return jnp.concatenate([a[i] for i in range(nb)], axis=0)


def _fused_vit_kernel(pfull_ref, patch_w_ref, posadd_ref,
                      preg_ref, preb_ref,
                      ln1g_ref, ln1b_ref,
                      qkvw_ref, qkvb_ref, ow_ref, ob_ref,
                      ln2g_ref, ln2b_ref,
                      f1w_ref, f1b_ref, f2w_ref, f2b_ref,
                      out_ref, *, num_layers, num_heads, nb):
    """Whole CLIP vision tower for one batch chunk of nb images.

    pfull_ref : (1, rows, CPP) bf16 flattened patches; cls slot + pad rows zero
    posadd_ref: (SEQ_PAD, D) f32 class+pos embedding table (pad rows zero)
    out_ref   : (L+1, 1, rows, D) f32 all hidden states
    """
    rows = nb * SEQ_PAD

    # --- patch embedding (conv-as-matmul, bf16 operands / f32 accum) ---
    posadd = jnp.concatenate([posadd_ref[...]] * nb, axis=0)          # (rows, D)
    emb = jnp.dot(pfull_ref[0], patch_w_ref[...],
                  preferred_element_type=jnp.float32) + posadd
    x = _ln(emb, preg_ref[...], preb_ref[...])
    out_ref[0, 0] = x                                   # hidden_states[0]

    # additive key mask for padded sequence slots (keys >= SEQ)
    key_pos = lax.broadcasted_iota(jnp.int32, (1, SEQ_PAD), 1)
    key_mask = jnp.where(key_pos < SEQ, 0.0, NEG_INF).astype(jnp.float32)

    # TODO(synk): for 12 layers use lax.fori_loop / a layer grid axis instead
    # of a static unroll (bounds vreg live ranges, enables weight streaming).
    for l in range(num_layers):                         # static unroll (LAYERS=2)
        # ---- self-attention (fused QKV projection, per-image scores) ----
        h = _ln(x, ln1g_ref[l], ln1b_ref[l])
        qkv = jnp.dot(h.astype(jnp.bfloat16), qkvw_ref[l],
                      preferred_element_type=jnp.float32) + qkvb_ref[l]
        q = _split_images(qkv[:, 0 * HIDDEN:1 * HIDDEN], nb)   # (nb, S, D) f32
        k = _split_images(qkv[:, 1 * HIDDEN:2 * HIDDEN], nb)
        v = _split_images(qkv[:, 2 * HIDDEN:3 * HIDDEN], nb)

        ctx_heads = []
        for hd in range(num_heads):
            sl = slice(hd * HEAD_DIM, (hd + 1) * HEAD_DIM)
            qh = q[:, :, sl].astype(jnp.bfloat16)               # (nb, S, dh)
            kh = k[:, :, sl].astype(jnp.bfloat16)
            vh = v[:, :, sl].astype(jnp.bfloat16)
            s = jnp.einsum('bqd,bkd->bqk', qh, kh,
                           preferred_element_type=jnp.float32) + key_mask
            s = s - jnp.max(s, axis=-1, keepdims=True)
            p = jnp.exp(s)
            p = p * pl.reciprocal(jnp.sum(p, axis=-1, keepdims=True), approx=True)
            ctx_heads.append(jnp.einsum('bqk,bkd->bqd', p.astype(jnp.bfloat16),
                                        vh, preferred_element_type=jnp.float32))
        ctx = _merge_images(jnp.concatenate(ctx_heads, axis=-1), nb)  # (rows, D)
        attn = jnp.dot(ctx.astype(jnp.bfloat16), ow_ref[l],
                       preferred_element_type=jnp.float32) + ob_ref[l]
        x = x + attn

        # ---- MLP block with quick_gelu (x * sigmoid(1.702 x)) ----
        hm = _ln(x, ln2g_ref[l], ln2b_ref[l])
        hm = jnp.dot(hm.astype(jnp.bfloat16), f1w_ref[l],
                     preferred_element_type=jnp.float32) + f1b_ref[l]
        hm = hm * jax.nn.sigmoid(1.702 * hm)
        hm = jnp.dot(hm.astype(jnp.bfloat16), f2w_ref[l],
                     preferred_element_type=jnp.float32) + f2b_ref[l]
        x = x + hm
        out_ref[l + 1, 0] = x                           # hidden_states[l + 1]


# ------------------------------ wrappers -------------------------------------
def _full_spec(shape):
    zeros = (0,) * len(shape)
    return pl.BlockSpec(tuple(shape), lambda c, _z=zeros: _z)


def _vision_forward(fp, x):
    """x: (N, C, H, W) NCHW -> stacked hidden states (LAYERS+1, N, SEQ, HIDDEN)."""
    N = x.shape[0]
    nc = _NUM_CORES if (_NUM_CORES > 1 and N % _NUM_CORES == 0) else 1
    nb = N // nc                                   # batch elems per chunk
    rows = nb * SEQ_PAD                            # flattened rows per chunk

    # NCHW -> flattened patches in (C, ph, pw) order (same as torch conv weight),
    # padded to SEQ_PAD rows/image (row 0 = cls slot, rows SEQ.. = padding; the
    # patch-embedding conv has no bias, so zero rows are safe).
    g = IMG // PATCH
    p = x.reshape(N, CHANNELS, g, PATCH, g, PATCH)
    p = p.transpose(0, 2, 4, 1, 3, 5).reshape(N, NUM_PATCHES, CPP)
    pfull = jnp.pad(p.astype(jnp.bfloat16),
                    ((0, 0), (1, SEQ_PAD - 1 - NUM_PATCHES), (0, 0)))
    pfull = pfull.reshape(nc, rows, CPP)

    weights = (fp['pre_ln_g'], fp['pre_ln_b'],
               fp['ln1_g'], fp['ln1_b'],
               fp['qkv_w'], fp['qkv_b'], fp['o_w'], fp['o_b'],
               fp['ln2_g'], fp['ln2_b'],
               fp['fc1_w'], fp['fc1_b'], fp['fc2_w'], fp['fc2_b'])

    in_specs = [pl.BlockSpec((1, rows, CPP), lambda c: (c, 0, 0)),
                _full_spec(fp['patch_w'].shape),
                _full_spec(fp['posadd'].shape)]
    in_specs += [_full_spec(w.shape) for w in weights]
    inputs = (pfull, fp['patch_w'], fp['posadd']) + weights

    # advisory cost estimate so XLA can schedule the pre/post reshapes around us
    flops = nc * (2 * rows * CPP * HIDDEN + LAYERS * (
        2 * rows * HIDDEN * 3 * HIDDEN
        + 4 * nb * HEADS * SEQ_PAD * SEQ_PAD * HEAD_DIM
        + 2 * rows * HIDDEN * HIDDEN
        + 4 * rows * HIDDEN * INTERMEDIATE))
    transcendentals = nc * LAYERS * (nb * HEADS * SEQ_PAD * SEQ_PAD
                                     + rows * INTERMEDIATE)
    out_bytes = (LAYERS + 1) * nc * rows * HIDDEN * 4
    bytes_accessed = sum(int(a.size) * a.dtype.itemsize for a in inputs) + out_bytes

    out = pl.pallas_call(
        functools.partial(_fused_vit_kernel, num_layers=LAYERS,
                          num_heads=HEADS, nb=nb),
        out_shape=jax.ShapeDtypeStruct((LAYERS + 1, nc, rows, HIDDEN),
                                       jnp.float32),
        grid=(nc,),
        in_specs=in_specs,
        out_specs=pl.BlockSpec((LAYERS + 1, 1, rows, HIDDEN),
                               lambda c: (0, c, 0, 0)),
        compiler_params=pltpu.CompilerParams(
            dimension_semantics=("parallel",) if nc > 1 else ("arbitrary",)),
        cost_estimate=pl.CostEstimate(flops=int(flops),
                                      transcendentals=int(transcendentals),
                                      bytes_accessed=int(bytes_accessed)),
    )(*inputs)

    hs = out.reshape(LAYERS + 1, N, SEQ_PAD, HIDDEN)
    return hs[:, :, :SEQ, :]                       # drop padded query rows


_vision_forward_jit = jax.jit(_vision_forward)


def get_vision_prompt(fused_params, x):
    """CLIPVisionModel(x, output_hidden_states=True).hidden_states as a list."""
    hs = _vision_forward_jit(fused_params, x)
    return [hs[i] for i in range(LAYERS + 1)]


def image_model_forward(fused_params, imgs, aux_imgs=None):
    """ImageModel.forward: (prompt_guids, aux_prompt_guids).

    Main + all aux images are batched into one fused forward, then the hidden
    states are split back out per image group.
    """
    if aux_imgs is None:
        return get_vision_prompt(fused_params, imgs), None
    B = imgs.shape[0]
    n_aux = aux_imgs.shape[1]
    aux_flat = jnp.transpose(aux_imgs, (1, 0, 2, 3, 4)).reshape(
        n_aux * B, CHANNELS, IMG, IMG)                 # == permute([1,0,2,3,4])
    all_imgs = jnp.concatenate([imgs, aux_flat], axis=0)
    hs = _vision_forward_jit(fused_params, all_imgs)   # (L+1, (1+n_aux)*B, S, D)
    prompt_guids = [hs[l, :B] for l in range(LAYERS + 1)]
    aux_prompt_guids = [
        [hs[l, B * (1 + i):B * (2 + i)] for l in range(LAYERS + 1)]
        for i in range(n_aux)
    ]
    return prompt_guids, aux_prompt_guids


# ------------------------- parameters ----------------------------------------
def init_params(key):
    keys = jax.random.split(key, 3 + LAYERS)

    def nrm(k, shape, scale=0.02):
        return (scale * jax.random.normal(k, shape)).astype(jnp.float32)

    params = {
        'patch_w': nrm(keys[0], (CPP, HIDDEN)),
        'class_emb': nrm(keys[1], (HIDDEN,)),
        'pos_emb': nrm(keys[2], (SEQ, HIDDEN)),
        'pre_ln_g': jnp.ones((1, HIDDEN), jnp.float32),
        'pre_ln_b': jnp.zeros((1, HIDDEN), jnp.float32),
        'layers': [],
    }
    for l in range(LAYERS):
        lk = jax.random.split(keys[3 + l], 6)
        params['layers'].append({
            'ln1_g': jnp.ones((1, HIDDEN), jnp.float32),
            'ln1_b': jnp.zeros((1, HIDDEN), jnp.float32),
            'q_w': nrm(lk[0], (HIDDEN, HIDDEN)),
            'q_b': jnp.zeros((1, HIDDEN), jnp.float32),
            'k_w': nrm(lk[1], (HIDDEN, HIDDEN)),
            'k_b': jnp.zeros((1, HIDDEN), jnp.float32),
            'v_w': nrm(lk[2], (HIDDEN, HIDDEN)),
            'v_b': jnp.zeros((1, HIDDEN), jnp.float32),
            'o_w': nrm(lk[3], (HIDDEN, HIDDEN)),
            'o_b': jnp.zeros((1, HIDDEN), jnp.float32),
            'ln2_g': jnp.ones((1, HIDDEN), jnp.float32),
            'ln2_b': jnp.zeros((1, HIDDEN), jnp.float32),
            'fc1_w': nrm(lk[4], (HIDDEN, INTERMEDIATE)),
            'fc1_b': jnp.zeros((1, INTERMEDIATE), jnp.float32),
            'fc2_w': nrm(lk[5], (INTERMEDIATE, HIDDEN)),
            'fc2_b': jnp.zeros((1, HIDDEN), jnp.float32),
        })
    return params


def prepare_fused_params(params):
    """Restructure / pre-pack params for the fused kernel (done once, outside).

    * q/k/v fused into one (D, 3D) bf16 slab per layer; the 1/sqrt(dh) attention
      scale is folded into the q slice of both weight and bias.
    * matmul weights stored in bf16 (MXU-native); LN params and biases stay f32.
    * class + position embeddings pre-folded into one (SEQ_PAD, D) additive
      table (padded rows zero), computed once here instead of per forward.
    """
    scale = HEAD_DIM ** -0.5
    layers = params['layers']

    stack = lambda name: jnp.stack([lp[name] for lp in layers]).astype(jnp.float32)
    stack_w = lambda name: jnp.stack([lp[name] for lp in layers]).astype(jnp.bfloat16)

    qkv_w = jnp.stack([
        jnp.concatenate([lp['q_w'] * scale, lp['k_w'], lp['v_w']], axis=1)
        for lp in layers]).astype(jnp.bfloat16)                  # (L, D, 3D)
    qkv_b = jnp.stack([
        jnp.concatenate([lp['q_b'] * scale, lp['k_b'], lp['v_b']], axis=1)
        for lp in layers]).astype(jnp.float32)                   # (L, 1, 3D)

    posadd = jnp.zeros((SEQ_PAD, HIDDEN), jnp.float32)
    posadd = posadd.at[:SEQ].set(params['pos_emb'])
    posadd = posadd.at[0].add(params['class_emb'])               # cls row

    return {
        'patch_w': params['patch_w'].astype(jnp.bfloat16),
        'posadd': posadd,
        'pre_ln_g': params['pre_ln_g'], 'pre_ln_b': params['pre_ln_b'],
        'ln1_g': stack('ln1_g'), 'ln1_b': stack('ln1_b'),
        'qkv_w': qkv_w, 'qkv_b': qkv_b,
        'o_w': stack_w('o_w'), 'o_b': stack('o_b'),
        'ln2_g': stack('ln2_g'), 'ln2_b': stack('ln2_b'),
        'fc1_w': stack_w('fc1_w'), 'fc1_b': stack('fc1_b'),
        'fc2_w': stack_w('fc2_w'), 'fc2_b': stack('fc2_b'),
    }


if __name__ == "__main__":
    key = jax.random.PRNGKey(0)
    kp, ki, ka = jax.random.split(key, 3)
    params = init_params(kp)
    fused_params = prepare_fused_params(params)

    B, N_AUX = 2, 2
    imgs = jax.random.normal(ki, (B, CHANNELS, IMG, IMG), jnp.float32)
    aux_imgs = jax.random.normal(ka, (B, N_AUX, CHANNELS, IMG, IMG), jnp.float32)

    prompt_guids, aux_prompt_guids = image_model_forward(fused_params, imgs, aux_imgs)

    jax.block_until_ready(prompt_guids)
    jax.block_until_ready(aux_prompt_guids)

    # sanity: LAYERS+1 hidden states of shape (B, SEQ, HIDDEN) each
    assert len(prompt_guids) == LAYERS + 1
    assert all(h.shape == (B, SEQ, HIDDEN) for h in prompt_guids)
    assert len(aux_prompt_guids) == N_AUX
    assert all(len(gl) == LAYERS + 1 for gl in aux_prompt_guids)
    assert all(h.shape == (B, SEQ, HIDDEN) for gl in aux_prompt_guids for h in gl)
    assert all(bool(jnp.all(jnp.isfinite(h))) for h in prompt_guids)

    print("KERNEL_OK")
</pallas_src>

<mosaic_0001>
module attributes {stable_mosaic.version = 11 : i64} {
  func.func @_fused_vit_kernel(%arg0: i32, %arg1: memref<1x48x768xbf16, #tpu.memory_space<vmem>>, %arg2: memref<768x32xbf16, #tpu.memory_space<vmem>>, %arg3: memref<8x32xf32, #tpu.memory_space<vmem>>, %arg4: memref<1x32xf32, #tpu.memory_space<vmem>>, %arg5: memref<1x32xf32, #tpu.memory_space<vmem>>, %arg6: memref<2x1x32xf32, #tpu.memory_space<vmem>>, %arg7: memref<2x1x32xf32, #tpu.memory_space<vmem>>, %arg8: memref<2x32x96xbf16, #tpu.memory_space<vmem>>, %arg9: memref<2x1x96xf32, #tpu.memory_space<vmem>>, %arg10: memref<2x32x32xbf16, #tpu.memory_space<vmem>>, %arg11: memref<2x1x32xf32, #tpu.memory_space<vmem>>, %arg12: memref<2x1x32xf32, #tpu.memory_space<vmem>>, %arg13: memref<2x1x32xf32, #tpu.memory_space<vmem>>, %arg14: memref<2x32x64xbf16, #tpu.memory_space<vmem>>, %arg15: memref<2x1x64xf32, #tpu.memory_space<vmem>>, %arg16: memref<2x64x32xbf16, #tpu.memory_space<vmem>>, %arg17: memref<2x1x32xf32, #tpu.memory_space<vmem>>, %arg18: memref<3x1x48x32xf32, #tpu.memory_space<vmem>>) attributes {dimension_semantics = [#tpu.dimension_semantics<arbitrary>], iteration_bounds = array<i64: 1>, scalar_prefetch = 0 : i64, scratch_operands = 0 : i64, tpu.core_type = #tpu.core_type<tc>, window_params = [{transform_indices = @transform_0, window_bounds = array<i64: 1, 48, 768>}, {pipeline_mode = #tpu.pipeline_mode<synchronous>, transform_indices = @transform_1, window_bounds = array<i64: 768, 32>}, {pipeline_mode = #tpu.pipeline_mode<synchronous>, transform_indices = @transform_2, window_bounds = array<i64: 8, 32>}, {pipeline_mode = #tpu.pipeline_mode<synchronous>, transform_indices = @transform_3, window_bounds = array<i64: 1, 32>}, {pipeline_mode = #tpu.pipeline_mode<synchronous>, transform_indices = @transform_4, window_bounds = array<i64: 1, 32>}, {pipeline_mode = #tpu.pipeline_mode<synchronous>, transform_indices = @transform_5, window_bounds = array<i64: 2, 1, 32>}, {pipeline_mode = #tpu.pipeline_mode<synchronous>, transform_indices = @transform_6, window_bounds = array<i64: 2, 1, 32>}, {pipeline_mode = #tpu.pipeline_mode<synchronous>, transform_indices = @transform_7, window_bounds = array<i64: 2, 32, 96>}, {pipeline_mode = #tpu.pipeline_mode<synchronous>, transform_indices = @transform_8, window_bounds = array<i64: 2, 1, 96>}, {pipeline_mode = #tpu.pipeline_mode<synchronous>, transform_indices = @transform_9, window_bounds = array<i64: 2, 32, 32>}, {pipeline_mode = #tpu.pipeline_mode<synchronous>, transform_indices = @transform_10, window_bounds = array<i64: 2, 1, 32>}, {pipeline_mode = #tpu.pipeline_mode<synchronous>, transform_indices = @transform_11, window_bounds = array<i64: 2, 1, 32>}, {pipeline_mode = #tpu.pipeline_mode<synchronous>, transform_indices = @transform_12, window_bounds = array<i64: 2, 1, 32>}, {pipeline_mode = #tpu.pipeline_mode<synchronous>, transform_indices = @transform_13, window_bounds = array<i64: 2, 32, 64>}, {pipeline_mode = #tpu.pipeline_mode<synchronous>, transform_indices = @transform_14, window_bounds = array<i64: 2, 1, 64>}, {pipeline_mode = #tpu.pipeline_mode<synchronous>, transform_indices = @transform_15, window_bounds = array<i64: 2, 64, 32>}, {pipeline_mode = #tpu.pipeline_mode<synchronous>, transform_indices = @transform_16, window_bounds = array<i64: 2, 1, 32>}, {transform_indices = @transform_17, window_bounds = array<i64: 3, 1, 48, 32>}]} {
    %c0 = arith.constant 0 : index
    %c0_0 = arith.constant 0 : index
    %0 = vector.load %arg3[%c0, %c0_0] : memref<8x32xf32, #tpu.memory_space<vmem>>, vector<8x32xf32>
    %1 = tpu.concatenate %0, %0, %0, %0, %0, %0 in 0 : vector<8x32xf32>, vector<8x32xf32>, vector<8x32xf32>, vector<8x32xf32>, vector<8x32xf32>, vector<8x32xf32> -> vector<48x32xf32>
    %c0_1 = arith.constant 0 : index
    %c0_2 = arith.constant 0 : index
    %c0_3 = arith.constant 0 : index
    %2 = vector.load %arg1[%c0_1, %c0_2, %c0_3] : memref<1x48x768xbf16, #tpu.memory_space<vmem>>, vector<1x48x768xbf16>
    %3 = vector.shape_cast %2 : vector<1x48x768xbf16> to vector<48x768xbf16>
    %c0_4 = arith.constant 0 : index
    %c0_5 = arith.constant 0 : index
    %4 = vector.load %arg2[%c0_4, %c0_5] : memref<768x32xbf16, #tpu.memory_space<vmem>>, vector<768x32xbf16>
    %cst = arith.constant dense<0.000000e+00> : vector<48x32xf32>
    %5 = tpu.matmul %3, %4, %cst {dimension_numbers = #tpu.dot_dimension_numbers<[1], [0], [0], [1], [0, 0, 1, 1], [], []>} : vector<48x768xbf16>, vector<768x32xbf16>, vector<48x32xf32> -> vector<48x32xf32>
    %6 = arith.addf %5, %1 : vector<48x32xf32>
    %c0_6 = arith.constant 0 : index
    %c0_7 = arith.constant 0 : index
    %7 = vector.load %arg4[%c0_6, %c0_7] : memref<1x32xf32, #tpu.memory_space<vmem>>, vector<1x32xf32>
    %c0_8 = arith.constant 0 : index
    %c0_9 = arith.constant 0 : index
    %8 = vector.load %arg5[%c0_8, %c0_9] : memref<1x32xf32, #tpu.memory_space<vmem>>, vector<1x32xf32>
    %cst_10 = arith.constant dense<0.000000e+00> : vector<48xf32>
    %9 = vector.multi_reduction <add>, %6, %cst_10 [1] : vector<48x32xf32> to vector<48xf32>
    %10 = vector.shape_cast %9 : vector<48xf32> to vector<48x1xf32>
    %cst_11 = arith.constant 3.200000e+01 : f32
    %11 = vector.broadcast %cst_11 : f32 to vector<48x1xf32>
    %12 = arith.divf %10, %11 : vector<48x1xf32>
    %13 = vector.broadcast %12 : vector<48x1xf32> to vector<48x32xf32>
    %14 = arith.subf %6, %13 : vector<48x32xf32>
    %15 = arith.mulf %14, %14 : vector<48x32xf32>
    %cst_12 = arith.constant dense<0.000000e+00> : vector<48xf32>
    %16 = vector.multi_reduction <add>, %15, %cst_12 [1] : vector<48x32xf32> to vector<48xf32>
    %17 = vector.shape_cast %16 : vector<48xf32> to vector<48x1xf32>
    %cst_13 = arith.constant 3.200000e+01 : f32
    %18 = vector.broadcast %cst_13 : f32 to vector<48x1xf32>
    %19 = arith.divf %17, %18 : vector<48x1xf32>
    %20 = vector.broadcast %12 : vector<48x1xf32> to vector<48x32xf32>
    %21 = arith.subf %6, %20 : vector<48x32xf32>
    %cst_14 = arith.constant 9.99999974E-6 : f32
    %22 = vector.broadcast %cst_14 : f32 to vector<48x1xf32>
    %23 = arith.addf %19, %22 : vector<48x1xf32>
    %24 = math.rsqrt %23 : vector<48x1xf32>
    %25 = vector.broadcast %24 : vector<48x1xf32> to vector<48x32xf32>
    %26 = arith.mulf %21, %25 : vector<48x32xf32>
    %27 = vector.broadcast %7 : vector<1x32xf32> to vector<48x32xf32>
    %28 = arith.mulf %26, %27 : vector<48x32xf32>
    %29 = vector.broadcast %8 : vector<1x32xf32> to vector<48x32xf32>
    %30 = arith.addf %28, %29 : vector<48x32xf32>
    %c0_15 = arith.constant 0 : index
    %c0_16 = arith.constant 0 : index
    %c0_17 = arith.constant 0 : index
    %c0_18 = arith.constant 0 : index
    %31 = vector.load %arg18[%c0_15, %c0_16, %c0_17, %c0_18] : memref<3x1x48x32xf32, #tpu.memory_space<vmem>>, vector<1x1x48x32xf32>
    %32 = vector.shape_cast %31 : vector<1x1x48x32xf32> to vector<48x32xf32>
    %33 = vector.shape_cast %30 : vector<48x32xf32> to vector<1x1x48x32xf32>
    tpu.vector_store %arg18[%c0_15, %c0_16, %c0_17, %c0_18], %33 {strides = array<i32>} : memref<3x1x48x32xf32, #tpu.memory_space<vmem>>, vector<1x1x48x32xf32>,
    %34 = tpu.iota {dimensions = array<i32: 1>} : vector<1x8xi32>
    %c5_i32 = arith.constant 5 : i32
    %35 = vector.broadcast %c5_i32 : i32 to vector<1x8xi32>
    %36 = arith.cmpi slt, %34, %35 : vector<1x8xi32>
    %cst_19 = arith.constant 0.000000e+00 : f32
    %cst_20 = arith.constant -1.000000e+09 : f32
    %37 = vector.broadcast %cst_19 : f32 to vector<1x8xf32>
    %38 = vector.broadcast %cst_20 : f32 to vector<1x8xf32>
    %39 = arith.select %36, %37, %38 : vector<1x8xi1>, vector<1x8xf32>
    %c0_21 = arith.constant 0 : index
    %c0_22 = arith.constant 0 : index
    %c0_23 = arith.constant 0 : index
    %40 = vector.load %arg6[%c0_21, %c0_22, %c0_23] : memref<2x1x32xf32, #tpu.memory_space<vmem>>, vector<1x1x32xf32>
    %41 = vector.shape_cast %40 : vector<1x1x32xf32> to vector<1x32xf32>
    %c0_24 = arith.constant 0 : index
    %c0_25 = arith.constant 0 : index
    %c0_26 = arith.constant 0 : index
    %42 = vector.load %arg7[%c0_24, %c0_25, %c0_26] : memref<2x1x32xf32, #tpu.memory_space<vmem>>, vector<1x1x32xf32>
    %43 = vector.shape_cast %42 : vector<1x1x32xf32> to vector<1x32xf32>
    %cst_27 = arith.constant dense<0.000000e+00> : vector<48xf32>
    %44 = vector.multi_reduction <add>, %30, %cst_27 [1] : vector<48x32xf32> to vector<48xf32>
    %45 = vector.shape_cast %44 : vector<48xf32> to vector<48x1xf32>
    %cst_28 = arith.constant 3.200000e+01 : f32
    %46 = vector.broadcast %cst_28 : f32 to vector<48x1xf32>
    %47 = arith.divf %45, %46 : vector<48x1xf32>
    %48 = vector.broadcast %47 : vector<48x1xf32> to vector<48x32xf32>
    %49 = arith.subf %30, %48 : vector<48x32xf32>
    %50 = arith.mulf %49, %49 : vector<48x32xf32>
    %cst_29 = arith.constant dense<0.000000e+00> : vector<48xf32>
    %51 = vector.multi_reduction <add>, %50, %cst_29 [1] : vector<48x32xf32> to vector<48xf32>
    %52 = vector.shape_cast %51 : vector<48xf32> to vector<48x1xf32>
    %cst_30 = arith.constant 3.200000e+01 : f32
    %53 = vector.broadcast %cst_30 : f32 to vector<48x1xf32>
    %54 = arith.divf %52, %53 : vector<48x1xf32>
    %55 = vector.broadcast %47 : vector<48x1xf32> to vector<48x32xf32>
    %56 = arith.subf %30, %55 : vector<48x32xf32>
    %cst_31 = arith.constant 9.99999974E-6 : f32
    %57 = vector.broadcast %cst_31 : f32 to vector<48x1xf32>
    %58 = arith.addf %54, %57 : vector<48x1xf32>
    %59 = math.rsqrt %58 : vector<48x1xf32>
    %60 = vector.broadcast %59 : vector<48x1xf32> to vector<48x32xf32>
    %61 = arith.mulf %56, %60 : vector<48x32xf32>
    %62 = vector.broadcast %41 : vector<1x32xf32> to vector<48x32xf32>
    %63 = arith.mulf %61, %62 : vector<48x32xf32>
    %64 = vector.broadcast %43 : vector<1x32xf32> to vector<48x32xf32>
    %65 = arith.addf %63, %64 : vector<48x32xf32>
    %66 = arith.truncf %65 : vector<48x32xf32> to vector<48x32xbf16>
    %c0_32 = arith.constant 0 : index
    %c0_33 = arith.constant 0 : index
    %c0_34 = arith.constant 0 : index
    %67 = vector.load %arg8[%c0_32, %c0_33, %c0_34] : memref<2x32x96xbf16, #tpu.memory_space<vmem>>, vector<1x32x96xbf16>
    %68 = vector.shape_cast %67 : vector<1x32x96xbf16> to vector<32x96xbf16>
    %cst_35 = arith.constant dense<0.000000e+00> : vector<48x96xf32>
    %69 = tpu.matmul %66, %68, %cst_35 {dimension_numbers = #tpu.dot_dimension_numbers<[1], [0], [0], [1], [0, 0, 1, 1], [], []>} : vector<48x32xbf16>, vector<32x96xbf16>, vector<48x96xf32> -> vector<48x96xf32>
    %c0_36 = arith.constant 0 : index
    %c0_37 = arith.constant 0 : index
    %c0_38 = arith.constant 0 : index
    %70 = vector.load %arg9[%c0_36, %c0_37, %c0_38] : memref<2x1x96xf32, #tpu.memory_space<vmem>>, vector<1x1x96xf32>
    %71 = vector.shape_cast %70 : vector<1x1x96xf32> to vector<1x96xf32>
    %72 = vector.broadcast %71 : vector<1x96xf32> to vector<48x96xf32>
    %73 = arith.addf %69, %72 : vector<48x96xf32>
    %74 = vector.extract_strided_slice %73 {offsets = [0, 0], sizes = [48, 32], strides = [1, 1]} : vector<48x96xf32> to vector<48x32xf32>
    %75 = vector.extract_strided_slice %74 {offsets = [0, 0], sizes = [8, 32], strides = [1, 1]} : vector<48x32xf32> to vector<8x32xf32>
    %76 = vector.extract_strided_slice %74 {offsets = [8, 0], sizes = [8, 32], strides = [1, 1]} : vector<48x32xf32> to vector<8x32xf32>
    %77 = vector.extract_strided_slice %74 {offsets = [16, 0], sizes = [8, 32], strides = [1, 1]} : vector<48x32xf32> to vector<8x32xf32>
    %78 = vector.extract_strided_slice %74 {offsets = [24, 0], sizes = [8, 32], strides = [1, 1]} : vector<48x32xf32> to vector<8x32xf32>
    %79 = vector.extract_strided_slice %74 {offsets = [32, 0], sizes = [8, 32], strides = [1, 1]} : vector<48x32xf32> to vector<8x32xf32>
    %80 = vector.extract_strided_slice %74 {offsets = [40, 0], sizes = [8, 32], strides = [1, 1]} : vector<48x32xf32> to vector<8x32xf32>
    %81 = vector.shape_cast %75 : vector<8x32xf32> to vector<1x8x32xf32>
    %82 = vector.shape_cast %76 : vector<8x32xf32> to vector<1x8x32xf32>
    %83 = vector.shape_cast %77 : vector<8x32xf32> to vector<1x8x32xf32>
    %84 = vector.shape_cast %78 : vector<8x32xf32> to vector<1x8x32xf32>
    %85 = vector.shape_cast %79 : vector<8x32xf32> to vector<1x8x32xf32>
    %86 = vector.shape_cast %80 : vector<8x32xf32> to vector<1x8x32xf32>
    %87 = tpu.concatenate %81, %82, %83, %84, %85, %86 in 0 : vector<1x8x32xf32>, vector<1x8x32xf32>, vector<1x8x32xf32>, vector<1x8x32xf32>, vector<1x8x32xf32>, vector<1x8x32xf32> -> vector<6x8x32xf32>
    %88 = vector.extract_strided_slice %73 {offsets = [0, 32], sizes = [48, 32], strides = [1, 1]} : vector<48x96xf32> to vector<48x32xf32>
    %89 = vector.extract_strided_slice %88 {offsets = [0, 0], sizes = [8, 32], strides = [1, 1]} : vector<48x32xf32> to vector<8x32xf32>
    %90 = vector.extract_strided_slice %88 {offsets = [8, 0], sizes = [8, 32], strides = [1, 1]} : vector<48x32xf32> to vector<8x32xf32>
    %91 = vector.extract_strided_slice %88 {offsets = [16, 0], sizes = [8, 32], strides = [1, 1]} : vector<48x32xf32> to vector<8x32xf32>
    %92 = vector.extract_strided_slice %88 {offsets = [24, 0], sizes = [8, 32], strides = [1, 1]} : vector<48x32xf32> to vector<8x32xf32>
    %93 = vector.extract_strided_slice %88 {offsets = [32, 0], sizes = [8, 32], strides = [1, 1]} : vector<48x32xf32> to vector<8x32xf32>
    %94 = vector.extract_strided_slice %88 {offsets = [40, 0], sizes = [8, 32], strides = [1, 1]} : vector<48x32xf32> to vector<8x32xf32>
    %95 = vector.shape_cast %89 : vector<8x32xf32> to vector<1x8x32xf32>
    %96 = vector.shape_cast %90 : vector<8x32xf32> to vector<1x8x32xf32>
    %97 = vector.shape_cast %91 : vector<8x32xf32> to vector<1x8x32xf32>
    %98 = vector.shape_cast %92 : vector<8x32xf32> to vector<1x8x32xf32>
    %99 = vector.shape_cast %93 : vector<8x32xf32> to vector<1x8x32xf32>
    %100 = vector.shape_cast %94 : vector<8x32xf32> to vector<1x8x32xf32>
    %101 = tpu.concatenate %95, %96, %97, %98, %99, %100 in 0 : vector<1x8x32xf32>, vector<1x8x32xf32>, vector<1x8x32xf32>, vector<1x8x32xf32>, vector<1x8x32xf32>, vector<1x8x32xf32> -> vector<6x8x32xf32>
    %102 = vector.extract_strided_slice %73 {offsets = [0, 64], sizes = [48, 32], strides = [1, 1]} : vector<48x96xf32> to vector<48x32xf32>
    %103 = vector.extract_strided_slice %102 {offsets = [0, 0], sizes = [8, 32], strides = [1, 1]} : vector<48x32xf32> to vector<8x32xf32>
    %104 = vector.extract_strided_slice %102 {offsets = [8, 0], sizes = [8, 32], strides = [1, 1]} : vector<48x32xf32> to vector<8x32xf32>
    %105 = vector.extract_strided_slice %102 {offsets = [16, 0], sizes = [8, 32], strides = [1, 1]} : vector<48x32xf32> to vector<8x32xf32>
    %106 = vector.extract_strided_slice %102 {offsets = [24, 0], sizes = [8, 32], strides = [1, 1]} : vector<48x32xf32> to vector<8x32xf32>
    %107 = vector.extract_strided_slice %102 {offsets = [32, 0], sizes = [8, 32], strides = [1, 1]} : vector<48x32xf32> to vector<8x32xf32>
    %108 = vector.extract_strided_slice %102 {offsets = [40, 0], sizes = [8, 32], strides = [1, 1]} : vector<48x32xf32> to vector<8x32xf32>
    %109 = vector.shape_cast %103 : vector<8x32xf32> to vector<1x8x32xf32>
    %110 = vector.shape_cast %104 : vector<8x32xf32> to vector<1x8x32xf32>
    %111 = vector.shape_cast %105 : vector<8x32xf32> to vector<1x8x32xf32>
    %112 = vector.shape_cast %106 : vector<8x32xf32> to vector<1x8x32xf32>
    %113 = vector.shape_cast %107 : vector<8x32xf32> to vector<1x8x32xf32>
    %114 = vector.shape_cast %108 : vector<8x32xf32> to vector<1x8x32xf32>
    %115 = tpu.concatenate %109, %110, %111, %112, %113, %114 in 0 : vector<1x8x32xf32>, vector<1x8x32xf32>, vector<1x8x32xf32>, vector<1x8x32xf32>, vector<1x8x32xf32>, vector<1x8x32xf32> -> vector<6x8x32xf32>
    %116 = vector.extract_strided_slice %87 {offsets = [0, 0, 0], sizes = [6, 8, 8], strides = [1, 1, 1]} : vector<6x8x32xf32> to vector<6x8x8xf32>
    %117 = arith.truncf %116 : vector<6x8x8xf32> to vector<6x8x8xbf16>
    %118 = vector.extract_strided_slice %101 {offsets = [0, 0, 0], sizes = [6, 8, 8], strides = [1, 1, 1]} : vector<6x8x32xf32> to vector<6x8x8xf32>
    %119 = arith.truncf %118 : vector<6x8x8xf32> to vector<6x8x8xbf16>
    %120 = vector.extract_strided_slice %115 {offsets = [0, 0, 0], sizes = [6, 8, 8], strides = [1, 1, 1]} : vector<6x8x32xf32> to vector<6x8x8xf32>
    %121 = arith.truncf %120 : vector<6x8x8xf32> to vector<6x8x8xbf16>
    "tpu.trace_start"() <{level = 10 : i32, message = "bqd,bkd->bqk"}> : () -> ()
    %cst_39 = arith.constant dense<0.000000e+00> : vector<6x8x8xf32>
    %122 = tpu.matmul %117, %119, %cst_39 {dimension_numbers = #tpu.dot_dimension_numbers<[2], [2], [1], [1], [0, 0, 0, 1, 1, 1], [0], [0]>} : vector<6x8x8xbf16>, vector<6x8x8xbf16>, vector<6x8x8xf32> -> vector<6x8x8xf32>
    "tpu.trace_stop"() : () -> ()
    %123 = vector.shape_cast %39 : vector<1x8xf32> to vector<1x1x8xf32>
    %124 = vector.broadcast %123 : vector<1x1x8xf32> to vector<6x8x8xf32>
    %125 = arith.addf %122, %124 : vector<6x8x8xf32>
    %cst_40 = arith.constant dense<0xFF800000> : vector<6x8xf32>
    %126 = vector.multi_reduction <maximumf>, %125, %cst_40 [2] : vector<6x8x8xf32> to vector<6x8xf32>
    %127 = vector.shape_cast %126 : vector<6x8xf32> to vector<6x8x1xf32>
    %128 = vector.broadcast %127 : vector<6x8x1xf32> to vector<6x8x8xf32>
    %129 = arith.subf %125, %128 : vector<6x8x8xf32>
    %130 = math.exp %129 : vector<6x8x8xf32>
    %cst_41 = arith.constant dense<0.000000e+00> : vector<6x8xf32>
    %131 = vector.multi_reduction <add>, %130, %cst_41 [2] : vector<6x8x8xf32> to vector<6x8xf32>
    %132 = vector.shape_cast %131 : vector<6x8xf32> to vector<6x8x1xf32>
    %133 = tpu.reciprocal %132 {approx = true} : vector<6x8x1xf32> -> vector<6x8x1xf32>
    %134 = vector.broadcast %133 : vector<6x8x1xf32> to vector<6x8x8xf32>
    %135 = arith.mulf %130, %134 : vector<6x8x8xf32>
    %136 = arith.truncf %135 : vector<6x8x8xf32> to vector<6x8x8xbf16>
    "tpu.trace_start"() <{level = 10 : i32, message = "bqk,bkd->bqd"}> : () -> ()
    %cst_42 = arith.constant dense<0.000000e+00> : vector<6x8x8xf32>
    %137 = tpu.matmul %136, %121, %cst_42 {dimension_numbers = #tpu.dot_dimension_numbers<[2], [1], [1], [2], [0, 0, 0, 1, 1, 2], [0], [0]>} : vector<6x8x8xbf16>, vector<6x8x8xbf16>, vector<6x8x8xf32> -> vector<6x8x8xf32>
    "tpu.trace_stop"() : () -> ()
    %138 = vector.extract_strided_slice %87 {offsets = [0, 0, 8], sizes = [6, 8, 8], strides = [1, 1, 1]} : vector<6x8x32xf32> to vector<6x8x8xf32>
    %139 = arith.truncf %138 : vector<6x8x8xf32> to vector<6x8x8xbf16>
    %140 = vector.extract_strided_slice %101 {offsets = [0, 0, 8], sizes = [6, 8, 8], strides = [1, 1, 1]} : vector<6x8x32xf32> to vector<6x8x8xf32>
    %141 = arith.truncf %140 : vector<6x8x8xf32> to vector<6x8x8xbf16>
    %142 = vector.extract_strided_slice %115 {offsets = [0, 0, 8], sizes = [6, 8, 8], strides = [1, 1, 1]} : vector<6x8x32xf32> to vector<6x8x8xf32>
    %143 = arith.truncf %142 : vector<6x8x8xf32> to vector<6x8x8xbf16>
    "tpu.trace_start"() <{level = 10 : i32, message = "bqd,bkd->bqk"}> : () -> ()
    %cst_43 = arith.constant dense<0.000000e+00> : vector<6x8x8xf32>
    %144 = tpu.matmul %139, %141, %cst_43 {dimension_numbers = #tpu.dot_dimension_numbers<[2], [2], [1], [1], [0, 0, 0, 1, 1, 1], [0], [0]>} : vector<6x8x8xbf16>, vector<6x8x8xbf16>, vector<6x8x8xf32> -> vector<6x8x8xf32>
    "tpu.trace_stop"() : () -> ()
    %145 = vector.shape_cast %39 : vector<1x8xf32> to vector<1x1x8xf32>
    %146 = vector.broadcast %145 : vector<1x1x8xf32> to vector<6x8x8xf32>
    %147 = arith.addf %144, %146 : vector<6x8x8xf32>
    %cst_44 = arith.constant dense<0xFF800000> : vector<6x8xf32>
    %148 = vector.multi_reduction <maximumf>, %147, %cst_44 [2] : vector<6x8x8xf32> to vector<6x8xf32>
    %149 = vector.shape_cast %148 : vector<6x8xf32> to vector<6x8x1xf32>
    %150 = vector.broadcast %149 : vector<6x8x1xf32> to vector<6x8x8xf32>
    %151 = arith.subf %147, %150 : vector<6x8x8xf32>
    %152 = math.exp %151 : vector<6x8x8xf32>
    %cst_45 = arith.constant dense<0.000000e+00> : vector<6x8xf32>
    %153 = vector.multi_reduction <add>, %152, %cst_45 [2] : vector<6x8x8xf32> to vector<6x8xf32>
    %154 = vector.shape_cast %153 : vector<6x8xf32> to vector<6x8x1xf32>
    %155 = tpu.reciprocal %154 {approx = true} : vector<6x8x1xf32> -> vector<6x8x1xf32>
    %156 = vector.broadcast %155 : vector<6x8x1xf32> to vector<6x8x8xf32>
    %157 = arith.mulf %152, %156 : vector<6x8x8xf32>
    %158 = arith.truncf %157 : vector<6x8x8xf32> to vector<6x8x8xbf16>
    "tpu.trace_start"() <{level = 10 : i32, message = "bqk,bkd->bqd"}> : () -> ()
    %cst_46 = arith.constant dense<0.000000e+00> : vector<6x8x8xf32>
    %159 = tpu.matmul %158, %143, %cst_46 {dimension_numbers = #tpu.dot_dimension_numbers<[2], [1], [1], [2], [0, 0, 0, 1, 1, 2], [0], [0]>} : vector<6x8x8xbf16>, vector<6x8x8xbf16>, vector<6x8x8xf32> -> vector<6x8x8xf32>
    "tpu.trace_stop"() : () -> ()
    %160 = vector.extract_strided_slice %87 {offsets = [0, 0, 16], sizes = [6, 8, 8], strides = [1, 1, 1]} : vector<6x8x32xf32> to vector<6x8x8xf32>
    %161 = arith.truncf %160 : vector<6x8x8xf32> to vector<6x8x8xbf16>
    %162 = vector.extract_strided_slice %101 {offsets = [0, 0, 16], sizes = [6, 8, 8], strides = [1, 1, 1]} : vector<6x8x32xf32> to vector<6x8x8xf32>
    %163 = arith.truncf %162 : vector<6x8x8xf32> to vector<6x8x8xbf16>
    %164 = vector.extract_strided_slice %115 {offsets = [0, 0, 16], sizes = [6, 8, 8], strides = [1, 1, 1]} : vector<6x8x32xf32> to vector<6x8x8xf32>
    %165 = arith.truncf %164 : vector<6x8x8xf32> to vector<6x8x8xbf16>
    "tpu.trace_start"() <{level = 10 : i32, message = "bqd,bkd->bqk"}> : () -> ()
    %cst_47 = arith.constant dense<0.000000e+00> : vector<6x8x8xf32>
    %166 = tpu.matmul %161, %163, %cst_47 {dimension_numbers = #tpu.dot_dimension_numbers<[2], [2], [1], [1], [0, 0, 0, 1, 1, 1], [0], [0]>} : vector<6x8x8xbf16>, vector<6x8x8xbf16>, vector<6x8x8xf32> -> vector<6x8x8xf32>
    "tpu.trace_stop"() : () -> ()
    %167 = vector.shape_cast %39 : vector<1x8xf32> to vector<1x1x8xf32>
    %168 = vector.broadcast %167 : vector<1x1x8xf32> to vector<6x8x8xf32>
    %169 = arith.addf %166, %168 : vector<6x8x8xf32>
    %cst_48 = arith.constant dense<0xFF800000> : vector<6x8xf32>
    %170 = vector.multi_reduction <maximumf>, %169, %cst_48 [2] : vector<6x8x8xf32> to vector<6x8xf32>
    %171 = vector.shape_cast %170 : vector<6x8xf32> to vector<6x8x1xf32>
    %172 = vector.broadcast %171 : vector<6x8x1xf32> to vector<6x8x8xf32>
    %173 = arith.subf %169, %172 : vector<6x8x8xf32>
    %174 = math.exp %173 : vector<6x8x8xf32>
    %cst_49 = arith.constant dense<0.000000e+00> : vector<6x8xf32>
    %175 = vector.multi_reduction <add>, %174, %cst_49 [2] : vector<6x8x8xf32> to vector<6x8xf32>
    %176 = vector.shape_cast %175 : vector<6x8xf32> to vector<6x8x1xf32>
    %177 = tpu.reciprocal %176 {approx = true} : vector<6x8x1xf32> -> vector<6x8x1xf32>
    %178 = vector.broadcast %177 : vector<6x8x1xf32> to vector<6x8x8xf32>
    %179 = arith.mulf %174, %178 : vector<6x8x8xf32>
    %180 = arith.truncf %179 : vector<6x8x8xf32> to vector<6x8x8xbf16>
    "tpu.trace_start"() <{level = 10 : i32, message = "bqk,bkd->bqd"}> : () -> ()
    %cst_50 = arith.constant dense<0.000000e+00> : vector<6x8x8xf32>
    %181 = tpu.matmul %180, %165, %cst_50 {dimension_numbers = #tpu.dot_dimension_numbers<[2], [1], [1], [2], [0, 0, 0, 1, 1, 2], [0], [0]>} : vector<6x8x8xbf16>, vector<6x8x8xbf16>, vector<6x8x8xf32> -> vector<6x8x8xf32>
    "tpu.trace_stop"() : () -> ()
    %182 = vector.extract_strided_slice %87 {offsets = [0, 0, 24], sizes = [6, 8, 8], strides = [1, 1, 1]} : vector<6x8x32xf32> to vector<6x8x8xf32>
    %183 = arith.truncf %182 : vector<6x8x8xf32> to vector<6x8x8xbf16>
    %184 = vector.extract_strided_slice %101 {offsets = [0, 0, 24], sizes = [6, 8, 8], strides = [1, 1, 1]} : vector<6x8x32xf32> to vector<6x8x8xf32>
    %185 = arith.truncf %184 : vector<6x8x8xf32> to vector<6x8x8xbf16>
    %186 = vector.extract_strided_slice %115 {offsets = [0, 0, 24], sizes = [6, 8, 8], strides = [1, 1, 1]} : vector<6x8x32xf32> to vector<6x8x8xf32>
    %187 = arith.truncf %186 : vector<6x8x8xf32> to vector<6x8x8xbf16>
    "tpu.trace_start"() <{level = 10 : i32, message = "bqd,bkd->bqk"}> : () -> ()
    %cst_51 = arith.constant dense<0.000000e+00> : vector<6x8x8xf32>
    %188 = tpu.matmul %183, %185, %cst_51 {dimension_numbers = #tpu.dot_dimension_numbers<[2], [2], [1], [1], [0, 0, 0, 1, 1, 1], [0], [0]>} : vector<6x8x8xbf16>, vector<6x8x8xbf16>, vector<6x8x8xf32> -> vector<6x8x8xf32>
    "tpu.trace_stop"() : () -> ()
    %189 = vector.shape_cast %39 : vector<1x8xf32> to vector<1x1x8xf32>
    %190 = vector.broadcast %189 : vector<1x1x8xf32> to vector<6x8x8xf32>
    %191 = arith.addf %188, %190 : vector<6x8x8xf32>
    %cst_52 = arith.constant dense<0xFF800000> : vector<6x8xf32>
    %192 = vector.multi_reduction <maximumf>, %191, %cst_52 [2] : vector<6x8x8xf32> to vector<6x8xf32>
    %193 = vector.shape_cast %192 : vector<6x8xf32> to vector<6x8x1xf32>
    %194 = vector.broadcast %193 : vector<6x8x1xf32> to vector<6x8x8xf32>
    %195 = arith.subf %191, %194 : vector<6x8x8xf32>
    %196 = math.exp %195 : vector<6x8x8xf32>
    %cst_53 = arith.constant dense<0.000000e+00> : vector<6x8xf32>
    %197 = vector.multi_reduction <add>, %196, %cst_53 [2] : vector<6x8x8xf32> to vector<6x8xf32>
    %198 = vector.shape_cast %197 : vector<6x8xf32> to vector<6x8x1xf32>
    %199 = tpu.reciprocal %198 {approx = true} : vector<6x8x1xf32> -> vector<6x8x1xf32>
    %200 = vector.broadcast %199 : vector<6x8x1xf32> to vector<6x8x8xf32>
    %201 = arith.mulf %196, %200 : vector<6x8x8xf32>
    %202 = arith.truncf %201 : vector<6x8x8xf32> to vector<6x8x8xbf16>
    "tpu.trace_start"() <{level = 10 : i32, message = "bqk,bkd->bqd"}> : () -> ()
    %cst_54 = arith.constant dense<0.000000e+00> : vector<6x8x8xf32>
    %203 = tpu.matmul %202, %187, %cst_54 {dimension_numbers = #tpu.dot_dimension_numbers<[2], [1], [1], [2], [0, 0, 0, 1, 1, 2], [0], [0]>} : vector<6x8x8xbf16>, vector<6x8x8xbf16>, vector<6x8x8xf32> -> vector<6x8x8xf32>
    "tpu.trace_stop"() : () -> ()
    %204 = tpu.concatenate %137, %159, %181, %203 in 2 : vector<6x8x8xf32>, vector<6x8x8xf32>, vector<6x8x8xf32>, vector<6x8x8xf32> -> vector<6x8x32xf32>
    %205 = vector.extract_strided_slice %204 {offsets = [0, 0, 0], sizes = [1, 8, 32], strides = [1, 1, 1]} : vector<6x8x32xf32> to vector<1x8x32xf32>
    %206 = vector.shape_cast %205 : vector<1x8x32xf32> to vector<8x32xf32>
    %207 = vector.extract_strided_slice %204 {offsets = [1, 0, 0], sizes = [1, 8, 32], strides = [1, 1, 1]} : vector<6x8x32xf32> to vector<1x8x32xf32>
    %208 = vector.shape_cast %207 : vector<1x8x32xf32> to vector<8x32xf32>
    %209 = vector.extract_strided_slice %204 {offsets = [2, 0, 0], sizes = [1, 8, 32], strides = [1, 1, 1]} : vector<6x8x32xf32> to vector<1x8x32xf32>
    %210 = vector.shape_cast %209 : vector<1x8x32xf32> to vector<8x32xf32>
    %211 = vector.extract_strided_slice %204 {offsets = [3, 0, 0], sizes = [1, 8, 32], strides = [1, 1, 1]} : vector<6x8x32xf32> to vector<1x8x32xf32>
    %212 = vector.shape_cast %211 : vector<1x8x32xf32> to vector<8x32xf32>
    %213 = vector.extract_strided_slice %204 {offsets = [4, 0, 0], sizes = [1, 8, 32], strides = [1, 1, 1]} : vector<6x8x32xf32> to vector<1x8x32xf32>
    %214 = vector.shape_cast %213 : vector<1x8x32xf32> to vector<8x32xf32>
    %215 = vector.extract_strided_slice %204 {offsets = [5, 0, 0], sizes = [1, 8, 32], strides = [1, 1, 1]} : vector<6x8x32xf32> to vector<1x8x32xf32>
    %216 = vector.shape_cast %215 : vector<1x8x32xf32> to vector<8x32xf32>
    %217 = tpu.concatenate %206, %208, %210, %212, %214, %216 in 0 : vector<8x32xf32>, vector<8x32xf32>, vector<8x32xf32>, vector<8x32xf32>, vector<8x32xf32>, vector<8x32xf32> -> vector<48x32xf32>
    %218 = arith.truncf %217 : vector<48x32xf32> to vector<48x32xbf16>
    %c0_55 = arith.constant 0 : index
    %c0_56 = arith.constant 0 : index
    %c0_57 = arith.constant 0 : index
    %219 = vector.load %arg10[%c0_55, %c0_56, %c0_57] : memref<2x32x32xbf16, #tpu.memory_space<vmem>>, vector<1x32x32xbf16>
    %220 = vector.shape_cast %219 : vector<1x32x32xbf16> to vector<32x32xbf16>
    %cst_58 = arith.constant dense<0.000000e+00> : vector<48x32xf32>
    %221 = tpu.matmul %218, %220, %cst_58 {dimension_numbers = #tpu.dot_dimension_numbers<[1], [0], [0], [1], [0, 0, 1, 1], [], []>} : vector<48x32xbf16>, vector<32x32xbf16>, vector<48x32xf32> -> vector<48x32xf32>
    %c0_59 = arith.constant 0 : index
    %c0_60 = arith.constant 0 : index
    %c0_61 = arith.constant 0 : index
    %222 = vector.load %arg11[%c0_59, %c0_60, %c0_61] : memref<2x1x32xf32, #tpu.memory_space<vmem>>, vector<1x1x32xf32>
    %223 = vector.shape_cast %222 : vector<1x1x32xf32> to vector<1x32xf32>
    %224 = vector.broadcast %223 : vector<1x32xf32> to vector<48x32xf32>
    %225 = arith.addf %221, %224 : vector<48x32xf32>
    %226 = arith.addf %30, %225 : vector<48x32xf32>
    %c0_62 = arith.constant 0 : index
    %c0_63 = arith.constant 0 : index
    %c0_64 = arith.constant 0 : index
    %227 = vector.load %arg12[%c0_62, %c0_63, %c0_64] : memref<2x1x32xf32, #tpu.memory_space<vmem>>, vector<1x1x32xf32>
    %228 = vector.shape_cast %227 : vector<1x1x32xf32> to vector<1x32xf32>
    %c0_65 = arith.constant 0 : index
    %c0_66 = arith.constant 0 : index
    %c0_67 = arith.constant 0 : index
    %229 = vector.load %arg13[%c0_65, %c0_66, %c0_67] : memref<2x1x32xf32, #tpu.memory_space<vmem>>, vector<1x1x32xf32>
    %230 = vector.shape_cast %229 : vector<1x1x32xf32> to vector<1x32xf32>
    %cst_68 = arith.constant dense<0.000000e+00> : vector<48xf32>
    %231 = vector.multi_reduction <add>, %226, %cst_68 [1] : vector<48x32xf32> to vector<48xf32>
    %232 = vector.shape_cast %231 : vector<48xf32> to vector<48x1xf32>
    %cst_69 = arith.constant 3.200000e+01 : f32
    %233 = vector.broadcast %cst_69 : f32 to vector<48x1xf32>
    %234 = arith.divf %232, %233 : vector<48x1xf32>
    %235 = vector.broadcast %234 : vector<48x1xf32> to vector<48x32xf32>
    %236 = arith.subf %226, %235 : vector<48x32xf32>
    %237 = arith.mulf %236, %236 : vector<48x32xf32>
    %cst_70 = arith.constant dense<0.000000e+00> : vector<48xf32>
    %238 = vector.multi_reduction <add>, %237, %cst_70 [1] : vector<48x32xf32> to vector<48xf32>
    %239 = vector.shape_cast %238 : vector<48xf32> to vector<48x1xf32>
    %cst_71 = arith.constant 3.200000e+01 : f32
    %240 = vector.broadcast %cst_71 : f32 to vector<48x1xf32>
    %241 = arith.divf %239, %240 : vector<48x1xf32>
    %242 = vector.broadcast %234 : vector<48x1xf32> to vector<48x32xf32>
    %243 = arith.subf %226, %242 : vector<48x32xf32>
    %cst_72 = arith.constant 9.99999974E-6 : f32
    %244 = vector.broadcast %cst_72 : f32 to vector<48x1xf32>
    %245 = arith.addf %241, %244 : vector<48x1xf32>
    %246 = math.rsqrt %245 : vector<48x1xf32>
    %247 = vector.broadcast %246 : vector<48x1xf32> to vector<48x32xf32>
    %248 = arith.mulf %243, %247 : vector<48x32xf32>
    %249 = vector.broadcast %228 : vector<1x32xf32> to vector<48x32xf32>
    %250 = arith.mulf %248, %249 : vector<48x32xf32>
    %251 = vector.broadcast %230 : vector<1x32xf32> to vector<48x32xf32>
    %252 = arith.addf %250, %251 : vector<48x32xf32>
    %253 = arith.truncf %252 : vector<48x32xf32> to vector<48x32xbf16>
    %c0_73 = arith.constant 0 : index
    %c0_74 = arith.constant 0 : index
    %c0_75 = arith.constant 0 : index
    %254 = vector.load %arg14[%c0_73, %c0_74, %c0_75] : memref<2x32x64xbf16, #tpu.memory_space<vmem>>, vector<1x32x64xbf16>
    %255 = vector.shape_cast %254 : vector<1x32x64xbf16> to vector<32x64xbf16>
    %cst_76 = arith.constant dense<0.000000e+00> : vector<48x64xf32>
    %256 = tpu.matmul %253, %255, %cst_76 {dimension_numbers = #tpu.dot_dimension_numbers<[1], [0], [0], [1], [0, 0, 1, 1], [], []>} : vector<48x32xbf16>, vector<32x64xbf16>, vector<48x64xf32> -> vector<48x64xf32>
    %c0_77 = arith.constant 0 : index
    %c0_78 = arith.constant 0 : index
    %c0_79 = arith.constant 0 : index
    %257 = vector.load %arg15[%c0_77, %c0_78, %c0_79] : memref<2x1x64xf32, #tpu.memory_space<vmem>>, vector<1x1x64xf32>
    %258 = vector.shape_cast %257 : vector<1x1x64xf32> to vector<1x64xf32>
    %259 = vector.broadcast %258 : vector<1x64xf32> to vector<48x64xf32>
    %260 = arith.addf %256, %259 : vector<48x64xf32>
    %cst_80 = arith.constant 1.702000e+00 : f32
    %261 = vector.broadcast %cst_80 : f32 to vector<48x64xf32>
    %262 = arith.mulf %261, %260 : vector<48x64xf32>
    %263 = arith.negf %262 : vector<48x64xf32>
    %264 = math.exp %263 : vector<48x64xf32>
    %cst_81 = arith.constant 1.000000e+00 : f32
    %265 = vector.broadcast %cst_81 : f32 to vector<48x64xf32>
    %266 = arith.addf %265, %264 : vector<48x64xf32>
    %267 = arith.divf %265, %266 : vector<48x64xf32>
    %268 = arith.mulf %260, %267 : vector<48x64xf32>
    %269 = arith.truncf %268 : vector<48x64xf32> to vector<48x64xbf16>
    %c0_82 = arith.constant 0 : index
    %c0_83 = arith.constant 0 : index
    %c0_84 = arith.constant 0 : index
    %270 = vector.load %arg16[%c0_82, %c0_83, %c0_84] : memref<2x64x32xbf16, #tpu.memory_space<vmem>>, vector<1x64x32xbf16>
    %271 = vector.shape_cast %270 : vector<1x64x32xbf16> to vector<64x32xbf16>
    %cst_85 = arith.constant dense<0.000000e+00> : vector<48x32xf32>
    %272 = tpu.matmul %269, %271, %cst_85 {dimension_numbers = #tpu.dot_dimension_numbers<[1], [0], [0], [1], [0, 0, 1, 1], [], []>} : vector<48x64xbf16>, vector<64x32xbf16>, vector<48x32xf32> -> vector<48x32xf32>
    %c0_86 = arith.constant 0 : index
    %c0_87 = arith.constant 0 : index
    %c0_88 = arith.constant 0 : index
    %273 = vector.load %arg17[%c0_86, %c0_87, %c0_88] : memref<2x1x32xf32, #tpu.memory_space<vmem>>, vector<1x1x32xf32>
    %274 = vector.shape_cast %273 : vector<1x1x32xf32> to vector<1x32xf32>
    %275 = vector.broadcast %274 : vector<1x32xf32> to vector<48x32xf32>
    %276 = arith.addf %272, %275 : vector<48x32xf32>
    %277 = arith.addf %226, %276 : vector<48x32xf32>
    %c1 = arith.constant 1 : index
    %c0_89 = arith.constant 0 : index
    %c0_90 = arith.constant 0 : index
    %c0_91 = arith.constant 0 : index
    %278 = vector.load %arg18[%c1, %c0_89, %c0_90, %c0_91] : memref<3x1x48x32xf32, #tpu.memory_space<vmem>>, vector<1x1x48x32xf32>
    %279 = vector.shape_cast %278 : vector<1x1x48x32xf32> to vector<48x32xf32>
    %280 = vector.shape_cast %277 : vector<48x32xf32> to vector<1x1x48x32xf32>
    tpu.vector_store %arg18[%c1, %c0_89, %c0_90, %c0_91], %280 {strides = array<i32>} : memref<3x1x48x32xf32, #tpu.memory_space<vmem>>, vector<1x1x48x32xf32>,
    %c1_92 = arith.constant 1 : index
    %c0_93 = arith.constant 0 : index
    %c0_94 = arith.constant 0 : index
    %281 = vector.load %arg6[%c1_92, %c0_93, %c0_94] : memref<2x1x32xf32, #tpu.memory_space<vmem>>, vector<1x1x32xf32>
    %282 = vector.shape_cast %281 : vector<1x1x32xf32> to vector<1x32xf32>
    %c1_95 = arith.constant 1 : index
    %c0_96 = arith.constant 0 : index
    %c0_97 = arith.constant 0 : index
    %283 = vector.load %arg7[%c1_95, %c0_96, %c0_97] : memref<2x1x32xf32, #tpu.memory_space<vmem>>, vector<1x1x32xf32>
    %284 = vector.shape_cast %283 : vector<1x1x32xf32> to vector<1x32xf32>
    %cst_98 = arith.constant dense<0.000000e+00> : vector<48xf32>
    %285 = vector.multi_reduction <add>, %277, %cst_98 [1] : vector<48x32xf32> to vector<48xf32>
    %286 = vector.shape_cast %285 : vector<48xf32> to vector<48x1xf32>
    %cst_99 = arith.constant 3.200000e+01 : f32
    %287 = vector.broadcast %cst_99 : f32 to vector<48x1xf32>
    %288 = arith.divf %286, %287 : vector<48x1xf32>
    %289 = vector.broadcast %288 : vector<48x1xf32> to vector<48x32xf32>
    %290 = arith.subf %277, %289 : vector<48x32xf32>
    %291 = arith.mulf %290, %290 : vector<48x32xf32>
    %cst_100 = arith.constant dense<0.000000e+00> : vector<48xf32>
    %292 = vector.multi_reduction <add>, %291, %cst_100 [1] : vector<48x32xf32> to vector<48xf32>
    %293 = vector.shape_cast %292 : vector<48xf32> to vector<48x1xf32>
    %cst_101 = arith.constant 3.200000e+01 : f32
    %294 = vector.broadcast %cst_101 : f32 to vector<48x1xf32>
    %295 = arith.divf %293, %294 : vector<48x1xf32>
    %296 = vector.broadcast %288 : vector<48x1xf32> to vector<48x32xf32>
    %297 = arith.subf %277, %296 : vector<48x32xf32>
    %cst_102 = arith.constant 9.99999974E-6 : f32
    %298 = vector.broadcast %cst_102 : f32 to vector<48x1xf32>
    %299 = arith.addf %295, %298 : vector<48x1xf32>
    %300 = math.rsqrt %299 : vector<48x1xf32>
    %301 = vector.broadcast %300 : vector<48x1xf32> to vector<48x32xf32>
    %302 = arith.mulf %297, %301 : vector<48x32xf32>
    %303 = vector.broadcast %282 : vector<1x32xf32> to vector<48x32xf32>
    %304 = arith.mulf %302, %303 : vector<48x32xf32>
    %305 = vector.broadcast %284 : vector<1x32xf32> to vector<48x32xf32>
    %306 = arith.addf %304, %305 : vector<48x32xf32>
    %307 = arith.truncf %306 : vector<48x32xf32> to vector<48x32xbf16>
    %c1_103 = arith.constant 1 : index
    %c0_104 = arith.constant 0 : index
    %c0_105 = arith.constant 0 : index
    %308 = vector.load %arg8[%c1_103, %c0_104, %c0_105] : memref<2x32x96xbf16, #tpu.memory_space<vmem>>, vector<1x32x96xbf16>
    %309 = vector.shape_cast %308 : vector<1x32x96xbf16> to vector<32x96xbf16>
    %cst_106 = arith.constant dense<0.000000e+00> : vector<48x96xf32>
    %310 = tpu.matmul %307, %309, %cst_106 {dimension_numbers = #tpu.dot_dimension_numbers<[1], [0], [0], [1], [0, 0, 1, 1], [], []>} : vector<48x32xbf16>, vector<32x96xbf16>, vector<48x96xf32> -> vector<48x96xf32>
    %c1_107 = arith.constant 1 : index
    %c0_108 = arith.constant 0 : index
    %c0_109 = arith.constant 0 : index
    %311 = vector.load %arg9[%c1_107, %c0_108, %c0_109] : memref<2x1x96xf32, #tpu.memory_space<vmem>>, vector<1x1x96xf32>
    %312 = vector.shape_cast %311 : vector<1x1x96xf32> to vector<1x96xf32>
    %313 = vector.broadcast %312 : vector<1x96xf32> to vector<48x96xf32>
    %314 = arith.addf %310, %313 : vector<48x96xf32>
    %315 = vector.extract_strided_slice %314 {offsets = [0, 0], sizes = [48, 32], strides = [1, 1]} : vector<48x96xf32> to vector<48x32xf32>
    %316 = vector.extract_strided_slice %315 {offsets = [0, 0], sizes = [8, 32], strides = [1, 1]} : vector<48x32xf32> to vector<8x32xf32>
    %317 = vector.extract_strided_slice %315 {offsets = [8, 0], sizes = [8, 32], strides = [1, 1]} : vector<48x32xf32> to vector<8x32xf32>
    %318 = vector.extract_strided_slice %315 {offsets = [16, 0], sizes = [8, 32], strides = [1, 1]} : vector<48x32xf32> to vector<8x32xf32>
    %319 = vector.extract_strided_slice %315 {offsets = [24, 0], sizes = [8, 32], strides = [1, 1]} : vector<48x32xf32> to vector<8x32xf32>
    %320 = vector.extract_strided_slice %315 {offsets = [32, 0], sizes = [8, 32], strides = [1, 1]} : vector<48x32xf32> to vector<8x32xf32>
    %321 = vector.extract_strided_slice %315 {offsets = [40, 0], sizes = [8, 32], strides = [1, 1]} : vector<48x32xf32> to vector<8x32xf32>
    %322 = vector.shape_cast %316 : vector<8x32xf32> to vector<1x8x32xf32>
    %323 = vector.shape_cast %317 : vector<8x32xf32> to vector<1x8x32xf32>
    %324 = vector.shape_cast %318 : vector<8x32xf32> to vector<1x8x32xf32>
    %325 = vector.shape_cast %319 : vector<8x32xf32> to vector<1x8x32xf32>
    %326 = vector.shape_cast %320 : vector<8x32xf32> to vector<1x8x32xf32>
    %327 = vector.shape_cast %321 : vector<8x32xf32> to vector<1x8x32xf32>
    %328 = tpu.concatenate %322, %323, %324, %325, %326, %327 in 0 : vector<1x8x32xf32>, vector<1x8x32xf32>, vector<1x8x32xf32>, vector<1x8x32xf32>, vector<1x8x32xf32>, vector<1x8x32xf32> -> vector<6x8x32xf32>
    %329 = vector.extract_strided_slice %314 {offsets = [0, 32], sizes = [48, 32], strides = [1, 1]} : vector<48x96xf32> to vector<48x32xf32>
    %330 = vector.extract_strided_slice %329 {offsets = [0, 0], sizes = [8, 32], strides = [1, 1]} : vector<48x32xf32> to vector<8x32xf32>
    %331 = vector.extract_strided_slice %329 {offsets = [8, 0], sizes = [8, 32], strides = [1, 1]} : vector<48x32xf32> to vector<8x32xf32>
    %332 = vector.extract_strided_slice %329 {offsets = [16, 0], sizes = [8, 32], strides = [1, 1]} : vector<48x32xf32> to vector<8x32xf32>
    %333 = vector.extract_strided_slice %329 {offsets = [24, 0], sizes = [8, 32], strides = [1, 1]} : vector<48x32xf32> to vector<8x32xf32>
    %334 = vector.extract_strided_slice %329 {offsets = [32, 0], sizes = [8, 32], strides = [1, 1]} : vector<48x32xf32> to vector<8x32xf32>
    %335 = vector.extract_strided_slice %329 {offsets = [40, 0], sizes = [8, 32], strides = [1, 1]} : vector<48x32xf32> to vector<8x32xf32>
    %336 = vector.shape_cast %330 : vector<8x32xf32> to vector<1x8x32xf32>
    %337 = vector.shape_cast %331 : vector<8x32xf32> to vector<1x8x32xf32>
    %338 = vector.shape_cast %332 : vector<8x32xf32> to vector<1x8x32xf32>
    %339 = vector.shape_cast %333 : vector<8x32xf32> to vector<1x8x32xf32>
    %340 = vector.shape_cast %334 : vector<8x32xf32> to vector<1x8x32xf32>
    %341 = vector.shape_cast %335 : vector<8x32xf32> to vector<1x8x32xf32>
    %342 = tpu.concatenate %336, %337, %338, %339, %340, %341 in 0 : vector<1x8x32xf32>, vector<1x8x32xf32>, vector<1x8x32xf32>, vector<1x8x32xf32>, vector<1x8x32xf32>, vector<1x8x32xf32> -> vector<6x8x32xf32>
    %343 = vector.extract_strided_slice %314 {offsets = [0, 64], sizes = [48, 32], strides = [1, 1]} : vector<48x96xf32> to vector<48x32xf32>
    %344 = vector.extract_strided_slice %343 {offsets = [0, 0], sizes = [8, 32], strides = [1, 1]} : vector<48x32xf32> to vector<8x32xf32>
    %345 = vector.extract_strided_slice %343 {offsets = [8, 0], sizes = [8, 32], strides = [1, 1]} : vector<48x32xf32> to vector<8x32xf32>
    %346 = vector.extract_strided_slice %343 {offsets = [16, 0], sizes = [8, 32], strides = [1, 1]} : vector<48x32xf32> to vector<8x32xf32>
    %347 = vector.extract_strided_slice %343 {offsets = [24, 0], sizes = [8, 32], strides = [1, 1]} : vector<48x32xf32> to vector<8x32xf32>
    %348 = vector.extract_strided_slice %343 {offsets = [32, 0], sizes = [8, 32], strides = [1, 1]} : vector<48x32xf32> to vector<8x32xf32>
    %349 = vector.extract_strided_slice %343 {offsets = [40, 0], sizes = [8, 32], strides = [1, 1]} : vector<48x32xf32> to vector<8x32xf32>
    %350 = vector.shape_cast %344 : vector<8x32xf32> to vector<1x8x32xf32>
    %351 = vector.shape_cast %345 : vector<8x32xf32> to vector<1x8x32xf32>
    %352 = vector.shape_cast %346 : vector<8x32xf32> to vector<1x8x32xf32>
    %353 = vector.shape_cast %347 : vector<8x32xf32> to vector<1x8x32xf32>
    %354 = vector.shape_cast %348 : vector<8x32xf32> to vector<1x8x32xf32>
    %355 = vector.shape_cast %349 : vector<8x32xf32> to vector<1x8x32xf32>
    %356 = tpu.concatenate %350, %351, %352, %353, %354, %355 in 0 : vector<1x8x32xf32>, vector<1x8x32xf32>, vector<1x8x32xf32>, vector<1x8x32xf32>, vector<1x8x32xf32>, vector<1x8x32xf32> -> vector<6x8x32xf32>
    %357 = vector.extract_strided_slice %328 {offsets = [0, 0, 0], sizes = [6, 8, 8], strides = [1, 1, 1]} : vector<6x8x32xf32> to vector<6x8x8xf32>
    %358 = arith.truncf %357 : vector<6x8x8xf32> to vector<6x8x8xbf16>
    %359 = vector.extract_strided_slice %342 {offsets = [0, 0, 0], sizes = [6, 8, 8], strides = [1, 1, 1]} : vector<6x8x32xf32> to vector<6x8x8xf32>
    %360 = arith.truncf %359 : vector<6x8x8xf32> to vector<6x8x8xbf16>
    %361 = vector.extract_strided_slice %356 {offsets = [0, 0, 0], sizes = [6, 8, 8], strides = [1, 1, 1]} : vector<6x8x32xf32> to vector<6x8x8xf32>
    %362 = arith.truncf %361 : vector<6x8x8xf32> to vector<6x8x8xbf16>
    "tpu.trace_start"() <{level = 10 : i32, message = "bqd,bkd->bqk"}> : () -> ()
    %cst_110 = arith.constant dense<0.000000e+00> : vector<6x8x8xf32>
    %363 = tpu.matmul %358, %360, %cst_110 {dimension_numbers = #tpu.dot_dimension_numbers<[2], [2], [1], [1], [0, 0, 0, 1, 1, 1], [0], [0]>} : vector<6x8x8xbf16>, vector<6x8x8xbf16>, vector<6x8x8xf32> -> vector<6x8x8xf32>
    "tpu.trace_stop"() : () -> ()
    %364 = vector.shape_cast %39 : vector<1x8xf32> to vector<1x1x8xf32>
    %365 = vector.broadcast %364 : vector<1x1x8xf32> to vector<6x8x8xf32>
    %366 = arith.addf %363, %365 : vector<6x8x8xf32>
    %cst_111 = arith.constant dense<0xFF800000> : vector<6x8xf32>
    %367 = vector.multi_reduction <maximumf>, %366, %cst_111 [2] : vector<6x8x8xf32> to vector<6x8xf32>
    %368 = vector.shape_cast %367 : vector<6x8xf32> to vector<6x8x1xf32>
    %369 = vector.broadcast %368 : vector<6x8x1xf32> to vector<6x8x8xf32>
    %370 = arith.subf %366, %369 : vector<6x8x8xf32>
    %371 = math.exp %370 : vector<6x8x8xf32>
    %cst_112 = arith.constant dense<0.000000e+00> : vector<6x8xf32>
    %372 = vector.multi_reduction <add>, %371, %cst_112 [2] : vector<6x8x8xf32> to vector<6x8xf32>
    %373 = vector.shape_cast %372 : vector<6x8xf32> to vector<6x8x1xf32>
    %374 = tpu.reciprocal %373 {approx = true} : vector<6x8x1xf32> -> vector<6x8x1xf32>
    %375 = vector.broadcast %374 : vector<6x8x1xf32> to vector<6x8x8xf32>
    %376 = arith.mulf %371, %375 : vector<6x8x8xf32>
    %377 = arith.truncf %376 : vector<6x8x8xf32> to vector<6x8x8xbf16>
    "tpu.trace_start"() <{level = 10 : i32, message = "bqk,bkd->bqd"}> : () -> ()
    %cst_113 = arith.constant dense<0.000000e+00> : vector<6x8x8xf32>
    %378 = tpu.matmul %377, %362, %cst_113 {dimension_numbers = #tpu.dot_dimension_numbers<[2], [1], [1], [2], [0, 0, 0, 1, 1, 2], [0], [0]>} : vector<6x8x8xbf16>, vector<6x8x8xbf16>, vector<6x8x8xf32> -> vector<6x8x8xf32>
    "tpu.trace_stop"() : () -> ()
    %379 = vector.extract_strided_slice %328 {offsets = [0, 0, 8], sizes = [6, 8, 8], strides = [1, 1, 1]} : vector<6x8x32xf32> to vector<6x8x8xf32>
    %380 = arith.truncf %379 : vector<6x8x8xf32> to vector<6x8x8xbf16>
    %381 = vector.extract_strided_slice %342 {offsets = [0, 0, 8], sizes = [6, 8, 8], strides = [1, 1, 1]} : vector<6x8x32xf32> to vector<6x8x8xf32>
    %382 = arith.truncf %381 : vector<6x8x8xf32> to vector<6x8x8xbf16>
    %383 = vector.extract_strided_slice %356 {offsets = [0, 0, 8], sizes = [6, 8, 8], strides = [1, 1, 1]} : vector<6x8x32xf32> to vector<6x8x8xf32>
    %384 = arith.truncf %383 : vector<6x8x8xf32> to vector<6x8x8xbf16>
    "tpu.trace_start"() <{level = 10 : i32, message = "bqd,bkd->bqk"}> : () -> ()
    %cst_114 = arith.constant dense<0.000000e+00> : vector<6x8x8xf32>
    %385 = tpu.matmul %380, %382, %cst_114 {dimension_numbers = #tpu.dot_dimension_numbers<[2], [2], [1], [1], [0, 0, 0, 1, 1, 1], [0], [0]>} : vector<6x8x8xbf16>, vector<6x8x8xbf16>, vector<6x8x8xf32> -> vector<6x8x8xf32>
    "tpu.trace_stop"() : () -> ()
    %386 = vector.shape_cast %39 : vector<1x8xf32> to vector<1x1x8xf32>
    %387 = vector.broadcast %386 : vector<1x1x8xf32> to vector<6x8x8xf32>
    %388 = arith.addf %385, %387 : vector<6x8x8xf32>
    %cst_115 = arith.constant dense<0xFF800000> : vector<6x8xf32>
    %389 = vector.multi_reduction <maximumf>, %388, %cst_115 [2] : vector<6x8x8xf32> to vector<6x8xf32>
    %390 = vector.shape_cast %389 : vector<6x8xf32> to vector<6x8x1xf32>
    %391 = vector.broadcast %390 : vector<6x8x1xf32> to vector<6x8x8xf32>
    %392 = arith.subf %388, %391 : vector<6x8x8xf32>
    %393 = math.exp %392 : vector<6x8x8xf32>
    %cst_116 = arith.constant dense<0.000000e+00> : vector<6x8xf32>
    %394 = vector.multi_reduction <add>, %393, %cst_116 [2] : vector<6x8x8xf32> to vector<6x8xf32>
    %395 = vector.shape_cast %394 : vector<6x8xf32> to vector<6x8x1xf32>
    %396 = tpu.reciprocal %395 {approx = true} : vector<6x8x1xf32> -> vector<6x8x1xf32>
    %397 = vector.broadcast %396 : vector<6x8x1xf32> to vector<6x8x8xf32>
    %398 = arith.mulf %393, %397 : vector<6x8x8xf32>
    %399 = arith.truncf %398 : vector<6x8x8xf32> to vector<6x8x8xbf16>
    "tpu.trace_start"() <{level = 10 : i32, message = "bqk,bkd->bqd"}> : () -> ()
    %cst_117 = arith.constant dense<0.000000e+00> : vector<6x8x8xf32>
    %400 = tpu.matmul %399, %384, %cst_117 {dimension_numbers = #tpu.dot_dimension_numbers<[2], [1], [1], [2], [0, 0, 0, 1, 1, 2], [0], [0]>} : vector<6x8x8xbf16>, vector<6x8x8xbf16>, vector<6x8x8xf32> -> vector<6x8x8xf32>
    "tpu.trace_stop"() : () -> ()
    %401 = vector.extract_strided_slice %328 {offsets = [0, 0, 16], sizes = [6, 8, 8], strides = [1, 1, 1]} : vector<6x8x32xf32> to vector<6x8x8xf32>
    %402 = arith.truncf %401 : vector<6x8x8xf32> to vector<6x8x8xbf16>
    %403 = vector.extract_strided_slice %342 {offsets = [0, 0, 16], sizes = [6, 8, 8], strides = [1, 1, 1]} : vector<6x8x32xf32> to vector<6x8x8xf32>
    %404 = arith.truncf %403 : vector<6x8x8xf32> to vector<6x8x8xbf16>
    %405 = vector.extract_strided_slice %356 {offsets = [0, 0, 16], sizes = [6, 8, 8], strides = [1, 1, 1]} : vector<6x8x32xf32> to vector<6x8x8xf32>
    %406 = arith.truncf %405 : vector<6x8x8xf32> to vector<6x8x8xbf16>
    "tpu.trace_start"() <{level = 10 : i32, message = "bqd,bkd->bqk"}> : () -> ()
    %cst_118 = arith.constant dense<0.000000e+00> : vector<6x8x8xf32>
    %407 = tpu.matmul %402, %404, %cst_118 {dimension_numbers = #tpu.dot_dimension_numbers<[2], [2], [1], [1], [0, 0, 0, 1, 1, 1], [0], [0]>} : vector<6x8x8xbf16>, vector<6x8x8xbf16>, vector<6x8x8xf32> -> vector<6x8x8xf32>
    "tpu.trace_stop"() : () -> ()
    %408 = vector.shape_cast %39 : vector<1x8xf32> to vector<1x1x8xf32>
    %409 = vector.broadcast %408 : vector<1x1x8xf32> to vector<6x8x8xf32>
    %410 = arith.addf %407, %409 : vector<6x8x8xf32>
    %cst_119 = arith.constant dense<0xFF800000> : vector<6x8xf32>
    %411 = vector.multi_reduction <maximumf>, %410, %cst_119 [2] : vector<6x8x8xf32> to vector<6x8xf32>
    %412 = vector.shape_cast %411 : vector<6x8xf32> to vector<6x8x1xf32>
    %413 = vector.broadcast %412 : vector<6x8x1xf32> to vector<6x8x8xf32>
    %414 = arith.subf %410, %413 : vector<6x8x8xf32>
    %415 = math.exp %414 : vector<6x8x8xf32>
    %cst_120 = arith.constant dense<0.000000e+00> : vector<6x8xf32>
    %416 = vector.multi_reduction <add>, %415, %cst_120 [2] : vector<6x8x8xf32> to vector<6x8xf32>
    %417 = vector.shape_cast %416 : vector<6x8xf32> to vector<6x8x1xf32>
    %418 = tpu.reciprocal %417 {approx = true} : vector<6x8x1xf32> -> vector<6x8x1xf32>
    %419 = vector.broadcast %418 : vector<6x8x1xf32> to vector<6x8x8xf32>
    %420 = arith.mulf %415, %419 : vector<6x8x8xf32>
    %421 = arith.truncf %420 : vector<6x8x8xf32> to vector<6x8x8xbf16>
    "tpu.trace_start"() <{level = 10 : i32, message = "bqk,bkd->bqd"}> : () -> ()
    %cst_121 = arith.constant dense<0.000000e+00> : vector<6x8x8xf32>
    %422 = tpu.matmul %421, %406, %cst_121 {dimension_numbers = #tpu.dot_dimension_numbers<[2], [1], [1], [2], [0, 0, 0, 1, 1, 2], [0], [0]>} : vector<6x8x8xbf16>, vector<6x8x8xbf16>, vector<6x8x8xf32> -> vector<6x8x8xf32>
    "tpu.trace_stop"() : () -> ()
    %423 = vector.extract_strided_slice %328 {offsets = [0, 0, 24], sizes = [6, 8, 8], strides = [1, 1, 1]} : vector<6x8x32xf32> to vector<6x8x8xf32>
    %424 = arith.truncf %423 : vector<6x8x8xf32> to vector<6x8x8xbf16>
    %425 = vector.extract_strided_slice %342 {offsets = [0, 0, 24], sizes = [6, 8, 8], strides = [1, 1, 1]} : vector<6x8x32xf32> to vector<6x8x8xf32>
    %426 = arith.truncf %425 : vector<6x8x8xf32> to vector<6x8x8xbf16>
    %427 = vector.extract_strided_slice %356 {offsets = [0, 0, 24], sizes = [6, 8, 8], strides = [1, 1, 1]} : vector<6x8x32xf32> to vector<6x8x8xf32>
    %428 = arith.truncf %427 : vector<6x8x8xf32> to vector<6x8x8xbf16>
    "tpu.trace_start"() <{level = 10 : i32, message = "bqd,bkd->bqk"}> : () -> ()
    %cst_122 = arith.constant dense<0.000000e+00> : vector<6x8x8xf32>
    %429 = tpu.matmul %424, %426, %cst_122 {dimension_numbers = #tpu.dot_dimension_numbers<[2], [2], [1], [1], [0, 0, 0, 1, 1, 1], [0], [0]>} : vector<6x8x8xbf16>, vector<6x8x8xbf16>, vector<6x8x8xf32> -> vector<6x8x8xf32>
    "tpu.trace_stop"() : () -> ()
    %430 = vector.shape_cast %39 : vector<1x8xf32> to vector<1x1x8xf32>
    %431 = vector.broadcast %430 : vector<1x1x8xf32> to vector<6x8x8xf32>
    %432 = arith.addf %429, %431 : vector<6x8x8xf32>
    %cst_123 = arith.constant dense<0xFF800000> : vector<6x8xf32>
    %433 = vector.multi_reduction <maximumf>, %432, %cst_123 [2] : vector<6x8x8xf32> to vector<6x8xf32>
    %434 = vector.shape_cast %433 : vector<6x8xf32> to vector<6x8x1xf32>
    %435 = vector.broadcast %434 : vector<6x8x1xf32> to vector<6x8x8xf32>
    %436 = arith.subf %432, %435 : vector<6x8x8xf32>
    %437 = math.exp %436 : vector<6x8x8xf32>
    %cst_124 = arith.constant dense<0.000000e+00> : vector<6x8xf32>
    %438 = vector.multi_reduction <add>, %437, %cst_124 [2] : vector<6x8x8xf32> to vector<6x8xf32>
    %439 = vector.shape_cast %438 : vector<6x8xf32> to vector<6x8x1xf32>
    %440 = tpu.reciprocal %439 {approx = true} : vector<6x8x1xf32> -> vector<6x8x1xf32>
    %441 = vector.broadcast %440 : vector<6x8x1xf32> to vector<6x8x8xf32>
    %442 = arith.mulf %437, %441 : vector<6x8x8xf32>
    %443 = arith.truncf %442 : vector<6x8x8xf32> to vector<6x8x8xbf16>
    "tpu.trace_start"() <{level = 10 : i32, message = "bqk,bkd->bqd"}> : () -> ()
    %cst_125 = arith.constant dense<0.000000e+00> : vector<6x8x8xf32>
    %444 = tpu.matmul %443, %428, %cst_125 {dimension_numbers = #tpu.dot_dimension_numbers<[2], [1], [1], [2], [0, 0, 0, 1, 1, 2], [0], [0]>} : vector<6x8x8xbf16>, vector<6x8x8xbf16>, vector<6x8x8xf32> -> vector<6x8x8xf32>
    "tpu.trace_stop"() : () -> ()
    %445 = tpu.concatenate %378, %400, %422, %444 in 2 : vector<6x8x8xf32>, vector<6x8x8xf32>, vector<6x8x8xf32>, vector<6x8x8xf32> -> vector<6x8x32xf32>
    %446 = vector.extract_strided_slice %445 {offsets = [0, 0, 0], sizes = [1, 8, 32], strides = [1, 1, 1]} : vector<6x8x32xf32> to vector<1x8x32xf32>
    %447 = vector.shape_cast %446 : vector<1x8x32xf32> to vector<8x32xf32>
    %448 = vector.extract_strided_slice %445 {offsets = [1, 0, 0], sizes = [1, 8, 32], strides = [1, 1, 1]} : vector<6x8x32xf32> to vector<1x8x32xf32>
    %449 = vector.shape_cast %448 : vector<1x8x32xf32> to vector<8x32xf32>
    %450 = vector.extract_strided_slice %445 {offsets = [2, 0, 0], sizes = [1, 8, 32], strides = [1, 1, 1]} : vector<6x8x32xf32> to vector<1x8x32xf32>
    %451 = vector.shape_cast %450 : vector<1x8x32xf32> to vector<8x32xf32>
    %452 = vector.extract_strided_slice %445 {offsets = [3, 0, 0], sizes = [1, 8, 32], strides = [1, 1, 1]} : vector<6x8x32xf32> to vector<1x8x32xf32>
    %453 = vector.shape_cast %452 : vector<1x8x32xf32> to vector<8x32xf32>
    %454 = vector.extract_strided_slice %445 {offsets = [4, 0, 0], sizes = [1, 8, 32], strides = [1, 1, 1]} : vector<6x8x32xf32> to vector<1x8x32xf32>
    %455 = vector.shape_cast %454 : vector<1x8x32xf32> to vector<8x32xf32>
    %456 = vector.extract_strided_slice %445 {offsets = [5, 0, 0], sizes = [1, 8, 32], strides = [1, 1, 1]} : vector<6x8x32xf32> to vector<1x8x32xf32>
    %457 = vector.shape_cast %456 : vector<1x8x32xf32> to vector<8x32xf32>
    %458 = tpu.concatenate %447, %449, %451, %453, %455, %457 in 0 : vector<8x32xf32>, vector<8x32xf32>, vector<8x32xf32>, vector<8x32xf32>, vector<8x32xf32>, vector<8x32xf32> -> vector<48x32xf32>
    %459 = arith.truncf %458 : vector<48x32xf32> to vector<48x32xbf16>
    %c1_126 = arith.constant 1 : index
    %c0_127 = arith.constant 0 : index
    %c0_128 = arith.constant 0 : index
    %460 = vector.load %arg10[%c1_126, %c0_127, %c0_128] : memref<2x32x32xbf16, #tpu.memory_space<vmem>>, vector<1x32x32xbf16>
    %461 = vector.shape_cast %460 : vector<1x32x32xbf16> to vector<32x32xbf16>
    %cst_129 = arith.constant dense<0.000000e+00> : vector<48x32xf32>
    %462 = tpu.matmul %459, %461, %cst_129 {dimension_numbers = #tpu.dot_dimension_numbers<[1], [0], [0], [1], [0, 0, 1, 1], [], []>} : vector<48x32xbf16>, vector<32x32xbf16>, vector<48x32xf32> -> vector<48x32xf32>
    %c1_130 = arith.constant 1 : index
    %c0_131 = arith.constant 0 : index
    %c0_132 = arith.constant 0 : index
    %463 = vector.load %arg11[%c1_130, %c0_131, %c0_132] : memref<2x1x32xf32, #tpu.memory_space<vmem>>, vector<1x1x32xf32>
    %464 = vector.shape_cast %463 : vector<1x1x32xf32> to vector<1x32xf32>
    %465 = vector.broadcast %464 : vector<1x32xf32> to vector<48x32xf32>
    %466 = arith.addf %462, %465 : vector<48x32xf32>
    %467 = arith.addf %277, %466 : vector<48x32xf32>
    %c1_133 = arith.constant 1 : index
    %c0_134 = arith.constant 0 : index
    %c0_135 = arith.constant 0 : index
    %468 = vector.load %arg12[%c1_133, %c0_134, %c0_135] : memref<2x1x32xf32, #tpu.memory_space<vmem>>, vector<1x1x32xf32>
    %469 = vector.shape_cast %468 : vector<1x1x32xf32> to vector<1x32xf32>
    %c1_136 = arith.constant 1 : index
    %c0_137 = arith.constant 0 : index
    %c0_138 = arith.constant 0 : index
    %470 = vector.load %arg13[%c1_136, %c0_137, %c0_138] : memref<2x1x32xf32, #tpu.memory_space<vmem>>, vector<1x1x32xf32>
    %471 = vector.shape_cast %470 : vector<1x1x32xf32> to vector<1x32xf32>
    %cst_139 = arith.constant dense<0.000000e+00> : vector<48xf32>
    %472 = vector.multi_reduction <add>, %467, %cst_139 [1] : vector<48x32xf32> to vector<48xf32>
    %473 = vector.shape_cast %472 : vector<48xf32> to vector<48x1xf32>
    %cst_140 = arith.constant 3.200000e+01 : f32
    %474 = vector.broadcast %cst_140 : f32 to vector<48x1xf32>
    %475 = arith.divf %473, %474 : vector<48x1xf32>
    %476 = vector.broadcast %475 : vector<48x1xf32> to vector<48x32xf32>
    %477 = arith.subf %467, %476 : vector<48x32xf32>
    %478 = arith.mulf %477, %477 : vector<48x32xf32>
    %cst_141 = arith.constant dense<0.000000e+00> : vector<48xf32>
    %479 = vector.multi_reduction <add>, %478, %cst_141 [1] : vector<48x32xf32> to vector<48xf32>
    %480 = vector.shape_cast %479 : vector<48xf32> to vector<48x1xf32>
    %cst_142 = arith.constant 3.200000e+01 : f32
    %481 = vector.broadcast %cst_142 : f32 to vector<48x1xf32>
    %482 = arith.divf %480, %481 : vector<48x1xf32>
    %483 = vector.broadcast %475 : vector<48x1xf32> to vector<48x32xf32>
    %484 = arith.subf %467, %483 : vector<48x32xf32>
    %cst_143 = arith.constant 9.99999974E-6 : f32
    %485 = vector.broadcast %cst_143 : f32 to vector<48x1xf32>
    %486 = arith.addf %482, %485 : vector<48x1xf32>
    %487 = math.rsqrt %486 : vector<48x1xf32>
    %488 = vector.broadcast %487 : vector<48x1xf32> to vector<48x32xf32>
    %489 = arith.mulf %484, %488 : vector<48x32xf32>
    %490 = vector.broadcast %469 : vector<1x32xf32> to vector<48x32xf32>
    %491 = arith.mulf %489, %490 : vector<48x32xf32>
    %492 = vector.broadcast %471 : vector<1x32xf32> to vector<48x32xf32>
    %493 = arith.addf %491, %492 : vector<48x32xf32>
    %494 = arith.truncf %493 : vector<48x32xf32> to vector<48x32xbf16>
    %c1_144 = arith.constant 1 : index
    %c0_145 = arith.constant 0 : index
    %c0_146 = arith.constant 0 : index
    %495 = vector.load %arg14[%c1_144, %c0_145, %c0_146] : memref<2x32x64xbf16, #tpu.memory_space<vmem>>, vector<1x32x64xbf16>
    %496 = vector.shape_cast %495 : vector<1x32x64xbf16> to vector<32x64xbf16>
    %cst_147 = arith.constant dense<0.000000e+00> : vector<48x64xf32>
    %497 = tpu.matmul %494, %496, %cst_147 {dimension_numbers = #tpu.dot_dimension_numbers<[1], [0], [0], [1], [0, 0, 1, 1], [], []>} : vector<48x32xbf16>, vector<32x64xbf16>, vector<48x64xf32> -> vector<48x64xf32>
    %c1_148 = arith.constant 1 : index
    %c0_149 = arith.constant 0 : index
    %c0_150 = arith.constant 0 : index
    %498 = vector.load %arg15[%c1_148, %c0_149, %c0_150] : memref<2x1x64xf32, #tpu.memory_space<vmem>>, vector<1x1x64xf32>
    %499 = vector.shape_cast %498 : vector<1x1x64xf32> to vector<1x64xf32>
    %500 = vector.broadcast %499 : vector<1x64xf32> to vector<48x64xf32>
    %501 = arith.addf %497, %500 : vector<48x64xf32>
    %cst_151 = arith.constant 1.702000e+00 : f32
    %502 = vector.broadcast %cst_151 : f32 to vector<48x64xf32>
    %503 = arith.mulf %502, %501 : vector<48x64xf32>
    %504 = arith.negf %503 : vector<48x64xf32>
    %505 = math.exp %504 : vector<48x64xf32>
    %cst_152 = arith.constant 1.000000e+00 : f32
    %506 = vector.broadcast %cst_152 : f32 to vector<48x64xf32>
    %507 = arith.addf %506, %505 : vector<48x64xf32>
    %508 = arith.divf %506, %507 : vector<48x64xf32>
    %509 = arith.mulf %501, %508 : vector<48x64xf32>
    %510 = arith.truncf %509 : vector<48x64xf32> to vector<48x64xbf16>
    %c1_153 = arith.constant 1 : index
    %c0_154 = arith.constant 0 : index
    %c0_155 = arith.constant 0 : index
    %511 = vector.load %arg16[%c1_153, %c0_154, %c0_155] : memref<2x64x32xbf16, #tpu.memory_space<vmem>>, vector<1x64x32xbf16>
    %512 = vector.shape_cast %511 : vector<1x64x32xbf16> to vector<64x32xbf16>
    %cst_156 = arith.constant dense<0.000000e+00> : vector<48x32xf32>
    %513 = tpu.matmul %510, %512, %cst_156 {dimension_numbers = #tpu.dot_dimension_numbers<[1], [0], [0], [1], [0, 0, 1, 1], [], []>} : vector<48x64xbf16>, vector<64x32xbf16>, vector<48x32xf32> -> vector<48x32xf32>
    %c1_157 = arith.constant 1 : index
    %c0_158 = arith.constant 0 : index
    %c0_159 = arith.constant 0 : index
    %514 = vector.load %arg17[%c1_157, %c0_158, %c0_159] : memref<2x1x32xf32, #tpu.memory_space<vmem>>, vector<1x1x32xf32>
    %515 = vector.shape_cast %514 : vector<1x1x32xf32> to vector<1x32xf32>
    %516 = vector.broadcast %515 : vector<1x32xf32> to vector<48x32xf32>
    %517 = arith.addf %513, %516 : vector<48x32xf32>
    %518 = arith.addf %467, %517 : vector<48x32xf32>
    %c2 = arith.constant 2 : index
    %c0_160 = arith.constant 0 : index
    %c0_161 = arith.constant 0 : index
    %c0_162 = arith.constant 0 : index
    %519 = vector.load %arg18[%c2, %c0_160, %c0_161, %c0_162] : memref<3x1x48x32xf32, #tpu.memory_space<vmem>>, vector<1x1x48x32xf32>
    %520 = vector.shape_cast %519 : vector<1x1x48x32xf32> to vector<48x32xf32>
    %521 = vector.shape_cast %518 : vector<48x32xf32> to vector<1x1x48x32xf32>
    tpu.vector_store %arg18[%c2, %c0_160, %c0_161, %c0_162], %521 {strides = array<i32>} : memref<3x1x48x32xf32, #tpu.memory_space<vmem>>, vector<1x1x48x32xf32>,
    return
  }
  func.func @transform_0(%arg0: i32) -> (i32, i32, i32) {
    %c0_i32 = arith.constant 0 : i32
    %c0_i32_0 = arith.constant 0 : i32
    %c0_i32_1 = arith.constant 0 : i32
    return %arg0, %c0_i32, %c0_i32_0 : i32, i32, i32
  }
  func.func @transform_1(%arg0: i32) -> (i32, i32) {
    %c0_i32 = arith.constant 0 : i32
    %c0_i32_0 = arith.constant 0 : i32
    %c0_i32_1 = arith.constant 0 : i32
    return %c0_i32, %c0_i32_0 : i32, i32
  }
  func.func @transform_2(%arg0: i32) -> (i32, i32) {
    %c0_i32 = arith.constant 0 : i32
    %c0_i32_0 = arith.constant 0 : i32
    %c0_i32_1 = arith.constant 0 : i32
    return %c0_i32, %c0_i32_0 : i32, i32
  }
  func.func @transform_3(%arg0: i32) -> (i32, i32) {
    %c0_i32 = arith.constant 0 : i32
    %c0_i32_0 = arith.constant 0 : i32
    %c0_i32_1 = arith.constant 0 : i32
    return %c0_i32, %c0_i32_0 : i32, i32
  }
  func.func @transform_4(%arg0: i32) -> (i32, i32) {
    %c0_i32 = arith.constant 0 : i32
    %c0_i32_0 = arith.constant 0 : i32
    %c0_i32_1 = arith.constant 0 : i32
    return %c0_i32, %c0_i32_0 : i32, i32
  }
  func.func @transform_5(%arg0: i32) -> (i32, i32, i32) {
    %c0_i32 = arith.constant 0 : i32
    %c0_i32_0 = arith.constant 0 : i32
    %c0_i32_1 = arith.constant 0 : i32
    %c0_i32_2 = arith.constant 0 : i32
    return %c0_i32, %c0_i32_0, %c0_i32_1 : i32, i32, i32
  }
  func.func @transform_6(%arg0: i32) -> (i32, i32, i32) {
    %c0_i32 = arith.constant 0 : i32
    %c0_i32_0 = arith.constant 0 : i32
    %c0_i32_1 = arith.constant 0 : i32
    %c0_i32_2 = arith.constant 0 : i32
    return %c0_i32, %c0_i32_0, %c0_i32_1 : i32, i32, i32
  }
  func.func @transform_7(%arg0: i32) -> (i32, i32, i32) {
    %c0_i32 = arith.constant 0 : i32
    %c0_i32_0 = arith.constant 0 : i32
    %c0_i32_1 = arith.constant 0 : i32
    %c0_i32_2 = arith.constant 0 : i32
    return %c0_i32, %c0_i32_0, %c0_i32_1 : i32, i32, i32
  }
  func.func @transform_8(%arg0: i32) -> (i32, i32, i32) {
    %c0_i32 = arith.constant 0 : i32
    %c0_i32_0 = arith.constant 0 : i32
    %c0_i32_1 = arith.constant 0 : i32
    %c0_i32_2 = arith.constant 0 : i32
    return %c0_i32, %c0_i32_0, %c0_i32_1 : i32, i32, i32
  }
  func.func @transform_9(%arg0: i32) -> (i32, i32, i32) {
    %c0_i32 = arith.constant 0 : i32
    %c0_i32_0 = arith.constant 0 : i32
    %c0_i32_1 = arith.constant 0 : i32
    %c0_i32_2 = arith.constant 0 : i32
    return %c0_i32, %c0_i32_0, %c0_i32_1 : i32, i32, i32
  }
  func.func @transform_10(%arg0: i32) -> (i32, i32, i32) {
    %c0_i32 = arith.constant 0 : i32
    %c0_i32_0 = arith.constant 0 : i32
    %c0_i32_1 = arith.constant 0 : i32
    %c0_i32_2 = arith.constant 0 : i32
    return %c0_i32, %c0_i32_0, %c0_i32_1 : i32, i32, i32
  }
  func.func @transform_11(%arg0: i32) -> (i32, i32, i32) {
    %c0_i32 = arith.constant 0 : i32
    %c0_i32_0 = arith.constant 0 : i32
    %c0_i32_1 = arith.constant 0 : i32
    %c0_i32_2 = arith.constant 0 : i32
    return %c0_i32, %c0_i32_0, %c0_i32_1 : i32, i32, i32
  }
  func.func @transform_12(%arg0: i32) -> (i32, i32, i32) {
    %c0_i32 = arith.constant 0 : i32
    %c0_i32_0 = arith.constant 0 : i32
    %c0_i32_1 = arith.constant 0 : i32
    %c0_i32_2 = arith.constant 0 : i32
    return %c0_i32, %c0_i32_0, %c0_i32_1 : i32, i32, i32
  }
  func.func @transform_13(%arg0: i32) -> (i32, i32, i32) {
    %c0_i32 = arith.constant 0 : i32
    %c0_i32_0 = arith.constant 0 : i32
    %c0_i32_1 = arith.constant 0 : i32
    %c0_i32_2 = arith.constant 0 : i32
    return %c0_i32, %c0_i32_0, %c0_i32_1 : i32, i32, i32
  }
  func.func @transform_14(%arg0: i32) -> (i32, i32, i32) {
    %c0_i32 = arith.constant 0 : i32
    %c0_i32_0 = arith.constant 0 : i32
    %c0_i32_1 = arith.constant 0 : i32
    %c0_i32_2 = arith.constant 0 : i32
    return %c0_i32, %c0_i32_0, %c0_i32_1 : i32, i32, i32
  }
  func.func @transform_15(%arg0: i32) -> (i32, i32, i32) {
    %c0_i32 = arith.constant 0 : i32
    %c0_i32_0 = arith.constant 0 : i32
    %c0_i32_1 = arith.constant 0 : i32
    %c0_i32_2 = arith.constant 0 : i32
    return %c0_i32, %c0_i32_0, %c0_i32_1 : i32, i32, i32
  }
  func.func @transform_16(%arg0: i32) -> (i32, i32, i32) {
    %c0_i32 = arith.constant 0 : i32
    %c0_i32_0 = arith.constant 0 : i32
    %c0_i32_1 = arith.constant 0 : i32
    %c0_i32_2 = arith.constant 0 : i32
    return %c0_i32, %c0_i32_0, %c0_i32_1 : i32, i32, i32
  }
  func.func @transform_17(%arg0: i32) -> (i32, i32, i32, i32) {
    %c0_i32 = arith.constant 0 : i32
    %c0_i32_0 = arith.constant 0 : i32
    %c0_i32_1 = arith.constant 0 : i32
    %c0_i32_2 = arith.constant 0 : i32
    return %c0_i32, %arg0, %c0_i32_0, %c0_i32_1 : i32, i32, i32, i32
  }
}

</mosaic_0001>

<bundles_post_ra>
// kernel: _vision_forward.1
= control target key start
LH: loop header
LB: loop body
LE: loop exit
PB: predicated region body
PF: predicated region fallthrough
CT: control target
= control target key end

     0   :  { %vm696_vm0 = vcmask 261120   ;;  %s6184_s22 = smov 96   ;;  %s6185_s23 = smov 64   ;;  %s8173_s1 = inlined_call_operand.vmem [shape: bf16[768,32], index: 1, kind: input, shape index: {}]   ;;  %s8174_s0 = inlined_call_operand.vmem [shape: bf16[1,48,768], index: 0, kind: input, shape index: {}]   ;;  %s8175_s2 = inlined_call_operand.vmem [shape: f32[8,32], index: 2, kind: input, shape index: {}]   ;;  %s8176_s3 = inlined_call_operand.vmem [shape: f32[1,32], index: 3, kind: input, shape index: {}]   ;;  %s8177_s4 = inlined_call_operand.vmem [shape: f32[1,32], index: 4, kind: input, shape index: {}]   ;;  %s8178_s17 = inlined_call_operand.vmem [shape: f32[3,1,48,32], index: 17, kind: output, shape index: {}]   ;;  %s8179_s5 = inlined_call_operand.vmem [shape: f32[2,1,32], index: 5, kind: input, shape index: {}]   ;;  %s8180_s6 = inlined_call_operand.vmem [shape: f32[2,1,32], index: 6, kind: input, shape index: {}]   ;;  %s8181_s8 = inlined_call_operand.vmem [shape: f32[2,1,96], index: 8, kind: input, shape index: {}]   ;;  %s8182_s7 = inlined_call_operand.vmem [shape: bf16[2,32,96], index: 7, kind: input, shape index: {}]   ;;  %s8183_s9 = inlined_call_operand.vmem [shape: bf16[2,32,32], index: 9, kind: input, shape index: {}]   ;;  %s8184_s10 = inlined_call_operand.vmem [shape: f32[2,1,32], index: 10, kind: input, shape index: {}]   ;;  %s8185_s11 = inlined_call_operand.vmem [shape: f32[2,1,32], index: 11, kind: input, shape index: {}]   ;;  %s8186_s12 = inlined_call_operand.vmem [shape: f32[2,1,32], index: 12, kind: input, shape index: {}]   ;;  %s8187_s14 = inlined_call_operand.vmem [shape: f32[2,1,64], index: 14, kind: input, shape index: {}]   ;;  %s8188_s13 = inlined_call_operand.vmem [shape: bf16[2,32,64], index: 13, kind: input, shape index: {}]   ;;  %s8189_s16 = inlined_call_operand.vmem [shape: f32[2,1,32], index: 16, kind: input, shape index: {}]   ;;  %s8190_s15 = inlined_call_operand.vmem [shape: bf16[2,64,32], index: 15, kind: input, shape index: {}]  }
   0x1   :  { %8201 = sst [smem:[#allocation2_spill]] %s8173_s1  ;;  %s6186_s24 = smov 120  }
   0x2   :  { %8202 = sst [smem:[#allocation3_spill]] %s8174_s0  ;;  %s6187_s25 = smov 88  }
   0x3   :  { %s8203_s26 = sld [smem:[#allocation2_spill]]  ;;  %s6189_s27 = smov 56  }
   0x4   :  { %s8204_s20 = sld [smem:[#allocation3_spill]]  ;;  %s6190_s28 = smov 80  }
   0x5   :  { %s6192_s29 = smov 48   ;;  %s6193_s1 = smov 72  }
   0x6   :  { %s6194_s30 = smov 104   ;;  %s8195_s18 = smov 16  }
   0x7   :  { %s8193_s19 = smov 24  }
   0x9   :  { %v5696_v0 = vld [vmem:[%s8203_s26 + $0x38] sm:$0xff]  ;;  %v5695_v4 = vld [vmem:[%s8203_s26 + $0x30] sm:$0xff]  ;;  %v5694_v8 = vld [vmem:[%s8203_s26 + $0x28] sm:$0xff] }
   0xa   :  { %v5704_v1 = vld [vmem:[%s8203_s26 + $0x78] sm:$0xff]  ;;  %550 = vmatpush.bf16.msra.mxu0 %v5696_v0  ;;  %v5703_v5 = vld [vmem:[%s8203_s26 + $0x70] sm:$0xff]  ;;  %v5702_v9 = vld [vmem:[%s8203_s26 + $0x68] sm:$0xff] }
   0xb   :  { %v5712_v2 = vld [vmem:[%s8203_s26 + $0xb8] sm:$0xff]  ;;  %574 = vmatpush.bf16.msra.mxu1 %v5704_v1  ;;  %v5711_v6 = vld [vmem:[%s8203_s26 + $0xb0] sm:$0xff]  ;;  %v5710_v10 = vld [vmem:[%s8203_s26 + $0xa8] sm:$0xff] }
   0xc   :  { %v5720_v3 = vld [vmem:[%s8203_s26 + $0xf8] sm:$0xff]  ;;  %598 = vmatpush.bf16.msra.mxu2 %v5712_v2  ;;  %v5719_v7 = vld [vmem:[%s8203_s26 + $0xf0] sm:$0xff]  ;;  %v5718_v11 = vld [vmem:[%s8203_s26 + $0xe8] sm:$0xff] }
   0xd   :  { %622 = vmatpush.bf16.msra.mxu3 %v5720_v3  ;;  %v5693_v12 = vld [vmem:[%s8203_s26 + $0x20] sm:$0xff]  ;;  %v5692_v16 = vld [vmem:[%s8203_s26 + $0x18] sm:$0xff]  ;;  %v5691_v20 = vld [vmem:[%s8203_s26 + $0x10] sm:$0xff] }
   0xe   :  { %551 = vmatpush.bf16.msra.mxu0 %v5695_v4  ;;  %v5701_v13 = vld [vmem:[%s8203_s26 + $0x60] sm:$0xff]  ;;  %v5700_v17 = vld [vmem:[%s8203_s26 + $0x58] sm:$0xff]  ;;  %v5699_v21 = vld [vmem:[%s8203_s26 + $0x50] sm:$0xff] }
   0xf   :  { %575 = vmatpush.bf16.msra.mxu1 %v5703_v5  ;;  %v5709_v14 = vld [vmem:[%s8203_s26 + $0xa0] sm:$0xff]  ;;  %v5708_v18 = vld [vmem:[%s8203_s26 + $0x98] sm:$0xff]  ;;  %v5707_v22 = vld [vmem:[%s8203_s26 + $0x90] sm:$0xff] }
  0x10   :  { %599 = vmatpush.bf16.msra.mxu2 %v5711_v6  ;;  %v5717_v15 = vld [vmem:[%s8203_s26 + $0xe0] sm:$0xff]  ;;  %v5716_v19 = vld [vmem:[%s8203_s26 + $0xd8] sm:$0xff]  ;;  %v5715_v23 = vld [vmem:[%s8203_s26 + $0xd0] sm:$0xff] }
  0x11   :  { %623 = vmatpush.bf16.msra.mxu3 %v5719_v7  ;;  %v5690_v24 = vld [vmem:[%s8203_s26 + $0x8] sm:$0xff]  ;;  %v5689_v28 = vld [vmem:[%s8203_s26] sm:$0xff]  ;;  %v5674_v33 = vld [vmem:[%s8204_s20 + $0x14] sm:$0xf0] }
  0x12   :  { %552 = vmatpush.bf16.msra.mxu0 %v5694_v8  ;;  %v5698_v25 = vld [vmem:[%s8203_s26 + $0x48] sm:$0xff]  ;;  %v5697_v29 = vld [vmem:[%s8203_s26 + $0x40] sm:$0xff]  ;;  %v5159_v35 = vld [vmem:[%s8204_s20 + $0x18] sm:$0xf0] }
  0x13   :  { %576 = vmatpush.bf16.msra.mxu1 %v5702_v9  ;;  %v5706_v26 = vld [vmem:[%s8203_s26 + $0x88] sm:$0xff]  ;;  %v5705_v30 = vld [vmem:[%s8203_s26 + $0x80] sm:$0xff]  ;;  %v5728_v40 = vld [vmem:[%s8203_s26 + $0x138] sm:$0xff] }
  0x14   :  { %600 = vmatpush.bf16.msra.mxu2 %v5710_v10  ;;  %v5714_v27 = vld [vmem:[%s8203_s26 + $0xc8] sm:$0xff]  ;;  %v5713_v31 = vld [vmem:[%s8203_s26 + $0xc0] sm:$0xff]  ;;  %v5736_v41 = vld [vmem:[%s8203_s26 + $0x178] sm:$0xff] }
  0x15   :  { %624 = vmatpush.bf16.msra.mxu3 %v5718_v11  ;;  %v5157_v32 = vld [vmem:[%s8204_s20] sm:$0xf]  ;;  %v5671_v34 = vld [vmem:[%s8204_s20 + $0x4] sm:$0xf]  ;;  %v5165_v36 = vld [vmem:[%s8204_s20 + $0x8] sm:$0xf] }
  0x16   :  { %553 = vmatpush.bf16.msra.mxu0 %v5693_v12  ;;  %v5675_v37 = vld [vmem:[%s8204_s20 + $0x1c] sm:$0xf0]  ;;  %v5672_v38 = vld [vmem:[%s8204_s20 + $0xc] sm:$0xf]  ;;  %v5167_v39 = vld [vmem:[%s8204_s20 + $0x20] sm:$0xf0]  ;;  %v5158_v42 = vor.u32 %v5674_v33, %v5157_v32  ;;  %v5162_v43 = vor.u32 %v5671_v34, %v5159_v35 }
  0x17   :  { %577 = vmatpush.bf16.msra.mxu1 %v5701_v13  ;;  %v5166_v44 = vor.u32 %v5675_v37, %v5165_v36  ;;  %v5170_v45 = vor.u32 %v5672_v38, %v5167_v39  ;;  %v5727_v46 = vld [vmem:[%s8203_s26 + $0x130] sm:$0xff]  ;;  %v5726_v48 = vld [vmem:[%s8203_s26 + $0x128] sm:$0xff]  ;;  %v5725_v50 = vld [vmem:[%s8203_s26 + $0x120] sm:$0xff] }
  0x18   :  { %601 = vmatpush.bf16.msra.mxu2 %v5709_v14  ;;  %v5735_v47 = vld [vmem:[%s8203_s26 + $0x170] sm:$0xff]  ;;  %v5734_v49 = vld [vmem:[%s8203_s26 + $0x168] sm:$0xff]  ;;  %v5733_v51 = vld [vmem:[%s8203_s26 + $0x160] sm:$0xff] }
  0x19   :  { %625 = vmatpush.bf16.msra.mxu3 %v5717_v15  ;;  %v5181_v52 = vld [vmem:[%s8204_s20 + $0x30] sm:$0xf]  ;;  %v5680_v53 = vld [vmem:[%s8204_s20 + $0x44] sm:$0xf0]  ;;  %v5677_v54 = vld [vmem:[%s8204_s20 + $0x34] sm:$0xf] }
  0x1a   :  { %554 = vmatpush.bf16.msra.mxu0 %v5692_v16  ;;  %v5183_v55 = vld [vmem:[%s8204_s20 + $0x48] sm:$0xf0]  ;;  %v5189_v56 = vld [vmem:[%s8204_s20 + $0x38] sm:$0xf]  ;;  %v5681_v57 = vld [vmem:[%s8204_s20 + $0x4c] sm:$0xf0]  ;;  %v5182_v62 = vor.u32 %v5680_v53, %v5181_v52 }
  0x1b   :  { %578 = vmatpush.bf16.msra.mxu1 %v5700_v17  ;;  %v5678_v58 = vld [vmem:[%s8204_s20 + $0x3c] sm:$0xf]  ;;  %v5191_v59 = vld [vmem:[%s8204_s20 + $0x50] sm:$0xf0]  ;;  %v5186_v63 = vor.u32 %v5677_v54, %v5183_v55  ;;  %v5190_v0 = vor.u32 %v5681_v57, %v5189_v56  ;;  %v5722_v4 = vld [vmem:[%s8203_s26 + $0x108] sm:$0xff] }
  0x1c   :  { %602 = vmatpush.bf16.msra.mxu2 %v5708_v18  ;;  %v5724_v60 = vld [vmem:[%s8203_s26 + $0x118] sm:$0xff]  ;;  %v5194_v1 = vor.u32 %v5678_v58, %v5191_v59  ;;  %v5723_v2 = vld [vmem:[%s8203_s26 + $0x110] sm:$0xff]  ;;  %v5730_v5 = vld [vmem:[%s8203_s26 + $0x148] sm:$0xff] }
  0x1d   :  { %626 = vmatpush.bf16.msra.mxu3 %v5716_v19  ;;  %v5732_v61 = vld [vmem:[%s8203_s26 + $0x158] sm:$0xff]  ;;  %v5731_v3 = vld [vmem:[%s8203_s26 + $0x150] sm:$0xff]  ;;  %v5721_v6 = vld [vmem:[%s8203_s26 + $0x100] sm:$0xff] }
  0x1e   :  { %555 = vmatpush.bf16.msra.mxu0 %v5691_v20  ;;  %v5729_v7 = vld [vmem:[%s8203_s26 + $0x140] sm:$0xff]  ;;  %v5686_v9 = vld [vmem:[%s8204_s20 + $0x74] sm:$0xf0]  ;;  %v5207_v11 = vld [vmem:[%s8204_s20 + $0x78] sm:$0xf0]  ;;  %s6191_s26 = smov 112  }
  0x1f   :  { %579 = vmatpush.bf16.msra.mxu1 %v5699_v21  ;;  %v5205_v8 = vld [vmem:[%s8204_s20 + $0x60] sm:$0xf]  ;;  %v5683_v10 = vld [vmem:[%s8204_s20 + $0x64] sm:$0xf]  ;;  %v5213_v12 = vld [vmem:[%s8204_s20 + $0x68] sm:$0xf] }
  0x20   :  { %603 = vmatpush.bf16.msra.mxu2 %v5707_v22  ;;  %v5687_v13 = vld [vmem:[%s8204_s20 + $0x7c] sm:$0xf0]  ;;  %v5684_v14 = vld [vmem:[%s8204_s20 + $0x6c] sm:$0xf]  ;;  %v5215_v15 = vld [vmem:[%s8204_s20 + $0x80] sm:$0xf0]  ;;  %v5206_v16 = vor.u32 %v5686_v9, %v5205_v8  ;;  %v5210_v17 = vor.u32 %v5683_v10, %v5207_v11 }
  0x21   :  { %627 = vmatpush.bf16.msra.mxu3 %v5715_v23  ;;  %v5214_v18 = vor.u32 %v5687_v13, %v5213_v12  ;;  %v5218_v19 = vor.u32 %v5684_v14, %v5215_v15  ;;  %v5173_v20 = vld [vmem:[%s8204_s20 + $0x10] sm:$0xf]  ;;  %v5676_v21 = vld [vmem:[%s8204_s20 + $0x24] sm:$0xf0]  ;;  %v5673_v22 = vld [vmem:[%s8204_s20 + $0x14] sm:$0xf] }
  0x22   :  { %556 = vmatpush.bf16.msra.mxu0 %v5690_v24  ;;  %v5175_v23 = vld [vmem:[%s8204_s20 + $0x28] sm:$0xf0]  ;;  %v5174_v24 = vor.u32 %v5676_v21, %v5173_v20  ;;  %v5221_v32 = vld [vmem:[%s8204_s20 + $0x70] sm:$0xf]  ;;  %v5688_v33 = vld [vmem:[%s8204_s20 + $0x84] sm:$0xf0] }
  0x23   :  { %580 = vmatpush.bf16.msra.mxu1 %v5698_v25  ;;  %v5178_v25 = vor.u32 %v5673_v22, %v5175_v23  ;;  %v5685_v34 = vld [vmem:[%s8204_s20 + $0x74] sm:$0xf]  ;;  %v5223_v35 = vld [vmem:[%s8204_s20 + $0x88] sm:$0xf0]  ;;  %v5222_v36 = vor.u32 %v5688_v33, %v5221_v32 }
  0x24   :  { %604 = vmatpush.bf16.msra.mxu2 %v5706_v26  ;;  %v5197_v26 = vld [vmem:[%s8204_s20 + $0x40] sm:$0xf]  ;;  %v5226_v37 = vor.u32 %v5685_v34, %v5223_v35 }
  0x25   :  { %628 = vmatpush.bf16.msra.mxu3 %v5714_v27  ;;  %v5682_v27 = vld [vmem:[%s8204_s20 + $0x54] sm:$0xf0] }
  0x26   :  { %557 = vmatpush.bf16.msra.mxu0 %v5689_v28  ;;  %v5679_v28 = vld [vmem:[%s8204_s20 + $0x44] sm:$0xf] }
  0x27   :  { %581 = vmatpush.bf16.msra.mxu1 %v5697_v29  ;;  %v5199_v29 = vld [vmem:[%s8204_s20 + $0x58] sm:$0xf0]  ;;  %s8197_s20 = smov 8  }
  0x28   :  { %605 = vmatpush.bf16.msra.mxu2 %v5705_v30  ;;  %v5198_v30 = vor.u32 %v5682_v27, %v5197_v26 }
  0x29   :  { %629 = vmatpush.bf16.msra.mxu3 %v5713_v31  ;;  %558 = vmatmul.bf16.vlgmr.msra.gmra.mxu0 %v5158_v42  ;;  %v5202_v31 = vor.u32 %v5679_v28, %v5199_v29 }
  0x2a   :  { %646 = vmatpush.bf16.msrb.mxu0 %v5728_v40  ;;  %582 = vmatmul.bf16.vlgmr.msra.gmra.mxu1 %v5162_v43 }
  0x2b   :  { %670 = vmatpush.bf16.msrb.mxu1 %v5736_v41  ;;  %606 = vmatmul.bf16.vlgmr.msra.gmra.mxu2 %v5166_v44 }
  0x2c   :  { %630 = vmatmul.bf16.vlgmr.msra.gmra.mxu3 %v5170_v45 }
  0x2e   :  { %647 = vmatpush.bf16.msrb.mxu0 %v5727_v46 }
  0x2f   :  { %671 = vmatpush.bf16.msrb.mxu1 %v5735_v47 }
  0x32   :  { %648 = vmatpush.bf16.msrb.mxu0 %v5726_v48 }
  0x33   :  { %672 = vmatpush.bf16.msrb.mxu1 %v5734_v49 }
  0x36   :  { %649 = vmatpush.bf16.msrb.mxu0 %v5725_v50  ;;  %v57_v50 = vld [vmem:[%s8175_s2] sm:$0xff]  ;;  %s8199_s2 = smov 40  }
  0x37   :  { %673 = vmatpush.bf16.msrb.mxu1 %v5733_v51 }
  0x39   :  { %563 = vmatmul.bf16.gmra.mxu0 %v5182_v62 }
  0x3a   :  { %650 = vmatpush.bf16.msrb.mxu0 %v5724_v60  ;;  %587 = vmatmul.bf16.gmra.mxu1 %v5186_v63 }
  0x3b   :  { %674 = vmatpush.bf16.msrb.mxu1 %v5732_v61  ;;  %611 = vmatmul.bf16.gmra.mxu2 %v5190_v0 }
  0x3c   :  { %635 = vmatmul.bf16.gmra.mxu3 %v5194_v1 }
  0x3e   :  { %651 = vmatpush.bf16.msrb.mxu0 %v5723_v2 }
  0x3f   :  { %675 = vmatpush.bf16.msrb.mxu1 %v5731_v3 }
  0x42   :  { %652 = vmatpush.bf16.msrb.mxu0 %v5722_v4 }
  0x43   :  { %676 = vmatpush.bf16.msrb.mxu1 %v5730_v5 }
  0x46   :  { %653 = vmatpush.bf16.msrb.mxu0 %v5721_v6 }
  0x47   :  { %677 = vmatpush.bf16.msrb.mxu1 %v5729_v7 }
  0x49   :  { %568 = vmatmul.bf16.gmra.mxu0 %v5206_v16 }
  0x4a   :  { %592 = vmatmul.bf16.gmra.mxu1 %v5210_v17 }
  0x4b   :  { %616 = vmatmul.bf16.gmra.mxu2 %v5214_v18 }
  0x4c   :  { %640 = vmatmul.bf16.gmra.mxu3 %v5218_v19 }
  0x59   :  { %654 = vmatmul.bf16.vlgmr.msrb.gmra.mxu0 %v5174_v24 }
  0x5a   :  { %678 = vmatmul.bf16.vlgmr.msrb.gmra.mxu1 %v5178_v25 }
  0x69   :  { %659 = vmatmul.bf16.gmra.mxu0 %v5198_v30 }
  0x6a   :  { %683 = vmatmul.bf16.gmra.mxu1 %v5202_v31 }
  0x79   :  { %664 = vmatmul.bf16.gmra.mxu0 %v5222_v36 }
  0x7a   :  { %688 = vmatmul.bf16.gmra.mxu1 %v5226_v37 }
  0xa6   :  { %v559_v38 = vpop.f32.mrf.mxu0 }
  0xa7   :  { %v583_v39 = vpop.f32.mrf.mxu1  ;;  %v560_v51 = vadd.f32 %v559_v38, %v57_v50 }
  0xa9   :  { %v584_v55 = vadd.f32 %v583_v39, %v560_v51 }
  0xae   :  { %v561_v40 = vpop.f32.mrf.mxu0  ;;  %v607_v46 = vpop.f32.mrf.mxu2 }
  0xaf   :  { %v585_v41 = vpop.f32.mrf.mxu1  ;;  %v631_v49 = vpop.f32.mrf.mxu3  ;;  %v608_v56 = vadd.f32 %v607_v46, %v584_v55  ;;  %v562_v58 = vadd.f32 %v561_v40, %v57_v50 }
  0xb1   :  { %v632_v59 = vadd.f32 %v631_v49, %v608_v56  ;;  %v586_v62 = vadd.f32 %v585_v41, %v562_v58 }
  0xb6   :  { %v564_v42 = vpop.f32.mrf.mxu0  ;;  %v609_v52 = vpop.f32.mrf.mxu2 }
  0xb7   :  { %v588_v43 = vpop.f32.mrf.mxu1  ;;  %v633_v57 = vpop.f32.mrf.mxu3  ;;  %v610_v1 = vadd.f32 %v609_v52, %v586_v62  ;;  %v565_v3 = vadd.f32 %v564_v42, %v57_v50 }
  0xb9   :  { %v634_v6 = vadd.f32 %v633_v57, %v610_v1  ;;  %v589_v9 = vadd.f32 %v588_v43, %v565_v3 }
  0xbe   :  { %v566_v44 = vpop.f32.mrf.mxu0  ;;  %v612_v63 = vpop.f32.mrf.mxu2 }
  0xbf   :  { %v590_v45 = vpop.f32.mrf.mxu1  ;;  %v636_v4 = vpop.f32.mrf.mxu3  ;;  %v613_v11 = vadd.f32 %v612_v63, %v589_v9  ;;  %v567_v14 = vadd.f32 %v566_v44, %v57_v50 }
  0xc1   :  { %v637_v16 = vadd.f32 %v636_v4, %v613_v11  ;;  %v591_v20 = vadd.f32 %v590_v45, %v567_v14 }
  0xc6   :  { %v569_v47 = vpop.f32.mrf.mxu0  ;;  %v614_v12 = vpop.f32.mrf.mxu2 }
  0xc7   :  { %v593_v48 = vpop.f32.mrf.mxu1  ;;  %v638_v17 = vpop.f32.mrf.mxu3  ;;  %v615_v22 = vadd.f32 %v614_v12, %v591_v20  ;;  %v570_v24 = vadd.f32 %v569_v47, %v57_v50 }
  0xc9   :  { %v639_v27 = vadd.f32 %v638_v17, %v615_v22  ;;  %v594_v30 = vadd.f32 %v593_v48, %v570_v24 }
  0xce   :  { %v571_v53 = vpop.f32.mrf.mxu0  ;;  %v617_v25 = vpop.f32.mrf.mxu2 }
  0xcf   :  { %v595_v54 = vpop.f32.mrf.mxu1  ;;  %v641_v32 = vpop.f32.mrf.mxu3  ;;  %v618_v33 = vadd.f32 %v617_v25, %v594_v30  ;;  %v572_v35 = vadd.f32 %v571_v53, %v57_v50  ;;  %v6183_v53 = vmov 32.0  }
  0xd0   :  { %5881 = vrcp.f32 %v6183_v53 }
  0xd1   :  { %v642_v37 = vadd.f32 %v641_v32, %v618_v33  ;;  %v596_v41 = vadd.f32 %v595_v54, %v572_v35 }
  0xd6   :  { %v655_v60 = vpop.f32.mrf.mxu0  ;;  %v619_v38 = vpop.f32.mrf.mxu2 }
  0xd7   :  { %v679_v61 = vpop.f32.mrf.mxu1  ;;  %v656_v0 = vadd.f32 %v655_v60, %v632_v59  ;;  %v620_v43 = vadd.f32 %v619_v38, %v596_v41  ;;  %v643_v45 = vpop.f32.mrf.mxu3 }
  0xd8   :  { %v5882_v55 = vpop.eup %5881 }
  0xd9   :  { %v6544_v2 = vadd.f32 %v679_v61, %v656_v0  ;;  %v644_v47 = vadd.f32 %v643_v45, %v620_v43  ;;  %v716_v56 = vmul.f32 32.0, %v5882_v55  ;;  %vm720_vm1 = vweird.f32 %v5882_v55  ;;  %v6594_v43 = vld [vmem:[%s8176_s3] ss:$0 sm:$0xff] }
  0xdb   :  { %v697_v5 = vsel %vm696_vm0, %v6544_v2, 0.0  ;;  %v717_v54 = vsub.f32 1.0, %v716_v56 }
  0xdc   :  { %698 = vadd.xlane.f32.xlu0 %v697_v5 }
  0xdd   :  { %v718_v57 = vmul.f32 %v5882_v55, %v717_v54 }
  0xde   :  { %v657_v7 = vpop.f32.mrf.mxu0 }
  0xdf   :  { %v681_v8 = vpop.f32.mrf.mxu1  ;;  %v658_v10 = vadd.f32 %v657_v7, %v634_v6  ;;  %v719_v58 = vadd.f32 %v5882_v55, %v718_v57 }
  0xe1   :  { %v682_v13 = vadd.f32 %v681_v8, %v658_v10  ;;  %v6553_v59 = vsel %vm720_vm1, %v5882_v55, %v719_v58 }
  0xe3   :  { %v700_v15 = vsel %vm696_vm0, %v682_v13, 0.0 }
  0xe4   :  { %701 = vadd.xlane.f32.xlu0 %v700_v15 }
  0xe6   :  { %v660_v18 = vpop.f32.mrf.mxu0 }
  0xe7   :  { %v684_v19 = vpop.f32.mrf.mxu1  ;;  %v661_v21 = vadd.f32 %v660_v18, %v637_v16 }
  0xe9   :  { %v685_v23 = vadd.f32 %v684_v19, %v661_v21 }
  0xeb   :  { %v703_v26 = vsel %vm696_vm0, %v685_v23, 0.0 }
  0xec   :  { %704 = vadd.xlane.f32.xlu1 %v703_v26 }
  0xee   :  { %v662_v28 = vpop.f32.mrf.mxu0 }
  0xef   :  { %v686_v29 = vpop.f32.mrf.mxu1  ;;  %v663_v31 = vadd.f32 %v662_v28, %v639_v27 }
  0xf1   :  { %v687_v34 = vadd.f32 %v686_v29, %v663_v31 }
  0xf3   :  { %v706_v36 = vsel %vm696_vm0, %v687_v34, 0.0 }
  0xf4   :  { %707 = vadd.xlane.f32.xlu1 %v706_v36 }
  0xf6   :  { %v665_v39 = vpop.f32.mrf.mxu0 }
  0xf7   :  { %v689_v40 = vpop.f32.mrf.mxu1  ;;  %v666_v42 = vadd.f32 %v665_v39, %v642_v37 }
  0xf9   :  { %v690_v44 = vadd.f32 %v689_v40, %v666_v42 }
  0xfb   :  { %v709_v46 = vsel %vm696_vm0, %v690_v44, 0.0 }
  0xfc   :  { %710 = vadd.xlane.f32.xlu2 %v709_v46 }
  0xfe   :  { %v667_v48 = vpop.f32.mrf.mxu0 }
  0xff   :  { %v691_v49 = vpop.f32.mrf.mxu1  ;;  %v668_v51 = vadd.f32 %v667_v48, %v644_v47  ;;  %v6599_v47 = vld [vmem:[%s8177_s4] ss:$0 sm:$0xff] }
 0x101   :  { %v692_v50 = vadd.f32 %v691_v49, %v668_v51 }
 0x103   :  { %v712_v52 = vsel %vm696_vm0, %v692_v50, 0.0 }
 0x104   :  { %713 = vadd.xlane.f32.xlu2 %v712_v52 }
 0x14f   :  { %v699_v60 = vpop.xlane.xlu0 %698 }
 0x150   :  { %v722_v61 = vmul.f32 %v6553_v59, %v699_v60 }
 0x152   :  { %v728_v62 = vsub.f32 %v6544_v2, %v722_v61 }
 0x154   :  { %v734_v63 = vmul.f32 %v728_v62, %v728_v62 }
 0x156   :  { %v740_v0 = vsel %vm696_vm0, %v734_v63, 0.0 }
 0x157   :  { %741 = vadd.xlane.f32.xlu0 %v740_v0  ;;  %v702_v1 = vpop.xlane.xlu0 %701 }
 0x158   :  { %v723_v3 = vmul.f32 %v6553_v59, %v702_v1 }
 0x15a   :  { %v6559_v4 = vsub.f32 %v682_v13, %v723_v3 }
 0x15c   :  { %v735_v5 = vmul.f32 %v6559_v4, %v6559_v4 }
 0x15e   :  { %v743_v6 = vsel %vm696_vm0, %v735_v5, 0.0 }
 0x15f   :  { %v705_v7 = vpop.xlane.xlu1 %704  ;;  %744 = vadd.xlane.f32.xlu1 %v743_v6 }
 0x160   :  { %v724_v8 = vmul.f32 %v6553_v59, %v705_v7 }
 0x162   :  { %v6565_v9 = vsub.f32 %v685_v23, %v724_v8 }
 0x164   :  { %v736_v2 = vmul.f32 %v6565_v9, %v6565_v9 }
 0x166   :  { %v746_v10 = vsel %vm696_vm0, %v736_v2, 0.0 }
 0x167   :  { %747 = vadd.xlane.f32.xlu2 %v746_v10  ;;  %v708_v11 = vpop.xlane.xlu1 %707 }
 0x168   :  { %v725_v12 = vmul.f32 %v6553_v59, %v708_v11 }
 0x16a   :  { %v6571_v13 = vsub.f32 %v687_v34, %v725_v12 }
 0x16c   :  { %v737_v14 = vmul.f32 %v6571_v13, %v6571_v13 }
 0x16e   :  { %v749_v15 = vsel %vm696_vm0, %v737_v14, 0.0 }
 0x16f   :  { %v711_v16 = vpop.xlane.xlu2 %710  ;;  %750 = vadd.xlane.f32.xlu0 %v749_v15 }
 0x170   :  { %v726_v17 = vmul.f32 %v6553_v59, %v711_v16 }
 0x172   :  { %v6577_v18 = vsub.f32 %v690_v44, %v726_v17 }
 0x174   :  { %v738_v19 = vmul.f32 %v6577_v18, %v6577_v18 }
 0x176   :  { %v752_v20 = vsel %vm696_vm0, %v738_v19, 0.0 }
 0x177   :  { %v714_v21 = vpop.xlane.xlu2 %713  ;;  %753 = vadd.xlane.f32.xlu1 %v752_v20 }
 0x178   :  { %v727_v22 = vmul.f32 %v6553_v59, %v714_v21 }
 0x17a   :  { %v6583_v23 = vsub.f32 %v692_v50, %v727_v22 }
 0x17c   :  { %v739_v24 = vmul.f32 %v6583_v23, %v6583_v23 }
 0x17e   :  { %v755_v25 = vsel %vm696_vm0, %v739_v24, 0.0 }
 0x17f   :  { %756 = vadd.xlane.f32.xlu2 %v755_v25 }
 0x1ca   :  { %v742_v26 = vpop.xlane.xlu0 %741 }
 0x1cb   :  { %v758_v27 = vmul.f32 %v742_v26, %v6553_v59 }
 0x1cd   :  { %v764_v28 = vadd.f32 1e-05, %v758_v27 }
 0x1cf   :  { %5883 = vrsqrt.f32 %v764_v28  ;;  %vm776_vm3 = vweird.f32 %v764_v28 }
 0x1d2   :  { %v745_v29 = vpop.xlane.xlu1 %744 }
 0x1d3   :  { %v759_v30 = vmul.f32 %v745_v29, %v6553_v59 }
 0x1d5   :  { %v5884_v31 = vpop.eup %5883  ;;  %v765_v32 = vadd.f32 1e-05, %v759_v30 }
 0x1d6   :  { %v771_v33 = vmul.f32 %v5884_v31, %v764_v28  ;;  %vm777_vm2 = vweird.f32 %v5884_v31 }
 0x1d7   :  { %5885 = vrsqrt.f32 %v765_v32  ;;  %vm778_vm4 = vmor %vm776_vm3, %vm777_vm2  ;;  %vm786_vm6 = vweird.f32 %v765_v32 }
 0x1d8   :  { %v772_v34 = vmul.f32 %v5884_v31, %v771_v33 }
 0x1da   :  { %v773_v35 = vmul.f32 0.5, %v772_v34  ;;  %v748_v36 = vpop.xlane.xlu2 %747 }
 0x1db   :  { %v760_v37 = vmul.f32 %v748_v36, %v6553_v59 }
 0x1dc   :  { %v774_v38 = vsub.f32 1.5, %v773_v35 }
 0x1dd   :  { %v5886_v39 = vpop.eup %5885  ;;  %v766_v40 = vadd.f32 1e-05, %v760_v37 }
 0x1de   :  { %v775_v41 = vmul.f32 %v5884_v31, %v774_v38  ;;  %v781_v42 = vmul.f32 %v5886_v39, %v765_v32  ;;  %vm787_vm5 = vweird.f32 %v5886_v39 }
 0x1df   :  { %5887 = vrsqrt.f32 %v766_v40  ;;  %vm788_vm7 = vmor %vm786_vm6, %vm787_vm5  ;;  %vm796_vm9 = vweird.f32 %v766_v40 }
 0x1e0   :  { %v779_v44 = vsel %vm778_vm4, %v5884_v31, %v775_v41  ;;  %v782_v45 = vmul.f32 %v5886_v39, %v781_v42 }
 0x1e1   :  { %v830_v46 = vmul.f32 %v779_v44, %v728_v62 }
 0x1e2   :  { %v783_v48 = vmul.f32 0.5, %v782_v45  ;;  %v751_v49 = vpop.xlane.xlu0 %750 }
 0x1e3   :  { %v761_v51 = vmul.f32 %v751_v49, %v6553_v59  ;;  %v839_v50 = vmul.f32 %v6594_v43, %v830_v46 }
 0x1e4   :  { %v784_v52 = vsub.f32 1.5, %v783_v48 }
 0x1e5   :  { %v5888_v53 = vpop.eup %5887  ;;  %v767_v55 = vadd.f32 1e-05, %v761_v51  ;;  %v6604_v56 = vadd.f32 %v6599_v47, %v839_v50 }
 0x1e6   :  { %v785_v54 = vmul.f32 %v5886_v39, %v784_v52  ;;  %v791_v57 = vmul.f32 %v5888_v53, %v766_v40  ;;  %vm797_vm8 = vweird.f32 %v5888_v53 }
 0x1e7   :  { %5889 = vrsqrt.f32 %v767_v55  ;;  %v866_v58 = vsel %vm696_vm0, %v6604_v56, 0.0  ;;  %854 = vst.msk [vmem:[%s8178_s17] sm:$0xff] %vm696_vm0, %v6604_v56  ;;  %vm798_vm10 = vmor %vm796_vm9, %vm797_vm8  ;;  %vm806_vm12 = vweird.f32 %v767_v55 }
 0x1e8   :  { %v789_v60 = vsel %vm788_vm7, %v5886_v39, %v785_v54  ;;  %v792_v61 = vmul.f32 %v5888_v53, %v791_v57  ;;  %867 = vadd.xlane.f32.xlu0 %v866_v58 }
 0x1e9   :  { %v831_v62 = vmul.f32 %v789_v60, %v6559_v4 }
 0x1ea   :  { %v793_v63 = vmul.f32 0.5, %v792_v61  ;;  %v754_v0 = vpop.xlane.xlu1 %753 }
 0x1eb   :  { %v762_v1 = vmul.f32 %v754_v0, %v6553_v59  ;;  %v840_v3 = vmul.f32 %v6594_v43, %v831_v62 }
 0x1ec   :  { %v794_v5 = vsub.f32 1.5, %v793_v63 }
 0x1ed   :  { %v5890_v6 = vpop.eup %5889  ;;  %v768_v7 = vadd.f32 1e-05, %v762_v1  ;;  %v6617_v8 = vadd.f32 %v6599_v47, %v840_v3 }
 0x1ee   :  { %v795_v2 = vmul.f32 %v5888_v53, %v794_v5  ;;  %v801_v10 = vmul.f32 %v5890_v6, %v767_v55  ;;  %vm807_vm11 = vweird.f32 %v5890_v6 }
 0x1ef   :  { %5891 = vrsqrt.f32 %v768_v7  ;;  %v869_v4 = vsel %vm696_vm0, %v6617_v8, 0.0  ;;  %855 = vst.msk [vmem:[%s8178_s17 + $0x8] sm:$0xff] %vm696_vm0, %v6617_v8  ;;  %vm808_vm13 = vmor %vm806_vm12, %vm807_vm11  ;;  %vm816_vm15 = vweird.f32 %v768_v7 }
 0x1f0   :  { %v799_v11 = vsel %vm798_vm10, %v5888_v53, %v795_v2  ;;  %v802_v12 = vmul.f32 %v5890_v6, %v801_v10  ;;  %870 = vadd.xlane.f32.xlu1 %v869_v4 }
 0x1f1   :  { %v832_v14 = vmul.f32 %v799_v11, %v6565_v9 }
 0x1f2   :  { %v803_v15 = vmul.f32 0.5, %v802_v12  ;;  %v757_v16 = vpop.xlane.xlu2 %756 }
 0x1f3   :  { %v763_v17 = vmul.f32 %v757_v16, %v6553_v59  ;;  %v841_v19 = vmul.f32 %v6594_v43, %v832_v14 }
 0x1f4   :  { %v804_v20 = vsub.f32 1.5, %v803_v15 }
 0x1f5   :  { %v5892_v21 = vpop.eup %5891  ;;  %v769_v22 = vadd.f32 1e-05, %v763_v17  ;;  %v6630_v24 = vadd.f32 %v6599_v47, %v841_v19 }
 0x1f6   :  { %v805_v25 = vmul.f32 %v5890_v6, %v804_v20  ;;  %v811_v26 = vmul.f32 %v5892_v21, %v768_v7  ;;  %vm817_vm14 = vweird.f32 %v5892_v21 }
 0x1f7   :  { %5893 = vrsqrt.f32 %v769_v22  ;;  %v872_v9 = vsel %vm696_vm0, %v6630_v24, 0.0  ;;  %856 = vst.msk [vmem:[%s8178_s17 + $0x10] sm:$0xff] %vm696_vm0, %v6630_v24  ;;  %vm818_vm1 = vmor %vm816_vm15, %vm817_vm14  ;;  %vm826_vm3 = vweird.f32 %v769_v22 }
 0x1f8   :  { %v809_v27 = vsel %vm808_vm13, %v5890_v6, %v805_v25  ;;  %v812_v28 = vmul.f32 %v5892_v21, %v811_v26  ;;  %873 = vadd.xlane.f32.xlu2 %v872_v9  ;;  %v5737_v9 = vld [vmem:[%s8182_s7] sm:$0xff] }
 0x1f9   :  { %v833_v29 = vmul.f32 %v809_v27, %v6571_v13 }
 0x1fa   :  { %v813_v30 = vmul.f32 0.5, %v812_v28 }
 0x1fb   :  { %v842_v31 = vmul.f32 %v6594_v43, %v833_v29 }
 0x1fc   :  { %v814_v32 = vsub.f32 1.5, %v813_v30 }
 0x1fd   :  { %v5894_v33 = vpop.eup %5893  ;;  %v6642_v34 = vadd.f32 %v6599_v47, %v842_v31 }
 0x1fe   :  { %v815_v35 = vmul.f32 %v5892_v21, %v814_v32  ;;  %v821_v36 = vmul.f32 %v5894_v33, %v769_v22  ;;  %vm827_vm2 = vweird.f32 %v5894_v33 }
 0x1ff   :  { %v875_v37 = vsel %vm696_vm0, %v6642_v34, 0.0  ;;  %857 = vst.msk [vmem:[%s8178_s17 + $0x18] sm:$0xff] %vm696_vm0, %v6642_v34  ;;  %vm828_vm4 = vmor %vm826_vm3, %vm827_vm2 }
 0x200   :  { %v819_v13 = vsel %vm818_vm1, %v5892_v21, %v815_v35  ;;  %v822_v38 = vmul.f32 %v5894_v33, %v821_v36  ;;  %876 = vadd.xlane.f32.xlu0 %v875_v37  ;;  %v5738_v21 = vld [vmem:[%s8182_s7 + $0x8] sm:$0xff] }
 0x201   :  { %v834_v39 = vmul.f32 %v819_v13, %v6577_v18  ;;  %1054 = vmatpush.bf16.msrb.mxu2 %v5738_v21 }
 0x202   :  { %v823_v40 = vmul.f32 0.5, %v822_v38 }
 0x203   :  { %v843_v41 = vmul.f32 %v6594_v43, %v834_v39 }
 0x204   :  { %v824_v42 = vsub.f32 1.5, %v823_v40 }
 0x205   :  { %v6654_v44 = vadd.f32 %v6599_v47, %v843_v41  ;;  %1055 = vmatpush.bf16.msrb.mxu2 %v5737_v9 }
 0x206   :  { %v825_v45 = vmul.f32 %v5894_v33, %v824_v42 }
 0x207   :  { %v878_v46 = vsel %vm696_vm0, %v6654_v44, 0.0  ;;  %858 = vst.msk [vmem:[%s8178_s17 + $0x20] sm:$0xff] %vm696_vm0, %v6654_v44 }
 0x208   :  { %v829_v18 = vsel %vm828_vm4, %v5894_v33, %v825_v45  ;;  %879 = vadd.xlane.f32.xlu1 %v878_v46 }
 0x209   :  { %v835_v48 = vmul.f32 %v829_v18, %v6583_v23 }
 0x20b   :  { %v844_v49 = vmul.f32 %v6594_v43, %v835_v48 }
 0x20d   :  { %v6666_v51 = vadd.f32 %v6599_v47, %v844_v49 }
 0x20f   :  { %v881_v50 = vsel %vm696_vm0, %v6666_v51, 0.0  ;;  %859 = vst.msk [vmem:[%s8178_s17 + $0x28] sm:$0xff] %vm696_vm0, %v6666_v51 }
 0x210   :  { %882 = vadd.xlane.f32.xlu2 %v881_v50 }
 0x25b   :  { %v868_v52 = vpop.xlane.xlu0 %867 }
 0x25c   :  { %v884_v53 = vmul.f32 %v868_v52, %v6553_v59 }
 0x25e   :  { %v6677_v23 = vsub.f32 %v6604_v56, %v884_v53  ;;  %v6731_v53 = vld [vmem:[%s8179_s5] ss:$0 sm:$0xff] }
 0x260   :  { %v896_v43 = vmul.f32 %v6677_v23, %v6677_v23 }
 0x262   :  { %v902_v47 = vsel %vm696_vm0, %v896_v43, 0.0 }
 0x263   :  { %v871_v55 = vpop.xlane.xlu1 %870  ;;  %903 = vadd.xlane.f32.xlu0 %v902_v47 }
 0x264   :  { %v885_v54 = vmul.f32 %v871_v55, %v6553_v59 }
 0x266   :  { %v6684_v57 = vsub.f32 %v6617_v8, %v885_v54 }
 0x268   :  { %v897_v58 = vmul.f32 %v6684_v57, %v6684_v57 }
 0x26a   :  { %v905_v60 = vsel %vm696_vm0, %v897_v58, 0.0 }
 0x26b   :  { %v874_v61 = vpop.xlane.xlu2 %873  ;;  %906 = vadd.xlane.f32.xlu1 %v905_v60 }
 0x26c   :  { %v886_v62 = vmul.f32 %v874_v61, %v6553_v59 }
 0x26e   :  { %v6691_v63 = vsub.f32 %v6630_v24, %v886_v62 }
 0x270   :  { %v898_v0 = vmul.f32 %v6691_v63, %v6691_v63 }
 0x272   :  { %v908_v1 = vsel %vm696_vm0, %v898_v0, 0.0 }
 0x273   :  { %909 = vadd.xlane.f32.xlu2 %v908_v1  ;;  %v877_v3 = vpop.xlane.xlu0 %876 }
 0x274   :  { %v887_v5 = vmul.f32 %v877_v3, %v6553_v59 }
 0x276   :  { %v6698_v6 = vsub.f32 %v6642_v34, %v887_v5 }
 0x278   :  { %v899_v7 = vmul.f32 %v6698_v6, %v6698_v6 }
 0x27a   :  { %v911_v2 = vsel %vm696_vm0, %v899_v7, 0.0 }
 0x27b   :  { %v880_v10 = vpop.xlane.xlu1 %879  ;;  %912 = vadd.xlane.f32.xlu0 %v911_v2 }
 0x27c   :  { %v888_v4 = vmul.f32 %v880_v10, %v6553_v59 }
 0x27e   :  { %v6705_v11 = vsub.f32 %v6654_v44, %v888_v4 }
 0x280   :  { %v900_v12 = vmul.f32 %v6705_v11, %v6705_v11 }
 0x282   :  { %v914_v14 = vsel %vm696_vm0, %v900_v12, 0.0 }
 0x283   :  { %v883_v15 = vpop.xlane.xlu2 %882  ;;  %915 = vadd.xlane.f32.xlu1 %v914_v14 }
 0x284   :  { %v889_v16 = vmul.f32 %v883_v15, %v6553_v59 }
 0x286   :  { %v6712_v17 = vsub.f32 %v6666_v51, %v889_v16 }
 0x288   :  { %v901_v19 = vmul.f32 %v6712_v17, %v6712_v17 }
 0x28a   :  { %v917_v20 = vsel %vm696_vm0, %v901_v19, 0.0 }
 0x28b   :  { %918 = vadd.xlane.f32.xlu2 %v917_v20 }
 0x2d6   :  { %v904_v22 = vpop.xlane.xlu0 %903 }
 0x2d7   :  { %v920_v25 = vmul.f32 %v904_v22, %v6553_v59 }
 0x2d9   :  { %v926_v26 = vadd.f32 1e-05, %v920_v25 }
 0x2db   :  { %5895 = vrsqrt.f32 %v926_v26  ;;  %vm938_vm6 = vweird.f32 %v926_v26 }
 0x2de   :  { %v907_v27 = vpop.xlane.xlu1 %906 }
 0x2df   :  { %v921_v28 = vmul.f32 %v907_v27, %v6553_v59 }
 0x2e1   :  { %v5896_v29 = vpop.eup %5895  ;;  %v927_v30 = vadd.f32 1e-05, %v921_v28 }
 0x2e2   :  { %v933_v31 = vmul.f32 %v5896_v29, %v926_v26  ;;  %vm939_vm5 = vweird.f32 %v5896_v29 }
 0x2e3   :  { %5897 = vrsqrt.f32 %v927_v30  ;;  %vm940_vm7 = vmor %vm938_vm6, %vm939_vm5  ;;  %vm948_vm9 = vweird.f32 %v927_v30 }
 0x2e4   :  { %v934_v32 = vmul.f32 %v5896_v29, %v933_v31 }
 0x2e6   :  { %v935_v33 = vmul.f32 0.5, %v934_v32  ;;  %v910_v35 = vpop.xlane.xlu2 %909 }
 0x2e7   :  { %v922_v36 = vmul.f32 %v910_v35, %v6553_v59 }
 0x2e8   :  { %v936_v37 = vsub.f32 1.5, %v935_v33 }
 0x2e9   :  { %v5898_v13 = vpop.eup %5897  ;;  %v928_v38 = vadd.f32 1e-05, %v922_v36 }
 0x2ea   :  { %v937_v39 = vmul.f32 %v5896_v29, %v936_v37  ;;  %v943_v40 = vmul.f32 %v5898_v13, %v927_v30  ;;  %vm949_vm8 = vweird.f32 %v5898_v13 }
 0x2eb   :  { %5899 = vrsqrt.f32 %v928_v38  ;;  %vm950_vm10 = vmor %vm948_vm9, %vm949_vm8  ;;  %vm958_vm12 = vweird.f32 %v928_v38  ;;  %vm1083_vm8 = vcmask 64512   ;;  %vm1300_vm9 = vcmask 1043456  }
 0x2ec   :  { %v944_v41 = vmul.f32 %v5898_v13, %v943_v40  ;;  %v941_v42 = vsel %vm940_vm7, %v5896_v29, %v937_v39 }
 0x2ed   :  { %v992_v50 = vmul.f32 %v941_v42, %v6677_v23  ;;  %v6738_v23 = vld [vmem:[%s8180_s6] ss:$0 sm:$0xff] }
 0x2ee   :  { %v945_v45 = vmul.f32 0.5, %v944_v41  ;;  %v913_v46 = vpop.xlane.xlu0 %912 }
 0x2ef   :  { %v923_v18 = vmul.f32 %v913_v46, %v6553_v59  ;;  %v1001_v60 = vmul.f32 %v6731_v53, %v992_v50 }
 0x2f0   :  { %v946_v48 = vsub.f32 1.5, %v945_v45 }
 0x2f1   :  { %v5900_v49 = vpop.eup %5899  ;;  %v929_v52 = vadd.f32 1e-05, %v923_v18  ;;  %v1010_v2 = vadd.f32 %v6738_v23, %v1001_v60 }
 0x2f2   :  { %v947_v43 = vmul.f32 %v5898_v13, %v946_v48  ;;  %v953_v47 = vmul.f32 %v5900_v49, %v928_v38  ;;  %vm959_vm11 = vweird.f32 %v5900_v49 }
 0x2f3   :  { %5901 = vrsqrt.f32 %v929_v52  ;;  %vm960_vm13 = vmor %vm958_vm12, %vm959_vm11  ;;  %vm968_vm15 = vweird.f32 %v929_v52  ;;  %vm2508_vm11 = vcmask 130048   ;;  %vm2515_vm12 = vcmask 195584  }
 0x2f4   :  { %v951_v55 = vsel %vm950_vm10, %v5898_v13, %v947_v43  ;;  %v954_v54 = vmul.f32 %v5900_v49, %v953_v47 }
 0x2f5   :  { %v993_v58 = vmul.f32 %v951_v55, %v6684_v57 }
 0x2f6   :  { %v955_v61 = vmul.f32 0.5, %v954_v54  ;;  %v916_v62 = vpop.xlane.xlu1 %915 }
 0x2f7   :  { %v924_v0 = vmul.f32 %v916_v62, %v6553_v59  ;;  %v1002_v1 = vmul.f32 %v6731_v53, %v993_v58 }
 0x2f8   :  { %v956_v3 = vsub.f32 1.5, %v955_v61 }
 0x2f9   :  { %v5902_v5 = vpop.eup %5901  ;;  %v930_v7 = vadd.f32 1e-05, %v924_v0  ;;  %v1011_v57 = vadd.f32 %v6738_v23, %v1002_v1 }
 0x2fa   :  { %v957_v10 = vmul.f32 %v5900_v49, %v956_v3  ;;  %v963_v4 = vmul.f32 %v5902_v5, %v929_v52  ;;  %vm969_vm14 = vweird.f32 %v5902_v5 }
 0x2fb   :  { %5903 = vrsqrt.f32 %v930_v7  ;;  %v1016_v12 = vpack.c.bf16 %v1011_v57, %v1010_v2  ;;  %vm970_vm1 = vmor %vm968_vm15, %vm969_vm14  ;;  %vm978_vm3 = vweird.f32 %v930_v7 }
 0x2fc   :  { %v964_v14 = vmul.f32 %v5902_v5, %v963_v4  ;;  %v961_v15 = vsel %vm960_vm13, %v5900_v49, %v957_v10 }
 0x2fd   :  { %5427 = vmatmul.msk.bf16.vlgmr.msrb.gmra.mxu2 %vm696_vm0, %v1016_v12  ;;  %v994_v26 = vmul.f32 %v961_v15, %v6691_v63 }
 0x2fe   :  { %v965_v16 = vmul.f32 0.5, %v964_v14  ;;  %v919_v19 = vpop.xlane.xlu2 %918 }
 0x2ff   :  { %v925_v20 = vmul.f32 %v919_v19, %v6553_v59  ;;  %v1003_v31 = vmul.f32 %v6731_v53, %v994_v26 }
 0x300   :  { %v966_v21 = vsub.f32 1.5, %v965_v16 }
 0x301   :  { %v5904_v22 = vpop.eup %5903  ;;  %v931_v25 = vadd.f32 1e-05, %v925_v20  ;;  %v1012_v37 = vadd.f32 %v6738_v23, %v1003_v31 }
 0x302   :  { %v967_v9 = vmul.f32 %v5902_v5, %v966_v21  ;;  %v973_v27 = vmul.f32 %v5904_v22, %v930_v7  ;;  %vm979_vm2 = vweird.f32 %v5904_v22 }
 0x303   :  { %5905 = vrsqrt.f32 %v931_v25  ;;  %vm980_vm4 = vmor %vm978_vm3, %vm979_vm2  ;;  %vm988_vm6 = vweird.f32 %v931_v25 }
 0x304   :  { %v971_v28 = vsel %vm970_vm1, %v5902_v5, %v967_v9  ;;  %v974_v29 = vmul.f32 %v5904_v22, %v973_v27 }
 0x305   :  { %v995_v30 = vmul.f32 %v971_v28, %v6698_v6 }
 0x306   :  { %v975_v32 = vmul.f32 0.5, %v974_v29 }
 0x307   :  { %v1004_v33 = vmul.f32 %v6731_v53, %v995_v30 }
 0x308   :  { %v976_v35 = vsub.f32 1.5, %v975_v32 }
 0x309   :  { %v5906_v36 = vpop.eup %5905  ;;  %v1013_v63 = vadd.f32 %v6738_v23, %v1004_v33 }
 0x30a   :  { %v977_v13 = vmul.f32 %v5904_v22, %v976_v35  ;;  %v983_v38 = vmul.f32 %v5906_v36, %v931_v25  ;;  %vm989_vm5 = vweird.f32 %v5906_v36 }
 0x30b   :  { %v1017_v39 = vpack.c.bf16 %v1013_v63, %v1012_v37  ;;  %vm990_vm7 = vmor %vm988_vm6, %vm989_vm5 }
 0x30c   :  { %v984_v40 = vmul.f32 %v5906_v36, %v983_v38  ;;  %v981_v6 = vsel %vm980_vm4, %v5904_v22, %v977_v13 }
 0x30d   :  { %5428 = vmatmul.msk.bf16.gmra.mxu2 %vm696_vm0, %v1017_v39  ;;  %v996_v45 = vmul.f32 %v981_v6, %v6705_v11  ;;  %v5868_v11 = vld [vmem:[%s8181_s8] ss:$0 sm:$0xff] }
 0x30e   :  { %v985_v41 = vmul.f32 0.5, %v984_v40 }
 0x30f   :  { %v1005_v49 = vmul.f32 %v6731_v53, %v996_v45 }
 0x310   :  { %v986_v42 = vsub.f32 1.5, %v985_v41 }
 0x311   :  { %v1014_v52 = vadd.f32 %v6738_v23, %v1005_v49 }
 0x312   :  { %v987_v46 = vmul.f32 %v5906_v36, %v986_v42 }
 0x314   :  { %v991_v18 = vsel %vm990_vm7, %v5906_v36, %v987_v46 }
 0x315   :  { %v997_v48 = vmul.f32 %v991_v18, %v6712_v17 }
 0x317   :  { %v1006_v50 = vmul.f32 %v6731_v53, %v997_v48 }
 0x319   :  { %v1015_v43 = vadd.f32 %v6738_v23, %v1006_v50 }
 0x31b   :  { %v1018_v47 = vpack.c.bf16 %v1015_v43, %v1014_v52 }
 0x31d   :  { %5429 = vmatmul.msk.bf16.gmra.mxu2 %vm696_vm0, %v1018_v47 }
 0x380   :  { %v1057_v55 = vpop.f32.mrf.mxu2 }
 0x381   :  { %v1058_v54 = vadd.f32 %v5868_v11, %v1057_v55 }
 0x383   :  { %v1072_v58 = vpack.c.bf16 %v1058_v54, %v1058_v54 }
 0x385   :  { %v1079_v60 = vunpack.c.l.b16 %v1072_v58 }
 0x387   :  { %v6763_v17 = vpack.c.b16 %v1079_v60, %v1079_v60 }
 0x388   :  { %v1059_v61 = vpop.f32.mrf.mxu2 }
 0x389   :  { %v1060_v62 = vadd.f32 %v5868_v11, %v1059_v61  ;;  %1081 = vrot.lane.b32.xlu0 %v6763_v17, %s6184_s22  ;;  %v6188_v61 = vmov -1e+09  }
 0x38b   :  { %v1073_v53 = vpack.c.bf16 %v1060_v62, %v1060_v62 }
 0x38d   :  { %v1104_v23 = vunpack.c.l.b16 %v1073_v53 }
 0x38f   :  { %v6767_v0 = vpack.c.b16 %v1104_v23, %v1104_v23 }
 0x390   :  { %v1062_v1 = vpop.f32.mrf.mxu2 }
 0x391   :  { %v1063_v3 = vadd.f32 %v5868_v11, %v1062_v1  ;;  %1106 = vrot.lane.b32.xlu1 %v6767_v0, %s6184_s22 }
 0x393   :  { %v6771_v5 = vpack.c.bf16 %v1063_v3, %v1063_v3 }
 0x395   :  { %v1128_v7 = vunpack.c.l.b16 %v6771_v5 }
 0x397   :  { %v6774_v2 = vpack.c.b16 %v1128_v7, %v1128_v7 }
 0x398   :  { %v1064_v57 = vpop.f32.mrf.mxu2 }
 0x399   :  { %v1065_v10 = vadd.f32 %v5868_v11, %v1064_v57  ;;  %1130 = vrot.lane.b32.xlu2 %v6774_v2, %s6184_s22 }
 0x39b   :  { %v1075_v4 = vpack.c.bf16 %v1065_v10, %v1065_v10 }
 0x39d   :  { %v1152_v12 = vunpack.c.l.b16 %v1075_v4 }
 0x39f   :  { %v6778_v14 = vpack.c.b16 %v1152_v12, %v1152_v12 }
 0x3a0   :  { %v1067_v15 = vpop.f32.mrf.mxu2 }
 0x3a1   :  { %v1068_v16 = vadd.f32 %v5868_v11, %v1067_v15  ;;  %1154 = vrot.lane.b32.xlu0 %v6778_v14, %s6184_s22 }
 0x3a3   :  { %v6782_v19 = vpack.c.bf16 %v1068_v16, %v1068_v16 }
 0x3a5   :  { %v1176_v20 = vunpack.c.l.b16 %v6782_v19 }
 0x3a7   :  { %v6785_v21 = vpack.c.b16 %v1176_v20, %v1176_v20 }
 0x3a8   :  { %v1069_v22 = vpop.f32.mrf.mxu2 }
 0x3a9   :  { %v1070_v25 = vadd.f32 %v5868_v11, %v1069_v22  ;;  %1178 = vrot.lane.b32.xlu1 %v6785_v21, %s6184_s22  ;;  %1338 = vrot.lane.b32.xlu0 %v6774_v2, %s6185_s23 }
 0x3ab   :  { %v1077_v26 = vpack.c.bf16 %v1070_v25, %v1070_v25 }
 0x3ad   :  { %v1200_v9 = vunpack.c.l.b16 %v1077_v26 }
 0x3af   :  { %v6791_v27 = vpack.c.b16 %v1200_v9, %v1200_v9 }
 0x3b1   :  { %1317 = vrot.lane.b32.xlu1 %v6767_v0, %s6185_s23  ;;  %1445 = vrot.lane.b32.xlu0 %v6767_v0, %s6186_s24 }
 0x3b2   :  { %1202 = vrot.lane.b32.xlu2 %v6791_v27, %s6184_s22 }
 0x3ba   :  { %1295 = vrot.lane.b32.xlu2 %v6763_v17, %s6185_s23 }
 0x3c2   :  { %1359 = vrot.lane.b32.xlu2 %v6778_v14, %s6185_s23 }
 0x3ca   :  { %1424 = vrot.lane.b32.xlu2 %v6763_v17, %s6187_s25 }
 0x3d2   :  { %1447 = vrot.lane.b32.xlu2 %v6767_v0, %s6187_s25 }
 0x3da   :  { %1380 = vrot.lane.b32.xlu2 %v6785_v21, %s6185_s23 }
 0x3e2   :  { %1422 = vrot.lane.b32.xlu2 %v6763_v17, %s6186_s24 }
 0x3ea   :  { %1401 = vrot.lane.b32.xlu2 %v6791_v27, %s6185_s23 }
 0x3f3   :  { %v1131_v30 = vpop.permute.xlu2 %1130 }
 0x3f4   :  { %v1136_v33 = vsel %vm1083_vm8, %v1131_v30, 0 }
 0x3fb   :  { %v1082_v28 = vpop.permute.xlu0 %1081 }
 0x3fc   :  { %v1088_v29 = vsel %vm1083_vm8, %v1082_v28, 0 }
 0x3fd   :  { %1097 = vmatpush.bf16.xpose.msrb.mxu3 %v1088_v29 }
 0x403   :  { %v1107_v31 = vpop.permute.xlu1 %1106 }
 0x404   :  { %v1112_v32 = vsel %vm1083_vm8, %v1107_v31, 0  ;;  %5430 = vmatmul.msk.bf16.vlgmr.msrb.gmra.mxu3 %vm1083_vm8, %v1072_v58  ;;  %v860_v58 = vlaneseq }
 0x405   :  { %1121 = vmatpush.bf16.xpose.msra.mxu3 %v1112_v32 }
 0x406   :  { %v861_v60 = vand.u32 127, %v860_v58 }
 0x408   :  { %vm862_vm10 = vcmp.lt.s32.totalorder %v861_v60, 5 }
 0x409   :  { %v6837_v62 = vsel %vm862_vm10, 0.0, %v6188_v61 }
 0x40c   :  { %v1203_v35 = vpop.permute.xlu2 %1202 }
 0x40d   :  { %1145 = vmatpush.bf16.xpose.msrb.mxu3 %v1136_v33  ;;  %v1208_v36 = vsel %vm1083_vm8, %v1203_v35, 0 }
 0x40e   :  { %1217 = vmatpush.bf16.xpose.msra.mxu2 %v1208_v36 }
 0x413   :  { %v1155_v37 = vpop.permute.xlu0 %1154 }
 0x414   :  { %v1296_v63 = vpop.permute.xlu2 %1295  ;;  %v1160_v13 = vsel %vm1083_vm8, %v1155_v37, 0  ;;  %5431 = vmatmul.msk.bf16.vlgmr.msra.gmra.mxu3 %vm1083_vm8, %v1073_v53 }
 0x415   :  { %v1302_v38 = vsel %vm1300_vm9, %v1296_v63, 0  ;;  %5435 = vmatmul.msk.bf16.vlgmr.msra.gmra.mxu2 %vm1083_vm8, %v1077_v26  ;;  %1169 = vmatpush.bf16.xpose.msra.mxu0 %v1160_v13 }
 0x416   :  { %1311 = vmatpush.bf16.msra.mxu3 %v1302_v38 }
 0x41b   :  { %v1179_v39 = vpop.permute.xlu1 %1178  ;;  %v1339_v40 = vpop.permute.xlu0 %1338 }
 0x41c   :  { %v1184_v6 = vsel %vm1083_vm8, %v1179_v39, 0  ;;  %v1360_v41 = vpop.permute.xlu2 %1359  ;;  %v1344_v42 = vsel %vm1300_vm9, %v1339_v40, 0  ;;  %5433 = vmatmul.msk.bf16.vlgmr.msra.gmra.mxu0 %vm1083_vm8, %v1075_v4 }
 0x41d   :  { %v1365_v45 = vsel %vm1300_vm9, %v1360_v41, 0  ;;  %1193 = vmatpush.bf16.xpose.msrb.mxu0 %v1184_v6  ;;  %1353 = vmatpush.bf16.msra.mxu1 %v1344_v42 }
 0x41e   :  { %1374 = vmatpush.bf16.msrb.mxu2 %v1365_v45 }
 0x423   :  { %v1318_v46 = vpop.permute.xlu1 %1317  ;;  %v6859_v35 = vpop.permute.xlu0 %1445 }
 0x424   :  { %v1323_v18 = vsel %vm1300_vm9, %v1318_v46, 0  ;;  %v1425_v48 = vpop.permute.xlu2 %1424  ;;  %5432 = vmatmul.msk.bf16.vlgmr.msrb.gmra.mxu3 %vm1083_vm8, %v6771_v5 }
 0x425   :  { %v1430_v49 = vsel %vm1083_vm8, %v1425_v48, 0  ;;  %1332 = vmatpush.bf16.msra.mxu0 %v1323_v18 }
 0x426   :  { %1439 = vmatpush.bf16.xpose.msrb.mxu1 %v1430_v49 }
 0x42c   :  { %v1448_v50 = vpop.permute.xlu2 %1447  ;;  %5434 = vmatmul.msk.bf16.vlgmr.msrb.gmra.mxu0 %vm1083_vm8, %v6782_v19 }
 0x42d   :  { %v1453_v52 = vsel %vm1083_vm8, %v1448_v50, 0 }
 0x42e   :  { %1462 = vmatpush.bf16.xpose.msra.mxu2 %v1453_v52 }
 0x434   :  { %v1381_v43 = vpop.permute.xlu2 %1380 }
 0x435   :  { %v1386_v47 = vsel %vm1300_vm9, %v1381_v43, 0 }
 0x436   :  { %1395 = vmatpush.bf16.msrb.mxu3 %v1386_v47 }
 0x43c   :  { %v6834_v11 = vpop.permute.xlu2 %1422 }
 0x444   :  { %v1402_v55 = vpop.permute.xlu2 %1401 }
 0x445   :  { %v1407_v54 = vsel %vm1300_vm9, %v1402_v55, 0 }
 0x446   :  { %1416 = vmatpush.bf16.msrb.mxu0 %v1407_v54 }
 0x487   :  { %v1099_v53 = vpop.f32.mrf.mxu3 }
 0x488   :  { %v1100_v23 = vadd.f32 %v1099_v53, %v6837_v62 }
 0x48a   :  { %v1223_v1 = vsel %vm1083_vm8, %v1100_v23, -inf }
 0x48b   :  { %1224 = vmax.xlane.f32.xlu0 %v1223_v1 }
 0x48f   :  { %v1101_v3 = vpop.f32.mrf.mxu3 }
 0x497   :  { %v1123_v5 = vpop.f32.mrf.mxu3 }
 0x498   :  { %v1124_v7 = vadd.f32 %v1123_v5, %v6837_v62  ;;  %v1219_v57 = vpop.f32.mrf.mxu2 }
 0x499   :  { %v1171_v10 = vpop.f32.mrf.mxu0  ;;  %v1220_v30 = vadd.f32 %v1219_v57, %v6837_v62 }
 0x49a   :  { %v1172_v4 = vadd.f32 %v1171_v10, %v6837_v62  ;;  %v1226_v12 = vsel %vm1083_vm8, %v1124_v7, -inf }
 0x49b   :  { %1227 = vmax.xlane.f32.xlu2 %v1226_v12  ;;  %v1238_v33 = vsel %vm1083_vm8, %v1220_v30, -inf }
 0x49c   :  { %v1232_v15 = vsel %vm1083_vm8, %v1172_v4, -inf }
 0x49d   :  { %1233 = vmax.xlane.f32.xlu0 %v1232_v15 }
 0x49f   :  { %v1125_v16 = vpop.f32.mrf.mxu3 }
 0x4a0   :  { %v1221_v19 = vpop.f32.mrf.mxu2 }
 0x4a1   :  { %v1173_v20 = vpop.f32.mrf.mxu0 }
 0x4a7   :  { %v1147_v22 = vpop.f32.mrf.mxu3 }
 0x4a8   :  { %v1148_v25 = vadd.f32 %v1147_v22, %v6837_v62 }
 0x4a9   :  { %v1195_v26 = vpop.f32.mrf.mxu0 }
 0x4aa   :  { %v1196_v9 = vadd.f32 %v1195_v26, %v6837_v62  ;;  %v1229_v28 = vsel %vm1083_vm8, %v1148_v25, -inf }
 0x4ab   :  { %1230 = vmax.xlane.f32.xlu1 %v1229_v28 }
 0x4ac   :  { %v1235_v29 = vsel %vm1083_vm8, %v1196_v9, -inf }
 0x4ad   :  { %1236 = vmax.xlane.f32.xlu2 %v1235_v29 }
 0x4af   :  { %v1149_v31 = vpop.f32.mrf.mxu3 }
 0x4b1   :  { %v1197_v32 = vpop.f32.mrf.mxu0  ;;  %1539 = vrot.lane.b32.xlu0 %v6791_v27, %s6187_s25 }
 0x4b3   :  { %1239 = vmax.xlane.f32.xlu1 %v1238_v33 }
 0x4c5   :  { %1493 = vrot.lane.b32.xlu2 %v6778_v14, %s6187_s25 }
 0x4cc   :  { %1470 = vrot.lane.b32.xlu1 %v6774_v2, %s6187_s25 }
 0x4cd   :  { %1516 = vrot.lane.b32.xlu2 %v6785_v21, %s6187_s25 }
 0x4fe   :  { %v1225_v36 = vpop.xlane.xlu0 %1224 }
 0x4ff   :  { %v1241_v37 = vsub.f32 %v1100_v23, %v1225_v36 }
 0x501   :  { %v1247_v63 = vmul.f32 1.442695, %v1241_v37 }
 0x503   :  { %5907 = vpow2.f32 %v1247_v63 }
 0x509   :  { %v5908_v13 = vpop.eup %5907 }
 0x50a   :  { %v1259_v38 = vsel %vm1083_vm8, %v5908_v13, 0.0 }
 0x50b   :  { %1260 = vadd.xlane.f32.xlu0 %v1259_v38 }
 0x50e   :  { %v1228_v39 = vpop.xlane.xlu2 %1227 }
 0x50f   :  { %v1242_v40 = vsub.f32 %v1124_v7, %v1228_v39 }
 0x510   :  { %v1234_v6 = vpop.xlane.xlu0 %1233 }
 0x511   :  { %v1249_v41 = vmul.f32 1.442695, %v1242_v40  ;;  %v1244_v42 = vsub.f32 %v1172_v4, %v1234_v6 }
 0x513   :  { %5909 = vpow2.f32 %v1249_v41  ;;  %v1253_v45 = vmul.f32 1.442695, %v1244_v42 }
 0x515   :  { %5911 = vpow2.f32 %v1253_v45 }
 0x519   :  { %v5910_v46 = vpop.eup %5909 }
 0x51a   :  { %v1262_v18 = vsel %vm1083_vm8, %v5910_v46, 0.0 }
 0x51b   :  { %v5912_v48 = vpop.eup %5911  ;;  %1263 = vadd.xlane.f32.xlu2 %v1262_v18 }
 0x51c   :  { %v1268_v49 = vsel %vm1083_vm8, %v5912_v48, 0.0 }
 0x51d   :  { %1269 = vadd.xlane.f32.xlu0 %v1268_v49 }
 0x51e   :  { %v1231_v50 = vpop.xlane.xlu1 %1230 }
 0x51f   :  { %v1243_v52 = vsub.f32 %v1148_v25, %v1231_v50 }
 0x520   :  { %v1237_v43 = vpop.xlane.xlu2 %1236 }
 0x521   :  { %v1251_v47 = vmul.f32 1.442695, %v1243_v52  ;;  %v1245_v55 = vsub.f32 %v1196_v9, %v1237_v43 }
 0x523   :  { %5913 = vpow2.f32 %v1251_v47  ;;  %v1255_v54 = vmul.f32 1.442695, %v1245_v55  ;;  %v1540_v57 = vpop.permute.xlu0 %1539 }
 0x524   :  { %v1545_v36 = vsel %vm1083_vm8, %v1540_v57, 0 }
 0x525   :  { %5915 = vpow2.f32 %v1255_v54 }
 0x526   :  { %v1240_v58 = vpop.xlane.xlu1 %1239 }
 0x527   :  { %v1246_v60 = vsub.f32 %v1220_v30, %v1240_v58 }
 0x528   :  { %v1494_v10 = vpop.permute.xlu2 %1493 }
 0x529   :  { %v5914_v61 = vpop.eup %5913  ;;  %v1257_v53 = vmul.f32 1.442695, %v1246_v60  ;;  %v1499_v32 = vsel %vm1083_vm8, %v1494_v10, 0 }
 0x52a   :  { %v1265_v23 = vsel %vm1083_vm8, %v5914_v61, 0.0 }
 0x52b   :  { %v5916_v1 = vpop.eup %5915  ;;  %5917 = vpow2.f32 %v1257_v53  ;;  %1266 = vadd.xlane.f32.xlu1 %v1265_v23 }
 0x52c   :  { %v1271_v3 = vsel %vm1083_vm8, %v5916_v1, 0.0 }
 0x52d   :  { %1272 = vadd.xlane.f32.xlu0 %v1271_v3 }
 0x530   :  { %v1517_v15 = vpop.permute.xlu2 %1516 }
 0x531   :  { %v5918_v5 = vpop.eup %5917  ;;  %v1522_v42 = vsel %vm1083_vm8, %v1517_v15, 0 }
 0x532   :  { %v1274_v7 = vsel %vm1083_vm8, %v5918_v5, 0.0 }
 0x533   :  { %1275 = vadd.xlane.f32.xlu1 %v1274_v7  ;;  %1468 = vrot.lane.b32.xlu2 %v6774_v2, %s6186_s24 }
 0x53b   :  { %1537 = vrot.lane.b32.xlu2 %v6791_v27, %s6186_s24 }
 0x53e   :  { %v1471_v19 = vpop.permute.xlu1 %1470 }
 0x53f   :  { %v1476_v22 = vsel %vm1083_vm8, %v1471_v19, 0 }
 0x541   :  { %1514 = vrot.lane.b32.xlu0 %v6785_v21, %s6186_s24 }
 0x54c   :  { %1491 = vrot.lane.b32.xlu1 %v6778_v14, %s6186_s24 }
 0x57e   :  { %v1261_v4 = vpop.xlane.xlu0 %1260 }
 0x57f   :  { %5919 = vrcp.f32 %v1261_v4 }
 0x585   :  { %v5920_v12 = vpop.eup %5919 }
 0x586   :  { %v1283_v16 = vmul.f32 %v5920_v12, %v5908_v13 }
 0x588   :  { %v1289_v20 = vpack.c.bf16 %v1283_v16, %v1283_v16 }
 0x58a   :  { %5436 = vmatmul.msk.bf16.vlgmr.msra.gmra.mxu3 %vm1083_vm8, %v1289_v20 }
 0x58b   :  { %1485 = vmatpush.bf16.xpose.msra.mxu3 %v1476_v22 }
 0x58e   :  { %v1264_v25 = vpop.xlane.xlu2 %1263 }
 0x58f   :  { %5921 = vrcp.f32 %v1264_v25 }
 0x590   :  { %v1270_v26 = vpop.xlane.xlu0 %1269 }
 0x591   :  { %5923 = vrcp.f32 %v1270_v26 }
 0x595   :  { %v5922_v9 = vpop.eup %5921 }
 0x596   :  { %v1284_v28 = vmul.f32 %v5922_v9, %v5910_v46  ;;  %v1469_v49 = vpop.permute.xlu2 %1468 }
 0x597   :  { %v5924_v29 = vpop.eup %5923 }
 0x598   :  { %v1290_v30 = vpack.c.bf16 %v1284_v28, %v1284_v28  ;;  %v1286_v31 = vmul.f32 %v5924_v29, %v5912_v48 }
 0x59a   :  { %v1292_v33 = vpack.c.bf16 %v1286_v31, %v1286_v31  ;;  %5437 = vmatmul.msk.bf16.vlgmr.msra.gmra.mxu0 %vm1083_vm8, %v1290_v30 }
 0x59b   :  { %1508 = vmatpush.bf16.xpose.msra.mxu0 %v1499_v32 }
 0x59c   :  { %5439 = vmatmul.msk.bf16.vlgmr.msrb.gmra.mxu2 %vm1083_vm8, %v1292_v33 }
 0x59d   :  { %1554 = vmatpush.bf16.xpose.msrb.mxu2 %v1545_v36 }
 0x59e   :  { %v1267_v37 = vpop.xlane.xlu1 %1266  ;;  %v1538_v50 = vpop.permute.xlu2 %1537 }
 0x59f   :  { %5925 = vrcp.f32 %v1267_v37 }
 0x5a0   :  { %v1273_v63 = vpop.xlane.xlu0 %1272 }
 0x5a1   :  { %5927 = vrcp.f32 %v1273_v63 }
 0x5a5   :  { %v5926_v13 = vpop.eup %5925 }
 0x5a6   :  { %v1285_v38 = vmul.f32 %v5926_v13, %v5914_v61  ;;  %v1276_v39 = vpop.xlane.xlu1 %1275 }
 0x5a7   :  { %v5928_v40 = vpop.eup %5927  ;;  %5929 = vrcp.f32 %v1276_v39 }
 0x5a8   :  { %v1291_v6 = vpack.c.bf16 %v1285_v38, %v1285_v38  ;;  %v1287_v41 = vmul.f32 %v5928_v40, %v5916_v1 }
 0x5aa   :  { %v1293_v45 = vpack.c.bf16 %v1287_v41, %v1287_v41  ;;  %5438 = vmatmul.msk.bf16.vlgmr.msra.gmra.mxu1 %vm1083_vm8, %v1291_v6 }
 0x5ab   :  { %1531 = vmatpush.bf16.xpose.msra.mxu1 %v1522_v42 }
 0x5ac   :  { %5440 = vmatmul.msk.bf16.vlgmr.msrb.gmra.mxu3 %vm1083_vm8, %v1293_v45  ;;  %5443 = vmatmul.msk.bf16.vlgmr.msra.gmra.mxu2 %vm1083_vm8, %v6859_v35 }
 0x5ad   :  { %v5930_v46 = vpop.eup %5929 }
 0x5ae   :  { %v1288_v18 = vmul.f32 %v5930_v46, %v5918_v5 }
 0x5b0   :  { %v1294_v48 = vpack.c.bf16 %v1288_v18, %v1288_v18 }
 0x5b2   :  { %5441 = vmatmul.msk.bf16.vlgmr.msrb.gmra.mxu0 %vm1083_vm8, %v1294_v48 }
 0x5b3   :  { %v1515_v43 = vpop.permute.xlu0 %1514 }
 0x5ba   :  { %5442 = vmatmul.msk.bf16.vlgmr.msrb.gmra.mxu1 %vm1083_vm8, %v6834_v11 }
 0x5bc   :  { %5444 = vmatmul.msk.bf16.vlgmr.msra.gmra.mxu3 %vm1083_vm8, %v1469_v49  ;;  %5447 = vmatmul.msk.bf16.vlgmr.msrb.gmra.mxu2 %vm1083_vm8, %v1538_v50 }
 0x5be   :  { %v1492_v52 = vpop.permute.xlu1 %1491 }
 0x5c2   :  { %5445 = vmatmul.msk.bf16.vlgmr.msra.gmra.mxu0 %vm1083_vm8, %v1492_v52 }
 0x5ca   :  { %5446 = vmatmul.msk.bf16.vlgmr.msra.gmra.mxu1 %vm1083_vm8, %v1515_v43 }
 0x60d   :  { %v6893_v35 = vpop.f32.mrf.mxu3 }
 0x615   :  { %v1315_v47 = vpop.f32.mrf.mxu3 }
 0x617   :  { %v6895_v55 = vpop.f32.mrf.mxu0 }
 0x61f   :  { %v1336_v54 = vpop.f32.mrf.mxu0  ;;  %v6897_v58 = vpop.f32.mrf.mxu2 }
 0x627   :  { %v6899_v11 = vpop.f32.mrf.mxu1  ;;  %v1378_v60 = vpop.f32.mrf.mxu2 }
 0x62f   :  { %v1357_v61 = vpop.f32.mrf.mxu1  ;;  %v6901_v53 = vpop.f32.mrf.mxu3 }
 0x630   :  { %v6903_v23 = vpop.f32.mrf.mxu0  ;;  %v1464_v1 = vpop.f32.mrf.mxu2 }
 0x631   :  { %v1465_v3 = vadd.f32 %v1464_v1, %v6837_v62 }
 0x633   :  { %v1563_v5 = vsel %vm1083_vm8, %v1465_v3, -inf }
 0x634   :  { %1564 = vmax.xlane.f32.xlu0 %v1563_v5 }
 0x637   :  { %v1399_v7 = vpop.f32.mrf.mxu3  ;;  %v1441_v57 = vpop.f32.mrf.mxu1 }
 0x638   :  { %v1420_v10 = vpop.f32.mrf.mxu0  ;;  %v6908_v4 = vadd.f32 %v1441_v57, %v6837_v62  ;;  %v1466_v12 = vpop.f32.mrf.mxu2 }
 0x63a   :  { %v1560_v15 = vsel %vm1083_vm8, %v6908_v4, -inf }
 0x63b   :  { %1561 = vmax.xlane.f32.xlu1 %v1560_v15 }
 0x63f   :  { %v1443_v16 = vpop.f32.mrf.mxu1  ;;  %v1487_v19 = vpop.f32.mrf.mxu3 }
 0x640   :  { %v1488_v20 = vadd.f32 %v1487_v19, %v6837_v62  ;;  %v1510_v22 = vpop.f32.mrf.mxu0  ;;  %v1556_v25 = vpop.f32.mrf.mxu2 }
 0x641   :  { %v1511_v26 = vadd.f32 %v1510_v22, %v6837_v62  ;;  %v1557_v29 = vadd.f32 %v1556_v25, %v6837_v62 }
 0x642   :  { %v1566_v9 = vsel %vm1083_vm8, %v1488_v20, -inf }
 0x643   :  { %v1569_v28 = vsel %vm1083_vm8, %v1511_v26, -inf  ;;  %1567 = vmax.xlane.f32.xlu0 %v1566_v9  ;;  %v1575_v36 = vsel %vm1083_vm8, %v1557_v29, -inf }
 0x644   :  { %1570 = vmax.xlane.f32.xlu2 %v1569_v28 }
 0x647   :  { %v1489_v30 = vpop.f32.mrf.mxu3  ;;  %v1533_v31 = vpop.f32.mrf.mxu1 }
 0x648   :  { %v1512_v32 = vpop.f32.mrf.mxu0  ;;  %v1558_v33 = vpop.f32.mrf.mxu2  ;;  %v6935_v63 = vadd.f32 %v1533_v31, %v6837_v62 }
 0x64a   :  { %v1572_v13 = vsel %vm1083_vm8, %v6935_v63, -inf }
 0x64c   :  { %1576 = vmax.xlane.f32.xlu2 %v1575_v36 }
 0x64f   :  { %v1535_v37 = vpop.f32.mrf.mxu1 }
 0x654   :  { %1653 = vrot.lane.b32.xlu1 %v6767_v0, %s6189_s27 }
 0x657   :  { %1695 = vrot.lane.b32.xlu0 %v6778_v14, %s6189_s27 }
 0x65c   :  { %1716 = vrot.lane.b32.xlu1 %v6785_v21, %s6189_s27 }
 0x65f   :  { %1783 = vrot.lane.b32.xlu0 %v6767_v0, %s6190_s28 }
 0x664   :  { %1632 = vrot.lane.b32.xlu2 %v6763_v17, %s6189_s27  ;;  %1674 = vrot.lane.b32.xlu1 %v6774_v2, %s6189_s27 }
 0x667   :  { %1760 = vrot.lane.b32.xlu0 %v6763_v17, %s6190_s28 }
 0x66c   :  { %1737 = vrot.lane.b32.xlu1 %v6791_v27, %s6189_s27 }
 0x696   :  { %1573 = vmax.xlane.f32.xlu1 %v1572_v13 }
 0x6a7   :  { %v1565_v38 = vpop.xlane.xlu0 %1564 }
 0x6a8   :  { %v1579_v39 = vsub.f32 %v1465_v3, %v1565_v38 }
 0x6aa   :  { %v1586_v40 = vmul.f32 1.442695, %v1579_v39 }
 0x6ac   :  { %5931 = vpow2.f32 %v1586_v40 }
 0x6ae   :  { %v1562_v49 = vpop.xlane.xlu1 %1561 }
 0x6af   :  { %1806 = vrot.lane.b32.xlu1 %v6774_v2, %s6190_s28  ;;  %v1578_v1 = vsub.f32 %v6908_v4, %v1562_v49 }
 0x6b1   :  { %v1584_v16 = vmul.f32 1.442695, %v1578_v1 }
 0x6b2   :  { %v6941_v6 = vpop.eup %5931 }
 0x6b3   :  { %v1599_v41 = vsel %vm1083_vm8, %v6941_v6, 0.0 }
 0x6b4   :  { %1600 = vadd.xlane.f32.xlu0 %v1599_v41 }
 0x6b6   :  { %v1568_v45 = vpop.xlane.xlu0 %1567 }
 0x6b7   :  { %v1571_v42 = vpop.xlane.xlu2 %1570  ;;  %v1580_v48 = vsub.f32 %v1488_v20, %v1568_v45 }
 0x6b8   :  { %v1581_v46 = vsub.f32 %v1511_v26, %v1571_v42 }
 0x6b9   :  { %v1588_v50 = vmul.f32 1.442695, %v1580_v48 }
 0x6ba   :  { %v1590_v18 = vmul.f32 1.442695, %v1581_v46 }
 0x6bc   :  { %5933 = vpow2.f32 %v1590_v18 }
 0x6bd   :  { %5935 = vpow2.f32 %v1588_v50 }
 0x6bf   :  { %v1577_v52 = vpop.xlane.xlu2 %1576 }
 0x6c0   :  { %v1583_v43 = vsub.f32 %v1557_v29, %v1577_v52 }
 0x6c2   :  { %v6945_v47 = vpop.eup %5933  ;;  %v1594_v54 = vmul.f32 1.442695, %v1583_v43 }
 0x6c3   :  { %v1605_v60 = vsel %vm1083_vm8, %v6945_v47, 0.0  ;;  %v6951_v7 = vpop.eup %5935 }
 0x6c4   :  { %5937 = vpow2.f32 %v1594_v54  ;;  %1606 = vadd.xlane.f32.xlu0 %v1605_v60  ;;  %v1602_v4 = vsel %vm1083_vm8, %v6951_v7, 0.0 }
 0x6c5   :  { %5939 = vpow2.f32 %v1584_v16 }
 0x6c6   :  { %v1654_v61 = vpop.permute.xlu1 %1653 }
 0x6c7   :  { %v1659_v3 = vsel %vm1300_vm9, %v1654_v61, 0  ;;  %v1633_v5 = vpop.permute.xlu2 %1632 }
 0x6c8   :  { %v1638_v57 = vsel %vm1300_vm9, %v1633_v5, 0  ;;  %1668 = vmatpush.bf16.msrb.mxu0 %v1659_v3 }
 0x6c9   :  { %1647 = vmatpush.bf16.msrb.mxu3 %v1638_v57  ;;  %v1696_v10 = vpop.permute.xlu0 %1695 }
 0x6ca   :  { %v6954_v12 = vpop.eup %5937  ;;  %v1701_v15 = vsel %vm1300_vm9, %v1696_v10, 0 }
 0x6cb   :  { %v1611_v19 = vsel %vm1083_vm8, %v6954_v12, 0.0  ;;  %1710 = vmatpush.bf16.msra.mxu2 %v1701_v15  ;;  %v6963_v9 = vpop.eup %5939 }
 0x6cc   :  { %1612 = vadd.xlane.f32.xlu2 %v1611_v19  ;;  %1603 = vadd.xlane.f32.xlu0 %v1602_v4  ;;  %v1596_v30 = vsel %vm1083_vm8, %v6963_v9, 0.0 }
 0x6ce   :  { %v1717_v20 = vpop.permute.xlu1 %1716 }
 0x6cf   :  { %v1722_v22 = vsel %vm1300_vm9, %v1717_v20, 0 }
 0x6d0   :  { %1731 = vmatpush.bf16.msra.mxu3 %v1722_v22 }
 0x6d1   :  { %v1784_v25 = vpop.permute.xlu0 %1783 }
 0x6d2   :  { %v1789_v26 = vsel %vm1083_vm8, %v1784_v25, 0 }
 0x6d3   :  { %1798 = vmatpush.bf16.xpose.msrb.mxu2 %v1789_v26 }
 0x6d6   :  { %v1675_v28 = vpop.permute.xlu1 %1674 }
 0x6d7   :  { %v1680_v29 = vsel %vm1300_vm9, %v1675_v28, 0 }
 0x6d8   :  { %1689 = vmatpush.bf16.msrb.mxu1 %v1680_v29 }
 0x6d9   :  { %1597 = vadd.xlane.f32.xlu1 %v1596_v30  ;;  %v1761_v31 = vpop.permute.xlu0 %1760 }
 0x6da   :  { %v1766_v32 = vsel %vm1083_vm8, %v1761_v31, 0 }
 0x6dc   :  { %1775 = vmatpush.bf16.xpose.msra.mxu1 %v1766_v32 }
 0x6de   :  { %v1738_v33 = vpop.permute.xlu1 %1737 }
 0x6df   :  { %v1743_v36 = vsel %vm1300_vm9, %v1738_v33, 0 }
 0x6e0   :  { %1804 = vrot.lane.b32.xlu0 %v6774_v2, %s6191_s26  ;;  %1752 = vmatpush.bf16.msra.mxu0 %v1743_v36 }
 0x6e4   :  { %1781 = vrot.lane.b32.xlu2 %v6767_v0, %s6191_s26 }
 0x6e8   :  { %1827 = vrot.lane.b32.xlu0 %v6778_v14, %s6191_s26 }
 0x6ec   :  { %1850 = vrot.lane.b32.xlu2 %v6785_v21, %s6191_s26 }
 0x6f2   :  { %1829 = vrot.lane.b32.xlu1 %v6778_v14, %s6190_s28 }
 0x6f4   :  { %1989 = vrot.lane.b32.xlu2 %v6767_v0, %s6192_s29 }
 0x6fa   :  { %1758 = vrot.lane.b32.xlu1 %v6763_v17, %s6191_s26 }
 0x702   :  { %1875 = vrot.lane.b32.xlu1 %v6791_v27, %s6190_s28 }
 0x709   :  { %v1574_v37 = vpop.xlane.xlu1 %1573 }
 0x70a   :  { %v1582_v13 = vsub.f32 %v6935_v63, %v1574_v37  ;;  %1873 = vrot.lane.b32.xlu1 %v6791_v27, %s6191_s26 }
 0x70c   :  { %v1592_v38 = vmul.f32 1.442695, %v1582_v13 }
 0x70e   :  { %5941 = vpow2.f32 %v1592_v38 }
 0x712   :  { %1968 = vrot.lane.b32.xlu1 %v6763_v17, %s6192_s29 }
 0x714   :  { %v6991_v39 = vpop.eup %5941 }
 0x715   :  { %v1608_v40 = vsel %vm1083_vm8, %v6991_v39, 0.0 }
 0x716   :  { %1609 = vadd.xlane.f32.xlu0 %v1608_v40 }
 0x727   :  { %v1601_v41 = vpop.xlane.xlu0 %1600 }
 0x728   :  { %5943 = vrcp.f32 %v1601_v41 }
 0x72a   :  { %1852 = vrot.lane.b32.xlu0 %v6785_v21, %s6190_s28 }
 0x72e   :  { %v5944_v63 = vpop.eup %5943 }
 0x72f   :  { %v1621_v42 = vmul.f32 %v5944_v63, %v6941_v6  ;;  %v1807_v6 = vpop.permute.xlu1 %1806 }
 0x731   :  { %v1627_v45 = vpack.c.bf16 %v1621_v42, %v1621_v42 }
 0x732   :  { %2010 = vrot.lane.b32.xlu0 %v6774_v2, %s6192_s29 }
 0x733   :  { %5449 = vmatmul.msk.bf16.vlgmr.msrb.gmra.mxu0 %vm1083_vm8, %v1627_v45 }
 0x737   :  { %v1607_v46 = vpop.xlane.xlu0 %1606 }
 0x738   :  { %5945 = vrcp.f32 %v1607_v46 }
 0x73a   :  { %2031 = vrot.lane.b32.xlu0 %v6778_v14, %s6192_s29 }
 0x73e   :  { %v5946_v18 = vpop.eup %5945 }
 0x73f   :  { %v1623_v48 = vmul.f32 %v5946_v18, %v6945_v47  ;;  %v1613_v49 = vpop.xlane.xlu2 %1612  ;;  %v1604_v50 = vpop.xlane.xlu0 %1603 }
 0x740   :  { %5947 = vrcp.f32 %v1613_v49 }
 0x741   :  { %v1629_v52 = vpack.c.bf16 %v1623_v48, %v1623_v48  ;;  %5949 = vrcp.f32 %v1604_v50 }
 0x742   :  { %2096 = vrot.lane.b32.xlu0 %v6763_v17, %s6193_s1 }
 0x743   :  { %5451 = vmatmul.msk.bf16.vlgmr.msra.gmra.mxu2 %vm1083_vm8, %v1629_v52 }
 0x746   :  { %v5948_v43 = vpop.eup %5947 }
 0x747   :  { %v5950_v54 = vpop.eup %5949  ;;  %v1625_v60 = vmul.f32 %v5948_v43, %v6954_v12  ;;  %v1782_v5 = vpop.permute.xlu2 %1781  ;;  %v1812_v12 = vsel %vm1083_vm8, %v1807_v6, 0 }
 0x748   :  { %v1622_v61 = vmul.f32 %v5950_v54, %v6951_v7 }
 0x749   :  { %v1631_v1 = vpack.c.bf16 %v1625_v60, %v1625_v60 }
 0x74a   :  { %v1628_v47 = vpack.c.bf16 %v1622_v61, %v1622_v61  ;;  %2119 = vrot.lane.b32.xlu0 %v6767_v0, %s6193_s1 }
 0x74b   :  { %5453 = vmatmul.msk.bf16.vlgmr.msra.gmra.mxu0 %vm1083_vm8, %v1631_v1 }
 0x74c   :  { %5450 = vmatmul.msk.bf16.vlgmr.msrb.gmra.mxu1 %vm1083_vm8, %v1628_v47  ;;  %v1598_v3 = vpop.xlane.xlu1 %1597 }
 0x74d   :  { %5951 = vrcp.f32 %v1598_v3 }
 0x74f   :  { %v1851_v15 = vpop.permute.xlu2 %1850 }
 0x752   :  { %2052 = vrot.lane.b32.xlu0 %v6785_v21, %s6192_s29  ;;  %v1805_v16 = vpop.permute.xlu0 %1804 }
 0x753   :  { %v5952_v57 = vpop.eup %5951  ;;  %5455 = vmatmul.msk.bf16.vlgmr.msrb.gmra.mxu2 %vm1083_vm8, %v1782_v5 }
 0x754   :  { %v1620_v7 = vmul.f32 %v5952_v57, %v6963_v9 }
 0x756   :  { %v1626_v10 = vpack.c.bf16 %v1620_v7, %v1620_v7 }
 0x757   :  { %v1990_v19 = vpop.permute.xlu2 %1989 }
 0x758   :  { %5448 = vmatmul.msk.bf16.vlgmr.msrb.gmra.mxu3 %vm1083_vm8, %v1626_v10  ;;  %v1995_v22 = vsel %vm1300_vm9, %v1990_v19, 0 }
 0x759   :  { %1821 = vmatpush.bf16.xpose.msrb.mxu3 %v1812_v12 }
 0x75a   :  { %2073 = vrot.lane.b32.xlu0 %v6791_v27, %s6192_s29  ;;  %v1828_v25 = vpop.permute.xlu0 %1827 }
 0x764   :  { %v1830_v4 = vpop.permute.xlu1 %1829 }
 0x765   :  { %v1835_v20 = vsel %vm1083_vm8, %v1830_v4, 0 }
 0x766   :  { %1844 = vmatpush.bf16.xpose.msrb.mxu0 %v1835_v20 }
 0x76c   :  { %v1759_v26 = vpop.permute.xlu1 %1758 }
 0x76d   :  { %5454 = vmatmul.msk.bf16.vlgmr.msra.gmra.mxu1 %vm1083_vm8, %v1759_v26  ;;  %5457 = vmatmul.msk.bf16.vlgmr.msrb.gmra.mxu0 %vm1083_vm8, %v1828_v25 }
 0x76e   :  { %2004 = vmatpush.bf16.msra.mxu0 %v1995_v22 }
 0x774   :  { %v1876_v9 = vpop.permute.xlu1 %1875 }
 0x775   :  { %v1881_v28 = vsel %vm1083_vm8, %v1876_v9, 0 }
 0x776   :  { %1890 = vmatpush.bf16.xpose.msra.mxu2 %v1881_v28 }
 0x77c   :  { %v1874_v29 = vpop.permute.xlu1 %1873 }
 0x77d   :  { %5459 = vmatmul.msk.bf16.vlgmr.msra.gmra.mxu2 %vm1083_vm8, %v1874_v29 }
 0x784   :  { %v1969_v33 = vpop.permute.xlu1 %1968 }
 0x785   :  { %v1974_v37 = vsel %vm1300_vm9, %v1969_v33, 0 }
 0x789   :  { %v1610_v30 = vpop.xlane.xlu0 %1609 }
 0x78a   :  { %5953 = vrcp.f32 %v1610_v30 }
 0x790   :  { %v5954_v31 = vpop.eup %5953 }
 0x791   :  { %v1624_v32 = vmul.f32 %v5954_v31, %v6991_v39 }
 0x793   :  { %v1630_v36 = vpack.c.bf16 %v1624_v32, %v1624_v32 }
 0x795   :  { %5452 = vmatmul.msk.bf16.vlgmr.msra.gmra.mxu3 %vm1083_vm8, %v1630_v36 }
 0x796   :  { %1983 = vmatpush.bf16.msra.mxu3 %v1974_v37 }
 0x79c   :  { %v1853_v13 = vpop.permute.xlu0 %1852 }
 0x79d   :  { %v1858_v38 = vsel %vm1083_vm8, %v1853_v13, 0 }
 0x79e   :  { %1867 = vmatpush.bf16.xpose.msrb.mxu1 %v1858_v38 }
 0x7a4   :  { %v2011_v40 = vpop.permute.xlu0 %2010 }
 0x7a5   :  { %v2016_v41 = vsel %vm1300_vm9, %v2011_v40, 0  ;;  %5456 = vmatmul.msk.bf16.vlgmr.msrb.gmra.mxu3 %vm1083_vm8, %v1805_v16  ;;  %5458 = vmatmul.msk.bf16.vlgmr.msrb.gmra.mxu1 %vm1083_vm8, %v1851_v15 }
 0x7a6   :  { %2025 = vmatpush.bf16.msra.mxu1 %v2016_v41 }
 0x7ac   :  { %v2032_v39 = vpop.permute.xlu0 %2031 }
 0x7ad   :  { %v2037_v63 = vsel %vm1300_vm9, %v2032_v39, 0 }
 0x7ae   :  { %2046 = vmatpush.bf16.msrb.mxu2 %v2037_v63 }
 0x7b0   :  { %v7035_v42 = vpop.f32.mrf.mxu0 }
 0x7b4   :  { %v2097_v45 = vpop.permute.xlu0 %2096 }
 0x7b5   :  { %v2102_v46 = vsel %vm1083_vm8, %v2097_v45, 0 }
 0x7b6   :  { %2111 = vmatpush.bf16.xpose.msrb.mxu1 %v2102_v46 }
 0x7b8   :  { %v1672_v18 = vpop.f32.mrf.mxu0 }
 0x7bc   :  { %v2120_v48 = vpop.permute.xlu0 %2119 }
 0x7bd   :  { %v2125_v49 = vsel %vm1083_vm8, %v2120_v48, 0 }
 0x7be   :  { %2134 = vmatpush.bf16.xpose.msra.mxu2 %v2125_v49 }
 0x7c4   :  { %v2053_v50 = vpop.permute.xlu0 %2052 }
 0x7c5   :  { %v2058_v52 = vsel %vm1300_vm9, %v2053_v50, 0 }
 0x7c6   :  { %v7040_v6 = vpop.f32.mrf.mxu2  ;;  %2067 = vmatpush.bf16.msrb.mxu3 %v2058_v52 }
 0x7c8   :  { %v7042_v43 = vpop.f32.mrf.mxu0 }
 0x7c9   :  { %v7044_v54 = vpop.f32.mrf.mxu1 }
 0x7ca   :  { %v5788_v60 = vpack.i.bf16 %v7040_v6, %v7044_v54 }
 0x7cc   :  { %v2074_v61 = vpop.permute.xlu0 %2073 }
 0x7cd   :  { %v2079_v1 = vsel %vm1300_vm9, %v2074_v61, 0 }
 0x7ce   :  { %v1714_v47 = vpop.f32.mrf.mxu2  ;;  %2088 = vmatpush.bf16.msrb.mxu0 %v2079_v1 }
 0x7d0   :  { %v1756_v3 = vpop.f32.mrf.mxu0 }
 0x7d1   :  { %v1693_v5 = vpop.f32.mrf.mxu1 }
 0x7d6   :  { %v1800_v57 = vpop.f32.mrf.mxu2 }
 0x7d7   :  { %v1801_v7 = vadd.f32 %v1800_v57, %v6837_v62 }
 0x7d9   :  { %v1899_v10 = vsel %vm1083_vm8, %v1801_v7, -inf }
 0x7da   :  { %1900 = vmax.xlane.f32.xlu1 %v1899_v10 }
 0x7db   :  { %v7051_v12 = vpop.f32.mrf.mxu3 }
 0x7dc   :  { %v5773_v15 = vpack.i.bf16 %v7035_v42, %v7051_v12 }
 0x7de   :  { %v1802_v16 = vpop.f32.mrf.mxu2 }
 0x7e3   :  { %v1651_v19 = vpop.f32.mrf.mxu3 }
 0x7ea   :  { %v1777_v4 = vpop.f32.mrf.mxu1  ;;  %v1846_v20 = vpop.f32.mrf.mxu0 }
 0x7eb   :  { %v1778_v22 = vadd.f32 %v1777_v4, %v6837_v62  ;;  %v1847_v26 = vadd.f32 %v1846_v20, %v6837_v62 }
 0x7ed   :  { %v1896_v25 = vsel %vm1083_vm8, %v1778_v22, -inf  ;;  %v1905_v29 = vsel %vm1083_vm8, %v1847_v26, -inf }
 0x7ee   :  { %1897 = vmax.xlane.f32.xlu0 %v1896_v25 }
 0x7f2   :  { %v1779_v9 = vpop.f32.mrf.mxu1  ;;  %v1848_v28 = vpop.f32.mrf.mxu0 }
 0x7f6   :  { %1906 = vmax.xlane.f32.xlu0 %v1905_v29 }
 0x800   :  { %v1892_v30 = vpop.f32.mrf.mxu2 }
 0x801   :  { %v1893_v63 = vadd.f32 %v1892_v30, %v6837_v62 }
 0x803   :  { %v1911_v46 = vsel %vm1083_vm8, %v1893_v63, -inf }
 0x808   :  { %v1894_v31 = vpop.f32.mrf.mxu2 }
 0x80a   :  { %2094 = vrot.lane.b32.xlu0 %v6763_v17, %s6194_s30 }
 0x818   :  { %v7061_v32 = vpop.f32.mrf.mxu3 }
 0x820   :  { %v1735_v33 = vpop.f32.mrf.mxu3 }
 0x822   :  { %v1869_v36 = vpop.f32.mrf.mxu1 }
 0x823   :  { %v7064_v37 = vadd.f32 %v1869_v36, %v6837_v62 }
 0x825   :  { %v1908_v13 = vsel %vm1083_vm8, %v7064_v37, -inf }
 0x826   :  { %1909 = vmax.xlane.f32.xlu1 %v1908_v13 }
 0x828   :  { %v1823_v38 = vpop.f32.mrf.mxu3 }
 0x829   :  { %v1824_v40 = vadd.f32 %v1823_v38, %v6837_v62 }
 0x82a   :  { %v1871_v41 = vpop.f32.mrf.mxu1 }
 0x82b   :  { %v1902_v39 = vsel %vm1083_vm8, %v1824_v40, -inf }
 0x82c   :  { %1903 = vmax.xlane.f32.xlu2 %v1902_v39 }
 0x830   :  { %v1825_v45 = vpop.f32.mrf.mxu3 }
 0x834   :  { %1912 = vmax.xlane.f32.xlu2 %v1911_v46 }
 0x84d   :  { %v1901_v18 = vpop.xlane.xlu1 %1900 }
 0x84e   :  { %v1915_v48 = vsub.f32 %v1801_v7, %v1901_v18 }
 0x850   :  { %v1922_v49 = vmul.f32 1.442695, %v1915_v48 }
 0x852   :  { %5955 = vpow2.f32 %v1922_v49 }
 0x858   :  { %v5956_v50 = vpop.eup %5955 }
 0x859   :  { %v1935_v52 = vsel %vm1083_vm8, %v5956_v50, 0.0 }
 0x85a   :  { %1936 = vadd.xlane.f32.xlu1 %v1935_v52 }
 0x861   :  { %v1898_v61 = vpop.xlane.xlu0 %1897 }
 0x862   :  { %v1914_v1 = vsub.f32 %v1778_v22, %v1898_v61 }
 0x864   :  { %v1920_v47 = vmul.f32 1.442695, %v1914_v1 }
 0x866   :  { %5957 = vpow2.f32 %v1920_v47 }
 0x869   :  { %v1907_v3 = vpop.xlane.xlu0 %1906 }
 0x86a   :  { %v1917_v5 = vsub.f32 %v1847_v26, %v1907_v3 }
 0x86c   :  { %v5958_v57 = vpop.eup %5957  ;;  %v1926_v10 = vmul.f32 1.442695, %v1917_v5 }
 0x86d   :  { %v1932_v16 = vsel %vm1083_vm8, %v5958_v57, 0.0 }
 0x86e   :  { %5959 = vpow2.f32 %v1926_v10  ;;  %1933 = vadd.xlane.f32.xlu0 %v1932_v16 }
 0x873   :  { %2142 = vrot.lane.b32.xlu1 %v6774_v2, %s6193_s1 }
 0x874   :  { %v5960_v7 = vpop.eup %5959 }
 0x875   :  { %v1941_v19 = vsel %vm1083_vm8, %v5960_v7, 0.0 }
 0x876   :  { %1942 = vadd.xlane.f32.xlu0 %v1941_v19 }
 0x87c   :  { %v2095_v41 = vpop.permute.xlu0 %2094 }
 0x88a   :  { %2165 = vrot.lane.b32.xlu0 %v6778_v14, %s6193_s1 }
 0x892   :  { %2140 = vrot.lane.b32.xlu0 %v6774_v2, %s6194_s30 }
 0x899   :  { %v1910_v33 = vpop.xlane.xlu1 %1909 }
 0x89a   :  { %2163 = vrot.lane.b32.xlu0 %v6778_v14, %s6194_s30  ;;  %v1918_v39 = vsub.f32 %v7064_v37, %v1910_v33 }
 0x89f   :  { %v1904_v4 = vpop.xlane.xlu2 %1903 }
 0x8a0   :  { %v1916_v20 = vsub.f32 %v1824_v40, %v1904_v4 }
 0x8a2   :  { %v1924_v22 = vmul.f32 1.442695, %v1916_v20  ;;  %2186 = vrot.lane.b32.xlu0 %v6785_v21, %s6194_s30 }
 0x8a4   :  { %5961 = vpow2.f32 %v1924_v22 }
 0x8a7   :  { %v1913_v25 = vpop.xlane.xlu2 %1912 }
 0x8a8   :  { %v1919_v26 = vsub.f32 %v1893_v63, %v1913_v25  ;;  %v1928_v63 = vmul.f32 1.442695, %v1918_v39 }
 0x8aa   :  { %v5962_v9 = vpop.eup %5961  ;;  %v1930_v28 = vmul.f32 1.442695, %v1919_v26 }
 0x8ab   :  { %v1938_v29 = vsel %vm1083_vm8, %v5962_v9, 0.0 }
 0x8ac   :  { %5963 = vpow2.f32 %v1930_v28  ;;  %1939 = vadd.xlane.f32.xlu2 %v1938_v29 }
 0x8b2   :  { %v5964_v30 = vpop.eup %5963 }
 0x8b3   :  { %v1947_v31 = vsel %vm1083_vm8, %v5964_v30, 0.0 }
 0x8b4   :  { %1948 = vadd.xlane.f32.xlu1 %v1947_v31 }
 0x8c4   :  { %2117 = vrot.lane.b32.xlu2 %v6767_v0, %s6194_s30 }
 0x8cd   :  { %v1937_v36 = vpop.xlane.xlu1 %1936  ;;  %2211 = vrot.lane.b32.xlu1 %v6791_v27, %s6193_s1 }
 0x8ce   :  { %5965 = vrcp.f32 %v1937_v36 }
 0x8d4   :  { %v5966_v13 = vpop.eup %5965 }
 0x8d5   :  { %v1957_v38 = vmul.f32 %v5966_v13, %v5956_v50 }
 0x8d7   :  { %v1963_v40 = vpack.c.bf16 %v1957_v38, %v1957_v38 }
 0x8d9   :  { %5461 = vmatmul.msk.bf16.vlgmr.msra.gmra.mxu0 %vm1083_vm8, %v1963_v40 }
 0x8e1   :  { %v1934_v45 = vpop.xlane.xlu0 %1933 }
 0x8e2   :  { %5967 = vrcp.f32 %v1934_v45 }
 0x8e3   :  { %5969 = vpow2.f32 %v1928_v63 }
 0x8e5   :  { %v2143_v52 = vpop.permute.xlu1 %2142 }
 0x8e6   :  { %v2148_v50 = vsel %vm1083_vm8, %v2143_v52, 0 }
 0x8e8   :  { %v5968_v46 = vpop.eup %5967 }
 0x8e9   :  { %v5970_v18 = vpop.eup %5969  ;;  %v1956_v48 = vmul.f32 %v5968_v46, %v5958_v57  ;;  %v1943_v49 = vpop.xlane.xlu0 %1942 }
 0x8ea   :  { %5971 = vrcp.f32 %v1943_v49  ;;  %v1944_v1 = vsel %vm1083_vm8, %v5970_v18, 0.0 }
 0x8eb   :  { %v1962_v61 = vpack.c.bf16 %v1956_v48, %v1956_v48 }
 0x8ed   :  { %1945 = vadd.xlane.f32.xlu2 %v1944_v1  ;;  %5460 = vmatmul.msk.bf16.vlgmr.msra.gmra.mxu3 %vm1083_vm8, %v1962_v61 }
 0x8ee   :  { %2157 = vmatpush.bf16.xpose.msra.mxu3 %v2148_v50 }
 0x8f0   :  { %v5972_v37 = vpop.eup %5971 }
 0x8f1   :  { %v1959_v47 = vmul.f32 %v5972_v37, %v5960_v7 }
 0x8f3   :  { %v1965_v3 = vpack.c.bf16 %v1959_v47, %v1959_v47 }
 0x8f5   :  { %5463 = vmatmul.msk.bf16.vlgmr.msrb.gmra.mxu2 %vm1083_vm8, %v1965_v3 }
 0x8fc   :  { %v2166_v5 = vpop.permute.xlu0 %2165 }
 0x8fd   :  { %v2171_v57 = vsel %vm1083_vm8, %v2166_v5, 0 }
 0x8fe   :  { %2180 = vmatpush.bf16.xpose.msra.mxu0 %v2171_v57 }
 0x904   :  { %v2141_v28 = vpop.permute.xlu0 %2140 }
 0x905   :  { %2188 = vrot.lane.b32.xlu2 %v6785_v21, %s6193_s1 }
 0x90d   :  { %2209 = vrot.lane.b32.xlu2 %v6791_v27, %s6194_s30 }
 0x91f   :  { %v1940_v10 = vpop.xlane.xlu2 %1939 }
 0x920   :  { %5973 = vrcp.f32 %v1940_v10 }
 0x926   :  { %v5974_v16 = vpop.eup %5973 }
 0x927   :  { %v1958_v19 = vmul.f32 %v5974_v16, %v5962_v9  ;;  %v2118_v4 = vpop.permute.xlu2 %2117  ;;  %v1949_v20 = vpop.xlane.xlu1 %1948 }
 0x928   :  { %5975 = vrcp.f32 %v1949_v20  ;;  %5467 = vmatmul.msk.bf16.vlgmr.msra.gmra.mxu2 %vm1083_vm8, %v2118_v4  ;;  %v2164_v9 = vpop.permute.xlu0 %2163 }
 0x929   :  { %v1964_v7 = vpack.c.bf16 %v1958_v19, %v1958_v19 }
 0x92b   :  { %5462 = vmatmul.msk.bf16.vlgmr.msra.gmra.mxu1 %vm1083_vm8, %v1964_v7 }
 0x92e   :  { %v5976_v22 = vpop.eup %5975 }
 0x92f   :  { %v1961_v25 = vmul.f32 %v5976_v22, %v5964_v30 }
 0x931   :  { %v1967_v26 = vpack.c.bf16 %v1961_v25, %v1961_v25 }
 0x933   :  { %5465 = vmatmul.msk.bf16.vlgmr.msrb.gmra.mxu0 %vm1083_vm8, %v1967_v26 }
 0x93b   :  { %5466 = vmatmul.msk.bf16.vlgmr.msrb.gmra.mxu1 %vm1083_vm8, %v2095_v41  ;;  %v2187_v41 = vpop.permute.xlu0 %2186 }
 0x93f   :  { %v2212_v29 = vpop.permute.xlu1 %2211 }
 0x940   :  { %v2217_v31 = vsel %vm1083_vm8, %v2212_v29, 0 }
 0x941   :  { %2226 = vmatpush.bf16.xpose.msrb.mxu2 %v2217_v31 }
 0x943   :  { %5469 = vmatmul.msk.bf16.vlgmr.msra.gmra.mxu0 %vm1083_vm8, %v2164_v9 }
 0x956   :  { %v7108_v33 = vpop.f32.mrf.mxu0 }
 0x95e   :  { %v2008_v36 = vpop.f32.mrf.mxu0 }
 0x960   :  { %v1946_v13 = vpop.xlane.xlu2 %1945 }
 0x961   :  { %5977 = vrcp.f32 %v1946_v13 }
 0x967   :  { %v5978_v38 = vpop.eup %5977 }
 0x968   :  { %v1960_v30 = vmul.f32 %v5978_v38, %v5970_v18  ;;  %v2189_v40 = vpop.permute.xlu2 %2188 }
 0x969   :  { %v2194_v39 = vsel %vm1083_vm8, %v2189_v40, 0 }
 0x96a   :  { %v1966_v63 = vpack.c.bf16 %v1960_v30, %v1960_v30  ;;  %2203 = vmatpush.bf16.xpose.msra.mxu1 %v2194_v39 }
 0x96c   :  { %5464 = vmatmul.msk.bf16.vlgmr.msrb.gmra.mxu3 %vm1083_vm8, %v1966_v63 }
 0x970   :  { %v2210_v45 = vpop.permute.xlu2 %2209  ;;  %v7112_v46 = vpop.f32.mrf.mxu3 }
 0x971   :  { %v5778_v48 = vpack.i.bf16 %v7108_v33, %v7112_v46  ;;  %5470 = vmatmul.msk.bf16.vlgmr.msra.gmra.mxu1 %vm1083_vm8, %v2187_v41  ;;  %5471 = vmatmul.msk.bf16.vlgmr.msrb.gmra.mxu2 %vm1083_vm8, %v2210_v45 }
 0x978   :  { %v1987_v49 = vpop.f32.mrf.mxu3  ;;  %v7118_v18 = vpop.f32.mrf.mxu2 }
 0x97c   :  { %5468 = vmatmul.msk.bf16.vlgmr.msra.gmra.mxu3 %vm1083_vm8, %v2141_v28 }
 0x980   :  { %v2050_v52 = vpop.f32.mrf.mxu2 }
 0x9a8   :  { %v7121_v61 = vpop.f32.mrf.mxu1 }
 0x9a9   :  { %v5793_v1 = vpack.i.bf16 %v7118_v18, %v7121_v61 }
 0x9ab   :  { %v2136_v50 = vpop.f32.mrf.mxu2 }
 0x9ac   :  { %v2137_v37 = vadd.f32 %v2136_v50, %v6837_v62 }
 0x9ae   :  { %v2235_v47 = vsel %vm1083_vm8, %v2137_v37, -inf }
 0x9af   :  { %2236 = vmax.xlane.f32.xlu0 %v2235_v47 }
 0x9b0   :  { %v2029_v3 = vpop.f32.mrf.mxu1  ;;  %v7127_v5 = vpop.f32.mrf.mxu0 }
 0x9b3   :  { %v2138_v57 = vpop.f32.mrf.mxu2 }
 0x9b8   :  { %v2092_v10 = vpop.f32.mrf.mxu0  ;;  %v2113_v16 = vpop.f32.mrf.mxu1 }
 0x9b9   :  { %v2114_v19 = vadd.f32 %v2113_v16, %v6837_v62 }
 0x9bb   :  { %v2232_v4 = vsel %vm1083_vm8, %v2114_v19, -inf }
 0x9bc   :  { %2233 = vmax.xlane.f32.xlu1 %v2232_v4 }
 0x9c0   :  { %v2115_v20 = vpop.f32.mrf.mxu1  ;;  %v2182_v7 = vpop.f32.mrf.mxu0 }
 0x9c1   :  { %v2183_v22 = vadd.f32 %v2182_v7, %v6837_v62 }
 0x9c3   :  { %v2241_v25 = vsel %vm1083_vm8, %v2183_v22, -inf }
 0x9c4   :  { %2242 = vmax.xlane.f32.xlu2 %v2241_v25 }
 0x9c8   :  { %v2184_v26 = vpop.f32.mrf.mxu0 }
 0x9dc   :  { %2304 = vrot.lane.b32.xlu2 %v6763_v17, %s8199_s2 }
 0x9ee   :  { %v2205_v28 = vpop.f32.mrf.mxu1 }
 0x9ef   :  { %v2206_v29 = vadd.f32 %v2205_v28, %v6837_v62  ;;  %v7136_v31 = vpop.f32.mrf.mxu3 }
 0x9f0   :  { %v5808_v9 = vpack.i.bf16 %v7127_v5, %v7136_v31 }
 0x9f1   :  { %v2244_v36 = vsel %vm1083_vm8, %v2206_v29, -inf }
 0x9f2   :  { %2245 = vmax.xlane.f32.xlu0 %v2244_v36 }
 0x9f4   :  { %v2228_v13 = vpop.f32.mrf.mxu2 }
 0x9f5   :  { %v2229_v63 = vadd.f32 %v2228_v13, %v6837_v62 }
 0x9f6   :  { %v2207_v38 = vpop.f32.mrf.mxu1 }
 0x9f7   :  { %v2071_v30 = vpop.f32.mrf.mxu3  ;;  %v2247_v45 = vsel %vm1083_vm8, %v2229_v63, -inf }
 0x9fc   :  { %v2230_v40 = vpop.f32.mrf.mxu2 }
 0x9ff   :  { %v2159_v39 = vpop.f32.mrf.mxu3 }
 0xa00   :  { %v2160_v17 = vadd.f32 %v2159_v39, %v6837_v62 }
 0xa02   :  { %v2238_v41 = vsel %vm1083_vm8, %v2160_v17, -inf }
 0xa03   :  { %2239 = vmax.xlane.f32.xlu1 %v2238_v41 }
 0xa05   :  { %2248 = vmax.xlane.f32.xlu2 %v2247_v45 }
 0xa07   :  { %v2161_v49 = vpop.f32.mrf.mxu3 }
 0xa1d   :  { %2346 = vrot.lane.b32.xlu2 %v6774_v2, %s8199_s2 }
 0xa22   :  { %v2237_v52 = vpop.xlane.xlu0 %2236 }
 0xa23   :  { %v2251_v50 = vsub.f32 %v2137_v37, %v2237_v52 }
 0xa25   :  { %v2258_v47 = vmul.f32 1.442695, %v2251_v50 }
 0xa27   :  { %5979 = vpow2.f32 %v2258_v47 }
 0xa2d   :  { %v7147_v3 = vpop.eup %5979 }
 0xa2e   :  { %v2271_v57 = vsel %vm1083_vm8, %v7147_v3, 0.0 }
 0xa2f   :  { %v2234_v10 = vpop.xlane.xlu1 %2233  ;;  %2272 = vadd.xlane.f32.xlu0 %v2271_v57 }
 0xa30   :  { %v2250_v16 = vsub.f32 %v2114_v19, %v2234_v10 }
 0xa32   :  { %v2256_v4 = vmul.f32 1.442695, %v2250_v16 }
 0xa34   :  { %5981 = vpow2.f32 %v2256_v4 }
 0xa37   :  { %v2243_v20 = vpop.xlane.xlu2 %2242 }
 0xa38   :  { %v2253_v26 = vsub.f32 %v2183_v22, %v2243_v20 }
 0xa3a   :  { %v5982_v7 = vpop.eup %5981  ;;  %v2262_v28 = vmul.f32 1.442695, %v2253_v26 }
 0xa3b   :  { %v2268_v25 = vsel %vm1083_vm8, %v5982_v7, 0.0 }
 0xa3c   :  { %2269 = vadd.xlane.f32.xlu1 %v2268_v25  ;;  %5983 = vpow2.f32 %v2262_v28 }
 0xa3f   :  { %v2305_v2 = vpop.permute.xlu2 %2304 }
 0xa40   :  { %v2310_v37 = vsel %vm1300_vm9, %v2305_v2, 0 }
 0xa41   :  { %2319 = vmatpush.bf16.msrb.mxu3 %v2310_v37 }
 0xa42   :  { %v5984_v19 = vpop.eup %5983 }
 0xa43   :  { %2367 = vrot.lane.b32.xlu0 %v6778_v14, %s8199_s2  ;;  %v2277_v13 = vsel %vm1083_vm8, %v5984_v19, 0.0 }
 0xa55   :  { %2325 = vrot.lane.b32.xlu1 %v6767_v0, %s8199_s2 }
 0xa65   :  { %v2246_v36 = vpop.xlane.xlu0 %2245 }
 0xa66   :  { %v2254_v38 = vsub.f32 %v2206_v29, %v2246_v36 }
 0xa68   :  { %v2264_v30 = vmul.f32 1.442695, %v2254_v38 }
 0xa6a   :  { %5985 = vpow2.f32 %v2264_v30 }
 0xa6d   :  { %2278 = vadd.xlane.f32.xlu0 %v2277_v13 }
 0xa70   :  { %v5986_v14 = vpop.eup %5985 }
 0xa71   :  { %v2280_v0 = vsel %vm1083_vm8, %v5986_v14, 0.0 }
 0xa76   :  { %v2240_v40 = vpop.xlane.xlu1 %2239 }
 0xa77   :  { %v2252_v39 = vsub.f32 %v2160_v17, %v2240_v40 }
 0xa78   :  { %v2249_v41 = vpop.xlane.xlu2 %2248 }
 0xa79   :  { %v2260_v45 = vmul.f32 1.442695, %v2252_v39  ;;  %v2255_v49 = vsub.f32 %v2229_v63, %v2249_v41 }
 0xa7b   :  { %5987 = vpow2.f32 %v2260_v45  ;;  %v2266_v52 = vmul.f32 1.442695, %v2255_v49 }
 0xa7d   :  { %5989 = vpow2.f32 %v2266_v52 }
 0xa7f   :  { %2281 = vadd.xlane.f32.xlu1 %v2280_v0 }
 0xa80   :  { %v2347_v22 = vpop.permute.xlu2 %2346 }
 0xa81   :  { %v5988_v50 = vpop.eup %5987  ;;  %v2352_v47 = vsel %vm1300_vm9, %v2347_v22, 0  ;;  %v5740_v22 = vld [vmem:[%s8183_s9 + $0x8] sm:$0xff] }
 0xa82   :  { %2361 = vmatpush.bf16.msrb.mxu1 %v2352_v47  ;;  %v2274_v29 = vsel %vm1083_vm8, %v5988_v50, 0.0 }
 0xa83   :  { %v5990_v57 = vpop.eup %5989  ;;  %2275 = vadd.xlane.f32.xlu0 %v2274_v29 }
 0xa84   :  { %v2283_v17 = vsel %vm1083_vm8, %v5990_v57, 0.0 }
 0xa85   :  { %2284 = vadd.xlane.f32.xlu2 %v2283_v17 }
 0xa86   :  { %2560 = vmatpush.bf16.msra.mxu1 %v5740_v22 }
 0xa97   :  { %2388 = vrot.lane.b32.xlu0 %v6785_v21, %s8199_s2 }
 0xa9d   :  { %5789 = vrot.lane.b32.xlu2 %v5788_v60, %s8197_s20 }
 0xa9f   :  { %2409 = vrot.lane.b32.xlu0 %v6791_v27, %s8199_s2 }
 0xaa2   :  { %v2273_v63 = vpop.xlane.xlu0 %2272 }
 0xaa7   :  { %5774 = vrot.lane.b32.xlu0 %v5773_v15, %s8197_s20 }
 0xaaf   :  { %v2270_v10 = vpop.xlane.xlu1 %2269  ;;  %5779 = vrot.lane.b32.xlu0 %v5778_v48, %s8195_s18 }
 0xab0   :  { %5991 = vrcp.f32 %v2270_v10  ;;  %v5739_v10 = vld [vmem:[%s8183_s9] sm:$0xff] }
 0xab1   :  { %5993 = vrcp.f32 %v2273_v63  ;;  %2561 = vmatpush.bf16.msra.mxu1 %v5739_v10 }
 0xab5   :  { %v2368_v21 = vpop.permute.xlu0 %2367 }
 0xab6   :  { %v5992_v6 = vpop.eup %5991  ;;  %v2373_v54 = vsel %vm1300_vm9, %v2368_v21, 0 }
 0xab7   :  { %v2292_v60 = vmul.f32 %v5992_v6, %v5982_v7  ;;  %5794 = vrot.lane.b32.xlu0 %v5793_v1, %s8195_s18  ;;  %2382 = vmatpush.bf16.msra.mxu2 %v2373_v54  ;;  %v5994_v42 = vpop.eup %5993 }
 0xab8   :  { %v2293_v12 = vmul.f32 %v5994_v42, %v7147_v3 }
 0xab9   :  { %v2298_v27 = vpack.c.bf16 %v2292_v60, %v2292_v60 }
 0xaba   :  { %v2299_v46 = vpack.c.bf16 %v2293_v12, %v2293_v12 }
 0xabb   :  { %5472 = vmatmul.msk.bf16.vlgmr.msrb.gmra.mxu3 %vm1083_vm8, %v2298_v27 }
 0xac7   :  { %v2326_v15 = vpop.permute.xlu1 %2325 }
 0xac8   :  { %v2331_v33 = vsel %vm1300_vm9, %v2326_v15, 0 }
 0xac9   :  { %2340 = vmatpush.bf16.msrb.mxu0 %v2331_v33 }
 0xacc   :  { %5473 = vmatmul.msk.bf16.vlgmr.msrb.gmra.mxu0 %vm1083_vm8, %v2299_v46 }
 0xae0   :  { %v2279_v48 = vpop.xlane.xlu0 %2278 }
 0xae1   :  { %5995 = vrcp.f32 %v2279_v48 }
 0xae7   :  { %v5996_v16 = vpop.eup %5995 }
 0xae8   :  { %v2295_v18 = vmul.f32 %v5996_v16, %v5984_v19 }
 0xaea   :  { %v2301_v61 = vpack.c.bf16 %v2295_v18, %v2295_v18 }
 0xaec   :  { %5475 = vmatmul.msk.bf16.vlgmr.msra.gmra.mxu2 %vm1083_vm8, %v2301_v61 }
 0xaf2   :  { %v2282_v4 = vpop.xlane.xlu1 %2281 }
 0xaf6   :  { %v2276_v1 = vpop.xlane.xlu0 %2275 }
 0xaf7   :  { %5997 = vrcp.f32 %v2276_v1 }
 0xaf8   :  { %5999 = vrcp.f32 %v2282_v4  ;;  %v2285_v25 = vpop.xlane.xlu2 %2284 }
 0xaf9   :  { %6001 = vrcp.f32 %v2285_v25 }
 0xafd   :  { %v5998_v20 = vpop.eup %5997 }
 0xafe   :  { %v2294_v7 = vmul.f32 %v5998_v20, %v5988_v50  ;;  %v6000_v2 = vpop.eup %5999 }
 0xaff   :  { %v2296_v37 = vmul.f32 %v6000_v2, %v5986_v14  ;;  %v6002_v36 = vpop.eup %6001 }
 0xb00   :  { %v2300_v3 = vpack.c.bf16 %v2294_v7, %v2294_v7  ;;  %v2297_v13 = vmul.f32 %v6002_v36, %v5990_v57  ;;  %v5803_v57 = vpack.i.bf16 %v7042_v43, %v7061_v32  ;;  %v5790_v4 = vpop.permute.xlu2 %5789 }
 0xb01   :  { %v2302_v19 = vpack.c.bf16 %v2296_v37, %v2296_v37  ;;  %v5792_v20 = vunpack.i.h.bf16 %v5790_v4 }
 0xb02   :  { %5474 = vmatmul.msk.bf16.vlgmr.msrb.gmra.mxu1 %vm1083_vm8, %v2300_v3  ;;  %v2303_v40 = vpack.c.bf16 %v2297_v13, %v2297_v13 }
 0xb03   :  { %v2505_v25 = vsel %vm1083_vm8, %v6897_v58, %v5792_v20 }
 0xb09   :  { %v2389_v26 = vpop.permute.xlu0 %2388 }
 0xb0a   :  { %v2394_v28 = vsel %vm1300_vm9, %v2389_v26, 0 }
 0xb0b   :  { %2403 = vmatpush.bf16.msra.mxu3 %v2394_v28 }
 0xb0e   :  { %5476 = vmatmul.msk.bf16.vlgmr.msra.gmra.mxu3 %vm1083_vm8, %v2302_v19 }
 0xb11   :  { %v2410_v38 = vpop.permute.xlu0 %2409 }
 0xb12   :  { %v2415_v30 = vsel %vm1300_vm9, %v2410_v38, 0 }
 0xb13   :  { %2424 = vmatpush.bf16.msra.mxu0 %v2415_v30 }
 0xb16   :  { %5477 = vmatmul.msk.bf16.vlgmr.msra.gmra.mxu0 %vm1083_vm8, %v2303_v40 }
 0xb19   :  { %v5775_v21 = vpop.permute.xlu0 %5774 }
 0xb1a   :  { %v5777_v54 = vunpack.i.h.bf16 %v5775_v21  ;;  %v5776_v60 = vunpack.i.l.bf16 %v5775_v21 }
 0xb1c   :  { %v2503_v42 = vsel %vm1083_vm8, %v6895_v55, %v5777_v54  ;;  %v2502_v12 = vsel %vm1083_vm8, %v6893_v35, %v5776_v60  ;;  %v5791_v55 = vunpack.i.l.bf16 %v5790_v4 }
 0xb1e   :  { %v2504_v2 = vsel %vm1083_vm8, %v6899_v11, %v5791_v55 }
 0xb21   :  { %v5780_v6 = vpop.permute.xlu0 %5779 }
 0xb22   :  { %v5782_v27 = vunpack.i.h.bf16 %v5780_v6  ;;  %v5781_v43 = vunpack.i.l.bf16 %v5780_v6 }
 0xb24   :  { %v2509_v46 = vsel %vm2508_vm11, %v2502_v12, %v5781_v43  ;;  %v2510_v48 = vsel %vm2508_vm11, %v2503_v42, %v5782_v27 }
 0xb29   :  { %v5795_v1 = vpop.permute.xlu0 %5794 }
 0xb2a   :  { %v5797_v7 = vunpack.i.h.bf16 %v5795_v1  ;;  %v5796_v3 = vunpack.i.l.bf16 %v5795_v1 }
 0xb2c   :  { %v2512_v28 = vsel %vm2508_vm11, %v2505_v25, %v5797_v7  ;;  %v2511_v19 = vsel %vm2508_vm11, %v2504_v2, %v5796_v3 }
 0xb3e   :  { %v2321_v39 = vpop.f32.mrf.mxu3 }
 0xb46   :  { %v2323_v41 = vpop.f32.mrf.mxu3 }
 0xb49   :  { %v2342_v45 = vpop.f32.mrf.mxu0 }
 0xb4a   :  { %v5783_v49 = vpack.i.bf16 %v2342_v45, %v2321_v39 }
 0xb4c   :  { %5784 = vrot.lane.b32.xlu1 %v5783_v49, %s8193_s19 }
 0xb51   :  { %v2344_v14 = vpop.f32.mrf.mxu0 }
 0xb54   :  { %5809 = vrot.lane.b32.xlu1 %v5808_v9, %s8195_s18 }
 0xb6f   :  { %v2384_v52 = vpop.f32.mrf.mxu2 }
 0xb77   :  { %v2386_v0 = vpop.f32.mrf.mxu2 }
 0xb7f   :  { %v2363_v50 = vpop.f32.mrf.mxu1 }
 0xb80   :  { %v5798_v47 = vpack.i.bf16 %v2384_v52, %v2363_v50 }
 0xb82   :  { %5799 = vrot.lane.b32.xlu0 %v5798_v47, %s8193_s19 }
 0xb87   :  { %v2365_v29 = vpop.f32.mrf.mxu1 }
 0xb8a   :  { %5804 = vrot.lane.b32.xlu0 %v5803_v57, %s8197_s20 }
 0xb91   :  { %v2405_v17 = vpop.f32.mrf.mxu3 }
 0xb93   :  { %v2426_v5 = vpop.f32.mrf.mxu0 }
 0xb94   :  { %v5813_v31 = vpack.i.bf16 %v2426_v5, %v2405_v17 }
 0xb96   :  { %5814 = vrot.lane.b32.xlu2 %v5813_v31, %s8193_s19 }
 0xb99   :  { %v2407_v9 = vpop.f32.mrf.mxu3 }
 0xb9b   :  { %v2428_v63 = vpop.f32.mrf.mxu0 }
 0xbbe   :  { %v5785_v32 = vpop.permute.xlu1 %5784 }
 0xbbf   :  { %v5787_v15 = vunpack.i.h.bf16 %v5785_v32  ;;  %v5786_v33 = vunpack.i.l.bf16 %v5785_v32 }
 0xbc1   :  { %v2516_v16 = vsel %vm2515_vm12, %v2509_v46, %v5786_v33  ;;  %v2517_v18 = vsel %vm2515_vm12, %v2510_v48, %v5787_v15 }
 0xbc2   :  { %v2522_v61 = vpack.c.bf16 %v2517_v18, %v2516_v16 }
 0xbc4   :  { %5486 = vmatmul.msk.bf16.vlgmr.msra.gmra.mxu1 %vm696_vm0, %v2522_v61 }
 0xbc6   :  { %v5810_v40 = vpop.permute.xlu1 %5809 }
 0xbc7   :  { %v5812_v45 = vunpack.i.h.bf16 %v5810_v40  ;;  %v5811_v49 = vunpack.i.l.bf16 %v5810_v40 }
 0xbf0   :  { %v5815_v14 = vpop.permute.xlu2 %5814 }
 0xbf1   :  { %v5817_v22 = vunpack.i.h.bf16 %v5815_v14  ;;  %v5816_v50 = vunpack.i.l.bf16 %v5815_v14 }
 0xbf4   :  { %v5800_v35 = vpop.permute.xlu0 %5799 }
 0xbf5   :  { %v5802_v37 = vunpack.i.h.bf16 %v5800_v35  ;;  %v5801_v26 = vunpack.i.l.bf16 %v5800_v35 }
 0xbf7   :  { %v2518_v36 = vsel %vm2515_vm12, %v2511_v19, %v5801_v26  ;;  %v2519_v13 = vsel %vm2515_vm12, %v2512_v28, %v5802_v37 }
 0xbf8   :  { %v2523_v38 = vpack.c.bf16 %v2519_v13, %v2518_v36 }
 0xbfa   :  { %5487 = vmatmul.msk.bf16.gmra.mxu1 %vm696_vm0, %v2523_v38 }
 0xbfc   :  { %v5805_v30 = vpop.permute.xlu0 %5804 }
 0xbfd   :  { %v5807_v39 = vunpack.i.h.bf16 %v5805_v30  ;;  %v5806_v58 = vunpack.i.l.bf16 %v5805_v30 }
 0xbff   :  { %v2507_v11 = vsel %vm1083_vm8, %v6903_v23, %v5807_v39  ;;  %v2506_v41 = vsel %vm1083_vm8, %v6901_v53, %v5806_v58  ;;  %v5869_v53 = vld [vmem:[%s8184_s10] ss:$0 sm:$0xff] }
 0xc00   :  { %v2514_v52 = vsel %vm2508_vm11, %v2507_v11, %v5812_v45  ;;  %v2513_v0 = vsel %vm2508_vm11, %v2506_v41, %v5811_v49 }
 0xc01   :  { %v2520_v47 = vsel %vm2515_vm12, %v2513_v0, %v5816_v50  ;;  %v2521_v29 = vsel %vm2515_vm12, %v2514_v52, %v5817_v22  ;;  %v5742_v0 = vld [vmem:[%s8188_s13 + $0x8] sm:$0xff] }
 0xc02   :  { %v2524_v57 = vpack.c.bf16 %v2521_v29, %v2520_v47  ;;  %2774 = vmatpush.bf16.msrb.mxu2 %v5742_v0  ;;  %v5741_v47 = vld [vmem:[%s8188_s13] sm:$0xff] }
 0xc06   :  { %2775 = vmatpush.bf16.msrb.mxu2 %v5741_v47 }
 0xc0a   :  { %5488 = vmatmul.msk.bf16.gmra.mxu1 %vm696_vm0, %v2524_v57 }
 0xc41   :  { %v2563_v23 = vpop.f32.mrf.mxu1 }
 0xc42   :  { %v2564_v17 = vadd.f32 %v5869_v53, %v2563_v23 }
 0xc44   :  { %v7240_v5 = vadd.f32 %v2564_v17, %v6604_v56 }
 0xc46   :  { %v2586_v31 = vsel %vm696_vm0, %v7240_v5, 0.0 }
 0xc47   :  { %2587 = vadd.xlane.f32.xlu0 %v2586_v31 }
 0xc49   :  { %v2565_v9 = vpop.f32.mrf.mxu1 }
 0xc4a   :  { %v2566_v63 = vadd.f32 %v5869_v53, %v2565_v9 }
 0xc4c   :  { %v7245_v10 = vadd.f32 %v2566_v63, %v6617_v8 }
 0xc4e   :  { %v2589_v21 = vsel %vm696_vm0, %v7245_v10, 0.0 }
 0xc4f   :  { %2590 = vadd.xlane.f32.xlu1 %v2589_v21 }
 0xc77   :  { %v2568_v6 = vpop.f32.mrf.mxu1 }
 0xc78   :  { %v2569_v54 = vadd.f32 %v5869_v53, %v2568_v6 }
 0xc7a   :  { %v7250_v60 = vadd.f32 %v2569_v54, %v6630_v24 }
 0xc7c   :  { %v2592_v56 = vsel %vm696_vm0, %v7250_v60, 0.0 }
 0xc7d   :  { %2593 = vadd.xlane.f32.xlu2 %v2592_v56 }
 0xc7f   :  { %v2570_v27 = vpop.f32.mrf.mxu1 }
 0xc80   :  { %v2571_v43 = vadd.f32 %v5869_v53, %v2570_v27 }
 0xc82   :  { %v7255_v32 = vadd.f32 %v2571_v43, %v6642_v34 }
 0xc84   :  { %v2595_v8 = vsel %vm696_vm0, %v7255_v32, 0.0 }
 0xc85   :  { %2596 = vadd.xlane.f32.xlu0 %v2595_v8 }
 0xc87   :  { %v2573_v42 = vpop.f32.mrf.mxu1 }
 0xc88   :  { %v2574_v12 = vadd.f32 %v5869_v53, %v2573_v42  ;;  %v7322_v42 = vld [vmem:[%s8185_s11] ss:$0 sm:$0xff] }
 0xc8a   :  { %v7260_v15 = vadd.f32 %v2574_v12, %v6654_v44 }
 0xc8c   :  { %v2598_v24 = vsel %vm696_vm0, %v7260_v15, 0.0 }
 0xc8d   :  { %2599 = vadd.xlane.f32.xlu1 %v2598_v24 }
 0xc8f   :  { %v2575_v33 = vpop.f32.mrf.mxu1 }
 0xc90   :  { %v2576_v46 = vadd.f32 %v5869_v53, %v2575_v33 }
 0xc92   :  { %v7265_v48 = vadd.f32 %v2576_v46, %v6666_v51  ;;  %v7328_v46 = vld [vmem:[%s8186_s12] ss:$0 sm:$0xff] }
 0xc94   :  { %v2601_v34 = vsel %vm696_vm0, %v7265_v48, 0.0 }
 0xc95   :  { %2602 = vadd.xlane.f32.xlu2 %v2601_v34 }
 0xcba   :  { %v2588_v16 = vpop.xlane.xlu0 %2587 }
 0xcbb   :  { %v2604_v18 = vmul.f32 %v2588_v16, %v6553_v59 }
 0xcbd   :  { %v7271_v61 = vsub.f32 %v7240_v5, %v2604_v18 }
 0xcbf   :  { %v2616_v44 = vmul.f32 %v7271_v61, %v7271_v61 }
 0xcc1   :  { %v2622_v1 = vsel %vm696_vm0, %v2616_v44, 0.0 }
 0xcc2   :  { %v2591_v4 = vpop.xlane.xlu1 %2590  ;;  %2623 = vadd.xlane.f32.xlu0 %v2622_v1 }
 0xcc3   :  { %v2605_v51 = vmul.f32 %v2591_v4, %v6553_v59 }
 0xcc5   :  { %v7278_v20 = vsub.f32 %v7245_v10, %v2605_v51 }
 0xcc7   :  { %v2617_v55 = vmul.f32 %v7278_v20, %v7278_v20 }
 0xcc9   :  { %v2625_v7 = vsel %vm696_vm0, %v2617_v55, 0.0 }
 0xcca   :  { %2626 = vadd.xlane.f32.xlu1 %v2625_v7 }
 0xcf0   :  { %v2594_v3 = vpop.xlane.xlu2 %2593 }
 0xcf1   :  { %v2606_v35 = vmul.f32 %v2594_v3, %v6553_v59 }
 0xcf3   :  { %v7285_v25 = vsub.f32 %v7250_v60, %v2606_v35 }
 0xcf5   :  { %v2618_v2 = vmul.f32 %v7285_v25, %v7285_v25 }
 0xcf7   :  { %v2628_v37 = vsel %vm696_vm0, %v2618_v2, 0.0 }
 0xcf8   :  { %2629 = vadd.xlane.f32.xlu2 %v2628_v37  ;;  %v2597_v26 = vpop.xlane.xlu0 %2596 }
 0xcf9   :  { %v2607_v28 = vmul.f32 %v2597_v26, %v6553_v59 }
 0xcfb   :  { %v7292_v19 = vsub.f32 %v7255_v32, %v2607_v28 }
 0xcfd   :  { %v2619_v36 = vmul.f32 %v7292_v19, %v7292_v19 }
 0xcff   :  { %v2631_v13 = vsel %vm696_vm0, %v2619_v36, 0.0 }
 0xd00   :  { %v2600_v38 = vpop.xlane.xlu1 %2599  ;;  %2632 = vadd.xlane.f32.xlu0 %v2631_v13 }
 0xd01   :  { %v2608_v30 = vmul.f32 %v2600_v38, %v6553_v59 }
 0xd03   :  { %v7299_v40 = vsub.f32 %v7260_v15, %v2608_v30 }
 0xd05   :  { %v2620_v39 = vmul.f32 %v7299_v40, %v7299_v40 }
 0xd07   :  { %v2634_v58 = vsel %vm696_vm0, %v2620_v39, 0.0 }
 0xd08   :  { %v2603_v11 = vpop.xlane.xlu2 %2602  ;;  %2635 = vadd.xlane.f32.xlu1 %v2634_v58 }
 0xd09   :  { %v2609_v41 = vmul.f32 %v2603_v11, %v6553_v59 }
 0xd0b   :  { %v7306_v45 = vsub.f32 %v7265_v48, %v2609_v41 }
 0xd0d   :  { %v2621_v49 = vmul.f32 %v7306_v45, %v7306_v45 }
 0xd0f   :  { %v2637_v14 = vsel %vm696_vm0, %v2621_v49, 0.0 }
 0xd10   :  { %2638 = vadd.xlane.f32.xlu2 %v2637_v14 }
 0xd35   :  { %v2624_v52 = vpop.xlane.xlu0 %2623 }
 0xd36   :  { %v2640_v22 = vmul.f32 %v2624_v52, %v6553_v59 }
 0xd38   :  { %v2646_v50 = vadd.f32 1e-05, %v2640_v22 }
 0xd3a   :  { %6003 = vrsqrt.f32 %v2646_v50  ;;  %vm2658_vm14 = vweird.f32 %v2646_v50 }
 0xd3d   :  { %v2627_v29 = vpop.xlane.xlu1 %2626 }
 0xd3e   :  { %v2641_v57 = vmul.f32 %v2627_v29, %v6553_v59 }
 0xd40   :  { %v6004_v53 = vpop.eup %6003  ;;  %v2647_v23 = vadd.f32 1e-05, %v2641_v57 }
 0xd41   :  { %v2653_v17 = vmul.f32 %v6004_v53, %v2646_v50  ;;  %vm2659_vm13 = vweird.f32 %v6004_v53 }
 0xd42   :  { %6005 = vrsqrt.f32 %v2647_v23  ;;  %vm2660_vm15 = vmor %vm2658_vm14, %vm2659_vm13  ;;  %vm2668_vm2 = vweird.f32 %v2647_v23 }
 0xd43   :  { %v2654_v31 = vmul.f32 %v6004_v53, %v2653_v17 }
 0xd45   :  { %v2655_v9 = vmul.f32 0.5, %v2654_v31 }
 0xd47   :  { %v2656_v63 = vsub.f32 1.5, %v2655_v9 }
 0xd48   :  { %v6006_v21 = vpop.eup %6005 }
 0xd49   :  { %v2657_v6 = vmul.f32 %v6004_v53, %v2656_v63  ;;  %v2663_v54 = vmul.f32 %v6006_v21, %v2647_v23  ;;  %vm2669_vm1 = vweird.f32 %v6006_v21 }
 0xd4a   :  { %vm2670_vm3 = vmor %vm2668_vm2, %vm2669_vm1 }
 0xd4b   :  { %v2664_v56 = vmul.f32 %v6006_v21, %v2663_v54  ;;  %v2661_v27 = vsel %vm2660_vm15, %v6004_v53, %v2657_v6 }
 0xd4c   :  { %v2712_v12 = vmul.f32 %v2661_v27, %v7271_v61 }
 0xd4d   :  { %v2665_v43 = vmul.f32 0.5, %v2664_v56 }
 0xd4e   :  { %v2721_v34 = vmul.f32 %v7322_v42, %v2712_v12 }
 0xd4f   :  { %v2666_v8 = vsub.f32 1.5, %v2665_v43 }
 0xd50   :  { %v2730_v44 = vadd.f32 %v7328_v46, %v2721_v34 }
 0xd51   :  { %v2667_v24 = vmul.f32 %v6006_v21, %v2666_v8 }
 0xd53   :  { %v2671_v33 = vsel %vm2670_vm3, %v6006_v21, %v2667_v24 }
 0xd54   :  { %v2713_v16 = vmul.f32 %v2671_v33, %v7278_v20 }
 0xd56   :  { %v2722_v18 = vmul.f32 %v7322_v42, %v2713_v16 }
 0xd58   :  { %v2731_v1 = vadd.f32 %v7328_v46, %v2722_v18 }
 0xd5a   :  { %v2736_v61 = vpack.c.bf16 %v2731_v1, %v2730_v44 }
 0xd5c   :  { %5497 = vmatmul.msk.bf16.vlgmr.msrb.gmra.mxu2 %vm696_vm0, %v2736_v61 }
 0xd6b   :  { %v2630_v4 = vpop.xlane.xlu2 %2629 }
 0xd6c   :  { %v2642_v51 = vmul.f32 %v2630_v4, %v6553_v59 }
 0xd6e   :  { %v2648_v55 = vadd.f32 1e-05, %v2642_v51 }
 0xd70   :  { %6007 = vrsqrt.f32 %v2648_v55  ;;  %vm2678_vm5 = vweird.f32 %v2648_v55 }
 0xd73   :  { %v2633_v7 = vpop.xlane.xlu0 %2632 }
 0xd74   :  { %v2643_v3 = vmul.f32 %v2633_v7, %v6553_v59 }
 0xd76   :  { %v6008_v35 = vpop.eup %6007  ;;  %v2649_v2 = vadd.f32 1e-05, %v2643_v3 }
 0xd77   :  { %v2673_v20 = vmul.f32 %v6008_v35, %v2648_v55  ;;  %vm2679_vm4 = vweird.f32 %v6008_v35 }
 0xd78   :  { %6009 = vrsqrt.f32 %v2649_v2  ;;  %vm2680_vm6 = vmor %vm2678_vm5, %vm2679_vm4  ;;  %vm2688_vm10 = vweird.f32 %v2649_v2 }
 0xd79   :  { %v2674_v37 = vmul.f32 %v6008_v35, %v2673_v20 }
 0xd7b   :  { %v2675_v26 = vmul.f32 0.5, %v2674_v37  ;;  %v2636_v28 = vpop.xlane.xlu1 %2635  ;;  %v5743_v37 = vld [vmem:[%s8190_s15] sm:$0xff] }
 0xd7c   :  { %v2644_v36 = vmul.f32 %v2636_v28, %v6553_v59 }
 0xd7d   :  { %v2676_v13 = vsub.f32 1.5, %v2675_v26 }
 0xd7e   :  { %v6010_v38 = vpop.eup %6009  ;;  %v2650_v30 = vadd.f32 1e-05, %v2644_v36 }
 0xd7f   :  { %v2677_v39 = vmul.f32 %v6008_v35, %v2676_v13  ;;  %v2683_v58 = vmul.f32 %v6010_v38, %v2649_v2  ;;  %vm2689_vm7 = vweird.f32 %v6010_v38 }
 0xd80   :  { %6011 = vrsqrt.f32 %v2650_v30  ;;  %vm2690_vm13 = vmor %vm2688_vm10, %vm2689_vm7  ;;  %vm2698_vm15 = vweird.f32 %v2650_v30 }
 0xd81   :  { %v2684_v11 = vmul.f32 %v6010_v38, %v2683_v58  ;;  %v2681_v41 = vsel %vm2680_vm6, %v6008_v35, %v2677_v39  ;;  %v5744_v35 = vld [vmem:[%s8190_s15 + $0x8] sm:$0xff] }
 0xd82   :  { %v2714_v50 = vmul.f32 %v2681_v41, %v7285_v25 }
 0xd83   :  { %v2685_v49 = vmul.f32 0.5, %v2684_v11  ;;  %v2639_v14 = vpop.xlane.xlu2 %2638 }
 0xd84   :  { %v2645_v52 = vmul.f32 %v2639_v14, %v6553_v59  ;;  %v2723_v31 = vmul.f32 %v7322_v42, %v2714_v50 }
 0xd85   :  { %v2686_v0 = vsub.f32 1.5, %v2685_v49 }
 0xd86   :  { %v6012_v22 = vpop.eup %6011  ;;  %v2651_v47 = vadd.f32 1e-05, %v2645_v52  ;;  %v2732_v54 = vadd.f32 %v7328_v46, %v2723_v31 }
 0xd87   :  { %v2687_v29 = vmul.f32 %v6010_v38, %v2686_v0  ;;  %v2693_v57 = vmul.f32 %v6012_v22, %v2650_v30  ;;  %vm2699_vm14 = vweird.f32 %v6012_v22 }
 0xd88   :  { %6013 = vrsqrt.f32 %v2651_v47  ;;  %vm2700_vm1 = vmor %vm2698_vm15, %vm2699_vm14  ;;  %vm2708_vm3 = vweird.f32 %v2651_v47 }
 0xd89   :  { %v2691_v53 = vsel %vm2690_vm13, %v6010_v38, %v2687_v29  ;;  %v2694_v23 = vmul.f32 %v6012_v22, %v2693_v57 }
 0xd8a   :  { %v2715_v17 = vmul.f32 %v2691_v53, %v7292_v19 }
 0xd8b   :  { %v2695_v9 = vmul.f32 0.5, %v2694_v23 }
 0xd8c   :  { %v2724_v63 = vmul.f32 %v7322_v42, %v2715_v17 }
 0xd8d   :  { %v2696_v21 = vsub.f32 1.5, %v2695_v9 }
 0xd8e   :  { %v6014_v6 = vpop.eup %6013  ;;  %v2733_v25 = vadd.f32 %v7328_v46, %v2724_v63 }
 0xd8f   :  { %v2697_v56 = vmul.f32 %v6012_v22, %v2696_v21  ;;  %v2703_v27 = vmul.f32 %v6014_v6, %v2651_v47  ;;  %vm2709_vm2 = vweird.f32 %v6014_v6 }
 0xd90   :  { %v2737_v43 = vpack.c.bf16 %v2733_v25, %v2732_v54  ;;  %vm2710_vm4 = vmor %vm2708_vm3, %vm2709_vm2  ;;  %vm2957_vm2 = vcmask 523264  }
 0xd91   :  { %v2704_v8 = vmul.f32 %v6014_v6, %v2703_v27  ;;  %v2701_v19 = vsel %vm2700_vm1, %v6012_v22, %v2697_v56 }
 0xd92   :  { %5498 = vmatmul.msk.bf16.gmra.mxu2 %vm696_vm0, %v2737_v43  ;;  %v2716_v33 = vmul.f32 %v2701_v19, %v7299_v40  ;;  %v7357_v40 = vld [vmem:[%s8187_s14] ss:$0 sm:$0xff] }
 0xd93   :  { %v2705_v12 = vmul.f32 0.5, %v2704_v8 }
 0xd94   :  { %v2725_v44 = vmul.f32 %v7322_v42, %v2716_v33 }
 0xd95   :  { %v2706_v24 = vsub.f32 1.5, %v2705_v12 }
 0xd96   :  { %v2734_v61 = vadd.f32 %v7328_v46, %v2725_v44 }
 0xd97   :  { %v2707_v34 = vmul.f32 %v6014_v6, %v2706_v24 }
 0xd99   :  { %v2711_v16 = vsel %vm2710_vm4, %v6014_v6, %v2707_v34 }
 0xd9a   :  { %v2717_v18 = vmul.f32 %v2711_v16, %v7306_v45  ;;  %v5746_v45 = vld [vmem:[%s8190_s15 + $0x18] sm:$0xff] }
 0xd9b   :  { %2971 = vmatpush.bf16.msrb.mxu3 %v5746_v45 }
 0xd9c   :  { %v2726_v1 = vmul.f32 %v7322_v42, %v2717_v18 }
 0xd9e   :  { %v2735_v4 = vadd.f32 %v7328_v46, %v2726_v1  ;;  %v5745_v46 = vld [vmem:[%s8190_s15 + $0x10] sm:$0xff] }
 0xd9f   :  { %2972 = vmatpush.bf16.msrb.mxu3 %v5745_v46 }
 0xda0   :  { %v2738_v51 = vpack.c.bf16 %v2735_v4, %v2734_v61 }
 0xda2   :  { %5499 = vmatmul.msk.bf16.gmra.mxu2 %vm696_vm0, %v2738_v51 }
 0xda3   :  { %2973 = vmatpush.bf16.msrb.mxu3 %v5744_v35 }
 0xda7   :  { %2974 = vmatpush.bf16.msrb.mxu3 %v5743_v37 }
 0xddf   :  { %v2777_v55 = vpop.f32.mrf.mxu2 }
 0xde0   :  { %v2778_v42 = vadd.f32 %v7357_v40, %v2777_v55 }
 0xde2   :  { %v5500_v7 = vmul.f32 -1.702, %v2778_v42 }
 0xde4   :  { %v2804_v3 = vmul.f32 1.442695, %v5500_v7 }
 0xde6   :  { %6015 = vpow2.f32 %v2804_v3 }
 0xde7   :  { %v2779_v2 = vpop.f32.mrf.mxu2 }
 0xde8   :  { %v2780_v20 = vadd.f32 %v7357_v40, %v2779_v2 }
 0xdea   :  { %v5501_v26 = vmul.f32 -1.702, %v2780_v20 }
 0xdec   :  { %v6016_v28 = vpop.eup %6015  ;;  %v2806_v36 = vmul.f32 1.442695, %v5501_v26 }
 0xded   :  { %v2816_v13 = vadd.f32 1.0, %v6016_v28 }
 0xdee   :  { %6017 = vpow2.f32 %v2806_v36 }
 0xdef   :  { %6019 = vrcp.f32 %v2816_v13  ;;  %v2833_v0 = vand.u32 2147483648, %v2816_v13  ;;  %vm2827_vm6 = vweird.f32 %v2816_v13  ;;  %v2831_v22 = vand.u32 2147483647, %v2816_v13 }
 0xdf1   :  { %v2834_v23 = vor.u32 1.1754944e-38, %v2833_v0  ;;  %vm2832_vm13 = vcmp.eq.f32.partialorder %v2831_v22, 8.507059e+37 }
 0xdf4   :  { %v6018_v38 = vpop.eup %6017 }
 0xdf5   :  { %v6020_v30 = vpop.eup %6019  ;;  %v2817_v39 = vadd.f32 1.0, %v6018_v38 }
 0xdf6   :  { %v2823_v58 = vmul.f32 %v6020_v30, %v2816_v13  ;;  %vm2828_vm5 = vweird.f32 %v6020_v30 }
 0xdf7   :  { %6021 = vrcp.f32 %v2817_v39  ;;  %vm2829_vm7 = vmor %vm2827_vm6, %vm2828_vm5  ;;  %v2848_v47 = vand.u32 2147483648, %v2817_v39  ;;  %v2846_v53 = vand.u32 2147483647, %v2817_v39  ;;  %vm2842_vm14 = vweird.f32 %v2817_v39 }
 0xdf8   :  { %v2824_v11 = vsub.f32 1.0, %v2823_v58 }
 0xdf9   :  { %v2849_v9 = vor.u32 1.1754944e-38, %v2848_v47  ;;  %vm2847_vm1 = vcmp.eq.f32.partialorder %v2846_v53, 8.507059e+37 }
 0xdfa   :  { %v2825_v41 = vmul.f32 %v6020_v30, %v2824_v11 }
 0xdfc   :  { %v2826_v14 = vadd.f32 %v6020_v30, %v2825_v41 }
 0xdfd   :  { %v6022_v49 = vpop.eup %6021 }
 0xdfe   :  { %v2838_v52 = vmul.f32 %v6022_v49, %v2817_v39  ;;  %v2830_v29 = vsel %vm2829_vm7, %v6020_v30, %v2826_v14  ;;  %vm2843_vm10 = vweird.f32 %v6022_v49 }
 0xdff   :  { %v2835_v31 = vsel %vm2832_vm13, %v2834_v23, %v2830_v29  ;;  %vm2844_vm15 = vmor %vm2842_vm14, %vm2843_vm10 }
 0xe00   :  { %v2839_v50 = vsub.f32 1.0, %v2838_v52  ;;  %v2912_v6 = vmul.f32 %v2835_v31, %v2778_v42 }
 0xe02   :  { %v2840_v57 = vmul.f32 %v6022_v49, %v2839_v50 }
 0xe04   :  { %v2841_v17 = vadd.f32 %v6022_v49, %v2840_v57 }
 0xe06   :  { %v2845_v63 = vsel %vm2844_vm15, %v6022_v49, %v2841_v17 }
 0xe07   :  { %v2850_v21 = vsel %vm2847_vm1, %v2849_v9, %v2845_v63 }
 0xe08   :  { %v2913_v54 = vmul.f32 %v2850_v21, %v2780_v20 }
 0xe0a   :  { %v2918_v25 = vpack.c.bf16 %v2913_v54, %v2912_v6 }
 0xe0c   :  { %5522 = vmatmul.msk.bf16.vlgmr.msrb.gmra.mxu3 %vm2957_vm2, %v2918_v25 }
 0xe15   :  { %v2782_v56 = vpop.f32.mrf.mxu2 }
 0xe16   :  { %v2783_v27 = vadd.f32 %v7357_v40, %v2782_v56 }
 0xe18   :  { %v5502_v43 = vmul.f32 -1.702, %v2783_v27 }
 0xe1a   :  { %v2808_v8 = vmul.f32 1.442695, %v5502_v43 }
 0xe1c   :  { %6023 = vpow2.f32 %v2808_v8 }
 0xe1d   :  { %v2784_v19 = vpop.f32.mrf.mxu2 }
 0xe1e   :  { %v2785_v12 = vadd.f32 %v7357_v40, %v2784_v19 }
 0xe20   :  { %v5503_v24 = vmul.f32 -1.702, %v2785_v12 }
 0xe22   :  { %v6024_v33 = vpop.eup %6023  ;;  %v2810_v34 = vmul.f32 1.442695, %v5503_v24 }
 0xe23   :  { %v2818_v16 = vadd.f32 1.0, %v6024_v33 }
 0xe24   :  { %6025 = vpow2.f32 %v2810_v34 }
 0xe25   :  { %6027 = vrcp.f32 %v2818_v16  ;;  %v2787_v18 = vpop.f32.mrf.mxu2  ;;  %v2863_v13 = vand.u32 2147483648, %v2818_v16  ;;  %vm2857_vm4 = vweird.f32 %v2818_v16  ;;  %v2861_v38 = vand.u32 2147483647, %v2818_v16 }
 0xe26   :  { %v7377_v44 = vadd.f32 %v7357_v40, %v2787_v18 }
 0xe27   :  { %v2864_v41 = vor.u32 1.1754944e-38, %v2863_v13  ;;  %vm2862_vm7 = vcmp.eq.f32.partialorder %v2861_v38, 8.507059e+37 }
 0xe28   :  { %v5504_v1 = vmul.f32 -1.702, %v7377_v44 }
 0xe2a   :  { %v6026_v61 = vpop.eup %6025  ;;  %v2812_v4 = vmul.f32 1.442695, %v5504_v1 }
 0xe2b   :  { %v6028_v51 = vpop.eup %6027  ;;  %v2819_v45 = vadd.f32 1.0, %v6026_v61 }
 0xe2c   :  { %v2853_v55 = vmul.f32 %v6028_v51, %v2818_v16  ;;  %6029 = vpow2.f32 %v2812_v4  ;;  %vm2858_vm3 = vweird.f32 %v6028_v51 }
 0xe2d   :  { %6031 = vrcp.f32 %v2819_v45  ;;  %v2789_v42 = vpop.f32.mrf.mxu2  ;;  %vm2859_vm5 = vmor %vm2857_vm4, %vm2858_vm3  ;;  %v2878_v39 = vand.u32 2147483648, %v2819_v45  ;;  %v2876_v11 = vand.u32 2147483647, %v2819_v45  ;;  %vm2872_vm10 = vweird.f32 %v2819_v45 }
 0xe2e   :  { %v2854_v46 = vsub.f32 1.0, %v2853_v55  ;;  %v7381_v7 = vadd.f32 %v7357_v40, %v2789_v42 }
 0xe2f   :  { %v2879_v22 = vor.u32 1.1754944e-38, %v2878_v39  ;;  %vm2877_vm14 = vcmp.eq.f32.partialorder %v2876_v11, 8.507059e+37 }
 0xe30   :  { %v2855_v3 = vmul.f32 %v6028_v51, %v2854_v46  ;;  %v5505_v35 = vmul.f32 -1.702, %v7381_v7 }
 0xe32   :  { %v6030_v2 = vpop.eup %6029  ;;  %v2814_v20 = vmul.f32 1.442695, %v5505_v35  ;;  %v2856_v28 = vadd.f32 %v6028_v51, %v2855_v3 }
 0xe33   :  { %v6032_v37 = vpop.eup %6031  ;;  %v2820_v26 = vadd.f32 1.0, %v6030_v2 }
 0xe34   :  { %v2868_v36 = vmul.f32 %v6032_v37, %v2819_v45  ;;  %6033 = vpow2.f32 %v2814_v20  ;;  %v2860_v40 = vsel %vm2859_vm5, %v6028_v51, %v2856_v28  ;;  %vm2873_vm6 = vweird.f32 %v6032_v37  ;;  %v5873_v51 = vld [vmem:[%s8189_s16] ss:$0 sm:$0xff] }
 0xe35   :  { %6035 = vrcp.f32 %v2820_v26  ;;  %v2865_v0 = vsel %vm2862_vm7, %v2864_v41, %v2860_v40  ;;  %vm2874_vm13 = vmor %vm2872_vm10, %vm2873_vm6  ;;  %v2893_v54 = vand.u32 2147483648, %v2820_v26  ;;  %vm2887_vm1 = vweird.f32 %v2820_v26 }
 0xe36   :  { %v2869_v30 = vsub.f32 1.0, %v2868_v36  ;;  %v2914_v53 = vmul.f32 %v2865_v0, %v2783_v27  ;;  %v2891_v25 = vand.u32 2147483647, %v2820_v26 }
 0xe38   :  { %v2870_v58 = vmul.f32 %v6032_v37, %v2869_v30  ;;  %vm2892_vm5 = vcmp.eq.f32.partialorder %v2891_v25, 8.507059e+37 }
 0xe3a   :  { %v6034_v49 = vpop.eup %6033  ;;  %v2871_v14 = vadd.f32 %v6032_v37, %v2870_v58 }
 0xe3b   :  { %v6036_v52 = vpop.eup %6035  ;;  %v2821_v50 = vadd.f32 1.0, %v6034_v49 }
 0xe3c   :  { %v2875_v47 = vsel %vm2874_vm13, %v6032_v37, %v2871_v14  ;;  %v2883_v29 = vmul.f32 %v6036_v52, %v2820_v26  ;;  %vm2888_vm15 = vweird.f32 %v6036_v52 }
 0xe3d   :  { %v2880_v57 = vsel %vm2877_vm14, %v2879_v22, %v2875_v47  ;;  %6037 = vrcp.f32 %v2821_v50  ;;  %vm2889_vm3 = vmor %vm2887_vm1, %vm2888_vm15  ;;  %v2908_v43 = vand.u32 2147483648, %v2821_v50  ;;  %v2906_v27 = vand.u32 2147483647, %v2821_v50 }
 0xe3e   :  { %v2915_v23 = vmul.f32 %v2880_v57, %v2785_v12  ;;  %v2884_v17 = vsub.f32 1.0, %v2883_v29  ;;  %v2894_v12 = vor.u32 1.1754944e-38, %v2893_v54  ;;  %vm2902_vm6 = vweird.f32 %v2821_v50 }
 0xe3f   :  { %v2909_v34 = vor.u32 1.1754944e-38, %v2908_v43  ;;  %vm2907_vm10 = vcmp.eq.f32.partialorder %v2906_v27, 8.507059e+37 }
 0xe40   :  { %v2919_v31 = vpack.c.bf16 %v2915_v23, %v2914_v53  ;;  %v2885_v9 = vmul.f32 %v6036_v52, %v2884_v17 }
 0xe42   :  { %5523 = vmatmul.msk.bf16.gmra.mxu3 %vm2957_vm2, %v2919_v31  ;;  %v2886_v21 = vadd.f32 %v6036_v52, %v2885_v9 }
 0xe43   :  { %v6038_v63 = vpop.eup %6037 }
 0xe44   :  { %v2898_v6 = vmul.f32 %v6038_v63, %v2821_v50  ;;  %v2890_v8 = vsel %vm2889_vm3, %v6036_v52, %v2886_v21  ;;  %vm2903_vm4 = vweird.f32 %v6038_v63 }
 0xe45   :  { %v2895_v33 = vsel %vm2892_vm5, %v2894_v12, %v2890_v8  ;;  %vm2904_vm7 = vmor %vm2902_vm6, %vm2903_vm4 }
 0xe46   :  { %v2899_v56 = vsub.f32 1.0, %v2898_v6  ;;  %v2916_v1 = vmul.f32 %v2895_v33, %v7377_v44 }
 0xe48   :  { %v2900_v19 = vmul.f32 %v6038_v63, %v2899_v56 }
 0xe4a   :  { %v2901_v24 = vadd.f32 %v6038_v63, %v2900_v19 }
 0xe4c   :  { %v2905_v16 = vsel %vm2904_vm7, %v6038_v63, %v2901_v24 }
 0xe4d   :  { %v2910_v18 = vsel %vm2907_vm10, %v2909_v34, %v2905_v16  ;;  %v5748_v34 = vld [vmem:[%s8182_s7 + $0x18] sm:$0xff] }
 0xe4e   :  { %v2917_v61 = vmul.f32 %v2910_v18, %v7381_v7  ;;  %3198 = vmatpush.bf16.msrb.mxu0 %v5748_v34 }
 0xe50   :  { %v2920_v4 = vpack.c.bf16 %v2917_v61, %v2916_v1  ;;  %v5747_v1 = vld [vmem:[%s8182_s7 + $0x10] sm:$0xff] }
 0xe52   :  { %5524 = vmatmul.msk.bf16.gmra.mxu3 %vm2957_vm2, %v2920_v4  ;;  %3199 = vmatpush.bf16.msrb.mxu0 %v5747_v1 }
 0xe8f   :  { %v2976_v45 = vpop.f32.mrf.mxu3 }
 0xe90   :  { %v2977_v55 = vadd.f32 %v5873_v51, %v2976_v45 }
 0xe92   :  { %v7392_v42 = vadd.f32 %v2977_v55, %v7240_v5 }
 0xe94   :  { %5525 = vst.msk [vmem:[%s8178_s17 + $0x30] sm:$0xff] %vm696_vm0, %v7392_v42  ;;  %v3008_v44 = vsel %vm696_vm0, %v7392_v42, 0.0 }
 0xe95   :  { %3009 = vadd.xlane.f32.xlu0 %v3008_v44 }
 0xe97   :  { %v2978_v46 = vpop.f32.mrf.mxu3 }
 0xe98   :  { %v2979_v7 = vadd.f32 %v5873_v51, %v2978_v46 }
 0xe9a   :  { %v7402_v3 = vadd.f32 %v2979_v7, %v7245_v10 }
 0xe9c   :  { %5526 = vst.msk [vmem:[%s8178_s17 + $0x38] sm:$0xff] %vm696_vm0, %v7402_v3  ;;  %v3011_v5 = vsel %vm696_vm0, %v7402_v3, 0.0 }
 0xe9d   :  { %3012 = vadd.xlane.f32.xlu1 %v3011_v5 }
 0xec5   :  { %v2981_v35 = vpop.f32.mrf.mxu3 }
 0xec6   :  { %v2982_v2 = vadd.f32 %v5873_v51, %v2981_v35 }
 0xec8   :  { %v7412_v20 = vadd.f32 %v2982_v2, %v7250_v60 }
 0xeca   :  { %5527 = vst.msk [vmem:[%s8178_s17 + $0x40] sm:$0xff] %vm696_vm0, %v7412_v20  ;;  %v3014_v10 = vsel %vm696_vm0, %v7412_v20, 0.0 }
 0xecb   :  { %3015 = vadd.xlane.f32.xlu2 %v3014_v10 }
 0xecd   :  { %v2983_v37 = vpop.f32.mrf.mxu3 }
 0xece   :  { %v2984_v26 = vadd.f32 %v5873_v51, %v2983_v37 }
 0xed0   :  { %v7422_v28 = vadd.f32 %v2984_v26, %v7255_v32 }
 0xed2   :  { %5528 = vst.msk [vmem:[%s8178_s17 + $0x48] sm:$0xff] %vm696_vm0, %v7422_v28  ;;  %v3017_v60 = vsel %vm696_vm0, %v7422_v28, 0.0 }
 0xed3   :  { %3018 = vadd.xlane.f32.xlu0 %v3017_v60 }
 0xed5   :  { %v2986_v36 = vpop.f32.mrf.mxu3 }
 0xed6   :  { %v2987_v13 = vadd.f32 %v5873_v51, %v2986_v36  ;;  %v7504_v36 = vld [vmem:[%s8179_s5 + $0x1] ss:$0 sm:$0xff] }
 0xed8   :  { %v7432_v38 = vadd.f32 %v2987_v13, %v7260_v15 }
 0xeda   :  { %5529 = vst.msk [vmem:[%s8178_s17 + $0x50] sm:$0xff] %vm696_vm0, %v7432_v38  ;;  %v3020_v32 = vsel %vm696_vm0, %v7432_v38, 0.0 }
 0xedb   :  { %3021 = vadd.xlane.f32.xlu1 %v3020_v32 }
 0xedd   :  { %v2988_v30 = vpop.f32.mrf.mxu3 }
 0xede   :  { %v2989_v39 = vadd.f32 %v5873_v51, %v2988_v30 }
 0xee0   :  { %v7442_v40 = vadd.f32 %v2989_v39, %v7265_v48  ;;  %v7510_v39 = vld [vmem:[%s8180_s6 + $0x1] ss:$0 sm:$0xff] }
 0xee2   :  { %5530 = vst.msk [vmem:[%s8178_s17 + $0x58] sm:$0xff] %vm696_vm0, %v7442_v40  ;;  %v3023_v15 = vsel %vm696_vm0, %v7442_v40, 0.0 }
 0xee3   :  { %3024 = vadd.xlane.f32.xlu2 %v3023_v15 }
 0xf08   :  { %v3010_v58 = vpop.xlane.xlu0 %3009 }
 0xf09   :  { %v3026_v11 = vmul.f32 %v3010_v58, %v6553_v59 }
 0xf0b   :  { %v7453_v41 = vsub.f32 %v7392_v42, %v3026_v11 }
 0xf0d   :  { %v3038_v48 = vmul.f32 %v7453_v41, %v7453_v41 }
 0xf0f   :  { %v3044_v49 = vsel %vm696_vm0, %v3038_v48, 0.0 }
 0xf10   :  { %v3013_v14 = vpop.xlane.xlu1 %3012  ;;  %3045 = vadd.xlane.f32.xlu0 %v3044_v49 }
 0xf11   :  { %v3027_v52 = vmul.f32 %v3013_v14, %v6553_v59 }
 0xf13   :  { %v7460_v0 = vsub.f32 %v7402_v3, %v3027_v52 }
 0xf15   :  { %v3039_v22 = vmul.f32 %v7460_v0, %v7460_v0 }
 0xf17   :  { %v3047_v50 = vsel %vm696_vm0, %v3039_v22, 0.0 }
 0xf18   :  { %3048 = vadd.xlane.f32.xlu1 %v3047_v50 }
 0xf3e   :  { %v3016_v47 = vpop.xlane.xlu2 %3015 }
 0xf3f   :  { %v3028_v29 = vmul.f32 %v3016_v47, %v6553_v59 }
 0xf41   :  { %v7467_v57 = vsub.f32 %v7412_v20, %v3028_v29 }
 0xf43   :  { %v3040_v53 = vmul.f32 %v7467_v57, %v7467_v57 }
 0xf45   :  { %v3050_v23 = vsel %vm696_vm0, %v3040_v53, 0.0 }
 0xf46   :  { %3051 = vadd.xlane.f32.xlu2 %v3050_v23  ;;  %v3019_v17 = vpop.xlane.xlu0 %3018 }
 0xf47   :  { %v3029_v31 = vmul.f32 %v3019_v17, %v6553_v59 }
 0xf49   :  { %v7474_v9 = vsub.f32 %v7422_v28, %v3029_v31 }
 0xf4b   :  { %v3041_v63 = vmul.f32 %v7474_v9, %v7474_v9 }
 0xf4d   :  { %v3053_v21 = vsel %vm696_vm0, %v3041_v63, 0.0 }
 0xf4e   :  { %v3022_v6 = vpop.xlane.xlu1 %3021  ;;  %3054 = vadd.xlane.f32.xlu0 %v3053_v21 }
 0xf4f   :  { %v3030_v54 = vmul.f32 %v3022_v6, %v6553_v59 }
 0xf51   :  { %v7481_v25 = vsub.f32 %v7432_v38, %v3030_v54 }
 0xf53   :  { %v3042_v56 = vmul.f32 %v7481_v25, %v7481_v25 }
 0xf55   :  { %v3056_v43 = vsel %vm696_vm0, %v3042_v56, 0.0 }
 0xf56   :  { %3057 = vadd.xlane.f32.xlu1 %v3056_v43  ;;  %v3025_v8 = vpop.xlane.xlu2 %3024 }
 0xf57   :  { %v3031_v19 = vmul.f32 %v3025_v8, %v6553_v59 }
 0xf59   :  { %v7488_v27 = vsub.f32 %v7442_v40, %v3031_v19 }
 0xf5b   :  { %v3043_v12 = vmul.f32 %v7488_v27, %v7488_v27 }
 0xf5d   :  { %v3059_v24 = vsel %vm696_vm0, %v3043_v12, 0.0 }
 0xf5e   :  { %3060 = vadd.xlane.f32.xlu2 %v3059_v24 }
 0xf83   :  { %v3046_v33 = vpop.xlane.xlu0 %3045 }
 0xf84   :  { %v3062_v16 = vmul.f32 %v3046_v33, %v6553_v59 }
 0xf86   :  { %v3068_v18 = vadd.f32 1e-05, %v3062_v16 }
 0xf88   :  { %6039 = vrsqrt.f32 %v3068_v18  ;;  %vm3080_vm14 = vweird.f32 %v3068_v18 }
 0xf8b   :  { %v3049_v61 = vpop.xlane.xlu1 %3048 }
 0xf8c   :  { %v3063_v4 = vmul.f32 %v3049_v61, %v6553_v59 }
 0xf8e   :  { %v6040_v51 = vpop.eup %6039  ;;  %v3069_v45 = vadd.f32 1e-05, %v3063_v4 }
 0xf8f   :  { %v3075_v55 = vmul.f32 %v6040_v51, %v3068_v18  ;;  %vm3081_vm13 = vweird.f32 %v6040_v51 }
 0xf90   :  { %6041 = vrsqrt.f32 %v3069_v45  ;;  %vm3082_vm15 = vmor %vm3080_vm14, %vm3081_vm13  ;;  %vm3090_vm3 = vweird.f32 %v3069_v45 }
 0xf91   :  { %v3076_v44 = vmul.f32 %v6040_v51, %v3075_v55 }
 0xf93   :  { %v3077_v46 = vmul.f32 0.5, %v3076_v44 }
 0xf95   :  { %v3078_v7 = vsub.f32 1.5, %v3077_v46 }
 0xf96   :  { %v6042_v5 = vpop.eup %6041 }
 0xf97   :  { %v3079_v35 = vmul.f32 %v6040_v51, %v3078_v7  ;;  %v3085_v2 = vmul.f32 %v6042_v5, %v3069_v45  ;;  %vm3091_vm1 = vweird.f32 %v6042_v5 }
 0xf98   :  { %vm3092_vm4 = vmor %vm3090_vm3, %vm3091_vm1 }
 0xf99   :  { %v3086_v10 = vmul.f32 %v6042_v5, %v3085_v2  ;;  %v3083_v37 = vsel %vm3082_vm15, %v6040_v51, %v3079_v35 }
 0xf9a   :  { %v3134_v13 = vmul.f32 %v3083_v37, %v7453_v41 }
 0xf9b   :  { %v3087_v26 = vmul.f32 0.5, %v3086_v10 }
 0xf9c   :  { %v3143_v15 = vmul.f32 %v7504_v36, %v3134_v13 }
 0xf9d   :  { %v3088_v60 = vsub.f32 1.5, %v3087_v26 }
 0xf9e   :  { %v3152_v48 = vadd.f32 %v7510_v39, %v3143_v15 }
 0xf9f   :  { %v3089_v32 = vmul.f32 %v6042_v5, %v3088_v60 }
 0xfa1   :  { %v3093_v30 = vsel %vm3092_vm4, %v6042_v5, %v3089_v32 }
 0xfa2   :  { %v3135_v58 = vmul.f32 %v3093_v30, %v7460_v0 }
 0xfa4   :  { %v3144_v11 = vmul.f32 %v7504_v36, %v3135_v58 }
 0xfa6   :  { %v3153_v49 = vadd.f32 %v7510_v39, %v3144_v11 }
 0xfa8   :  { %v3158_v41 = vpack.c.bf16 %v3153_v49, %v3152_v48 }
 0xfaa   :  { %5546 = vmatmul.msk.bf16.vlgmr.msrb.gmra.mxu0 %vm696_vm0, %v3158_v41 }
 0xfb9   :  { %v3052_v14 = vpop.xlane.xlu2 %3051 }
 0xfba   :  { %v3064_v52 = vmul.f32 %v3052_v14, %v6553_v59 }
 0xfbc   :  { %v3070_v22 = vadd.f32 1e-05, %v3064_v52 }
 0xfbe   :  { %6043 = vrsqrt.f32 %v3070_v22  ;;  %vm3100_vm6 = vweird.f32 %v3070_v22 }
 0xfc1   :  { %v3055_v50 = vpop.xlane.xlu0 %3054 }
 0xfc2   :  { %v3065_v47 = vmul.f32 %v3055_v50, %v6553_v59 }
 0xfc4   :  { %v6044_v29 = vpop.eup %6043  ;;  %v3071_v53 = vadd.f32 1e-05, %v3065_v47 }
 0xfc5   :  { %v3095_v0 = vmul.f32 %v6044_v29, %v3070_v22  ;;  %vm3101_vm5 = vweird.f32 %v6044_v29 }
 0xfc6   :  { %6045 = vrsqrt.f32 %v3071_v53  ;;  %vm3102_vm7 = vmor %vm3100_vm6, %vm3101_vm5  ;;  %vm3110_vm13 = vweird.f32 %v3071_v53 }
 0xfc7   :  { %v3096_v23 = vmul.f32 %v6044_v29, %v3095_v0 }
 0xfc9   :  { %v3097_v17 = vmul.f32 0.5, %v3096_v23  ;;  %v3058_v31 = vpop.xlane.xlu1 %3057 }
 0xfca   :  { %v3066_v63 = vmul.f32 %v3058_v31, %v6553_v59 }
 0xfcb   :  { %v3098_v21 = vsub.f32 1.5, %v3097_v17 }
 0xfcc   :  { %v6046_v6 = vpop.eup %6045  ;;  %v3072_v54 = vadd.f32 1e-05, %v3066_v63 }
 0xfcd   :  { %v3099_v56 = vmul.f32 %v6044_v29, %v3098_v21  ;;  %v3105_v43 = vmul.f32 %v6046_v6, %v3071_v53  ;;  %vm3111_vm10 = vweird.f32 %v6046_v6 }
 0xfce   :  { %6047 = vrsqrt.f32 %v3072_v54  ;;  %vm3112_vm14 = vmor %vm3110_vm13, %vm3111_vm10  ;;  %vm3120_vm1 = vweird.f32 %v3072_v54 }
 0xfcf   :  { %v3106_v8 = vmul.f32 %v6046_v6, %v3105_v43  ;;  %v3103_v19 = vsel %vm3102_vm7, %v6044_v29, %v3099_v56 }
 0xfd0   :  { %v3136_v18 = vmul.f32 %v3103_v19, %v7467_v57 }
 0xfd1   :  { %v3107_v12 = vmul.f32 0.5, %v3106_v8  ;;  %v3061_v24 = vpop.xlane.xlu2 %3060 }
 0xfd2   :  { %v3067_v33 = vmul.f32 %v3061_v24, %v6553_v59  ;;  %v3145_v44 = vmul.f32 %v7504_v36, %v3136_v18 }
 0xfd3   :  { %v3108_v34 = vsub.f32 1.5, %v3107_v12 }
 0xfd4   :  { %v6048_v16 = vpop.eup %6047  ;;  %v3073_v1 = vadd.f32 1e-05, %v3067_v33  ;;  %v3154_v2 = vadd.f32 %v7510_v39, %v3145_v44 }
 0xfd5   :  { %v3109_v61 = vmul.f32 %v6046_v6, %v3108_v34  ;;  %v3115_v4 = vmul.f32 %v6048_v16, %v3072_v54  ;;  %vm3121_vm15 = vweird.f32 %v6048_v16 }
 0xfd6   :  { %6049 = vrsqrt.f32 %v3073_v1  ;;  %vm3122_vm3 = vmor %vm3120_vm1, %vm3121_vm15  ;;  %vm3130_vm5 = vweird.f32 %v3073_v1 }
 0xfd7   :  { %v3113_v51 = vsel %vm3112_vm14, %v6046_v6, %v3109_v61  ;;  %v3116_v45 = vmul.f32 %v6048_v16, %v3115_v4 }
 0xfd8   :  { %v3137_v55 = vmul.f32 %v3113_v51, %v7474_v9 }
 0xfd9   :  { %v3117_v46 = vmul.f32 0.5, %v3116_v45 }
 0xfda   :  { %v3146_v7 = vmul.f32 %v7504_v36, %v3137_v55 }
 0xfdb   :  { %v3118_v5 = vsub.f32 1.5, %v3117_v46 }
 0xfdc   :  { %v6050_v35 = vpop.eup %6049  ;;  %v3155_v57 = vadd.f32 %v7510_v39, %v3146_v7 }
 0xfdd   :  { %v3119_v10 = vmul.f32 %v6048_v16, %v3118_v5  ;;  %v3125_v37 = vmul.f32 %v6050_v35, %v3073_v1  ;;  %vm3131_vm4 = vweird.f32 %v6050_v35 }
 0xfde   :  { %v3159_v26 = vpack.c.bf16 %v3155_v57, %v3154_v2  ;;  %vm3132_vm6 = vmor %vm3130_vm5, %vm3131_vm4 }
 0xfdf   :  { %v3126_v60 = vmul.f32 %v6050_v35, %v3125_v37  ;;  %v3123_v9 = vsel %vm3122_vm3, %v6048_v16, %v3119_v10 }
 0xfe0   :  { %5547 = vmatmul.msk.bf16.gmra.mxu0 %vm696_vm0, %v3159_v26  ;;  %v3138_v30 = vmul.f32 %v3123_v9, %v7481_v25  ;;  %v5875_v25 = vld [vmem:[%s8181_s8 + $0x1] ss:$0 sm:$0xff]  ;;  %s8205_s8 = smov 40  }
 0xfe1   :  { %v3127_v13 = vmul.f32 0.5, %v3126_v60 }
 0xfe2   :  { %v3147_v48 = vmul.f32 %v7504_v36, %v3138_v30 }
 0xfe3   :  { %v3128_v32 = vsub.f32 1.5, %v3127_v13 }
 0xfe4   :  { %v3156_v41 = vadd.f32 %v7510_v39, %v3147_v48 }
 0xfe5   :  { %v3129_v15 = vmul.f32 %v6050_v35, %v3128_v32 }
 0xfe7   :  { %v3133_v58 = vsel %vm3132_vm6, %v6050_v35, %v3129_v15 }
 0xfe8   :  { %v3139_v11 = vmul.f32 %v3133_v58, %v7488_v27 }
 0xfea   :  { %v3148_v49 = vmul.f32 %v7504_v36, %v3139_v11 }
 0xfec   :  { %v3157_v14 = vadd.f32 %v7510_v39, %v3148_v49 }
 0xfee   :  { %v3160_v52 = vpack.c.bf16 %v3157_v14, %v3156_v41 }
 0xff0   :  { %5548 = vmatmul.msk.bf16.gmra.mxu0 %vm696_vm0, %v3160_v52 }
0x1027   :  { %v3201_v22 = vpop.f32.mrf.mxu0 }
0x1028   :  { %v3202_v50 = vadd.f32 %v5875_v25, %v3201_v22 }
0x102a   :  { %v3216_v47 = vpack.c.bf16 %v3202_v50, %v3202_v50 }
0x102c   :  { %v3223_v29 = vunpack.c.l.b16 %v3216_v47 }
0x102e   :  { %v7539_v27 = vpack.c.b16 %v3223_v29, %v3223_v29 }
0x102f   :  { %v3203_v53 = vpop.f32.mrf.mxu0 }
0x1030   :  { %v3204_v0 = vadd.f32 %v5875_v25, %v3203_v53  ;;  %3225 = vrot.lane.b32.xlu2 %v7539_v27, %s6184_s22 }
0x1032   :  { %v3217_v36 = vpack.c.bf16 %v3204_v0, %v3204_v0 }
0x1034   :  { %v3247_v39 = vunpack.c.l.b16 %v3217_v36 }
0x1036   :  { %v7543_v23 = vpack.c.b16 %v3247_v39, %v3247_v39 }
0x1038   :  { %3249 = vrot.lane.b32.xlu0 %v7543_v23, %s6184_s22 }
0x105d   :  { %v3206_v17 = vpop.f32.mrf.mxu0 }
0x105e   :  { %v3207_v31 = vadd.f32 %v5875_v25, %v3206_v17 }
0x1060   :  { %v3218_v63 = vpack.c.bf16 %v3207_v31, %v3207_v31 }
0x1062   :  { %v3271_v21 = vunpack.c.l.b16 %v3218_v63 }
0x1064   :  { %v7547_v6 = vpack.c.b16 %v3271_v21, %v3271_v21 }
0x1065   :  { %v3208_v54 = vpop.f32.mrf.mxu0 }
0x1066   :  { %v3209_v56 = vadd.f32 %v5875_v25, %v3208_v54  ;;  %3273 = vrot.lane.b32.xlu1 %v7547_v6, %s6184_s22 }
0x1068   :  { %v3219_v43 = vpack.c.bf16 %v3209_v56, %v3209_v56 }
0x106a   :  { %v3295_v8 = vunpack.c.l.b16 %v3219_v43 }
0x106c   :  { %v7551_v19 = vpack.c.b16 %v3295_v8, %v3295_v8 }
0x106d   :  { %v3211_v12 = vpop.f32.mrf.mxu0 }
0x106e   :  { %v3212_v24 = vadd.f32 %v5875_v25, %v3211_v12  ;;  %3297 = vrot.lane.b32.xlu0 %v7551_v19, %s6184_s22  ;;  %3480 = vrot.lane.b32.xlu1 %v7547_v6, %s6185_s23 }
0x1070   :  { %v3220_v33 = vpack.c.bf16 %v3212_v24, %v3212_v24 }
0x1072   :  { %v3319_v34 = vunpack.c.l.b16 %v3220_v33 }
0x1074   :  { %v7557_v16 = vpack.c.b16 %v3319_v34, %v3319_v34 }
0x1075   :  { %v3213_v18 = vpop.f32.mrf.mxu0 }
0x1076   :  { %v3214_v1 = vadd.f32 %v5875_v25, %v3213_v18  ;;  %3321 = vrot.lane.b32.xlu2 %v7557_v16, %s6184_s22 }
0x1078   :  { %v3221_v61 = vpack.c.bf16 %v3214_v1, %v3214_v1 }
0x107a   :  { %v3343_v4 = vunpack.c.l.b16 %v3221_v61 }
0x107c   :  { %v7561_v51 = vpack.c.b16 %v3343_v4, %v3343_v4 }
0x107e   :  { %3438 = vrot.lane.b32.xlu2 %v7539_v27, %s6185_s23  ;;  %3345 = vrot.lane.b32.xlu0 %v7561_v51, %s6184_s22  ;;  %s8206_s22 = smov 8  }
0x1086   :  { %3587 = vrot.lane.b32.xlu2 %v7543_v23, %s6186_s24  ;;  %3459 = vrot.lane.b32.xlu0 %v7543_v23, %s6185_s23 }
0x108a   :  { %v3226_v45 = vpop.permute.xlu2 %3225 }
0x108b   :  { %v3231_v55 = vsel %vm1083_vm8, %v3226_v45, 0 }
0x108c   :  { %3240 = vmatpush.bf16.xpose.msrb.mxu1 %v3231_v55 }
0x108e   :  { %3501 = vrot.lane.b32.xlu0 %v7551_v19, %s6185_s23 }
0x1093   :  { %5549 = vmatmul.msk.bf16.vlgmr.msrb.gmra.mxu1 %vm1083_vm8, %v3216_v47 }
0x1096   :  { %3566 = vrot.lane.b32.xlu0 %v7539_v27, %s6187_s25 }
0x109e   :  { %3589 = vrot.lane.b32.xlu0 %v7543_v23, %s6187_s25 }
0x10a6   :  { %3522 = vrot.lane.b32.xlu0 %v7557_v16, %s6185_s23 }
0x10aa   :  { %v3250_v44 = vpop.permute.xlu0 %3249 }
0x10ab   :  { %v3255_v46 = vsel %vm1083_vm8, %v3250_v44, 0 }
0x10ac   :  { %3264 = vmatpush.bf16.xpose.msra.mxu2 %v3255_v46 }
0x10ae   :  { %3564 = vrot.lane.b32.xlu0 %v7539_v27, %s6186_s24 }
0x10b3   :  { %5550 = vmatmul.msk.bf16.vlgmr.msra.gmra.mxu2 %vm1083_vm8, %v3217_v36 }
0x10b6   :  { %3612 = vrot.lane.b32.xlu0 %v7547_v6, %s6187_s25 }
0x10be   :  { %3543 = vrot.lane.b32.xlu0 %v7561_v51, %s6185_s23  ;;  %s8207_s23 = smov 16  }
0x10d0   :  { %v3322_v7 = vpop.permute.xlu2 %3321 }
0x10d1   :  { %v3327_v5 = vsel %vm1083_vm8, %v3322_v7, 0 }
0x10d2   :  { %3336 = vmatpush.bf16.xpose.msra.mxu1 %v3327_v5 }
0x10d8   :  { %v3439_v35 = vpop.permute.xlu2 %3438  ;;  %v3274_v2 = vpop.permute.xlu1 %3273 }
0x10d9   :  { %v3444_v57 = vsel %vm1300_vm9, %v3439_v35, 0  ;;  %v3279_v10 = vsel %vm1083_vm8, %v3274_v2, 0  ;;  %5553 = vmatmul.msk.bf16.vlgmr.msra.gmra.mxu1 %vm1083_vm8, %v3220_v33 }
0x10da   :  { %3288 = vmatpush.bf16.xpose.msra.mxu3 %v3279_v10 }
0x10e0   :  { %v3481_v37 = vpop.permute.xlu1 %3480  ;;  %v3298_v60 = vpop.permute.xlu0 %3297 }
0x10e1   :  { %v3486_v26 = vsel %vm1300_vm9, %v3481_v37, 0  ;;  %5551 = vmatmul.msk.bf16.vlgmr.msra.gmra.mxu3 %vm1083_vm8, %v3218_v63  ;;  %v3303_v9 = vsel %vm1083_vm8, %v3298_v60, 0 }
0x10e2   :  { %3453 = vmatpush.bf16.msrb.mxu3 %v3444_v57  ;;  %3495 = vmatpush.bf16.msrb.mxu1 %v3486_v26 }
0x10e3   :  { %3312 = vmatpush.bf16.xpose.msra.mxu0 %v3303_v9 }
0x10ea   :  { %5552 = vmatmul.msk.bf16.vlgmr.msra.gmra.mxu0 %vm1083_vm8, %v3219_v43 }
0x10f0   :  { %v3346_v13 = vpop.permute.xlu0 %3345 }
0x10f1   :  { %v3351_v32 = vsel %vm1083_vm8, %v3346_v13, 0  ;;  %v7629_v13 = vpop.permute.xlu2 %3587 }
0x10f2   :  { %3360 = vmatpush.bf16.xpose.msrb.mxu2 %v3351_v32 }
0x10f8   :  { %v3460_v30 = vpop.permute.xlu0 %3459 }
0x10f9   :  { %v3465_v15 = vsel %vm1300_vm9, %v3460_v30, 0  ;;  %5554 = vmatmul.msk.bf16.vlgmr.msrb.gmra.mxu2 %vm1083_vm8, %v3221_v61 }
0x10fa   :  { %3474 = vmatpush.bf16.msrb.mxu0 %v3465_v15 }
0x1100   :  { %v3502_v58 = vpop.permute.xlu0 %3501 }
0x1101   :  { %v3507_v11 = vsel %vm1300_vm9, %v3502_v58, 0 }
0x1102   :  { %3516 = vmatpush.bf16.msra.mxu2 %v3507_v11 }
0x1108   :  { %v3567_v48 = vpop.permute.xlu0 %3566 }
0x1109   :  { %v3572_v49 = vsel %vm1083_vm8, %v3567_v48, 0 }
0x110a   :  { %3581 = vmatpush.bf16.xpose.msra.mxu1 %v3572_v49 }
0x1110   :  { %v3242_v41 = vpop.f32.mrf.mxu1  ;;  %v3590_v14 = vpop.permute.xlu0 %3589 }
0x1111   :  { %v3243_v52 = vadd.f32 %v3242_v41, %v6837_v62  ;;  %v3595_v25 = vsel %vm1083_vm8, %v3590_v14, 0 }
0x1112   :  { %3604 = vmatpush.bf16.xpose.msrb.mxu2 %v3595_v25 }
0x1113   :  { %v3366_v22 = vsel %vm1083_vm8, %v3243_v52, -inf }
0x1114   :  { %3367 = vmax.xlane.f32.xlu1 %v3366_v22 }
0x1118   :  { %v3244_v50 = vpop.f32.mrf.mxu1  ;;  %v3523_v47 = vpop.permute.xlu0 %3522 }
0x1119   :  { %v3528_v29 = vsel %vm1300_vm9, %v3523_v47, 0 }
0x111a   :  { %3537 = vmatpush.bf16.msra.mxu3 %v3528_v29 }
0x1120   :  { %v7606_v53 = vpop.permute.xlu0 %3564 }
0x1128   :  { %v7608_v0 = vpop.permute.xlu0 %3612 }
0x1130   :  { %v3544_v36 = vpop.permute.xlu0 %3543 }
0x1131   :  { %v3549_v39 = vsel %vm1300_vm9, %v3544_v36, 0 }
0x1132   :  { %3558 = vmatpush.bf16.msra.mxu0 %v3549_v39 }
0x1136   :  { %v3266_v17 = vpop.f32.mrf.mxu2 }
0x1137   :  { %v3267_v31 = vadd.f32 %v3266_v17, %v6837_v62 }
0x1139   :  { %v3369_v63 = vsel %vm1083_vm8, %v3267_v31, -inf }
0x113a   :  { %3370 = vmax.xlane.f32.xlu0 %v3369_v63 }
0x113e   :  { %v3268_v21 = vpop.f32.mrf.mxu2 }
0x1156   :  { %v3338_v54 = vpop.f32.mrf.mxu1 }
0x1157   :  { %v3339_v18 = vadd.f32 %v3338_v54, %v6837_v62 }
0x1159   :  { %v3378_v4 = vsel %vm1083_vm8, %v3339_v18, -inf }
0x115e   :  { %v3340_v56 = vpop.f32.mrf.mxu1 }
0x1164   :  { %v3290_v43 = vpop.f32.mrf.mxu3 }
0x1165   :  { %v3291_v8 = vadd.f32 %v3290_v43, %v6837_v62 }
0x1167   :  { %v3314_v12 = vpop.f32.mrf.mxu0  ;;  %v3372_v24 = vsel %vm1083_vm8, %v3291_v8, -inf }
0x1168   :  { %v3315_v33 = vadd.f32 %v3314_v12, %v6837_v62  ;;  %3373 = vmax.xlane.f32.xlu2 %v3372_v24  ;;  %v3618_v12 = vsel %vm1083_vm8, %v7608_v0, 0 }
0x116a   :  { %v3375_v34 = vsel %vm1083_vm8, %v3315_v33, -inf }
0x116b   :  { %3376 = vmax.xlane.f32.xlu1 %v3375_v34 }
0x116c   :  { %v3292_v1 = vpop.f32.mrf.mxu3 }
0x116f   :  { %v3316_v61 = vpop.f32.mrf.mxu0 }
0x1170   :  { %3379 = vmax.xlane.f32.xlu2 %v3378_v4 }
0x117c   :  { %v3362_v45 = vpop.f32.mrf.mxu2 }
0x117d   :  { %v3363_v55 = vadd.f32 %v3362_v45, %v6837_v62 }
0x117f   :  { %v3381_v44 = vsel %vm1083_vm8, %v3363_v55, -inf }
0x1180   :  { %3382 = vmax.xlane.f32.xlu0 %v3381_v44 }
0x1184   :  { %3635 = vrot.lane.b32.xlu1 %v7551_v19, %s6187_s25  ;;  %v3364_v46 = vpop.f32.mrf.mxu2 }
0x1187   :  { %v3368_v7 = vpop.xlane.xlu1 %3367 }
0x1188   :  { %v3384_v5 = vsub.f32 %v3243_v52, %v3368_v7 }
0x118a   :  { %v3390_v35 = vmul.f32 1.442695, %v3384_v5 }
0x118c   :  { %6051 = vpow2.f32 %v3390_v35 }
0x1192   :  { %v6052_v2 = vpop.eup %6051 }
0x1193   :  { %v3402_v57 = vsel %vm1083_vm8, %v6052_v2, 0.0 }
0x1194   :  { %3658 = vrot.lane.b32.xlu0 %v7557_v16, %s6187_s25 }
0x11ad   :  { %v3371_v10 = vpop.xlane.xlu0 %3370 }
0x11ae   :  { %3403 = vadd.xlane.f32.xlu1 %v3402_v57  ;;  %v3385_v37 = vsub.f32 %v3267_v31, %v3371_v10 }
0x11b0   :  { %v3392_v26 = vmul.f32 1.442695, %v3385_v37 }
0x11b2   :  { %6053 = vpow2.f32 %v3392_v26 }
0x11b8   :  { %v6054_v60 = vpop.eup %6053 }
0x11b9   :  { %v3405_v9 = vsel %vm1083_vm8, %v6054_v60, 0.0 }
0x11ba   :  { %3406 = vadd.xlane.f32.xlu2 %v3405_v9 }
0x11d2   :  { %3610 = vrot.lane.b32.xlu2 %v7547_v6, %s6186_s24 }
0x11db   :  { %v3374_v32 = vpop.xlane.xlu2 %3373 }
0x11dc   :  { %v3386_v30 = vsub.f32 %v3291_v8, %v3374_v32 }
0x11de   :  { %v3394_v15 = vmul.f32 1.442695, %v3386_v30  ;;  %v3377_v58 = vpop.xlane.xlu1 %3376 }
0x11df   :  { %v3387_v11 = vsub.f32 %v3315_v33, %v3377_v58 }
0x11e0   :  { %6055 = vpow2.f32 %v3394_v15 }
0x11e1   :  { %v3396_v48 = vmul.f32 1.442695, %v3387_v11 }
0x11e3   :  { %6057 = vpow2.f32 %v3396_v48  ;;  %v3380_v41 = vpop.xlane.xlu2 %3379 }
0x11e4   :  { %v3388_v25 = vsub.f32 %v3339_v18, %v3380_v41 }
0x11e6   :  { %v6056_v49 = vpop.eup %6055  ;;  %v3398_v50 = vmul.f32 1.442695, %v3388_v25 }
0x11e7   :  { %v3408_v14 = vsel %vm1083_vm8, %v6056_v49, 0.0 }
0x11e8   :  { %3409 = vadd.xlane.f32.xlu0 %v3408_v14  ;;  %6059 = vpow2.f32 %v3398_v50 }
0x11e9   :  { %v6058_v52 = vpop.eup %6057 }
0x11ea   :  { %v3411_v22 = vsel %vm1083_vm8, %v6058_v52, 0.0 }
0x11eb   :  { %3412 = vadd.xlane.f32.xlu1 %v3411_v22 }
0x11ee   :  { %v6060_v39 = vpop.eup %6059 }
0x11ef   :  { %v3414_v17 = vsel %vm1083_vm8, %v6060_v39, 0.0 }
0x11f3   :  { %v3383_v47 = vpop.xlane.xlu0 %3382 }
0x11f4   :  { %v3389_v29 = vsub.f32 %v3363_v55, %v3383_v47 }
0x11f6   :  { %v3400_v36 = vmul.f32 1.442695, %v3389_v29  ;;  %v3636_v21 = vpop.permute.xlu1 %3635 }
0x11f7   :  { %v3641_v1 = vsel %vm1083_vm8, %v3636_v21, 0 }
0x11f8   :  { %6061 = vpow2.f32 %v3400_v36 }
0x11fb   :  { %3415 = vadd.xlane.f32.xlu2 %v3414_v17 }
0x11fc   :  { %3681 = vrot.lane.b32.xlu0 %v7561_v51, %s6187_s25 }
0x11fe   :  { %v6062_v31 = vpop.eup %6061 }
0x11ff   :  { %v3417_v63 = vsel %vm1083_vm8, %v6062_v31, 0.0 }
0x1200   :  { %3418 = vadd.xlane.f32.xlu1 %v3417_v63 }
0x1204   :  { %3633 = vrot.lane.b32.xlu0 %v7551_v19, %s6186_s24 }
0x1206   :  { %v3659_v61 = vpop.permute.xlu0 %3658 }
0x1207   :  { %v3664_v35 = vsel %vm1083_vm8, %v3659_v61, 0 }
0x1213   :  { %3679 = vrot.lane.b32.xlu2 %v7561_v51, %s6186_s24 }
0x1219   :  { %3656 = vrot.lane.b32.xlu1 %v7557_v16, %s6186_s24  ;;  %s8208_s24 = smov 24  }
0x1221   :  { %v3404_v54 = vpop.xlane.xlu1 %3403 }
0x1222   :  { %6063 = vrcp.f32 %v3404_v54 }
0x1228   :  { %v6064_v56 = vpop.eup %6063 }
0x1229   :  { %v3426_v43 = vmul.f32 %v6064_v56, %v6052_v2 }
0x122b   :  { %v3432_v8 = vpack.c.bf16 %v3426_v43, %v3426_v43 }
0x122d   :  { %5555 = vmatmul.msk.bf16.vlgmr.msrb.gmra.mxu3 %vm1083_vm8, %v3432_v8  ;;  %v3407_v24 = vpop.xlane.xlu2 %3406 }
0x122e   :  { %3627 = vmatpush.bf16.xpose.msrb.mxu3 %v3618_v12  ;;  %6065 = vrcp.f32 %v3407_v24 }
0x1234   :  { %v6066_v33 = vpop.eup %6065 }
0x1235   :  { %v3427_v34 = vmul.f32 %v6066_v33, %v6054_v60  ;;  %v3611_v7 = vpop.permute.xlu2 %3610 }
0x1237   :  { %v3433_v18 = vpack.c.bf16 %v3427_v34, %v3427_v34 }
0x1239   :  { %5556 = vmatmul.msk.bf16.vlgmr.msrb.gmra.mxu0 %vm1083_vm8, %v3433_v18 }
0x123a   :  { %3650 = vmatpush.bf16.xpose.msrb.mxu0 %v3641_v1 }
0x125b   :  { %v3410_v4 = vpop.xlane.xlu0 %3409 }
0x125c   :  { %6067 = vrcp.f32 %v3410_v4 }
0x125e   :  { %v3413_v45 = vpop.xlane.xlu1 %3412 }
0x125f   :  { %6069 = vrcp.f32 %v3413_v45 }
0x1262   :  { %v6068_v55 = vpop.eup %6067 }
0x1263   :  { %v3428_v0 = vmul.f32 %v6068_v55, %v6056_v49 }
0x1265   :  { %v6070_v44 = vpop.eup %6069  ;;  %v3434_v46 = vpack.c.bf16 %v3428_v0, %v3428_v0 }
0x1266   :  { %v3429_v5 = vmul.f32 %v6070_v44, %v6058_v52 }
0x1267   :  { %5557 = vmatmul.msk.bf16.vlgmr.msrb.gmra.mxu1 %vm1083_vm8, %v3434_v46 }
0x1268   :  { %v3435_v2 = vpack.c.bf16 %v3429_v5, %v3429_v5  ;;  %3673 = vmatpush.bf16.xpose.msrb.mxu1 %v3664_v35 }
0x126a   :  { %5558 = vmatmul.msk.bf16.vlgmr.msra.gmra.mxu2 %vm1083_vm8, %v3435_v2 }
0x126e   :  { %v3416_v57 = vpop.xlane.xlu2 %3415  ;;  %v3682_v10 = vpop.permute.xlu0 %3681 }
0x126f   :  { %6071 = vrcp.f32 %v3416_v57  ;;  %v3687_v37 = vsel %vm1083_vm8, %v3682_v10, 0 }
0x1270   :  { %3696 = vmatpush.bf16.xpose.msra.mxu2 %v3687_v37 }
0x1273   :  { %v3419_v26 = vpop.xlane.xlu1 %3418 }
0x1274   :  { %6073 = vrcp.f32 %v3419_v26 }
0x1275   :  { %v6072_v60 = vpop.eup %6071 }
0x1276   :  { %v3430_v9 = vmul.f32 %v6072_v60, %v6060_v39  ;;  %v3680_v11 = vpop.permute.xlu2 %3679 }
0x1277   :  { %5561 = vmatmul.msk.bf16.vlgmr.msra.gmra.mxu1 %vm1083_vm8, %v7606_v53  ;;  %v3634_v53 = vpop.permute.xlu0 %3633 }
0x1278   :  { %v3436_v32 = vpack.c.bf16 %v3430_v9, %v3430_v9 }
0x127a   :  { %v6074_v30 = vpop.eup %6073  ;;  %5562 = vmatmul.msk.bf16.vlgmr.msrb.gmra.mxu2 %vm1083_vm8, %v7629_v13  ;;  %5559 = vmatmul.msk.bf16.vlgmr.msra.gmra.mxu3 %vm1083_vm8, %v3436_v32 }
0x127b   :  { %v3431_v15 = vmul.f32 %v6074_v30, %v6062_v31 }
0x127d   :  { %v3437_v58 = vpack.c.bf16 %v3431_v15, %v3431_v15 }
0x127f   :  { %5560 = vmatmul.msk.bf16.vlgmr.msra.gmra.mxu0 %vm1083_vm8, %v3437_v58 }
0x128a   :  { %5566 = vmatmul.msk.bf16.vlgmr.msra.gmra.mxu2 %vm1083_vm8, %v3680_v11  ;;  %5563 = vmatmul.msk.bf16.vlgmr.msrb.gmra.mxu3 %vm1083_vm8, %v3611_v7 }
0x128b   :  { %v3657_v48 = vpop.permute.xlu1 %3656 }
0x128c   :  { %5565 = vmatmul.msk.bf16.vlgmr.msrb.gmra.mxu1 %vm1083_vm8, %v3657_v48 }
0x128f   :  { %5564 = vmatmul.msk.bf16.vlgmr.msrb.gmra.mxu0 %vm1083_vm8, %v3634_v53 }
0x12b0   :  { %v7662_v49 = vpop.f32.mrf.mxu3 }
0x12b6   :  { %v7664_v13 = vpop.f32.mrf.mxu0 }
0x12b8   :  { %v3457_v41 = vpop.f32.mrf.mxu3 }
0x12be   :  { %v3478_v14 = vpop.f32.mrf.mxu0 }
0x12e4   :  { %v7666_v52 = vpop.f32.mrf.mxu1 }
0x12ec   :  { %v3499_v25 = vpop.f32.mrf.mxu1 }
0x12ed   :  { %v7668_v22 = vpop.f32.mrf.mxu2 }
0x12f4   :  { %v3583_v50 = vpop.f32.mrf.mxu1 }
0x12f5   :  { %v3520_v47 = vpop.f32.mrf.mxu2  ;;  %v3584_v29 = vadd.f32 %v3583_v50, %v6837_v62 }
0x12f7   :  { %v3702_v36 = vsel %vm1083_vm8, %v3584_v29, -inf }
0x12f8   :  { %3703 = vmax.xlane.f32.xlu0 %v3702_v36 }
0x12fc   :  { %v7672_v39 = vpop.f32.mrf.mxu0  ;;  %v3585_v17 = vpop.f32.mrf.mxu1 }
0x12fd   :  { %v3606_v31 = vpop.f32.mrf.mxu2  ;;  %v7674_v63 = vpop.f32.mrf.mxu3 }
0x12fe   :  { %v3607_v21 = vadd.f32 %v3606_v31, %v6837_v62 }
0x1300   :  { %v3705_v54 = vsel %vm1083_vm8, %v3607_v21, -inf }
0x1301   :  { %3706 = vmax.xlane.f32.xlu1 %v3705_v54 }
0x1304   :  { %v3562_v56 = vpop.f32.mrf.mxu0 }
0x1305   :  { %v3608_v43 = vpop.f32.mrf.mxu2  ;;  %v3541_v8 = vpop.f32.mrf.mxu3 }
0x1309   :  { %v3675_v12 = vpop.f32.mrf.mxu1 }
0x130a   :  { %v3676_v24 = vadd.f32 %v3675_v12, %v6837_v62 }
0x130c   :  { %v3652_v33 = vpop.f32.mrf.mxu0  ;;  %v3714_v34 = vsel %vm1083_vm8, %v3676_v24, -inf }
0x130d   :  { %v3653_v18 = vadd.f32 %v3652_v33, %v6837_v62  ;;  %v3698_v1 = vpop.f32.mrf.mxu2  ;;  %v3629_v61 = vpop.f32.mrf.mxu3  ;;  %3715 = vmax.xlane.f32.xlu0 %v3714_v34 }
0x130e   :  { %v3630_v4 = vadd.f32 %v3629_v61, %v6837_v62  ;;  %v3699_v44 = vadd.f32 %v3698_v1, %v6837_v62 }
0x130f   :  { %v3711_v45 = vsel %vm1083_vm8, %v3653_v18, -inf }
0x1310   :  { %3712 = vmax.xlane.f32.xlu2 %v3711_v45  ;;  %v3708_v55 = vsel %vm1083_vm8, %v3630_v4, -inf  ;;  %v3717_v35 = vsel %vm1083_vm8, %v3699_v44, -inf }
0x1311   :  { %3709 = vmax.xlane.f32.xlu1 %v3708_v55  ;;  %v3677_v0 = vpop.f32.mrf.mxu1 }
0x1314   :  { %v3654_v46 = vpop.f32.mrf.mxu0 }
0x1315   :  { %v3700_v7 = vpop.f32.mrf.mxu2  ;;  %v3631_v5 = vpop.f32.mrf.mxu3 }
0x1318   :  { %3718 = vmax.xlane.f32.xlu2 %v3717_v35 }
0x1321   :  { %3795 = vrot.lane.b32.xlu0 %v7543_v23, %s6189_s27 }
0x1329   :  { %3837 = vrot.lane.b32.xlu0 %v7551_v19, %s6189_s27 }
0x132a   :  { %3858 = vrot.lane.b32.xlu1 %v7557_v16, %s6189_s27 }
0x1330   :  { %3774 = vrot.lane.b32.xlu2 %v7539_v27, %s6189_s27 }
0x1331   :  { %3816 = vrot.lane.b32.xlu0 %v7547_v6, %s6189_s27 }
0x1332   :  { %3948 = vrot.lane.b32.xlu1 %v7547_v6, %s6190_s28 }
0x1339   :  { %3879 = vrot.lane.b32.xlu0 %v7561_v51, %s6189_s27 }
0x133a   :  { %3971 = vrot.lane.b32.xlu1 %v7551_v19, %s6190_s28 }
0x1341   :  { %3925 = vrot.lane.b32.xlu0 %v7543_v23, %s6190_s28 }
0x1349   :  { %3902 = vrot.lane.b32.xlu0 %v7539_v27, %s6190_s28 }
0x136b   :  { %v3704_v2 = vpop.xlane.xlu0 %3703 }
0x136c   :  { %v3720_v57 = vsub.f32 %v3584_v29, %v3704_v2 }
0x136e   :  { %v3726_v10 = vmul.f32 1.442695, %v3720_v57 }
0x1370   :  { %6075 = vpow2.f32 %v3726_v10 }
0x1374   :  { %v3707_v37 = vpop.xlane.xlu1 %3706 }
0x1375   :  { %v3721_v26 = vsub.f32 %v3607_v21, %v3707_v37 }
0x1376   :  { %v7706_v60 = vpop.eup %6075 }
0x1377   :  { %v3728_v9 = vmul.f32 1.442695, %v3721_v26  ;;  %v3738_v32 = vsel %vm1083_vm8, %v7706_v60, 0.0 }
0x1378   :  { %3739 = vadd.xlane.f32.xlu0 %v3738_v32 }
0x1379   :  { %6077 = vpow2.f32 %v3728_v9 }
0x137f   :  { %v7710_v30 = vpop.eup %6077 }
0x1380   :  { %v3741_v15 = vsel %vm1083_vm8, %v7710_v30, 0.0  ;;  %v3716_v58 = vpop.xlane.xlu0 %3715 }
0x1381   :  { %3742 = vadd.xlane.f32.xlu1 %v3741_v15  ;;  %v3724_v11 = vsub.f32 %v3676_v24, %v3716_v58 }
0x1383   :  { %v3734_v48 = vmul.f32 1.442695, %v3724_v11  ;;  %v3713_v53 = vpop.xlane.xlu2 %3712 }
0x1384   :  { %v3710_v41 = vpop.xlane.xlu1 %3709  ;;  %v3723_v47 = vsub.f32 %v3653_v18, %v3713_v53 }
0x1385   :  { %6079 = vpow2.f32 %v3734_v48  ;;  %v3722_v14 = vsub.f32 %v3630_v4, %v3710_v41 }
0x1386   :  { %v3732_v21 = vmul.f32 1.442695, %v3723_v47 }
0x1387   :  { %v3730_v25 = vmul.f32 1.442695, %v3722_v14 }
0x1389   :  { %6081 = vpow2.f32 %v3730_v25 }
0x138b   :  { %v7714_v50 = vpop.eup %6079  ;;  %v3719_v29 = vpop.xlane.xlu2 %3718 }
0x138c   :  { %v3725_v36 = vsub.f32 %v3699_v44, %v3719_v29  ;;  %3923 = vrot.lane.b32.xlu0 %v7543_v23, %s6191_s26  ;;  %v3750_v17 = vsel %vm1083_vm8, %v7714_v50, 0.0 }
0x138d   :  { %3751 = vadd.xlane.f32.xlu1 %v3750_v17 }
0x138e   :  { %v3736_v31 = vmul.f32 1.442695, %v3725_v36 }
0x138f   :  { %v7720_v54 = vpop.eup %6081 }
0x1390   :  { %6083 = vpow2.f32 %v3736_v31  ;;  %v3744_v24 = vsel %vm1083_vm8, %v7720_v54, 0.0 }
0x1391   :  { %6085 = vpow2.f32 %v3732_v21 }
0x1393   :  { %v3775_v56 = vpop.permute.xlu2 %3774  ;;  %v3796_v43 = vpop.permute.xlu0 %3795 }
0x1394   :  { %v3780_v8 = vsel %vm1300_vm9, %v3775_v56, 0  ;;  %v3801_v12 = vsel %vm1300_vm9, %v3796_v43, 0  ;;  %3969 = vrot.lane.b32.xlu0 %v7551_v19, %s6191_s26 }
0x1395   :  { %3789 = vmatpush.bf16.msra.mxu3 %v3780_v8  ;;  %3745 = vadd.xlane.f32.xlu1 %v3744_v24 }
0x1396   :  { %v7728_v33 = vpop.eup %6083  ;;  %3810 = vmatpush.bf16.msra.mxu0 %v3801_v12 }
0x1397   :  { %v3753_v34 = vsel %vm1083_vm8, %v7728_v33, 0.0  ;;  %v7732_v18 = vpop.eup %6085 }
0x1398   :  { %3754 = vadd.xlane.f32.xlu2 %v3753_v34  ;;  %v3747_v45 = vsel %vm1083_vm8, %v7732_v18, 0.0 }
0x139b   :  { %v3838_v1 = vpop.permute.xlu0 %3837 }
0x139c   :  { %v3843_v61 = vsel %vm1300_vm9, %v3838_v1, 0  ;;  %v3859_v4 = vpop.permute.xlu1 %3858  ;;  %3994 = vrot.lane.b32.xlu0 %v7557_v16, %s6190_s28 }
0x139d   :  { %v3864_v55 = vsel %vm1300_vm9, %v3859_v4, 0  ;;  %3748 = vadd.xlane.f32.xlu1 %v3747_v45  ;;  %3852 = vmatpush.bf16.msrb.mxu2 %v3843_v61 }
0x139e   :  { %3873 = vmatpush.bf16.msrb.mxu3 %v3864_v55 }
0x13a3   :  { %v3817_v0 = vpop.permute.xlu0 %3816 }
0x13a4   :  { %v3822_v44 = vsel %vm1300_vm9, %v3817_v0, 0  ;;  %3992 = vrot.lane.b32.xlu0 %v7557_v16, %s6191_s26  ;;  %v3949_v10 = vpop.permute.xlu1 %3948 }
0x13a5   :  { %3831 = vmatpush.bf16.msra.mxu1 %v3822_v44  ;;  %v3954_v11 = vsel %vm1083_vm8, %v3949_v10, 0 }
0x13ab   :  { %v3880_v46 = vpop.permute.xlu0 %3879 }
0x13ac   :  { %v3885_v7 = vsel %vm1300_vm9, %v3880_v46, 0  ;;  %4152 = vrot.lane.b32.xlu0 %v7547_v6, %s6192_s29  ;;  %v3972_v26 = vpop.permute.xlu1 %3971 }
0x13ad   :  { %3894 = vmatpush.bf16.msrb.mxu0 %v3885_v7  ;;  %v3977_v25 = vsel %vm1083_vm8, %v3972_v26, 0 }
0x13b0   :  { %3946 = vrot.lane.b32.xlu2 %v7547_v6, %s6191_s26 }
0x13b3   :  { %v3926_v5 = vpop.permute.xlu0 %3925 }
0x13b4   :  { %v3931_v35 = vsel %vm1083_vm8, %v3926_v5, 0  ;;  %4173 = vrot.lane.b32.xlu0 %v7551_v19, %s6192_s29 }
0x13b5   :  { %3940 = vmatpush.bf16.xpose.msra.mxu2 %v3931_v35 }
0x13b6   :  { %3900 = vrot.lane.b32.xlu1 %v7539_v27, %s6191_s26 }
0x13b8   :  { %4131 = vrot.lane.b32.xlu2 %v7543_v23, %s6192_s29 }
0x13bb   :  { %v3903_v2 = vpop.permute.xlu0 %3902 }
0x13bc   :  { %v3908_v57 = vsel %vm1083_vm8, %v3903_v2, 0  ;;  %4238 = vrot.lane.b32.xlu0 %v7539_v27, %s6193_s1 }
0x13bd   :  { %3917 = vmatpush.bf16.xpose.msrb.mxu1 %v3908_v57 }
0x13be   :  { %4017 = vrot.lane.b32.xlu1 %v7561_v51, %s6190_s28 }
0x13c4   :  { %4261 = vrot.lane.b32.xlu0 %v7543_v23, %s6193_s1 }
0x13c6   :  { %4015 = vrot.lane.b32.xlu1 %v7561_v51, %s6191_s26 }
0x13cc   :  { %4194 = vrot.lane.b32.xlu0 %v7557_v16, %s6192_s29 }
0x13ce   :  { %4110 = vrot.lane.b32.xlu1 %v7539_v27, %s6192_s29 }
0x13d4   :  { %4215 = vrot.lane.b32.xlu0 %v7561_v51, %s6192_s29 }
0x13eb   :  { %v3740_v37 = vpop.xlane.xlu0 %3739 }
0x13ec   :  { %6087 = vrcp.f32 %v3740_v37 }
0x13f2   :  { %v6088_v9 = vpop.eup %6087 }
0x13f3   :  { %v3762_v32 = vmul.f32 %v6088_v9, %v7706_v60 }
0x13f4   :  { %v3743_v15 = vpop.xlane.xlu1 %3742 }
0x13f5   :  { %v3768_v58 = vpack.c.bf16 %v3762_v32, %v3762_v32  ;;  %6089 = vrcp.f32 %v3743_v15 }
0x13f7   :  { %5567 = vmatmul.msk.bf16.vlgmr.msra.gmra.mxu3 %vm1083_vm8, %v3768_v58 }
0x13f8   :  { %3963 = vmatpush.bf16.xpose.msra.mxu3 %v3954_v11 }
0x13fb   :  { %v6090_v48 = vpop.eup %6089 }
0x13fc   :  { %v3763_v53 = vmul.f32 %v6090_v48, %v7710_v30 }
0x13fe   :  { %v3769_v41 = vpack.c.bf16 %v3763_v53, %v3763_v53  ;;  %v3924_v14 = vpop.permute.xlu0 %3923 }
0x1400   :  { %5568 = vmatmul.msk.bf16.vlgmr.msra.gmra.mxu0 %vm1083_vm8, %v3769_v41  ;;  %v3752_v47 = vpop.xlane.xlu1 %3751 }
0x1401   :  { %3986 = vmatpush.bf16.xpose.msra.mxu0 %v3977_v25  ;;  %6091 = vrcp.f32 %v3752_v47 }
0x1406   :  { %v3970_v60 = vpop.permute.xlu0 %3969 }
0x1407   :  { %v6092_v29 = vpop.eup %6091 }
0x1408   :  { %v3766_v36 = vmul.f32 %v6092_v29, %v7714_v50  ;;  %v3746_v17 = vpop.xlane.xlu1 %3745 }
0x1409   :  { %6093 = vrcp.f32 %v3746_v17 }
0x140a   :  { %v3772_v31 = vpack.c.bf16 %v3766_v36, %v3766_v36 }
0x140b   :  { %v3755_v21 = vpop.xlane.xlu2 %3754 }
0x140c   :  { %6095 = vrcp.f32 %v3755_v21  ;;  %5571 = vmatmul.msk.bf16.vlgmr.msrb.gmra.mxu3 %vm1083_vm8, %v3772_v31 }
0x140e   :  { %v3995_v30 = vpop.permute.xlu0 %3994 }
0x140f   :  { %v6094_v56 = vpop.eup %6093  ;;  %v4000_v50 = vsel %vm1083_vm8, %v3995_v30, 0 }
0x1410   :  { %v3764_v43 = vmul.f32 %v6094_v56, %v7720_v54  ;;  %v3749_v8 = vpop.xlane.xlu1 %3748 }
0x1411   :  { %6097 = vrcp.f32 %v3749_v8 }
0x1412   :  { %v6096_v12 = vpop.eup %6095  ;;  %v3770_v24 = vpack.c.bf16 %v3764_v43, %v3764_v43 }
0x1413   :  { %v3767_v34 = vmul.f32 %v6096_v12, %v7728_v33  ;;  %v3947_v1 = vpop.permute.xlu2 %3946 }
0x1414   :  { %5569 = vmatmul.msk.bf16.vlgmr.msra.gmra.mxu1 %vm1083_vm8, %v3770_v24 }
0x1415   :  { %v3773_v61 = vpack.c.bf16 %v3767_v34, %v3767_v34  ;;  %4009 = vmatpush.bf16.xpose.msra.mxu1 %v4000_v50 }
0x1416   :  { %v3993_v4 = vpop.permute.xlu0 %3992 }
0x1417   :  { %v6098_v45 = vpop.eup %6097  ;;  %5572 = vmatmul.msk.bf16.vlgmr.msrb.gmra.mxu0 %vm1083_vm8, %v3773_v61 }
0x1418   :  { %v3765_v55 = vmul.f32 %v6098_v45, %v7732_v18 }
0x141a   :  { %v3771_v54 = vpack.c.bf16 %v3765_v55, %v3765_v55 }
0x141b   :  { %v4132_v0 = vpop.permute.xlu2 %4131 }
0x141c   :  { %v4137_v44 = vsel %vm1300_vm9, %v4132_v0, 0  ;;  %5570 = vmatmul.msk.bf16.vlgmr.msrb.gmra.mxu2 %vm1083_vm8, %v3771_v54  ;;  %5575 = vmatmul.msk.bf16.vlgmr.msra.gmra.mxu3 %vm1083_vm8, %v3947_v1 }
0x141d   :  { %4146 = vmatpush.bf16.msrb.mxu0 %v4137_v44 }
0x141e   :  { %v4153_v33 = vpop.permute.xlu0 %4152 }
0x141f   :  { %v4158_v5 = vsel %vm1300_vm9, %v4153_v33, 0 }
0x1426   :  { %v4174_v46 = vpop.permute.xlu0 %4173 }
0x1427   :  { %5576 = vmatmul.msk.bf16.vlgmr.msra.gmra.mxu0 %vm1083_vm8, %v3970_v60  ;;  %v4179_v57 = vsel %vm1300_vm9, %v4174_v46, 0 }
0x1428   :  { %v3901_v7 = vpop.permute.xlu1 %3900 }
0x1429   :  { %5573 = vmatmul.msk.bf16.vlgmr.msrb.gmra.mxu1 %vm1083_vm8, %v3901_v7 }
0x142a   :  { %4167 = vmatpush.bf16.msrb.mxu1 %v4158_v5 }
0x142c   :  { %5574 = vmatmul.msk.bf16.vlgmr.msra.gmra.mxu2 %vm1083_vm8, %v3924_v14 }
0x142e   :  { %v4239_v18 = vpop.permute.xlu0 %4238 }
0x142f   :  { %v4244_v26 = vsel %vm1083_vm8, %v4239_v18, 0 }
0x1430   :  { %v4018_v35 = vpop.permute.xlu1 %4017 }
0x1431   :  { %v4023_v2 = vsel %vm1083_vm8, %v4018_v35, 0 }
0x1432   :  { %4032 = vmatpush.bf16.xpose.msrb.mxu2 %v4023_v2 }
0x1436   :  { %v4262_v10 = vpop.permute.xlu0 %4261 }
0x1437   :  { %v4267_v9 = vsel %vm1083_vm8, %v4262_v10, 0 }
0x1438   :  { %v4016_v37 = vpop.permute.xlu1 %4015 }
0x1439   :  { %5577 = vmatmul.msk.bf16.vlgmr.msra.gmra.mxu1 %vm1083_vm8, %v3993_v4 }
0x143a   :  { %4188 = vmatpush.bf16.msra.mxu2 %v4179_v57  ;;  %4253 = vmatpush.bf16.xpose.msra.mxu1 %v4244_v26 }
0x143c   :  { %5578 = vmatmul.msk.bf16.vlgmr.msrb.gmra.mxu2 %vm1083_vm8, %v4016_v37 }
0x143e   :  { %4276 = vmatpush.bf16.xpose.msrb.mxu2 %v4267_v9  ;;  %v4195_v32 = vpop.permute.xlu0 %4194 }
0x143f   :  { %v4200_v11 = vsel %vm1300_vm9, %v4195_v32, 0 }
0x1440   :  { %v4111_v15 = vpop.permute.xlu1 %4110 }
0x1441   :  { %v4116_v58 = vsel %vm1300_vm9, %v4111_v15, 0 }
0x1442   :  { %4125 = vmatpush.bf16.msrb.mxu3 %v4116_v58 }
0x1446   :  { %4209 = vmatpush.bf16.msra.mxu3 %v4200_v11  ;;  %v4216_v48 = vpop.permute.xlu0 %4215 }
0x1447   :  { %v4221_v53 = vsel %vm1300_vm9, %v4216_v48, 0 }
0x1448   :  { %4230 = vmatpush.bf16.msra.mxu0 %v4221_v53 }
0x147a   :  { %v7800_v41 = vpop.f32.mrf.mxu3 }
0x147d   :  { %v7802_v14 = vpop.f32.mrf.mxu0 }
0x147e   :  { %v5818_v25 = vpack.i.bf16 %v7802_v14, %v7800_v41 }
0x1482   :  { %v3793_v47 = vpop.f32.mrf.mxu3 }
0x1485   :  { %v3814_v60 = vpop.f32.mrf.mxu0 }
0x148f   :  { %v7806_v29 = vpop.f32.mrf.mxu3 }
0x1491   :  { %v7808_v36 = vpop.f32.mrf.mxu1 }
0x1494   :  { %v7810_v17 = vpop.f32.mrf.mxu0 }
0x1495   :  { %v5848_v31 = vpack.i.bf16 %v7810_v17, %v7806_v29 }
0x1497   :  { %v3877_v21 = vpop.f32.mrf.mxu3 }
0x1499   :  { %v3835_v30 = vpop.f32.mrf.mxu1 }
0x149c   :  { %v3898_v56 = vpop.f32.mrf.mxu0 }
0x149f   :  { %v7814_v43 = vpop.f32.mrf.mxu2  ;;  %v3965_v8 = vpop.f32.mrf.mxu3 }
0x14a0   :  { %v5833_v12 = vpack.i.bf16 %v7814_v43, %v7808_v36  ;;  %v3966_v24 = vadd.f32 %v3965_v8, %v6837_v62 }
0x14a2   :  { %v4044_v34 = vsel %vm1083_vm8, %v3966_v24, -inf }
0x14a3   :  { %4045 = vmax.xlane.f32.xlu0 %v4044_v34 }
0x14a4   :  { %v3988_v1 = vpop.f32.mrf.mxu0 }
0x14a5   :  { %v3989_v0 = vadd.f32 %v3988_v1, %v6837_v62 }
0x14a6   :  { %v3919_v50 = vpop.f32.mrf.mxu1 }
0x14a7   :  { %v3920_v61 = vadd.f32 %v3919_v50, %v6837_v62  ;;  %v3856_v4 = vpop.f32.mrf.mxu2  ;;  %v3967_v45 = vpop.f32.mrf.mxu3  ;;  %v4047_v7 = vsel %vm1083_vm8, %v3989_v0, -inf }
0x14a9   :  { %v4038_v55 = vsel %vm1083_vm8, %v3920_v61, -inf }
0x14aa   :  { %4039 = vmax.xlane.f32.xlu2 %v4038_v55 }
0x14ac   :  { %v3990_v54 = vpop.f32.mrf.mxu0 }
0x14ae   :  { %v3921_v44 = vpop.f32.mrf.mxu1 }
0x14af   :  { %v3942_v33 = vpop.f32.mrf.mxu2 }
0x14b0   :  { %v3943_v46 = vadd.f32 %v3942_v33, %v6837_v62 }
0x14b2   :  { %4048 = vmax.xlane.f32.xlu2 %v4047_v7  ;;  %v4041_v5 = vsel %vm1083_vm8, %v3943_v46, -inf }
0x14b3   :  { %4042 = vmax.xlane.f32.xlu1 %v4041_v5 }
0x14b6   :  { %v4011_v18 = vpop.f32.mrf.mxu1 }
0x14b7   :  { %v4012_v35 = vadd.f32 %v4011_v18, %v6837_v62  ;;  %4236 = vrot.lane.b32.xlu0 %v7539_v27, %s6194_s30  ;;  %v3944_v2 = vpop.f32.mrf.mxu2 }
0x14b9   :  { %v4050_v57 = vsel %vm1083_vm8, %v4012_v35, -inf }
0x14bb   :  { %4051 = vmax.xlane.f32.xlu1 %v4050_v57 }
0x14be   :  { %v4013_v10 = vpop.f32.mrf.mxu1 }
0x14bf   :  { %v4034_v37 = vpop.f32.mrf.mxu2 }
0x14c0   :  { %v4035_v26 = vadd.f32 %v4034_v37, %v6837_v62 }
0x14c2   :  { %v4053_v9 = vsel %vm1083_vm8, %v4035_v26, -inf }
0x14c3   :  { %4054 = vmax.xlane.f32.xlu2 %v4053_v9 }
0x14c7   :  { %v4036_v32 = vpop.f32.mrf.mxu2 }
0x1516   :  { %v4046_v15 = vpop.xlane.xlu0 %4045 }
0x1517   :  { %v4058_v58 = vsub.f32 %v3966_v24, %v4046_v15 }
0x1519   :  { %v4066_v11 = vmul.f32 1.442695, %v4058_v58 }
0x151b   :  { %6099 = vpow2.f32 %v4066_v11 }
0x151d   :  { %v4040_v48 = vpop.xlane.xlu2 %4039 }
0x151e   :  { %v4056_v53 = vsub.f32 %v3920_v61, %v4040_v48 }
0x1520   :  { %v4062_v47 = vmul.f32 1.442695, %v4056_v53 }
0x1521   :  { %v6100_v60 = vpop.eup %6099 }
0x1522   :  { %6101 = vpow2.f32 %v4062_v47  ;;  %v4080_v21 = vsel %vm1083_vm8, %v6100_v60, 0.0 }
0x1523   :  { %4081 = vadd.xlane.f32.xlu2 %v4080_v21 }
0x1525   :  { %v4049_v30 = vpop.xlane.xlu2 %4048 }
0x1526   :  { %v4059_v56 = vsub.f32 %v3989_v0, %v4049_v30  ;;  %v4043_v8 = vpop.xlane.xlu1 %4042 }
0x1527   :  { %v4057_v34 = vsub.f32 %v3943_v46, %v4043_v8 }
0x1528   :  { %v6102_v1 = vpop.eup %6101  ;;  %v4068_v50 = vmul.f32 1.442695, %v4059_v56 }
0x1529   :  { %v4064_v4 = vmul.f32 1.442695, %v4057_v34  ;;  %v4074_v45 = vsel %vm1083_vm8, %v6102_v1, 0.0  ;;  %v4237_v37 = vpop.permute.xlu0 %4236 }
0x152a   :  { %6103 = vpow2.f32 %v4068_v50  ;;  %4075 = vadd.xlane.f32.xlu0 %v4074_v45 }
0x152b   :  { %6105 = vpow2.f32 %v4064_v4 }
0x152e   :  { %v4052_v7 = vpop.xlane.xlu1 %4051 }
0x152f   :  { %v4060_v18 = vsub.f32 %v4012_v35, %v4052_v7 }
0x1530   :  { %v6104_v24 = vpop.eup %6103 }
0x1531   :  { %v6106_v61 = vpop.eup %6105  ;;  %v4083_v55 = vsel %vm1083_vm8, %v6104_v24, 0.0  ;;  %v4070_v2 = vmul.f32 1.442695, %v4060_v18 }
0x1532   :  { %4084 = vadd.xlane.f32.xlu0 %v4083_v55  ;;  %v4077_v54 = vsel %vm1083_vm8, %v6106_v61, 0.0 }
0x1533   :  { %4078 = vadd.xlane.f32.xlu1 %v4077_v54 }
0x1536   :  { %v4055_v0 = vpop.xlane.xlu2 %4054 }
0x1537   :  { %v4061_v44 = vsub.f32 %v4035_v26, %v4055_v0 }
0x1539   :  { %v4072_v33 = vmul.f32 1.442695, %v4061_v44 }
0x153b   :  { %4259 = vrot.lane.b32.xlu2 %v7543_v23, %s6194_s30  ;;  %6107 = vpow2.f32 %v4072_v33 }
0x153c   :  { %6109 = vpow2.f32 %v4070_v2 }
0x1541   :  { %v6108_v46 = vpop.eup %6107 }
0x1542   :  { %v4089_v5 = vsel %vm1083_vm8, %v6108_v46, 0.0  ;;  %v6110_v57 = vpop.eup %6109 }
0x1543   :  { %v4086_v10 = vsel %vm1083_vm8, %v6110_v57, 0.0 }
0x1546   :  { %4307 = vrot.lane.b32.xlu0 %v7551_v19, %s6193_s1 }
0x154c   :  { %4284 = vrot.lane.b32.xlu1 %v7547_v6, %s6193_s1 }
0x154e   :  { %4282 = vrot.lane.b32.xlu0 %v7547_v6, %s6194_s30 }
0x1556   :  { %4305 = vrot.lane.b32.xlu0 %v7551_v19, %s6194_s30 }
0x155e   :  { %4328 = vrot.lane.b32.xlu0 %v7557_v16, %s6194_s30 }
0x1564   :  { %4090 = vadd.xlane.f32.xlu2 %v4089_v5 }
0x1576   :  { %4087 = vadd.xlane.f32.xlu1 %v4086_v10 }
0x157c   :  { %4330 = vrot.lane.b32.xlu2 %v7557_v16, %s6193_s1 }
0x1584   :  { %4351 = vrot.lane.b32.xlu2 %v7561_v51, %s6194_s30 }
0x158f   :  { %4353 = vrot.lane.b32.xlu1 %v7561_v51, %s6193_s1 }
0x1596   :  { %v4082_v26 = vpop.xlane.xlu2 %4081 }
0x1597   :  { %6111 = vrcp.f32 %v4082_v26 }
0x159d   :  { %v6112_v35 = vpop.eup %6111  ;;  %v4076_v9 = vpop.xlane.xlu0 %4075 }
0x159e   :  { %v4100_v32 = vmul.f32 %v6112_v35, %v6100_v60  ;;  %6113 = vrcp.f32 %v4076_v9  ;;  %v4260_v55 = vpop.permute.xlu2 %4259 }
0x15a0   :  { %v4106_v15 = vpack.c.bf16 %v4100_v32, %v4100_v32 }
0x15a2   :  { %5581 = vmatmul.msk.bf16.vlgmr.msrb.gmra.mxu1 %vm1083_vm8, %v4106_v15 }
0x15a4   :  { %v6114_v58 = vpop.eup %6113 }
0x15a5   :  { %v4098_v11 = vmul.f32 %v6114_v58, %v6102_v1  ;;  %v4085_v48 = vpop.xlane.xlu0 %4084 }
0x15a6   :  { %6115 = vrcp.f32 %v4085_v48  ;;  %v4079_v53 = vpop.xlane.xlu1 %4078 }
0x15a7   :  { %v4104_v47 = vpack.c.bf16 %v4098_v11, %v4098_v11  ;;  %6117 = vrcp.f32 %v4079_v53 }
0x15a9   :  { %5579 = vmatmul.msk.bf16.vlgmr.msrb.gmra.mxu3 %vm1083_vm8, %v4104_v47 }
0x15ac   :  { %v6116_v21 = vpop.eup %6115 }
0x15ad   :  { %v6118_v30 = vpop.eup %6117  ;;  %v4101_v56 = vmul.f32 %v6116_v21, %v6104_v24 }
0x15ae   :  { %v4099_v8 = vmul.f32 %v6118_v30, %v6106_v61 }
0x15af   :  { %v4107_v34 = vpack.c.bf16 %v4101_v56, %v4101_v56 }
0x15b0   :  { %v4105_v50 = vpack.c.bf16 %v4099_v8, %v4099_v8 }
0x15b1   :  { %5582 = vmatmul.msk.bf16.vlgmr.msra.gmra.mxu2 %vm1083_vm8, %v4107_v34 }
0x15b2   :  { %5580 = vmatmul.msk.bf16.vlgmr.msrb.gmra.mxu0 %vm1083_vm8, %v4105_v50  ;;  %5585 = vmatmul.msk.bf16.vlgmr.msra.gmra.mxu1 %vm1083_vm8, %v4237_v37 }
0x15b8   :  { %v4308_v60 = vpop.permute.xlu0 %4307 }
0x15b9   :  { %v4313_v1 = vsel %vm1083_vm8, %v4308_v60, 0 }
0x15ba   :  { %4322 = vmatpush.bf16.xpose.msrb.mxu0 %v4313_v1 }
0x15be   :  { %v4285_v4 = vpop.permute.xlu1 %4284 }
0x15bf   :  { %v4290_v45 = vsel %vm1083_vm8, %v4285_v4, 0 }
0x15c0   :  { %4299 = vmatpush.bf16.xpose.msrb.mxu3 %v4290_v45  ;;  %v4283_v24 = vpop.permute.xlu0 %4282 }
0x15c1   :  { %5586 = vmatmul.msk.bf16.vlgmr.msrb.gmra.mxu2 %vm1083_vm8, %v4260_v55 }
0x15c8   :  { %v4306_v54 = vpop.permute.xlu0 %4305 }
0x15d0   :  { %v4329_v18 = vpop.permute.xlu0 %4328 }
0x15d7   :  { %v4091_v61 = vpop.xlane.xlu2 %4090 }
0x15d8   :  { %6119 = vrcp.f32 %v4091_v61 }
0x15de   :  { %v6120_v0 = vpop.eup %6119 }
0x15df   :  { %v4103_v44 = vmul.f32 %v6120_v0, %v6108_v46  ;;  %v4331_v33 = vpop.permute.xlu2 %4330 }
0x15e0   :  { %v4336_v7 = vsel %vm1083_vm8, %v4331_v33, 0 }
0x15e1   :  { %v4109_v5 = vpack.c.bf16 %v4103_v44, %v4103_v44  ;;  %4345 = vmatpush.bf16.xpose.msrb.mxu1 %v4336_v7 }
0x15e3   :  { %5584 = vmatmul.msk.bf16.vlgmr.msra.gmra.mxu0 %vm1083_vm8, %v4109_v5 }
0x15e7   :  { %v4352_v9 = vpop.permute.xlu2 %4351 }
0x15e8   :  { %5589 = vmatmul.msk.bf16.vlgmr.msrb.gmra.mxu1 %vm1083_vm8, %v4329_v18 }
0x15e9   :  { %v4088_v2 = vpop.xlane.xlu1 %4087 }
0x15ea   :  { %6121 = vrcp.f32 %v4088_v2 }
0x15f0   :  { %v6122_v10 = vpop.eup %6121 }
0x15f1   :  { %v4102_v37 = vmul.f32 %v6122_v10, %v6110_v57 }
0x15f3   :  { %v4108_v26 = vpack.c.bf16 %v4102_v37, %v4102_v37  ;;  %5588 = vmatmul.msk.bf16.vlgmr.msrb.gmra.mxu0 %vm1083_vm8, %v4306_v54 }
0x15f5   :  { %5583 = vmatmul.msk.bf16.vlgmr.msra.gmra.mxu3 %vm1083_vm8, %v4108_v26 }
0x1601   :  { %v4354_v46 = vpop.permute.xlu1 %4353 }
0x1602   :  { %v4359_v35 = vsel %vm1083_vm8, %v4354_v46, 0 }
0x1603   :  { %4368 = vmatpush.bf16.xpose.msra.mxu2 %v4359_v35 }
0x1605   :  { %5587 = vmatmul.msk.bf16.vlgmr.msrb.gmra.mxu3 %vm1083_vm8, %v4283_v24 }
0x160a   :  { %5590 = vmatmul.msk.bf16.vlgmr.msra.gmra.mxu2 %vm1083_vm8, %v4352_v9 }
0x161f   :  { %v7872_v32 = vpop.f32.mrf.mxu1 }
0x1627   :  { %v4171_v15 = vpop.f32.mrf.mxu1 }
0x162c   :  { %v7874_v58 = vpop.f32.mrf.mxu3 }
0x162f   :  { %v7876_v57 = vpop.f32.mrf.mxu0  ;;  %v4255_v11 = vpop.f32.mrf.mxu1 }
0x1630   :  { %v5823_v48 = vpack.i.bf16 %v7876_v57, %v7874_v58  ;;  %v4256_v53 = vadd.f32 %v4255_v11, %v6837_v62 }
0x1632   :  { %v4374_v47 = vsel %vm1083_vm8, %v4256_v53, -inf }
0x1633   :  { %4375 = vmax.xlane.f32.xlu1 %v4374_v47 }
0x1634   :  { %v4129_v21 = vpop.f32.mrf.mxu3  ;;  %v7882_v30 = vpop.f32.mrf.mxu2 }
0x1635   :  { %v5838_v56 = vpack.i.bf16 %v7882_v30, %v7872_v32 }
0x1637   :  { %v4150_v8 = vpop.f32.mrf.mxu0  ;;  %v4257_v34 = vpop.f32.mrf.mxu1 }
0x163c   :  { %v4192_v50 = vpop.f32.mrf.mxu2 }
0x1644   :  { %v4278_v60 = vpop.f32.mrf.mxu2 }
0x1645   :  { %v4279_v1 = vadd.f32 %v4278_v60, %v6837_v62 }
0x1647   :  { %v4377_v4 = vsel %vm1083_vm8, %v4279_v1, -inf }
0x1648   :  { %4378 = vmax.xlane.f32.xlu0 %v4377_v4 }
0x164c   :  { %v4280_v45 = vpop.f32.mrf.mxu2 }
0x1660   :  { %v7888_v55 = vpop.f32.mrf.mxu0 }
0x1665   :  { %v4347_v24 = vpop.f32.mrf.mxu1 }
0x1666   :  { %v4348_v61 = vadd.f32 %v4347_v24, %v6837_v62 }
0x1668   :  { %v4234_v54 = vpop.f32.mrf.mxu0  ;;  %v4386_v0 = vsel %vm1083_vm8, %v4348_v61, -inf }
0x1669   :  { %4387 = vmax.xlane.f32.xlu0 %v4386_v0 }
0x166d   :  { %v4349_v44 = vpop.f32.mrf.mxu1 }
0x1670   :  { %v4324_v33 = vpop.f32.mrf.mxu0 }
0x1671   :  { %v4325_v7 = vadd.f32 %v4324_v33, %v6837_v62 }
0x1673   :  { %v4383_v5 = vsel %vm1083_vm8, %v4325_v7, -inf }
0x1674   :  { %4384 = vmax.xlane.f32.xlu2 %v4383_v5 }
0x1678   :  { %v7894_v18 = vpop.f32.mrf.mxu3  ;;  %v4326_v2 = vpop.f32.mrf.mxu0 }
0x1679   :  { %v5853_v10 = vpack.i.bf16 %v7888_v55, %v7894_v18 }
0x167d   :  { %4509 = vrot.lane.b32.xlu0 %v7551_v19, %s8205_s8 }
0x1680   :  { %v4213_v37 = vpop.f32.mrf.mxu3 }
0x1688   :  { %v4301_v26 = vpop.f32.mrf.mxu3 }
0x1689   :  { %v4302_v46 = vadd.f32 %v4301_v26, %v6837_v62 }
0x168b   :  { %v4380_v35 = vsel %vm1083_vm8, %v4302_v46, -inf }
0x168c   :  { %4381 = vmax.xlane.f32.xlu1 %v4380_v35  ;;  %4446 = vrot.lane.b32.xlu2 %v7539_v27, %s8205_s8 }
0x168d   :  { %v4370_v9 = vpop.f32.mrf.mxu2 }
0x168e   :  { %v4371_v34 = vadd.f32 %v4370_v9, %v6837_v62 }
0x1690   :  { %v4303_v15 = vpop.f32.mrf.mxu3  ;;  %v4389_v60 = vsel %vm1083_vm8, %v4371_v34, -inf }
0x1695   :  { %v4372_v11 = vpop.f32.mrf.mxu2 }
0x16a6   :  { %v4376_v47 = vpop.xlane.xlu1 %4375 }
0x16a7   :  { %v4392_v21 = vsub.f32 %v4256_v53, %v4376_v47 }
0x16a9   :  { %v4398_v8 = vmul.f32 1.442695, %v4392_v21 }
0x16ab   :  { %6123 = vpow2.f32 %v4398_v8 }
0x16b1   :  { %v6124_v19 = vpop.eup %6123 }
0x16b2   :  { %v4410_v50 = vsel %vm1083_vm8, %v6124_v19, 0.0 }
0x16b3   :  { %4411 = vadd.xlane.f32.xlu1 %v4410_v50 }
0x16b5   :  { %4390 = vmax.xlane.f32.xlu2 %v4389_v60 }
0x16bb   :  { %v4379_v4 = vpop.xlane.xlu0 %4378 }
0x16bc   :  { %v4393_v45 = vsub.f32 %v4279_v1, %v4379_v4 }
0x16be   :  { %v4400_v24 = vmul.f32 1.442695, %v4393_v45 }
0x16c0   :  { %6125 = vpow2.f32 %v4400_v24 }
0x16c6   :  { %v6126_v27 = vpop.eup %6125 }
0x16c7   :  { %v4413_v54 = vsel %vm1083_vm8, %v6126_v27, 0.0 }
0x16c8   :  { %4414 = vadd.xlane.f32.xlu0 %v4413_v54 }
0x16cc   :  { %4467 = vrot.lane.b32.xlu1 %v7543_v23, %s8205_s8 }
0x16cd   :  { %4488 = vrot.lane.b32.xlu2 %v7547_v6, %s8205_s8 }
0x16dc   :  { %v4388_v62 = vpop.xlane.xlu0 %4387 }
0x16dd   :  { %v4396_v53 = vsub.f32 %v4348_v61, %v4388_v62 }
0x16df   :  { %v4406_v44 = vmul.f32 1.442695, %v4396_v53 }
0x16e1   :  { %6127 = vpow2.f32 %v4406_v44 }
0x16e7   :  { %v4385_v0 = vpop.xlane.xlu2 %4384  ;;  %v6128_v37 = vpop.eup %6127 }
0x16e8   :  { %v4422_v26 = vsel %vm1083_vm8, %v6128_v37, 0.0  ;;  %v4395_v6 = vsub.f32 %v4325_v7, %v4385_v0 }
0x16ea   :  { %v4404_v61 = vmul.f32 1.442695, %v4395_v6 }
0x16ef   :  { %v4447_v33 = vpop.permute.xlu2 %4446  ;;  %v4510_v5 = vpop.permute.xlu0 %4509 }
0x16f0   :  { %v4452_v1 = vsel %vm1300_vm9, %v4447_v33, 0  ;;  %v4515_v2 = vsel %vm1300_vm9, %v4510_v5, 0 }
0x16f1   :  { %4461 = vmatpush.bf16.msra.mxu3 %v4452_v1  ;;  %4524 = vmatpush.bf16.msrb.mxu2 %v4515_v2 }
0x16f6   :  { %4423 = vadd.xlane.f32.xlu1 %v4422_v26 }
0x16ff   :  { %v4382_v23 = vpop.xlane.xlu1 %4381 }
0x1700   :  { %v4394_v35 = vsub.f32 %v4302_v46, %v4382_v23 }
0x1702   :  { %v4402_v9 = vmul.f32 1.442695, %v4394_v35 }
0x1704   :  { %6129 = vpow2.f32 %v4402_v9 }
0x1705   :  { %6131 = vpow2.f32 %v4404_v61 }
0x170a   :  { %v6130_v15 = vpop.eup %6129 }
0x170b   :  { %v4416_v11 = vsel %vm1083_vm8, %v6130_v15, 0.0  ;;  %v6132_v47 = vpop.eup %6131 }
0x170c   :  { %4417 = vadd.xlane.f32.xlu0 %v4416_v11  ;;  %v4419_v21 = vsel %vm1083_vm8, %v6132_v47, 0.0 }
0x1714   :  { %4420 = vadd.xlane.f32.xlu0 %v4419_v21  ;;  %v5750_v21 = vld [vmem:[%s8183_s9 + $0x18] sm:$0xff] }
0x1726   :  { %v4412_v8 = vpop.xlane.xlu1 %4411 }
0x1727   :  { %6133 = vrcp.f32 %v4412_v8 }
0x1728   :  { %v4391_v50 = vpop.xlane.xlu2 %4390  ;;  %4530 = vrot.lane.b32.xlu0 %v7557_v16, %s8205_s8 }
0x1729   :  { %v4397_v46 = vsub.f32 %v4371_v34, %v4391_v50 }
0x172b   :  { %v4408_v7 = vmul.f32 1.442695, %v4397_v46  ;;  %v5749_v46 = vld [vmem:[%s8183_s9 + $0x10] sm:$0xff] }
0x172d   :  { %v6134_v60 = vpop.eup %6133  ;;  %6135 = vpow2.f32 %v4408_v7 }
0x172e   :  { %v4434_v4 = vmul.f32 %v6134_v60, %v6124_v19 }
0x1730   :  { %v4440_v45 = vpack.c.bf16 %v4434_v4, %v4434_v4  ;;  %v4489_v24 = vpop.permute.xlu2 %4488  ;;  %4551 = vrot.lane.b32.xlu0 %v7561_v51, %s8205_s8 }
0x1731   :  { %v4494_v54 = vsel %vm1300_vm9, %v4489_v24, 0 }
0x1732   :  { %5591 = vmatmul.msk.bf16.vlgmr.msra.gmra.mxu3 %vm1083_vm8, %v4440_v45  ;;  %4503 = vmatpush.bf16.msra.mxu1 %v4494_v54 }
0x1733   :  { %v6136_v62 = vpop.eup %6135 }
0x1734   :  { %v4425_v53 = vsel %vm1083_vm8, %v6136_v62, 0.0 }
0x1735   :  { %4426 = vadd.xlane.f32.xlu2 %v4425_v53 }
0x1736   :  { %4702 = vmatpush.bf16.msrb.mxu1 %v5750_v21 }
0x1738   :  { %5819 = vrot.lane.b32.xlu0 %v5818_v25, %s8206_s22 }
0x173a   :  { %4703 = vmatpush.bf16.msrb.mxu1 %v5749_v46 }
0x173b   :  { %v4415_v16 = vpop.xlane.xlu0 %4414 }
0x173c   :  { %6137 = vrcp.f32 %v4415_v16 }
0x173e   :  { %v4468_v34 = vpop.permute.xlu1 %4467 }
0x173f   :  { %v4473_v19 = vsel %vm1300_vm9, %v4468_v34, 0 }
0x1740   :  { %4482 = vmatpush.bf16.msra.mxu0 %v4473_v19  ;;  %5824 = vrot.lane.b32.xlu0 %v5823_v48, %s8207_s23 }
0x1742   :  { %v6138_v51 = vpop.eup %6137 }
0x1743   :  { %v4435_v0 = vmul.f32 %v6138_v51, %v6126_v27 }
0x1745   :  { %v4441_v44 = vpack.c.bf16 %v4435_v0, %v4435_v0 }
0x1747   :  { %5592 = vmatmul.msk.bf16.vlgmr.msra.gmra.mxu0 %vm1083_vm8, %v4441_v44 }
0x1748   :  { %5834 = vrot.lane.b32.xlu0 %v5833_v12, %s8206_s22 }
0x174d   :  { %5839 = vrot.lane.b32.xlu2 %v5838_v56, %s8207_s23 }
0x1769   :  { %v4424_v48 = vpop.xlane.xlu1 %4423 }
0x177f   :  { %v4418_v41 = vpop.xlane.xlu0 %4417 }
0x1780   :  { %6139 = vrcp.f32 %v4418_v41 }
0x1786   :  { %v6140_v14 = vpop.eup %6139 }
0x1787   :  { %v4436_v25 = vmul.f32 %v6140_v14, %v6130_v15  ;;  %v4421_v58 = vpop.xlane.xlu0 %4420 }
0x1788   :  { %6141 = vrcp.f32 %v4421_v58 }
0x1789   :  { %v4442_v57 = vpack.c.bf16 %v4436_v25, %v4436_v25  ;;  %6143 = vrcp.f32 %v4424_v48 }
0x178b   :  { %5593 = vmatmul.msk.bf16.vlgmr.msra.gmra.mxu1 %vm1083_vm8, %v4442_v57 }
0x178e   :  { %v6142_v27 = vpop.eup %6141 }
0x178f   :  { %v4437_v33 = vmul.f32 %v6142_v27, %v6132_v47  ;;  %v6144_v43 = vpop.eup %6143 }
0x1790   :  { %v4438_v12 = vmul.f32 %v6144_v43, %v6128_v37 }
0x1791   :  { %v4443_v36 = vpack.c.bf16 %v4437_v33, %v4437_v33 }
0x1792   :  { %v4444_v56 = vpack.c.bf16 %v4438_v12, %v4438_v12 }
0x1793   :  { %5594 = vmatmul.msk.bf16.vlgmr.msrb.gmra.mxu2 %vm1083_vm8, %v4443_v36 }
0x179a   :  { %v4531_v32 = vpop.permute.xlu0 %4530 }
0x179b   :  { %v4536_v30 = vsel %vm1300_vm9, %v4531_v32, 0 }
0x179c   :  { %4545 = vmatpush.bf16.msrb.mxu3 %v4536_v30 }
0x179f   :  { %5595 = vmatmul.msk.bf16.vlgmr.msrb.gmra.mxu3 %vm1083_vm8, %v4444_v56 }
0x17a2   :  { %v4552_v5 = vpop.permute.xlu0 %4551 }
0x17a3   :  { %v4557_v1 = vsel %vm1300_vm9, %v4552_v5, 0 }
0x17a4   :  { %4566 = vmatpush.bf16.msrb.mxu0 %v4557_v1 }
0x17a8   :  { %v4427_v2 = vpop.xlane.xlu2 %4426 }
0x17a9   :  { %6145 = vrcp.f32 %v4427_v2 }
0x17aa   :  { %v5820_v18 = vpop.permute.xlu0 %5819 }
0x17ab   :  { %v5822_v24 = vunpack.i.h.bf16 %v5820_v18  ;;  %v5821_v54 = vunpack.i.l.bf16 %v5820_v18 }
0x17ad   :  { %v4645_v19 = vsel %vm1083_vm8, %v7664_v13, %v5822_v24  ;;  %v4644_v29 = vsel %vm1083_vm8, %v7662_v49, %v5821_v54 }
0x17af   :  { %v6146_v26 = vpop.eup %6145 }
0x17b0   :  { %v4439_v23 = vmul.f32 %v6146_v26, %v6136_v62  ;;  %v5840_v13 = vpop.permute.xlu2 %5839 }
0x17b1   :  { %v5842_v27 = vunpack.i.h.bf16 %v5840_v13  ;;  %v5841_v33 = vunpack.i.l.bf16 %v5840_v13 }
0x17b2   :  { %v4445_v35 = vpack.c.bf16 %v4439_v23, %v4439_v23  ;;  %v5825_v45 = vpop.permute.xlu0 %5824 }
0x17b3   :  { %v5827_v62 = vunpack.i.h.bf16 %v5825_v45  ;;  %v5826_v53 = vunpack.i.l.bf16 %v5825_v45 }
0x17b4   :  { %5596 = vmatmul.msk.bf16.vlgmr.msrb.gmra.mxu0 %vm1083_vm8, %v4445_v35 }
0x17b5   :  { %v4463_v6 = vpop.f32.mrf.mxu3  ;;  %v4650_v51 = vsel %vm2508_vm11, %v4644_v29, %v5826_v53  ;;  %v4651_v0 = vsel %vm2508_vm11, %v4645_v19, %v5827_v62 }
0x17ba   :  { %v5835_v25 = vpop.permute.xlu0 %5834 }
0x17bb   :  { %v5837_v58 = vunpack.i.h.bf16 %v5835_v25  ;;  %v5836_v57 = vunpack.i.l.bf16 %v5835_v25 }
0x17bd   :  { %v4465_v37 = vpop.f32.mrf.mxu3  ;;  %v4647_v49 = vsel %vm1083_vm8, %v7668_v22, %v5837_v58  ;;  %v4646_v48 = vsel %vm1083_vm8, %v7666_v52, %v5836_v57 }
0x17be   :  { %v4652_v32 = vsel %vm2508_vm11, %v4646_v48, %v5841_v33  ;;  %v4653_v30 = vsel %vm2508_vm11, %v4647_v49, %v5842_v27 }
0x17c4   :  { %v4484_v9 = vpop.f32.mrf.mxu0 }
0x17c5   :  { %v5828_v61 = vpack.i.bf16 %v4484_v9, %v4463_v6 }
0x17c7   :  { %5829 = vrot.lane.b32.xlu1 %v5828_v61, %s8208_s24 }
0x17cc   :  { %v4486_v15 = vpop.f32.mrf.mxu0 }
0x17cf   :  { %5854 = vrot.lane.b32.xlu1 %v5853_v10, %s8207_s23 }
0x1808   :  { %v4505_v11 = vpop.f32.mrf.mxu1 }
0x1810   :  { %v4507_v47 = vpop.f32.mrf.mxu1 }
0x1816   :  { %v4526_v8 = vpop.f32.mrf.mxu2 }
0x1817   :  { %v5843_v50 = vpack.i.bf16 %v4526_v8, %v4505_v11 }
0x1819   :  { %5844 = vrot.lane.b32.xlu0 %v5843_v50, %s8208_s24 }
0x181e   :  { %v4528_v7 = vpop.f32.mrf.mxu2 }
0x1821   :  { %5849 = vrot.lane.b32.xlu0 %v5848_v31, %s8206_s22 }
0x1822   :  { %v4547_v55 = vpop.f32.mrf.mxu3 }
0x182a   :  { %v4549_v10 = vpop.f32.mrf.mxu3 }
0x1831   :  { %v4568_v60 = vpop.f32.mrf.mxu0 }
0x1832   :  { %v5858_v4 = vpack.i.bf16 %v4568_v60, %v4547_v55 }
0x1834   :  { %5859 = vrot.lane.b32.xlu0 %v5858_v4, %s8208_s24 }
0x1839   :  { %v5830_v16 = vpop.permute.xlu1 %5829  ;;  %v4570_v34 = vpop.f32.mrf.mxu0 }
0x183a   :  { %v5832_v17 = vunpack.i.h.bf16 %v5830_v16  ;;  %v5831_v31 = vunpack.i.l.bf16 %v5830_v16 }
0x183c   :  { %v4656_v44 = vsel %vm2515_vm12, %v4650_v51, %v5831_v31  ;;  %v4657_v41 = vsel %vm2515_vm12, %v4651_v0, %v5832_v17 }
0x183d   :  { %v4662_v14 = vpack.c.bf16 %v4657_v41, %v4656_v44 }
0x183f   :  { %5610 = vmatmul.msk.bf16.vlgmr.msrb.gmra.mxu1 %vm696_vm0, %v4662_v14 }
0x1841   :  { %v5855_v52 = vpop.permute.xlu1 %5854 }
0x1842   :  { %v5857_v6 = vunpack.i.h.bf16 %v5855_v52  ;;  %v5856_v37 = vunpack.i.l.bf16 %v5855_v52 }
0x188b   :  { %v5845_v36 = vpop.permute.xlu0 %5844 }
0x188c   :  { %v5847_v43 = vunpack.i.h.bf16 %v5845_v36  ;;  %v5846_v12 = vunpack.i.l.bf16 %v5845_v36 }
0x188e   :  { %v4658_v56 = vsel %vm2515_vm12, %v4652_v32, %v5846_v12  ;;  %v4659_v5 = vsel %vm2515_vm12, %v4653_v30, %v5847_v43 }
0x188f   :  { %v4663_v1 = vpack.c.bf16 %v4659_v5, %v4658_v56 }
0x1891   :  { %5611 = vmatmul.msk.bf16.gmra.mxu1 %vm696_vm0, %v4663_v1 }
0x1893   :  { %v5850_v22 = vpop.permute.xlu0 %5849 }
0x1894   :  { %v5852_v2 = vunpack.i.h.bf16 %v5850_v22  ;;  %v5851_v26 = vunpack.i.l.bf16 %v5850_v22 }
0x1896   :  { %v4649_v23 = vsel %vm1083_vm8, %v7672_v39, %v5852_v2  ;;  %v4648_v35 = vsel %vm1083_vm8, %v7674_v63, %v5851_v26  ;;  %v5876_v39 = vld [vmem:[%s8184_s10 + $0x1] ss:$0 sm:$0xff] }
0x1897   :  { %v4654_v11 = vsel %vm2508_vm11, %v4648_v35, %v5856_v37  ;;  %v4655_v47 = vsel %vm2508_vm11, %v4649_v23, %v5857_v6 }
0x18a6   :  { %v5860_v9 = vpop.permute.xlu0 %5859 }
0x18a7   :  { %v5862_v61 = vunpack.i.h.bf16 %v5860_v9  ;;  %v5861_v15 = vunpack.i.l.bf16 %v5860_v9  ;;  %v5752_v9 = vld [vmem:[%s8188_s13 + $0x18] sm:$0xff] }
0x18a8   :  { %4920 = vmatpush.bf16.msra.mxu2 %v5752_v9 }
0x18a9   :  { %v4660_v21 = vsel %vm2515_vm12, %v4654_v11, %v5861_v15  ;;  %v4661_v8 = vsel %vm2515_vm12, %v4655_v47, %v5862_v61  ;;  %v5751_v47 = vld [vmem:[%s8188_s13 + $0x10] sm:$0xff] }
0x18aa   :  { %v4664_v50 = vpack.c.bf16 %v4661_v8, %v4660_v21 }
0x18ac   :  { %5612 = vmatmul.msk.bf16.gmra.mxu1 %vm696_vm0, %v4664_v50  ;;  %4921 = vmatpush.bf16.msra.mxu2 %v5751_v47 }
0x18bc   :  { %v4705_v63 = vpop.f32.mrf.mxu1 }
0x18bd   :  { %v4706_v46 = vadd.f32 %v5876_v39, %v4705_v63 }
0x18bf   :  { %v7996_v7 = vadd.f32 %v4706_v46, %v7392_v42 }
0x18c1   :  { %v4730_v55 = vsel %vm696_vm0, %v7996_v7, 0.0 }
0x18c2   :  { %4731 = vadd.xlane.f32.xlu2 %v4730_v55 }
0x18c4   :  { %v4707_v18 = vpop.f32.mrf.mxu1 }
0x18c5   :  { %v4708_v10 = vadd.f32 %v5876_v39, %v4707_v18 }
0x18c7   :  { %v8001_v60 = vadd.f32 %v4708_v10, %v7402_v3 }
0x18c9   :  { %v4733_v4 = vsel %vm696_vm0, %v8001_v60, 0.0 }
0x18ca   :  { %4734 = vadd.xlane.f32.xlu1 %v4733_v4 }
0x190e   :  { %v4710_v45 = vpop.f32.mrf.mxu1 }
0x190f   :  { %v4711_v24 = vadd.f32 %v5876_v39, %v4710_v45 }
0x1911   :  { %v8006_v54 = vadd.f32 %v4711_v24, %v7412_v20 }
0x1913   :  { %v4736_v42 = vsel %vm696_vm0, %v8006_v54, 0.0 }
0x1914   :  { %4737 = vadd.xlane.f32.xlu0 %v4736_v42 }
0x1916   :  { %v4712_v62 = vpop.f32.mrf.mxu1 }
0x1917   :  { %v4713_v53 = vadd.f32 %v5876_v39, %v4712_v62 }
0x1919   :  { %v8011_v16 = vadd.f32 %v4713_v53, %v7422_v28 }
0x191b   :  { %v4739_v3 = vsel %vm696_vm0, %v8011_v16, 0.0 }
0x191c   :  { %4740 = vadd.xlane.f32.xlu2 %v4739_v3  ;;  %v8078_v3 = vld [vmem:[%s8185_s11 + $0x1] ss:$0 sm:$0xff] }
0x1929   :  { %v4715_v34 = vpop.f32.mrf.mxu1 }
0x192a   :  { %v4716_v19 = vadd.f32 %v5876_v39, %v4715_v34 }
0x192c   :  { %v8016_v29 = vadd.f32 %v4716_v19, %v7432_v38 }
0x192e   :  { %v4742_v20 = vsel %vm696_vm0, %v8016_v29, 0.0 }
0x192f   :  { %4743 = vadd.xlane.f32.xlu1 %v4742_v20 }
0x1931   :  { %v4717_v17 = vpop.f32.mrf.mxu1 }
0x1932   :  { %v4718_v31 = vadd.f32 %v5876_v39, %v4717_v17  ;;  %v8084_v17 = vld [vmem:[%s8186_s12 + $0x1] ss:$0 sm:$0xff] }
0x1934   :  { %v8021_v51 = vadd.f32 %v4718_v31, %v7442_v40 }
0x1935   :  { %v4732_v28 = vpop.xlane.xlu2 %4731 }
0x1936   :  { %v4748_v0 = vmul.f32 %v4732_v28, %v6553_v59  ;;  %v4745_v44 = vsel %vm696_vm0, %v8021_v51, 0.0 }
0x1937   :  { %4746 = vadd.xlane.f32.xlu2 %v4745_v44 }
0x1938   :  { %v8027_v41 = vsub.f32 %v7996_v7, %v4748_v0 }
0x193a   :  { %v4760_v38 = vmul.f32 %v8027_v41, %v8027_v41 }
0x193c   :  { %v4766_v14 = vsel %vm696_vm0, %v4760_v38, 0.0 }
0x193d   :  { %v4735_v25 = vpop.xlane.xlu1 %4734  ;;  %4767 = vadd.xlane.f32.xlu0 %v4766_v14 }
0x193e   :  { %v4749_v40 = vmul.f32 %v4735_v25, %v6553_v59 }
0x1940   :  { %v8034_v58 = vsub.f32 %v8001_v60, %v4749_v40 }
0x1942   :  { %v4761_v57 = vmul.f32 %v8034_v58, %v8034_v58 }
0x1944   :  { %v4769_v13 = vsel %vm696_vm0, %v4761_v57, 0.0 }
0x1945   :  { %4770 = vadd.xlane.f32.xlu1 %v4769_v13 }
0x1987   :  { %v4738_v49 = vpop.xlane.xlu0 %4737 }
0x1988   :  { %v4750_v48 = vmul.f32 %v4738_v49, %v6553_v59 }
0x198a   :  { %v8041_v27 = vsub.f32 %v8006_v54, %v4750_v48 }
0x198c   :  { %v4762_v33 = vmul.f32 %v8041_v27, %v8041_v27 }
0x198e   :  { %v4772_v36 = vsel %vm696_vm0, %v4762_v33, 0.0 }
0x198f   :  { %4773 = vadd.xlane.f32.xlu2 %v4772_v36  ;;  %v4741_v43 = vpop.xlane.xlu2 %4740 }
0x1990   :  { %v4751_v12 = vmul.f32 %v4741_v43, %v6553_v59 }
0x1992   :  { %v8048_v32 = vsub.f32 %v8011_v16, %v4751_v12 }
0x1994   :  { %v4763_v30 = vmul.f32 %v8048_v32, %v8048_v32 }
0x1996   :  { %v4775_v56 = vsel %vm696_vm0, %v4763_v30, 0.0 }
0x1997   :  { %4776 = vadd.xlane.f32.xlu0 %v4775_v56 }
0x19a2   :  { %v4744_v5 = vpop.xlane.xlu1 %4743 }
0x19a3   :  { %v4752_v1 = vmul.f32 %v4744_v5, %v6553_v59 }
0x19a5   :  { %v8055_v22 = vsub.f32 %v8016_v29, %v4752_v1 }
0x19a7   :  { %v4764_v2 = vmul.f32 %v8055_v22, %v8055_v22 }
0x19a9   :  { %v4778_v26 = vsel %vm696_vm0, %v4764_v2, 0.0 }
0x19aa   :  { %4779 = vadd.xlane.f32.xlu1 %v4778_v26  ;;  %v4747_v52 = vpop.xlane.xlu2 %4746 }
0x19ab   :  { %v4753_v23 = vmul.f32 %v4747_v52, %v6553_v59 }
0x19ad   :  { %v8062_v35 = vsub.f32 %v8021_v51, %v4753_v23 }
0x19af   :  { %v4765_v6 = vmul.f32 %v8062_v35, %v8062_v35 }
0x19b0   :  { %v4768_v37 = vpop.xlane.xlu0 %4767 }
0x19b1   :  { %v4784_v61 = vmul.f32 %v4768_v37, %v6553_v59  ;;  %v4781_v15 = vsel %vm696_vm0, %v4765_v6, 0.0 }
0x19b2   :  { %4782 = vadd.xlane.f32.xlu2 %v4781_v15 }
0x19b3   :  { %v4790_v11 = vadd.f32 1e-05, %v4784_v61 }
0x19b5   :  { %6147 = vrsqrt.f32 %v4790_v11  ;;  %vm4802_vm9 = vweird.f32 %v4790_v11 }
0x19b8   :  { %v4771_v21 = vpop.xlane.xlu1 %4770 }
0x19b9   :  { %v4785_v8 = vmul.f32 %v4771_v21, %v6553_v59 }
0x19bb   :  { %v6148_v50 = vpop.eup %6147  ;;  %v4791_v39 = vadd.f32 1e-05, %v4785_v8 }
0x19bc   :  { %v4797_v63 = vmul.f32 %v6148_v50, %v4790_v11  ;;  %vm4803_vm8 = vweird.f32 %v6148_v50 }
0x19bd   :  { %6149 = vrsqrt.f32 %v4791_v39  ;;  %vm4804_vm11 = vmor %vm4802_vm9, %vm4803_vm8  ;;  %vm4812_vm7 = vweird.f32 %v4791_v39 }
0x19be   :  { %v4798_v46 = vmul.f32 %v6148_v50, %v4797_v63 }
0x19c0   :  { %v4799_v55 = vmul.f32 0.5, %v4798_v46 }
0x19c2   :  { %v4800_v18 = vsub.f32 1.5, %v4799_v55 }
0x19c3   :  { %v6150_v10 = vpop.eup %6149 }
0x19c4   :  { %v4801_v4 = vmul.f32 %v6148_v50, %v4800_v18  ;;  %v4807_v45 = vmul.f32 %v6150_v10, %v4791_v39  ;;  %vm4813_vm12 = vweird.f32 %v6150_v10 }
0x19c5   :  { %vm4814_vm10 = vmor %vm4812_vm7, %vm4813_vm12 }
0x19c6   :  { %v4808_v24 = vmul.f32 %v6150_v10, %v4807_v45  ;;  %v4805_v42 = vsel %vm4804_vm11, %v6148_v50, %v4801_v4 }
0x19c7   :  { %v4856_v34 = vmul.f32 %v4805_v42, %v8027_v41 }
0x19c8   :  { %v4809_v62 = vmul.f32 0.5, %v4808_v24 }
0x19c9   :  { %v4865_v31 = vmul.f32 %v8078_v3, %v4856_v34 }
0x19ca   :  { %v4810_v53 = vsub.f32 1.5, %v4809_v62 }
0x19cb   :  { %v4874_v44 = vadd.f32 %v8084_v17, %v4865_v31 }
0x19cc   :  { %v4811_v19 = vmul.f32 %v6150_v10, %v4810_v53 }
0x19ce   :  { %v4815_v20 = vsel %vm4814_vm10, %v6150_v10, %v4811_v19 }
0x19cf   :  { %v4857_v28 = vmul.f32 %v4815_v20, %v8034_v58 }
0x19d1   :  { %v4866_v0 = vmul.f32 %v8078_v3, %v4857_v28 }
0x19d3   :  { %v4875_v38 = vadd.f32 %v8084_v17, %v4866_v0 }
0x19d5   :  { %v4880_v41 = vpack.c.bf16 %v4875_v38, %v4874_v44 }
0x19d7   :  { %5628 = vmatmul.msk.bf16.vlgmr.msra.gmra.mxu2 %vm696_vm0, %v4880_v41 }
0x1a02   :  { %v4774_v14 = vpop.xlane.xlu2 %4773 }
0x1a03   :  { %v4786_v25 = vmul.f32 %v4774_v14, %v6553_v59 }
0x1a05   :  { %v4792_v40 = vadd.f32 1e-05, %v4786_v25 }
0x1a07   :  { %6151 = vrsqrt.f32 %v4792_v40  ;;  %vm4822_vm14 = vweird.f32 %v4792_v40 }
0x1a0a   :  { %v4777_v57 = vpop.xlane.xlu0 %4776 }
0x1a0b   :  { %v4787_v13 = vmul.f32 %v4777_v57, %v6553_v59  ;;  %v5754_v57 = vld [vmem:[%s8190_s15 + $0x28] sm:$0xff] }
0x1a0d   :  { %v6152_v49 = vpop.eup %6151  ;;  %v4793_v48 = vadd.f32 1e-05, %v4787_v13 }
0x1a0e   :  { %v4817_v58 = vmul.f32 %v6152_v49, %v4792_v40  ;;  %vm4823_vm13 = vweird.f32 %v6152_v49 }
0x1a0f   :  { %6153 = vrsqrt.f32 %v4793_v48  ;;  %vm4824_vm15 = vmor %vm4822_vm14, %vm4823_vm13  ;;  %vm4832_vm3 = vweird.f32 %v4793_v48 }
0x1a10   :  { %v4818_v33 = vmul.f32 %v6152_v49, %v4817_v58 }
0x1a12   :  { %v4819_v36 = vmul.f32 0.5, %v4818_v33 }
0x1a14   :  { %v4820_v43 = vsub.f32 1.5, %v4819_v36 }
0x1a15   :  { %v6154_v12 = vpop.eup %6153 }
0x1a16   :  { %v4821_v30 = vmul.f32 %v6152_v49, %v4820_v43  ;;  %v4827_v56 = vmul.f32 %v6154_v12, %v4793_v48  ;;  %vm4833_vm1 = vweird.f32 %v6154_v12  ;;  %v5753_v48 = vld [vmem:[%s8190_s15 + $0x20] sm:$0xff] }
0x1a17   :  { %vm4834_vm4 = vmor %vm4832_vm3, %vm4833_vm1 }
0x1a18   :  { %v4828_v5 = vmul.f32 %v6154_v12, %v4827_v56  ;;  %v4825_v1 = vsel %vm4824_vm15, %v6152_v49, %v4821_v30 }
0x1a19   :  { %v4858_v52 = vmul.f32 %v4825_v1, %v8041_v27 }
0x1a1a   :  { %v4829_v2 = vmul.f32 0.5, %v4828_v5 }
0x1a1b   :  { %v4867_v11 = vmul.f32 %v8078_v3, %v4858_v52 }
0x1a1c   :  { %v4830_v26 = vsub.f32 1.5, %v4829_v2 }
0x1a1d   :  { %v4780_v23 = vpop.xlane.xlu1 %4779  ;;  %v4876_v8 = vadd.f32 %v8084_v17, %v4867_v11 }
0x1a1e   :  { %v4831_v6 = vmul.f32 %v6154_v12, %v4830_v26  ;;  %v4788_v37 = vmul.f32 %v4780_v23, %v6553_v59 }
0x1a20   :  { %v4835_v9 = vsel %vm4834_vm4, %v6154_v12, %v4831_v6  ;;  %v4794_v61 = vadd.f32 1e-05, %v4788_v37 }
0x1a21   :  { %v4859_v15 = vmul.f32 %v4835_v9, %v8048_v32 }
0x1a22   :  { %6155 = vrsqrt.f32 %v4794_v61  ;;  %vm4842_vm6 = vweird.f32 %v4794_v61 }
0x1a23   :  { %v4868_v47 = vmul.f32 %v8078_v3, %v4859_v15 }
0x1a25   :  { %v4783_v21 = vpop.xlane.xlu2 %4782  ;;  %v4877_v27 = vadd.f32 %v8084_v17, %v4868_v47 }
0x1a26   :  { %v4789_v50 = vmul.f32 %v4783_v21, %v6553_v59 }
0x1a27   :  { %v4881_v39 = vpack.c.bf16 %v4877_v27, %v4876_v8 }
0x1a28   :  { %v6156_v63 = vpop.eup %6155  ;;  %v4795_v46 = vadd.f32 1e-05, %v4789_v50 }
0x1a29   :  { %v4837_v55 = vmul.f32 %v6156_v63, %v4794_v61  ;;  %5629 = vmatmul.msk.bf16.gmra.mxu2 %vm696_vm0, %v4881_v39  ;;  %vm4843_vm5 = vweird.f32 %v6156_v63 }
0x1a2a   :  { %6157 = vrsqrt.f32 %v4795_v46  ;;  %vm4844_vm8 = vmor %vm4842_vm6, %vm4843_vm5  ;;  %vm4852_vm11 = vweird.f32 %v4795_v46 }
0x1a2b   :  { %v4838_v32 = vmul.f32 %v6156_v63, %v4837_v55 }
0x1a2d   :  { %v4839_v18 = vmul.f32 0.5, %v4838_v32 }
0x1a2f   :  { %v4840_v10 = vsub.f32 1.5, %v4839_v18 }
0x1a30   :  { %v6158_v4 = vpop.eup %6157 }
0x1a31   :  { %v4841_v45 = vmul.f32 %v6156_v63, %v4840_v10  ;;  %v4847_v24 = vmul.f32 %v6158_v4, %v4795_v46  ;;  %vm4853_vm9 = vweird.f32 %v6158_v4 }
0x1a32   :  { %vm4854_vm12 = vmor %vm4852_vm11, %vm4853_vm9 }
0x1a33   :  { %v4848_v42 = vmul.f32 %v6158_v4, %v4847_v24  ;;  %v4845_v62 = vsel %vm4844_vm8, %v6156_v63, %v4841_v45 }
0x1a34   :  { %v4860_v34 = vmul.f32 %v4845_v62, %v8055_v22  ;;  %v8113_v22 = vld [vmem:[%s8187_s14 + $0x1] ss:$0 sm:$0xff] }
0x1a35   :  { %v4849_v53 = vmul.f32 0.5, %v4848_v42 }
0x1a36   :  { %v4869_v28 = vmul.f32 %v8078_v3, %v4860_v34 }
0x1a37   :  { %v4850_v59 = vsub.f32 1.5, %v4849_v53 }
0x1a38   :  { %v4878_v44 = vadd.f32 %v8084_v17, %v4869_v28 }
0x1a39   :  { %v4851_v19 = vmul.f32 %v6158_v4, %v4850_v59 }
0x1a3b   :  { %v4855_v20 = vsel %vm4854_vm12, %v6158_v4, %v4851_v19 }
0x1a3c   :  { %v4861_v31 = vmul.f32 %v4855_v20, %v8062_v35  ;;  %v5756_v35 = vld [vmem:[%s8190_s15 + $0x38] sm:$0xff] }
0x1a3d   :  { %5118 = vmatpush.bf16.msra.mxu3 %v5756_v35 }
0x1a3e   :  { %v4870_v0 = vmul.f32 %v8078_v3, %v4861_v31 }
0x1a40   :  { %v4879_v38 = vadd.f32 %v8084_v17, %v4870_v0  ;;  %v5755_v17 = vld [vmem:[%s8190_s15 + $0x30] sm:$0xff] }
0x1a41   :  { %5119 = vmatpush.bf16.msra.mxu3 %v5755_v17 }
0x1a42   :  { %v4882_v41 = vpack.c.bf16 %v4879_v38, %v4878_v44 }
0x1a44   :  { %5630 = vmatmul.msk.bf16.gmra.mxu2 %vm696_vm0, %v4882_v41 }
0x1a45   :  { %5120 = vmatpush.bf16.msra.mxu3 %v5754_v57 }
0x1a49   :  { %5121 = vmatpush.bf16.msra.mxu3 %v5753_v48 }
0x1a5a   :  { %v4923_v14 = vpop.f32.mrf.mxu2 }
0x1a5b   :  { %v4924_v3 = vadd.f32 %v8113_v22, %v4923_v14 }
0x1a5d   :  { %v5631_v25 = vmul.f32 -1.702, %v4924_v3 }
0x1a5f   :  { %v4950_v40 = vmul.f32 1.442695, %v5631_v25 }
0x1a61   :  { %6159 = vpow2.f32 %v4950_v40 }
0x1a62   :  { %v4925_v13 = vpop.f32.mrf.mxu2 }
0x1a63   :  { %v4926_v49 = vadd.f32 %v8113_v22, %v4925_v13 }
0x1a65   :  { %v5632_v58 = vmul.f32 -1.702, %v4926_v49 }
0x1a67   :  { %v6160_v33 = vpop.eup %6159  ;;  %v4952_v36 = vmul.f32 1.442695, %v5632_v58 }
0x1a68   :  { %v4962_v43 = vadd.f32 1.0, %v6160_v33 }
0x1a69   :  { %6161 = vpow2.f32 %v4952_v36 }
0x1a6a   :  { %6163 = vrcp.f32 %v4962_v43  ;;  %v4979_v6 = vand.u32 2147483648, %v4962_v43  ;;  %vm4973_vm10 = vweird.f32 %v4962_v43  ;;  %v4977_v37 = vand.u32 2147483647, %v4962_v43 }
0x1a6c   :  { %v4980_v21 = vor.u32 1.1754944e-38, %v4979_v6  ;;  %vm4978_vm15 = vcmp.eq.f32.partialorder %v4977_v37, 8.507059e+37 }
0x1a6f   :  { %v6162_v12 = vpop.eup %6161 }
0x1a70   :  { %v6164_v30 = vpop.eup %6163  ;;  %v4963_v56 = vadd.f32 1.0, %v6162_v12 }
0x1a71   :  { %v4969_v5 = vmul.f32 %v6164_v30, %v4962_v43  ;;  %vm4974_vm7 = vweird.f32 %v6164_v30 }
0x1a72   :  { %6165 = vrcp.f32 %v4963_v56  ;;  %vm4975_vm13 = vmor %vm4973_vm10, %vm4974_vm7  ;;  %v4994_v61 = vand.u32 2147483648, %v4963_v56  ;;  %v4992_v47 = vand.u32 2147483647, %v4963_v56  ;;  %vm4988_vm1 = vweird.f32 %v4963_v56 }
0x1a73   :  { %v4970_v1 = vsub.f32 1.0, %v4969_v5 }
0x1a74   :  { %v4995_v50 = vor.u32 1.1754944e-38, %v4994_v61  ;;  %vm4993_vm4 = vcmp.eq.f32.partialorder %v4992_v47, 8.507059e+37 }
0x1a75   :  { %v4971_v2 = vmul.f32 %v6164_v30, %v4970_v1 }
0x1a77   :  { %v4972_v52 = vadd.f32 %v6164_v30, %v4971_v2 }
0x1a78   :  { %v6166_v26 = vpop.eup %6165 }
0x1a79   :  { %v4984_v23 = vmul.f32 %v6166_v26, %v4963_v56  ;;  %v4976_v15 = vsel %vm4975_vm13, %v6164_v30, %v4972_v52  ;;  %vm4989_vm14 = vweird.f32 %v6166_v26 }
0x1a7a   :  { %v4981_v27 = vsel %vm4978_vm15, %v4980_v21, %v4976_v15  ;;  %vm4990_vm3 = vmor %vm4988_vm1, %vm4989_vm14 }
0x1a7b   :  { %v4985_v9 = vsub.f32 1.0, %v4984_v23  ;;  %v5058_v46 = vmul.f32 %v4981_v27, %v4924_v3 }
0x1a7d   :  { %v4986_v11 = vmul.f32 %v6166_v26, %v4985_v9 }
0x1a7f   :  { %v4987_v8 = vadd.f32 %v6166_v26, %v4986_v11 }
0x1a81   :  { %v4991_v39 = vsel %vm4990_vm3, %v6166_v26, %v4987_v8 }
0x1a82   :  { %v4996_v63 = vsel %vm4993_vm4, %v4995_v50, %v4991_v39 }
0x1a83   :  { %v5059_v55 = vmul.f32 %v4996_v63, %v4926_v49 }
0x1a85   :  { %v5064_v32 = vpack.c.bf16 %v5059_v55, %v5058_v46 }
0x1a87   :  { %5662 = vmatmul.msk.bf16.vlgmr.msra.gmra.mxu3 %vm2957_vm2, %v5064_v32 }
0x1aac   :  { %v4928_v18 = vpop.f32.mrf.mxu2 }
0x1aad   :  { %v4929_v10 = vadd.f32 %v8113_v22, %v4928_v18 }
0x1aaf   :  { %v5633_v4 = vmul.f32 -1.702, %v4929_v10 }
0x1ab1   :  { %v4954_v45 = vmul.f32 1.442695, %v5633_v4 }
0x1ab3   :  { %6167 = vpow2.f32 %v4954_v45 }
0x1ab4   :  { %v4930_v24 = vpop.f32.mrf.mxu2 }
0x1ab5   :  { %v4931_v42 = vadd.f32 %v8113_v22, %v4930_v24 }
0x1ab7   :  { %v5634_v62 = vmul.f32 -1.702, %v4931_v42 }
0x1ab9   :  { %v6168_v53 = vpop.eup %6167  ;;  %v4956_v59 = vmul.f32 1.442695, %v5634_v62 }
0x1aba   :  { %v4964_v34 = vadd.f32 1.0, %v6168_v53 }
0x1abb   :  { %6169 = vpow2.f32 %v4956_v59 }
0x1abc   :  { %6171 = vrcp.f32 %v4964_v34  ;;  %v5009_v25 = vand.u32 2147483648, %v4964_v34  ;;  %vm5003_vm6 = vweird.f32 %v4964_v34  ;;  %v5007_v57 = vand.u32 2147483647, %v4964_v34 }
0x1abe   :  { %v5010_v43 = vor.u32 1.1754944e-38, %v5009_v25  ;;  %vm5008_vm11 = vcmp.eq.f32.partialorder %v5007_v57, 8.507059e+37 }
0x1ac1   :  { %v6170_v19 = vpop.eup %6169 }
0x1ac2   :  { %v6172_v20 = vpop.eup %6171  ;;  %v4965_v31 = vadd.f32 1.0, %v6170_v19 }
0x1ac3   :  { %v4999_v28 = vmul.f32 %v6172_v20, %v4964_v34  ;;  %vm5004_vm5 = vweird.f32 %v6172_v20 }
0x1ac4   :  { %6173 = vrcp.f32 %v4965_v31  ;;  %vm5005_vm8 = vmor %vm5003_vm6, %vm5004_vm5  ;;  %v5024_v49 = vand.u32 2147483648, %v4965_v31  ;;  %v5022_v33 = vand.u32 2147483647, %v4965_v31  ;;  %vm5018_vm12 = vweird.f32 %v4965_v31 }
0x1ac5   :  { %v5000_v0 = vsub.f32 1.0, %v4999_v28 }
0x1ac6   :  { %v5025_v5 = vor.u32 1.1754944e-38, %v5024_v49  ;;  %vm5023_vm10 = vcmp.eq.f32.partialorder %v5022_v33, 8.507059e+37 }
0x1ac7   :  { %v5001_v44 = vmul.f32 %v6172_v20, %v5000_v0  ;;  %v4933_v38 = vpop.f32.mrf.mxu2 }
0x1ac8   :  { %v8133_v41 = vadd.f32 %v8113_v22, %v4933_v38 }
0x1ac9   :  { %v5002_v3 = vadd.f32 %v6172_v20, %v5001_v44 }
0x1aca   :  { %v6174_v35 = vpop.eup %6173  ;;  %v5635_v14 = vmul.f32 -1.702, %v8133_v41 }
0x1acb   :  { %v5014_v17 = vmul.f32 %v6174_v35, %v4965_v31  ;;  %v5006_v48 = vsel %vm5005_vm8, %v6172_v20, %v5002_v3  ;;  %vm5019_vm9 = vweird.f32 %v6174_v35  ;;  %v5880_v31 = vld [vmem:[%s8189_s16 + $0x1] ss:$0 sm:$0xff] }
0x1acc   :  { %v4958_v40 = vmul.f32 1.442695, %v5635_v14  ;;  %v5011_v56 = vsel %vm5008_vm11, %v5010_v43, %v5006_v48  ;;  %vm5020_vm7 = vmor %vm5018_vm12, %vm5019_vm9 }
0x1acd   :  { %v5015_v13 = vsub.f32 1.0, %v5014_v17  ;;  %v5060_v6 = vmul.f32 %v5011_v56, %v4929_v10 }
0x1ace   :  { %6175 = vpow2.f32 %v4958_v40 }
0x1acf   :  { %v5016_v58 = vmul.f32 %v6174_v35, %v5015_v13  ;;  %v4935_v36 = vpop.f32.mrf.mxu2 }
0x1ad0   :  { %v4936_v12 = vadd.f32 %v8113_v22, %v4935_v36 }
0x1ad1   :  { %v5017_v30 = vadd.f32 %v6174_v35, %v5016_v58 }
0x1ad2   :  { %v5636_v1 = vmul.f32 -1.702, %v4936_v12 }
0x1ad3   :  { %v5021_v2 = vsel %vm5020_vm7, %v6174_v35, %v5017_v30 }
0x1ad4   :  { %v6176_v26 = vpop.eup %6175  ;;  %v5026_v52 = vsel %vm5023_vm10, %v5025_v5, %v5021_v2  ;;  %v4960_v23 = vmul.f32 1.442695, %v5636_v1 }
0x1ad5   :  { %v5061_v37 = vmul.f32 %v5026_v52, %v4931_v42  ;;  %v4966_v9 = vadd.f32 1.0, %v6176_v26 }
0x1ad6   :  { %6177 = vpow2.f32 %v4960_v23 }
0x1ad7   :  { %v5065_v61 = vpack.c.bf16 %v5061_v37, %v5060_v6  ;;  %6179 = vrcp.f32 %v4966_v9  ;;  %v5039_v63 = vand.u32 2147483648, %v4966_v9  ;;  %vm5033_vm14 = vweird.f32 %v4966_v9 }
0x1ad8   :  { %v5037_v46 = vand.u32 2147483647, %v4966_v9 }
0x1ad9   :  { %5663 = vmatmul.msk.bf16.gmra.mxu3 %vm2957_vm2, %v5065_v61  ;;  %v5040_v45 = vor.u32 1.1754944e-38, %v5039_v63 }
0x1ada   :  { %vm5038_vm3 = vcmp.eq.f32.partialorder %v5037_v46, 8.507059e+37 }
0x1adc   :  { %v6178_v22 = vpop.eup %6177 }
0x1add   :  { %v6180_v15 = vpop.eup %6179  ;;  %v4967_v11 = vadd.f32 1.0, %v6178_v22 }
0x1ade   :  { %v5029_v47 = vmul.f32 %v6180_v15, %v4966_v9  ;;  %vm5034_vm13 = vweird.f32 %v6180_v15 }
0x1adf   :  { %6181 = vrcp.f32 %v4967_v11  ;;  %vm5035_vm15 = vmor %vm5033_vm14, %vm5034_vm13  ;;  %v5054_v32 = vand.u32 2147483648, %v4967_v11  ;;  %v5052_v4 = vand.u32 2147483647, %v4967_v11  ;;  %vm5048_vm4 = vweird.f32 %v4967_v11 }
0x1ae0   :  { %v5030_v21 = vsub.f32 1.0, %v5029_v47 }
0x1ae1   :  { %v5055_v62 = vor.u32 1.1754944e-38, %v5054_v32  ;;  %vm5053_vm6 = vcmp.eq.f32.partialorder %v5052_v4, 8.507059e+37 }
0x1ae2   :  { %v5031_v8 = vmul.f32 %v6180_v15, %v5030_v21 }
0x1ae4   :  { %v5032_v50 = vadd.f32 %v6180_v15, %v5031_v8 }
0x1ae5   :  { %v6182_v27 = vpop.eup %6181 }
0x1ae6   :  { %v5044_v39 = vmul.f32 %v6182_v27, %v4967_v11  ;;  %v5036_v18 = vsel %vm5035_vm15, %v6180_v15, %v5032_v50  ;;  %vm5049_vm1 = vweird.f32 %v6182_v27 }
0x1ae7   :  { %v5041_v42 = vsel %vm5038_vm3, %v5040_v45, %v5036_v18  ;;  %vm5050_vm5 = vmor %vm5048_vm4, %vm5049_vm1 }
0x1ae8   :  { %v5045_v55 = vsub.f32 1.0, %v5044_v39  ;;  %v5062_v34 = vmul.f32 %v5041_v42, %v8133_v41 }
0x1aea   :  { %v5046_v10 = vmul.f32 %v6182_v27, %v5045_v55 }
0x1aec   :  { %v5047_v24 = vadd.f32 %v6182_v27, %v5046_v10 }
0x1aee   :  { %v5051_v53 = vsel %vm5050_vm5, %v6182_v27, %v5047_v24 }
0x1aef   :  { %v5056_v59 = vsel %vm5053_vm6, %v5055_v62, %v5051_v53 }
0x1af0   :  { %v5063_v19 = vmul.f32 %v5056_v59, %v4936_v12 }
0x1af2   :  { %v5066_v20 = vpack.c.bf16 %v5063_v19, %v5062_v34 }
0x1af4   :  { %5664 = vmatmul.msk.bf16.gmra.mxu3 %vm2957_vm2, %v5066_v20 }
0x1b0a   :  { %v5123_v28 = vpop.f32.mrf.mxu3 }
0x1b0b   :  { %v5124_v0 = vadd.f32 %v5880_v31, %v5123_v28 }
0x1b0d   :  { %v5138_v44 = vadd.f32 %v5124_v0, %v7996_v7 }
0x1b0f   :  { %5665 = vst.msk [vmem:[%s8178_s17 + $0x60] sm:$0xff] %vm696_vm0, %v5138_v44 }
0x1b12   :  { %v5125_v38 = vpop.f32.mrf.mxu3 }
0x1b13   :  { %v5126_v35 = vadd.f32 %v5880_v31, %v5125_v38 }
0x1b15   :  { %v5139_v41 = vadd.f32 %v5126_v35, %v8001_v60 }
0x1b17   :  { %5666 = vst.msk [vmem:[%s8178_s17 + $0x68] sm:$0xff] %vm696_vm0, %v5139_v41 }
0x1b5c   :  { %v5128_v14 = vpop.f32.mrf.mxu3 }
0x1b5d   :  { %v5129_v3 = vadd.f32 %v5880_v31, %v5128_v14 }
0x1b5f   :  { %v5140_v17 = vadd.f32 %v5129_v3, %v8006_v54 }
0x1b61   :  { %5667 = vst.msk [vmem:[%s8178_s17 + $0x70] sm:$0xff] %vm696_vm0, %v5140_v17 }
0x1b64   :  { %v5130_v7 = vpop.f32.mrf.mxu3 }
0x1b65   :  { %v5131_v25 = vadd.f32 %v5880_v31, %v5130_v7 }
0x1b67   :  { %v5141_v40 = vadd.f32 %v5131_v25, %v8011_v16 }
0x1b69   :  { %5668 = vst.msk [vmem:[%s8178_s17 + $0x78] sm:$0xff] %vm696_vm0, %v5141_v40 }
0x1b77   :  { %v5133_v60 = vpop.f32.mrf.mxu3 }
0x1b78   :  { %v5134_v57 = vadd.f32 %v5880_v31, %v5133_v60 }
0x1b7a   :  { %v5142_v13 = vadd.f32 %v5134_v57, %v8016_v29 }
0x1b7c   :  { %5669 = vst.msk [vmem:[%s8178_s17 + $0x80] sm:$0xff] %vm696_vm0, %v5142_v13 }
0x1b7f   :  { %v5135_v54 = vpop.f32.mrf.mxu3 }
0x1b80   :  { %v5136_v49 = vadd.f32 %v5880_v31, %v5135_v54 }
0x1b82   :  { %v5143_v48 = vadd.f32 %v5136_v49, %v8021_v51 }
0x1b84   :  { %5670 = vst.msk [vmem:[%s8178_s17 + $0x88] sm:$0xff] %vm696_vm0, %v5143_v48 }

</bundles_post_ra>
